<compile_context>
chip_gen: v7x
topology: tpu7x:2x2x1
jax: 0.10.0
libtpu: 0.0.40
codegen_flags: <defaults>
</compile_context>

<pallas_src>
import functools
import math

import jax
import jax.numpy as jnp
from jax.experimental import pallas as pl
from jax.experimental.pallas import tpu as pltpu


# ---------------------------------------------------------------------------
# graph-structure preprocessing (adjacency/parameter-only; hoisted out of the
# kernel and computed once per forward as tiny XLA ops feeding the pallas_call)
# ---------------------------------------------------------------------------
def cheb_polynomials(adj):
    """T_0=I, T_1=L, T_2=2*L@L-I with normalized Laplacian L = I - D^-1/2 A D^-1/2."""
    n = adj.shape[0]
    # 1e-5 guards isolated (zero-degree) joints, mirroring GraphNet's laplacian;
    # negligible (<3e-6 relative) for connected skeletons.
    d = (jnp.sum(adj, axis=-1) + 1e-5) ** (-0.5)
    L = jnp.eye(n, dtype=jnp.float32) - (d[:, None] * adj) * d[None, :]
    T0 = jnp.eye(n, dtype=jnp.float32)
    T1 = L
    T2 = 2.0 * (L @ L) - T0
    return jnp.stack([T0, T1, T2], axis=0)


def graphnet_laplacian(a_hat):
    """GraphNet (LAM_Gconv) normalized adjacency: D^-1/2 A_hat D^-1/2 (with 1e-5)."""
    d = (jnp.sum(a_hat, axis=0) + 1e-5) ** (-0.5)
    return d[:, None] * a_hat * d[None, :]


def _torch_layer_norm(x, g, b, eps=1e-6):
    """GraFormer LayerNorm: a_2*(x-mean)/(std+eps)+b_2, torch std is unbiased."""
    mean = jnp.mean(x, axis=-1, keepdims=True)
    d = x - mean
    var = jnp.sum(d * d, axis=-1, keepdims=True) / (x.shape[-1] - 1)
    return g * d / (jnp.sqrt(var) + eps) + b


# ---------------------------------------------------------------------------
# fused Pallas kernel  (grid = (batch,), whole network per grid step)
# ---------------------------------------------------------------------------
def _gcnpose_fused_kernel(
        t_ref, x_ref, mask_ref,
        w_in_ref, b_in_ref,
        ln1g_ref, ln1b_ref,
        wq_ref, bq_ref, wk_ref, bk_ref, wv_ref, bv_ref, wo_ref, bo_ref,
        ln2g_ref, ln2b_ref,
        lgn_ref, gw1_ref, gb1_ref, gw2_ref, gb2_ref,
        c1w_ref, c1b_ref, c2w_ref, c2b_ref,
        w_out_ref, b_out_ref,
        o_ref, *, n_layers, n_head):
    f32 = jnp.float32
    K = t_ref.shape[0]                           # 3 Chebyshev terms

    x = x_ref[...]                               # (N, Cin)
    mask = mask_ref[...]                         # (1, N)
    N = x.shape[0]

    def layer_norm(h, g, b, eps=1e-6):
        mean = jnp.mean(h, axis=-1, keepdims=True)
        d = h - mean
        var = jnp.sum(d * d, axis=-1, keepdims=True) * (1.0 / (h.shape[-1] - 1))
        inv = pl.reciprocal(jnp.sqrt(var) + eps, approx=True)   # EUP slot
        return g * d * inv + b

    def cheb(h, w_k, b):
        """sum_k (T_k @ h) @ W_k + b, with the T_0 = I matmul skipped."""
        acc = jnp.dot(h, w_k(0), preferred_element_type=f32)
        for k in range(1, K):
            th = jnp.dot(t_ref[k], h, preferred_element_type=f32)
            acc = acc + jnp.dot(th, w_k(k), preferred_element_type=f32)
        return acc + b

    def atten_layer(h, l):
        D = h.shape[-1]
        dk = D // n_head
        scale = 1.0 / math.sqrt(dk)

        # ---- sublayer 0: h + MHA(LayerNorm(h)) -----------------------------
        y = layer_norm(h, ln1g_ref[l], ln1b_ref[l])
        q = jnp.dot(y, wq_ref[l], preferred_element_type=f32) + bq_ref[l]
        k = jnp.dot(y, wk_ref[l], preferred_element_type=f32) + bk_ref[l]
        v = jnp.dot(y, wv_ref[l], preferred_element_type=f32) + bv_ref[l]
        wo = wo_ref[l]

        # per-head scores stacked on the sublane axis -> one softmax pass
        s_blocks = []
        for hh in range(n_head):                 # static loop over heads
            qh = q[:, hh * dk:(hh + 1) * dk]
            kh = k[:, hh * dk:(hh + 1) * dk]
            s_blocks.append(jax.lax.dot_general(
                qh, kh, (((1,), (1,)), ((), ())), preferred_element_type=f32))
        s = jnp.concatenate(s_blocks, axis=0) * scale            # (n_head*N, N)
        s = jnp.where(mask == 0.0, -1e9, s)                      # key mask
        s = s - jnp.max(s, axis=-1, keepdims=True)
        p = jnp.exp(s)
        p = p * pl.reciprocal(jnp.sum(p, axis=-1, keepdims=True), approx=True)

        # per-head context accumulated directly through W_o (no concat)
        attn_out = bo_ref[l]                                     # (1, D) broadcast
        for hh in range(n_head):
            ph = p[hh * N:(hh + 1) * N, :]
            ctx = jnp.dot(ph, v[:, hh * dk:(hh + 1) * dk],
                          preferred_element_type=f32)
            attn_out = attn_out + jnp.dot(ctx, wo[hh * dk:(hh + 1) * dk, :],
                                          preferred_element_type=f32)
        h1 = h + attn_out

        # ---- sublayer 1: h1 + GraphNet(LayerNorm(h1)) ----------------------
        y2 = layer_norm(h1, ln2g_ref[l], ln2b_ref[l])
        lgn = lgn_ref[l]                                         # (N, N)
        ly = jnp.dot(lgn, y2, preferred_element_type=f32)
        g0 = jnp.maximum(
            jnp.dot(ly, gw1_ref[l], preferred_element_type=f32) + gb1_ref[l], 0.0)
        lg = jnp.dot(lgn, g0, preferred_element_type=f32)
        g1 = jnp.dot(lg, gw2_ref[l], preferred_element_type=f32) + gb2_ref[l]
        return h1 + g1

    def res_cheb_gc(h, l):
        r = jnp.maximum(cheb(h, lambda k, l=l: c1w_ref[l, k], c1b_ref[l]), 0.0)
        r = jnp.maximum(cheb(r, lambda k, l=l: c2w_ref[l, k], c2b_ref[l]), 0.0)
        return h + r

    out = cheb(x, lambda k: w_in_ref[k], b_in_ref[...])
    for l in range(n_layers):                    # static layer loop, all in VMEM
        out = atten_layer(out, l)
        out = res_cheb_gc(out, l)
    o_ref[...] = cheb(out, lambda k: w_out_ref[k], b_out_ref[...])


# ---------------------------------------------------------------------------
# pallas_call wrapper
# ---------------------------------------------------------------------------
def _full_spec(shape):
    nd = len(shape)
    return pl.BlockSpec(tuple(shape), lambda bi, nd=nd: (0,) * nd)


def _batch_spec(shape_wo_batch):
    nd = len(shape_wo_batch)
    return pl.BlockSpec((None,) + tuple(shape_wo_batch),
                        lambda bi, nd=nd: (bi,) + (0,) * nd)


def gcnpose_forward(x, mask, adj, params, *, n_head):
    B, N, c_in = x.shape
    lp = params['layers']                        # stacked along leading layer axis
    n_layers = int(lp['wq'].shape[0])

    T = cheb_polynomials(adj)                    # (3, N, N), hoisted
    L_gn = jax.vmap(graphnet_laplacian)(lp['A_hat'])   # (L, N, N), hoisted

    args = (T, x, mask,
            params['gconv_input']['W'], params['gconv_input']['b'],
            lp['ln1_g'], lp['ln1_b'],
            lp['wq'], lp['bq'], lp['wk'], lp['bk'], lp['wv'], lp['bv'],
            lp['wo'], lp['bo'],
            lp['ln2_g'], lp['ln2_b'],
            L_gn, lp['gw1'], lp['gb1'], lp['gw2'], lp['gb2'],
            lp['cheb1_W'], lp['cheb1_b'], lp['cheb2_W'], lp['cheb2_b'],
            params['gconv_output']['W'], params['gconv_output']['b'])

    in_specs = [_full_spec(T.shape),
                _batch_spec((N, c_in)),
                _batch_spec((1, N))]
    in_specs += [_full_spec(a.shape) for a in args[3:]]

    kernel = functools.partial(_gcnpose_fused_kernel,
                               n_layers=n_layers, n_head=n_head)
    return pl.pallas_call(
        kernel,
        out_shape=jax.ShapeDtypeStruct((B, N, 3), jnp.float32),
        grid=(B,),
        in_specs=in_specs,
        out_specs=_batch_spec((N, 3)),
        compiler_params=pltpu.CompilerParams(dimension_semantics=("parallel",)),
    )(*args)


# ---------------------------------------------------------------------------
# parameter init (per-layer params pre-stacked along a leading layer axis)
# ---------------------------------------------------------------------------
def init_params(key, n_pts, coords_in, hid_dim, n_layers):
    D = hid_dim
    keys = iter(jax.random.split(key, 512))

    def nrm(shape, scale=0.1):
        return scale * jax.random.normal(next(keys), shape, dtype=jnp.float32)

    def lstack(shape, scale=0.1):
        return nrm((n_layers,) + shape, scale)

    layers = {
        'ln1_g': jnp.ones((n_layers, 1, D), jnp.float32),
        'ln1_b': jnp.zeros((n_layers, 1, D), jnp.float32),
        'wq': lstack((D, D)), 'bq': lstack((1, D), 0.01),
        'wk': lstack((D, D)), 'bk': lstack((1, D), 0.01),
        'wv': lstack((D, D)), 'bv': lstack((1, D), 0.01),
        'wo': lstack((D, D)), 'bo': lstack((1, D), 0.01),
        'ln2_g': jnp.ones((n_layers, 1, D), jnp.float32),
        'ln2_b': jnp.zeros((n_layers, 1, D), jnp.float32),
        # GraphNet learnable adjacency (identity + uniform coupling)
        'A_hat': jnp.tile((jnp.eye(n_pts, dtype=jnp.float32) + 0.1)[None],
                          (n_layers, 1, 1)),
        'gw1': lstack((D, 2 * D)), 'gb1': lstack((1, 2 * D), 0.01),
        'gw2': lstack((2 * D, D)), 'gb2': lstack((1, D), 0.01),
        'cheb1_W': lstack((3, D, D)), 'cheb1_b': lstack((1, D), 0.01),
        'cheb2_W': lstack((3, D, D)), 'cheb2_b': lstack((1, D), 0.01),
    }
    return {
        'gconv_input': {'W': nrm((3, coords_in, D)), 'b': nrm((1, D), 0.01)},
        'gconv_output': {'W': nrm((3, D, 3)), 'b': nrm((1, 3), 0.01)},
        'layers': layers,
    }


# ---------------------------------------------------------------------------
# pure-JAX reference (numerical sanity check)
# ---------------------------------------------------------------------------
def ref_forward(x, mask, adj, params, n_head):
    T = cheb_polynomials(adj)
    lp = params['layers']
    n_layers = lp['wq'].shape[0]

    def cheb(h, W, b):
        return jnp.einsum('knm,bmc,kcd->bnd', T, h, W) + b

    def mha(y, l):
        B, N, D = y.shape
        dk = D // n_head
        q = y @ lp['wq'][l] + lp['bq'][l]
        k = y @ lp['wk'][l] + lp['bk'][l]
        v = y @ lp['wv'][l] + lp['bv'][l]
        qh = q.reshape(B, N, n_head, dk).transpose(0, 2, 1, 3)
        kh = k.reshape(B, N, n_head, dk).transpose(0, 2, 1, 3)
        vh = v.reshape(B, N, n_head, dk).transpose(0, 2, 1, 3)
        s = jnp.einsum('bhnd,bhmd->bhnm', qh, kh) / math.sqrt(dk)
        s = jnp.where(mask[:, None, :, :] == 0.0, -1e9, s)
        p = jax.nn.softmax(s, axis=-1)
        ctx = jnp.einsum('bhnm,bhmd->bhnd', p, vh).transpose(0, 2, 1, 3).reshape(B, N, D)
        return ctx @ lp['wo'][l] + lp['bo'][l]

    def graphnet(y, l):
        L = graphnet_laplacian(lp['A_hat'][l])
        h0 = jax.nn.relu(jnp.einsum('nm,bmc->bnc', L, y) @ lp['gw1'][l] + lp['gb1'][l])
        return jnp.einsum('nm,bmc->bnc', L, h0) @ lp['gw2'][l] + lp['gb2'][l]

    out = cheb(x, params['gconv_input']['W'], params['gconv_input']['b'])
    for l in range(n_layers):
        out = out + mha(_torch_layer_norm(out, lp['ln1_g'][l], lp['ln1_b'][l]), l)
        out = out + graphnet(_torch_layer_norm(out, lp['ln2_g'][l], lp['ln2_b'][l]), l)
        h = jax.nn.relu(cheb(out, lp['cheb1_W'][l], lp['cheb1_b'][l]))
        h = jax.nn.relu(cheb(h, lp['cheb2_W'][l], lp['cheb2_b'][l]))
        out = out + h
    out = cheb(out, params['gconv_output']['W'], params['gconv_output']['b'])
    return out


# ---------------------------------------------------------------------------
if __name__ == "__main__":
    jax.config.update("jax_default_matmul_precision", "highest")

    # small synthetic config: n_pts=16 joints, coords_dim=(2,3), hid=32, 2 layers, 4 heads
    B, N, C_IN, HID, N_LAYERS, N_HEAD = 2, 16, 2, 32, 2, 4

    key = jax.random.PRNGKey(0)
    kx, kp = jax.random.split(key)
    x = jax.random.normal(kx, (B, N, C_IN), dtype=jnp.float32)   # 2D keypoints
    mask = jnp.ones((B, 1, N), dtype=jnp.float32)                # all-visible mask
    # chain skeleton adjacency with self loops
    adj = (jnp.eye(N, dtype=jnp.float32)
           + jnp.eye(N, k=1, dtype=jnp.float32)
           + jnp.eye(N, k=-1, dtype=jnp.float32))

    params = init_params(kp, N, C_IN, HID, N_LAYERS)

    fwd = jax.jit(functools.partial(gcnpose_forward, n_head=N_HEAD))
    out = jax.block_until_ready(fwd(x, mask, adj, params))

    ref = ref_forward(x, mask, adj, params, N_HEAD)

    assert out.shape == (B, N, 3), out.shape
    assert bool(jnp.all(jnp.isfinite(out)))
    assert bool(jnp.allclose(out, ref, atol=2e-2, rtol=2e-2)), \
        f"max abs diff {float(jnp.max(jnp.abs(out - ref)))}"
    print("KERNEL_OK")
</pallas_src>

<mosaic_0001>
module attributes {stable_mosaic.version = 11 : i64} {
  func.func @_gcnpose_fused_kernel(%arg0: i32, %arg1: memref<3x16x16xf32, #tpu.memory_space<vmem>>, %arg2: memref<1x16x2xf32, #tpu.memory_space<vmem>>, %arg3: memref<1x1x16xf32, #tpu.memory_space<vmem>>, %arg4: memref<3x2x32xf32, #tpu.memory_space<vmem>>, %arg5: memref<1x32xf32, #tpu.memory_space<vmem>>, %arg6: memref<2x1x32xf32, #tpu.memory_space<vmem>>, %arg7: memref<2x1x32xf32, #tpu.memory_space<vmem>>, %arg8: memref<2x32x32xf32, #tpu.memory_space<vmem>>, %arg9: memref<2x1x32xf32, #tpu.memory_space<vmem>>, %arg10: memref<2x32x32xf32, #tpu.memory_space<vmem>>, %arg11: memref<2x1x32xf32, #tpu.memory_space<vmem>>, %arg12: memref<2x32x32xf32, #tpu.memory_space<vmem>>, %arg13: memref<2x1x32xf32, #tpu.memory_space<vmem>>, %arg14: memref<2x32x32xf32, #tpu.memory_space<vmem>>, %arg15: memref<2x1x32xf32, #tpu.memory_space<vmem>>, %arg16: memref<2x1x32xf32, #tpu.memory_space<vmem>>, %arg17: memref<2x1x32xf32, #tpu.memory_space<vmem>>, %arg18: memref<2x16x16xf32, #tpu.memory_space<vmem>>, %arg19: memref<2x32x64xf32, #tpu.memory_space<vmem>>, %arg20: memref<2x1x64xf32, #tpu.memory_space<vmem>>, %arg21: memref<2x64x32xf32, #tpu.memory_space<vmem>>, %arg22: memref<2x1x32xf32, #tpu.memory_space<vmem>>, %arg23: memref<2x3x32x32xf32, #tpu.memory_space<vmem>>, %arg24: memref<2x1x32xf32, #tpu.memory_space<vmem>>, %arg25: memref<2x3x32x32xf32, #tpu.memory_space<vmem>>, %arg26: memref<2x1x32xf32, #tpu.memory_space<vmem>>, %arg27: memref<3x32x3xf32, #tpu.memory_space<vmem>>, %arg28: memref<1x3xf32, #tpu.memory_space<vmem>>, %arg29: memref<1x16x3xf32, #tpu.memory_space<vmem>>) attributes {dimension_semantics = [#tpu.dimension_semantics<parallel>], iteration_bounds = array<i64: 2>, scalar_prefetch = 0 : i64, scratch_operands = 0 : i64, tpu.core_type = #tpu.core_type<tc>, window_params = [{pipeline_mode = #tpu.pipeline_mode<synchronous>, transform_indices = @transform_0, window_bounds = array<i64: 3, 16, 16>}, {transform_indices = @transform_1, window_bounds = array<i64: 1, 16, 2>}, {transform_indices = @transform_2, window_bounds = array<i64: 1, 1, 16>}, {pipeline_mode = #tpu.pipeline_mode<synchronous>, transform_indices = @transform_3, window_bounds = array<i64: 3, 2, 32>}, {pipeline_mode = #tpu.pipeline_mode<synchronous>, transform_indices = @transform_4, window_bounds = array<i64: 1, 32>}, {pipeline_mode = #tpu.pipeline_mode<synchronous>, transform_indices = @transform_5, window_bounds = array<i64: 2, 1, 32>}, {pipeline_mode = #tpu.pipeline_mode<synchronous>, transform_indices = @transform_6, window_bounds = array<i64: 2, 1, 32>}, {pipeline_mode = #tpu.pipeline_mode<synchronous>, transform_indices = @transform_7, window_bounds = array<i64: 2, 32, 32>}, {pipeline_mode = #tpu.pipeline_mode<synchronous>, transform_indices = @transform_8, window_bounds = array<i64: 2, 1, 32>}, {pipeline_mode = #tpu.pipeline_mode<synchronous>, transform_indices = @transform_9, window_bounds = array<i64: 2, 32, 32>}, {pipeline_mode = #tpu.pipeline_mode<synchronous>, transform_indices = @transform_10, window_bounds = array<i64: 2, 1, 32>}, {pipeline_mode = #tpu.pipeline_mode<synchronous>, transform_indices = @transform_11, window_bounds = array<i64: 2, 32, 32>}, {pipeline_mode = #tpu.pipeline_mode<synchronous>, transform_indices = @transform_12, window_bounds = array<i64: 2, 1, 32>}, {pipeline_mode = #tpu.pipeline_mode<synchronous>, transform_indices = @transform_13, window_bounds = array<i64: 2, 32, 32>}, {pipeline_mode = #tpu.pipeline_mode<synchronous>, transform_indices = @transform_14, window_bounds = array<i64: 2, 1, 32>}, {pipeline_mode = #tpu.pipeline_mode<synchronous>, transform_indices = @transform_15, window_bounds = array<i64: 2, 1, 32>}, {pipeline_mode = #tpu.pipeline_mode<synchronous>, transform_indices = @transform_16, window_bounds = array<i64: 2, 1, 32>}, {pipeline_mode = #tpu.pipeline_mode<synchronous>, transform_indices = @transform_17, window_bounds = array<i64: 2, 16, 16>}, {pipeline_mode = #tpu.pipeline_mode<synchronous>, transform_indices = @transform_18, window_bounds = array<i64: 2, 32, 64>}, {pipeline_mode = #tpu.pipeline_mode<synchronous>, transform_indices = @transform_19, window_bounds = array<i64: 2, 1, 64>}, {pipeline_mode = #tpu.pipeline_mode<synchronous>, transform_indices = @transform_20, window_bounds = array<i64: 2, 64, 32>}, {pipeline_mode = #tpu.pipeline_mode<synchronous>, transform_indices = @transform_21, window_bounds = array<i64: 2, 1, 32>}, {pipeline_mode = #tpu.pipeline_mode<synchronous>, transform_indices = @transform_22, window_bounds = array<i64: 2, 3, 32, 32>}, {pipeline_mode = #tpu.pipeline_mode<synchronous>, transform_indices = @transform_23, window_bounds = array<i64: 2, 1, 32>}, {pipeline_mode = #tpu.pipeline_mode<synchronous>, transform_indices = @transform_24, window_bounds = array<i64: 2, 3, 32, 32>}, {pipeline_mode = #tpu.pipeline_mode<synchronous>, transform_indices = @transform_25, window_bounds = array<i64: 2, 1, 32>}, {pipeline_mode = #tpu.pipeline_mode<synchronous>, transform_indices = @transform_26, window_bounds = array<i64: 3, 32, 3>}, {pipeline_mode = #tpu.pipeline_mode<synchronous>, transform_indices = @transform_27, window_bounds = array<i64: 1, 3>}, {transform_indices = @transform_28, window_bounds = array<i64: 1, 16, 3>}]} {
    %c0 = arith.constant 0 : index
    %c0_0 = arith.constant 0 : index
    %c0_1 = arith.constant 0 : index
    %0 = vector.load %arg2[%c0, %c0_0, %c0_1] : memref<1x16x2xf32, #tpu.memory_space<vmem>>, vector<1x16x2xf32>
    %1 = vector.shape_cast %0 : vector<1x16x2xf32> to vector<16x2xf32>
    %c0_2 = arith.constant 0 : index
    %c0_3 = arith.constant 0 : index
    %c0_4 = arith.constant 0 : index
    %2 = vector.load %arg3[%c0_2, %c0_3, %c0_4] : memref<1x1x16xf32, #tpu.memory_space<vmem>>, vector<1x1x16xf32>
    %3 = vector.shape_cast %2 : vector<1x1x16xf32> to vector<1x16xf32>
    %c0_5 = arith.constant 0 : index
    %c0_6 = arith.constant 0 : index
    %4 = vector.load %arg5[%c0_5, %c0_6] : memref<1x32xf32, #tpu.memory_space<vmem>>, vector<1x32xf32>
    %c0_7 = arith.constant 0 : index
    %c0_8 = arith.constant 0 : index
    %c0_9 = arith.constant 0 : index
    %5 = vector.load %arg4[%c0_7, %c0_8, %c0_9] : memref<3x2x32xf32, #tpu.memory_space<vmem>>, vector<1x2x32xf32>
    %6 = vector.shape_cast %5 : vector<1x2x32xf32> to vector<2x32xf32>
    %cst = arith.constant dense<0.000000e+00> : vector<16x32xf32>
    %7 = tpu.matmul %1, %6, %cst {dimension_numbers = #tpu.dot_dimension_numbers<[1], [0], [0], [1], [0, 0, 1, 1], [], []>, precision = #tpu.contract_precision<fp32>} : vector<16x2xf32>, vector<2x32xf32>, vector<16x32xf32> -> vector<16x32xf32>
    %c1 = arith.constant 1 : index
    %c0_10 = arith.constant 0 : index
    %c0_11 = arith.constant 0 : index
    %8 = vector.load %arg1[%c1, %c0_10, %c0_11] : memref<3x16x16xf32, #tpu.memory_space<vmem>>, vector<1x16x16xf32>
    %9 = vector.shape_cast %8 : vector<1x16x16xf32> to vector<16x16xf32>
    %cst_12 = arith.constant dense<0.000000e+00> : vector<16x2xf32>
    %10 = tpu.matmul %9, %1, %cst_12 {dimension_numbers = #tpu.dot_dimension_numbers<[1], [0], [0], [1], [0, 0, 1, 1], [], []>, precision = #tpu.contract_precision<fp32>} : vector<16x16xf32>, vector<16x2xf32>, vector<16x2xf32> -> vector<16x2xf32>
    %c1_13 = arith.constant 1 : index
    %c0_14 = arith.constant 0 : index
    %c0_15 = arith.constant 0 : index
    %11 = vector.load %arg4[%c1_13, %c0_14, %c0_15] : memref<3x2x32xf32, #tpu.memory_space<vmem>>, vector<1x2x32xf32>
    %12 = vector.shape_cast %11 : vector<1x2x32xf32> to vector<2x32xf32>
    %cst_16 = arith.constant dense<0.000000e+00> : vector<16x32xf32>
    %13 = tpu.matmul %10, %12, %cst_16 {dimension_numbers = #tpu.dot_dimension_numbers<[1], [0], [0], [1], [0, 0, 1, 1], [], []>, precision = #tpu.contract_precision<fp32>} : vector<16x2xf32>, vector<2x32xf32>, vector<16x32xf32> -> vector<16x32xf32>
    %14 = arith.addf %7, %13 : vector<16x32xf32>
    %c2 = arith.constant 2 : index
    %c0_17 = arith.constant 0 : index
    %c0_18 = arith.constant 0 : index
    %15 = vector.load %arg1[%c2, %c0_17, %c0_18] : memref<3x16x16xf32, #tpu.memory_space<vmem>>, vector<1x16x16xf32>
    %16 = vector.shape_cast %15 : vector<1x16x16xf32> to vector<16x16xf32>
    %cst_19 = arith.constant dense<0.000000e+00> : vector<16x2xf32>
    %17 = tpu.matmul %16, %1, %cst_19 {dimension_numbers = #tpu.dot_dimension_numbers<[1], [0], [0], [1], [0, 0, 1, 1], [], []>, precision = #tpu.contract_precision<fp32>} : vector<16x16xf32>, vector<16x2xf32>, vector<16x2xf32> -> vector<16x2xf32>
    %c2_20 = arith.constant 2 : index
    %c0_21 = arith.constant 0 : index
    %c0_22 = arith.constant 0 : index
    %18 = vector.load %arg4[%c2_20, %c0_21, %c0_22] : memref<3x2x32xf32, #tpu.memory_space<vmem>>, vector<1x2x32xf32>
    %19 = vector.shape_cast %18 : vector<1x2x32xf32> to vector<2x32xf32>
    %cst_23 = arith.constant dense<0.000000e+00> : vector<16x32xf32>
    %20 = tpu.matmul %17, %19, %cst_23 {dimension_numbers = #tpu.dot_dimension_numbers<[1], [0], [0], [1], [0, 0, 1, 1], [], []>, precision = #tpu.contract_precision<fp32>} : vector<16x2xf32>, vector<2x32xf32>, vector<16x32xf32> -> vector<16x32xf32>
    %21 = arith.addf %14, %20 : vector<16x32xf32>
    %22 = vector.broadcast %4 : vector<1x32xf32> to vector<16x32xf32>
    %23 = arith.addf %21, %22 : vector<16x32xf32>
    %c0_24 = arith.constant 0 : index
    %c0_25 = arith.constant 0 : index
    %c0_26 = arith.constant 0 : index
    %24 = vector.load %arg6[%c0_24, %c0_25, %c0_26] : memref<2x1x32xf32, #tpu.memory_space<vmem>>, vector<1x1x32xf32>
    %25 = vector.shape_cast %24 : vector<1x1x32xf32> to vector<1x32xf32>
    %c0_27 = arith.constant 0 : index
    %c0_28 = arith.constant 0 : index
    %c0_29 = arith.constant 0 : index
    %26 = vector.load %arg7[%c0_27, %c0_28, %c0_29] : memref<2x1x32xf32, #tpu.memory_space<vmem>>, vector<1x1x32xf32>
    %27 = vector.shape_cast %26 : vector<1x1x32xf32> to vector<1x32xf32>
    %cst_30 = arith.constant dense<0.000000e+00> : vector<16xf32>
    %28 = vector.multi_reduction <add>, %23, %cst_30 [1] : vector<16x32xf32> to vector<16xf32>
    %29 = vector.shape_cast %28 : vector<16xf32> to vector<16x1xf32>
    %cst_31 = arith.constant 3.200000e+01 : f32
    %30 = vector.broadcast %cst_31 : f32 to vector<16x1xf32>
    %31 = arith.divf %29, %30 : vector<16x1xf32>
    %32 = vector.broadcast %31 : vector<16x1xf32> to vector<16x32xf32>
    %33 = arith.subf %23, %32 : vector<16x32xf32>
    %34 = arith.mulf %33, %33 : vector<16x32xf32>
    %cst_32 = arith.constant dense<0.000000e+00> : vector<16xf32>
    %35 = vector.multi_reduction <add>, %34, %cst_32 [1] : vector<16x32xf32> to vector<16xf32>
    %36 = vector.shape_cast %35 : vector<16xf32> to vector<16x1xf32>
    %cst_33 = arith.constant 0.0322580636 : f32
    %37 = vector.broadcast %cst_33 : f32 to vector<16x1xf32>
    %38 = arith.mulf %36, %37 : vector<16x1xf32>
    %39 = math.sqrt %38 : vector<16x1xf32>
    %cst_34 = arith.constant 9.99999997E-7 : f32
    %40 = vector.broadcast %cst_34 : f32 to vector<16x1xf32>
    %41 = arith.addf %39, %40 : vector<16x1xf32>
    %42 = tpu.reciprocal %41 {approx = true} : vector<16x1xf32> -> vector<16x1xf32>
    %43 = vector.broadcast %25 : vector<1x32xf32> to vector<16x32xf32>
    %44 = arith.mulf %43, %33 : vector<16x32xf32>
    %45 = vector.broadcast %42 : vector<16x1xf32> to vector<16x32xf32>
    %46 = arith.mulf %44, %45 : vector<16x32xf32>
    %47 = vector.broadcast %27 : vector<1x32xf32> to vector<16x32xf32>
    %48 = arith.addf %46, %47 : vector<16x32xf32>
    %c0_35 = arith.constant 0 : index
    %c0_36 = arith.constant 0 : index
    %c0_37 = arith.constant 0 : index
    %49 = vector.load %arg8[%c0_35, %c0_36, %c0_37] : memref<2x32x32xf32, #tpu.memory_space<vmem>>, vector<1x32x32xf32>
    %50 = vector.shape_cast %49 : vector<1x32x32xf32> to vector<32x32xf32>
    %cst_38 = arith.constant dense<0.000000e+00> : vector<16x32xf32>
    %51 = tpu.matmul %48, %50, %cst_38 {dimension_numbers = #tpu.dot_dimension_numbers<[1], [0], [0], [1], [0, 0, 1, 1], [], []>, precision = #tpu.contract_precision<fp32>} : vector<16x32xf32>, vector<32x32xf32>, vector<16x32xf32> -> vector<16x32xf32>
    %c0_39 = arith.constant 0 : index
    %c0_40 = arith.constant 0 : index
    %c0_41 = arith.constant 0 : index
    %52 = vector.load %arg9[%c0_39, %c0_40, %c0_41] : memref<2x1x32xf32, #tpu.memory_space<vmem>>, vector<1x1x32xf32>
    %53 = vector.shape_cast %52 : vector<1x1x32xf32> to vector<1x32xf32>
    %54 = vector.broadcast %53 : vector<1x32xf32> to vector<16x32xf32>
    %55 = arith.addf %51, %54 : vector<16x32xf32>
    %c0_42 = arith.constant 0 : index
    %c0_43 = arith.constant 0 : index
    %c0_44 = arith.constant 0 : index
    %56 = vector.load %arg10[%c0_42, %c0_43, %c0_44] : memref<2x32x32xf32, #tpu.memory_space<vmem>>, vector<1x32x32xf32>
    %57 = vector.shape_cast %56 : vector<1x32x32xf32> to vector<32x32xf32>
    %cst_45 = arith.constant dense<0.000000e+00> : vector<16x32xf32>
    %58 = tpu.matmul %48, %57, %cst_45 {dimension_numbers = #tpu.dot_dimension_numbers<[1], [0], [0], [1], [0, 0, 1, 1], [], []>, precision = #tpu.contract_precision<fp32>} : vector<16x32xf32>, vector<32x32xf32>, vector<16x32xf32> -> vector<16x32xf32>
    %c0_46 = arith.constant 0 : index
    %c0_47 = arith.constant 0 : index
    %c0_48 = arith.constant 0 : index
    %59 = vector.load %arg11[%c0_46, %c0_47, %c0_48] : memref<2x1x32xf32, #tpu.memory_space<vmem>>, vector<1x1x32xf32>
    %60 = vector.shape_cast %59 : vector<1x1x32xf32> to vector<1x32xf32>
    %61 = vector.broadcast %60 : vector<1x32xf32> to vector<16x32xf32>
    %62 = arith.addf %58, %61 : vector<16x32xf32>
    %c0_49 = arith.constant 0 : index
    %c0_50 = arith.constant 0 : index
    %c0_51 = arith.constant 0 : index
    %63 = vector.load %arg12[%c0_49, %c0_50, %c0_51] : memref<2x32x32xf32, #tpu.memory_space<vmem>>, vector<1x32x32xf32>
    %64 = vector.shape_cast %63 : vector<1x32x32xf32> to vector<32x32xf32>
    %cst_52 = arith.constant dense<0.000000e+00> : vector<16x32xf32>
    %65 = tpu.matmul %48, %64, %cst_52 {dimension_numbers = #tpu.dot_dimension_numbers<[1], [0], [0], [1], [0, 0, 1, 1], [], []>, precision = #tpu.contract_precision<fp32>} : vector<16x32xf32>, vector<32x32xf32>, vector<16x32xf32> -> vector<16x32xf32>
    %c0_53 = arith.constant 0 : index
    %c0_54 = arith.constant 0 : index
    %c0_55 = arith.constant 0 : index
    %66 = vector.load %arg13[%c0_53, %c0_54, %c0_55] : memref<2x1x32xf32, #tpu.memory_space<vmem>>, vector<1x1x32xf32>
    %67 = vector.shape_cast %66 : vector<1x1x32xf32> to vector<1x32xf32>
    %68 = vector.broadcast %67 : vector<1x32xf32> to vector<16x32xf32>
    %69 = arith.addf %65, %68 : vector<16x32xf32>
    %c0_56 = arith.constant 0 : index
    %c0_57 = arith.constant 0 : index
    %c0_58 = arith.constant 0 : index
    %70 = vector.load %arg14[%c0_56, %c0_57, %c0_58] : memref<2x32x32xf32, #tpu.memory_space<vmem>>, vector<1x32x32xf32>
    %71 = vector.shape_cast %70 : vector<1x32x32xf32> to vector<32x32xf32>
    %72 = vector.extract_strided_slice %55 {offsets = [0, 0], sizes = [16, 8], strides = [1, 1]} : vector<16x32xf32> to vector<16x8xf32>
    %73 = vector.extract_strided_slice %62 {offsets = [0, 0], sizes = [16, 8], strides = [1, 1]} : vector<16x32xf32> to vector<16x8xf32>
    %cst_59 = arith.constant dense<0.000000e+00> : vector<16x16xf32>
    %74 = tpu.matmul %72, %73, %cst_59 {dimension_numbers = #tpu.dot_dimension_numbers<[1], [1], [0], [0], [0, 0, 1, 0], [], []>, precision = #tpu.contract_precision<fp32>} : vector<16x8xf32>, vector<16x8xf32>, vector<16x16xf32> -> vector<16x16xf32>
    %75 = vector.extract_strided_slice %55 {offsets = [0, 8], sizes = [16, 8], strides = [1, 1]} : vector<16x32xf32> to vector<16x8xf32>
    %76 = vector.extract_strided_slice %62 {offsets = [0, 8], sizes = [16, 8], strides = [1, 1]} : vector<16x32xf32> to vector<16x8xf32>
    %cst_60 = arith.constant dense<0.000000e+00> : vector<16x16xf32>
    %77 = tpu.matmul %75, %76, %cst_60 {dimension_numbers = #tpu.dot_dimension_numbers<[1], [1], [0], [0], [0, 0, 1, 0], [], []>, precision = #tpu.contract_precision<fp32>} : vector<16x8xf32>, vector<16x8xf32>, vector<16x16xf32> -> vector<16x16xf32>
    %78 = vector.extract_strided_slice %55 {offsets = [0, 16], sizes = [16, 8], strides = [1, 1]} : vector<16x32xf32> to vector<16x8xf32>
    %79 = vector.extract_strided_slice %62 {offsets = [0, 16], sizes = [16, 8], strides = [1, 1]} : vector<16x32xf32> to vector<16x8xf32>
    %cst_61 = arith.constant dense<0.000000e+00> : vector<16x16xf32>
    %80 = tpu.matmul %78, %79, %cst_61 {dimension_numbers = #tpu.dot_dimension_numbers<[1], [1], [0], [0], [0, 0, 1, 0], [], []>, precision = #tpu.contract_precision<fp32>} : vector<16x8xf32>, vector<16x8xf32>, vector<16x16xf32> -> vector<16x16xf32>
    %81 = vector.extract_strided_slice %55 {offsets = [0, 24], sizes = [16, 8], strides = [1, 1]} : vector<16x32xf32> to vector<16x8xf32>
    %82 = vector.extract_strided_slice %62 {offsets = [0, 24], sizes = [16, 8], strides = [1, 1]} : vector<16x32xf32> to vector<16x8xf32>
    %cst_62 = arith.constant dense<0.000000e+00> : vector<16x16xf32>
    %83 = tpu.matmul %81, %82, %cst_62 {dimension_numbers = #tpu.dot_dimension_numbers<[1], [1], [0], [0], [0, 0, 1, 0], [], []>, precision = #tpu.contract_precision<fp32>} : vector<16x8xf32>, vector<16x8xf32>, vector<16x16xf32> -> vector<16x16xf32>
    %84 = tpu.concatenate %74, %77, %80, %83 in 0 : vector<16x16xf32>, vector<16x16xf32>, vector<16x16xf32>, vector<16x16xf32> -> vector<64x16xf32>
    %cst_63 = arith.constant 0.353553385 : f32
    %85 = vector.broadcast %cst_63 : f32 to vector<64x16xf32>
    %86 = arith.mulf %84, %85 : vector<64x16xf32>
    %cst_64 = arith.constant 0.000000e+00 : f32
    %87 = vector.broadcast %cst_64 : f32 to vector<1x16xf32>
    %88 = arith.cmpf oeq, %3, %87 : vector<1x16xf32>
    %cst_65 = arith.constant -1.000000e+09 : f32
    %89 = vector.shape_cast %88 : vector<1x16xi1> to vector<1x16xi1>
    %90 = vector.broadcast %89 : vector<1x16xi1> to vector<64x16xi1>
    %91 = vector.broadcast %cst_65 : f32 to vector<64x16xf32>
    %92 = arith.select %90, %91, %86 : vector<64x16xi1>, vector<64x16xf32>
    %cst_66 = arith.constant dense<0xFF800000> : vector<64xf32>
    %93 = vector.multi_reduction <maximumf>, %92, %cst_66 [1] : vector<64x16xf32> to vector<64xf32>
    %94 = vector.shape_cast %93 : vector<64xf32> to vector<64x1xf32>
    %95 = vector.broadcast %94 : vector<64x1xf32> to vector<64x16xf32>
    %96 = arith.subf %92, %95 : vector<64x16xf32>
    %97 = math.exp %96 : vector<64x16xf32>
    %cst_67 = arith.constant dense<0.000000e+00> : vector<64xf32>
    %98 = vector.multi_reduction <add>, %97, %cst_67 [1] : vector<64x16xf32> to vector<64xf32>
    %99 = vector.shape_cast %98 : vector<64xf32> to vector<64x1xf32>
    %100 = tpu.reciprocal %99 {approx = true} : vector<64x1xf32> -> vector<64x1xf32>
    %101 = vector.broadcast %100 : vector<64x1xf32> to vector<64x16xf32>
    %102 = arith.mulf %97, %101 : vector<64x16xf32>
    %c0_68 = arith.constant 0 : index
    %c0_69 = arith.constant 0 : index
    %c0_70 = arith.constant 0 : index
    %103 = vector.load %arg15[%c0_68, %c0_69, %c0_70] : memref<2x1x32xf32, #tpu.memory_space<vmem>>, vector<1x1x32xf32>
    %104 = vector.shape_cast %103 : vector<1x1x32xf32> to vector<1x32xf32>
    %105 = vector.extract_strided_slice %102 {offsets = [0, 0], sizes = [16, 16], strides = [1, 1]} : vector<64x16xf32> to vector<16x16xf32>
    %106 = vector.extract_strided_slice %69 {offsets = [0, 0], sizes = [16, 8], strides = [1, 1]} : vector<16x32xf32> to vector<16x8xf32>
    %cst_71 = arith.constant dense<0.000000e+00> : vector<16x8xf32>
    %107 = tpu.matmul %105, %106, %cst_71 {dimension_numbers = #tpu.dot_dimension_numbers<[1], [0], [0], [1], [0, 0, 1, 1], [], []>, precision = #tpu.contract_precision<fp32>} : vector<16x16xf32>, vector<16x8xf32>, vector<16x8xf32> -> vector<16x8xf32>
    %108 = vector.extract_strided_slice %71 {offsets = [0, 0], sizes = [8, 32], strides = [1, 1]} : vector<32x32xf32> to vector<8x32xf32>
    %cst_72 = arith.constant dense<0.000000e+00> : vector<16x32xf32>
    %109 = tpu.matmul %107, %108, %cst_72 {dimension_numbers = #tpu.dot_dimension_numbers<[1], [0], [0], [1], [0, 0, 1, 1], [], []>, precision = #tpu.contract_precision<fp32>} : vector<16x8xf32>, vector<8x32xf32>, vector<16x32xf32> -> vector<16x32xf32>
    %110 = vector.broadcast %104 : vector<1x32xf32> to vector<16x32xf32>
    %111 = arith.addf %110, %109 : vector<16x32xf32>
    %112 = vector.extract_strided_slice %102 {offsets = [16, 0], sizes = [16, 16], strides = [1, 1]} : vector<64x16xf32> to vector<16x16xf32>
    %113 = vector.extract_strided_slice %69 {offsets = [0, 8], sizes = [16, 8], strides = [1, 1]} : vector<16x32xf32> to vector<16x8xf32>
    %cst_73 = arith.constant dense<0.000000e+00> : vector<16x8xf32>
    %114 = tpu.matmul %112, %113, %cst_73 {dimension_numbers = #tpu.dot_dimension_numbers<[1], [0], [0], [1], [0, 0, 1, 1], [], []>, precision = #tpu.contract_precision<fp32>} : vector<16x16xf32>, vector<16x8xf32>, vector<16x8xf32> -> vector<16x8xf32>
    %115 = vector.extract_strided_slice %71 {offsets = [8, 0], sizes = [8, 32], strides = [1, 1]} : vector<32x32xf32> to vector<8x32xf32>
    %cst_74 = arith.constant dense<0.000000e+00> : vector<16x32xf32>
    %116 = tpu.matmul %114, %115, %cst_74 {dimension_numbers = #tpu.dot_dimension_numbers<[1], [0], [0], [1], [0, 0, 1, 1], [], []>, precision = #tpu.contract_precision<fp32>} : vector<16x8xf32>, vector<8x32xf32>, vector<16x32xf32> -> vector<16x32xf32>
    %117 = arith.addf %111, %116 : vector<16x32xf32>
    %118 = vector.extract_strided_slice %102 {offsets = [32, 0], sizes = [16, 16], strides = [1, 1]} : vector<64x16xf32> to vector<16x16xf32>
    %119 = vector.extract_strided_slice %69 {offsets = [0, 16], sizes = [16, 8], strides = [1, 1]} : vector<16x32xf32> to vector<16x8xf32>
    %cst_75 = arith.constant dense<0.000000e+00> : vector<16x8xf32>
    %120 = tpu.matmul %118, %119, %cst_75 {dimension_numbers = #tpu.dot_dimension_numbers<[1], [0], [0], [1], [0, 0, 1, 1], [], []>, precision = #tpu.contract_precision<fp32>} : vector<16x16xf32>, vector<16x8xf32>, vector<16x8xf32> -> vector<16x8xf32>
    %121 = vector.extract_strided_slice %71 {offsets = [16, 0], sizes = [8, 32], strides = [1, 1]} : vector<32x32xf32> to vector<8x32xf32>
    %cst_76 = arith.constant dense<0.000000e+00> : vector<16x32xf32>
    %122 = tpu.matmul %120, %121, %cst_76 {dimension_numbers = #tpu.dot_dimension_numbers<[1], [0], [0], [1], [0, 0, 1, 1], [], []>, precision = #tpu.contract_precision<fp32>} : vector<16x8xf32>, vector<8x32xf32>, vector<16x32xf32> -> vector<16x32xf32>
    %123 = arith.addf %117, %122 : vector<16x32xf32>
    %124 = vector.extract_strided_slice %102 {offsets = [48, 0], sizes = [16, 16], strides = [1, 1]} : vector<64x16xf32> to vector<16x16xf32>
    %125 = vector.extract_strided_slice %69 {offsets = [0, 24], sizes = [16, 8], strides = [1, 1]} : vector<16x32xf32> to vector<16x8xf32>
    %cst_77 = arith.constant dense<0.000000e+00> : vector<16x8xf32>
    %126 = tpu.matmul %124, %125, %cst_77 {dimension_numbers = #tpu.dot_dimension_numbers<[1], [0], [0], [1], [0, 0, 1, 1], [], []>, precision = #tpu.contract_precision<fp32>} : vector<16x16xf32>, vector<16x8xf32>, vector<16x8xf32> -> vector<16x8xf32>
    %127 = vector.extract_strided_slice %71 {offsets = [24, 0], sizes = [8, 32], strides = [1, 1]} : vector<32x32xf32> to vector<8x32xf32>
    %cst_78 = arith.constant dense<0.000000e+00> : vector<16x32xf32>
    %128 = tpu.matmul %126, %127, %cst_78 {dimension_numbers = #tpu.dot_dimension_numbers<[1], [0], [0], [1], [0, 0, 1, 1], [], []>, precision = #tpu.contract_precision<fp32>} : vector<16x8xf32>, vector<8x32xf32>, vector<16x32xf32> -> vector<16x32xf32>
    %129 = arith.addf %123, %128 : vector<16x32xf32>
    %130 = arith.addf %23, %129 : vector<16x32xf32>
    %c0_79 = arith.constant 0 : index
    %c0_80 = arith.constant 0 : index
    %c0_81 = arith.constant 0 : index
    %131 = vector.load %arg16[%c0_79, %c0_80, %c0_81] : memref<2x1x32xf32, #tpu.memory_space<vmem>>, vector<1x1x32xf32>
    %132 = vector.shape_cast %131 : vector<1x1x32xf32> to vector<1x32xf32>
    %c0_82 = arith.constant 0 : index
    %c0_83 = arith.constant 0 : index
    %c0_84 = arith.constant 0 : index
    %133 = vector.load %arg17[%c0_82, %c0_83, %c0_84] : memref<2x1x32xf32, #tpu.memory_space<vmem>>, vector<1x1x32xf32>
    %134 = vector.shape_cast %133 : vector<1x1x32xf32> to vector<1x32xf32>
    %cst_85 = arith.constant dense<0.000000e+00> : vector<16xf32>
    %135 = vector.multi_reduction <add>, %130, %cst_85 [1] : vector<16x32xf32> to vector<16xf32>
    %136 = vector.shape_cast %135 : vector<16xf32> to vector<16x1xf32>
    %cst_86 = arith.constant 3.200000e+01 : f32
    %137 = vector.broadcast %cst_86 : f32 to vector<16x1xf32>
    %138 = arith.divf %136, %137 : vector<16x1xf32>
    %139 = vector.broadcast %138 : vector<16x1xf32> to vector<16x32xf32>
    %140 = arith.subf %130, %139 : vector<16x32xf32>
    %141 = arith.mulf %140, %140 : vector<16x32xf32>
    %cst_87 = arith.constant dense<0.000000e+00> : vector<16xf32>
    %142 = vector.multi_reduction <add>, %141, %cst_87 [1] : vector<16x32xf32> to vector<16xf32>
    %143 = vector.shape_cast %142 : vector<16xf32> to vector<16x1xf32>
    %cst_88 = arith.constant 0.0322580636 : f32
    %144 = vector.broadcast %cst_88 : f32 to vector<16x1xf32>
    %145 = arith.mulf %143, %144 : vector<16x1xf32>
    %146 = math.sqrt %145 : vector<16x1xf32>
    %cst_89 = arith.constant 9.99999997E-7 : f32
    %147 = vector.broadcast %cst_89 : f32 to vector<16x1xf32>
    %148 = arith.addf %146, %147 : vector<16x1xf32>
    %149 = tpu.reciprocal %148 {approx = true} : vector<16x1xf32> -> vector<16x1xf32>
    %150 = vector.broadcast %132 : vector<1x32xf32> to vector<16x32xf32>
    %151 = arith.mulf %150, %140 : vector<16x32xf32>
    %152 = vector.broadcast %149 : vector<16x1xf32> to vector<16x32xf32>
    %153 = arith.mulf %151, %152 : vector<16x32xf32>
    %154 = vector.broadcast %134 : vector<1x32xf32> to vector<16x32xf32>
    %155 = arith.addf %153, %154 : vector<16x32xf32>
    %c0_90 = arith.constant 0 : index
    %c0_91 = arith.constant 0 : index
    %c0_92 = arith.constant 0 : index
    %156 = vector.load %arg18[%c0_90, %c0_91, %c0_92] : memref<2x16x16xf32, #tpu.memory_space<vmem>>, vector<1x16x16xf32>
    %157 = vector.shape_cast %156 : vector<1x16x16xf32> to vector<16x16xf32>
    %cst_93 = arith.constant dense<0.000000e+00> : vector<16x32xf32>
    %158 = tpu.matmul %157, %155, %cst_93 {dimension_numbers = #tpu.dot_dimension_numbers<[1], [0], [0], [1], [0, 0, 1, 1], [], []>, precision = #tpu.contract_precision<fp32>} : vector<16x16xf32>, vector<16x32xf32>, vector<16x32xf32> -> vector<16x32xf32>
    %c0_94 = arith.constant 0 : index
    %c0_95 = arith.constant 0 : index
    %c0_96 = arith.constant 0 : index
    %159 = vector.load %arg19[%c0_94, %c0_95, %c0_96] : memref<2x32x64xf32, #tpu.memory_space<vmem>>, vector<1x32x64xf32>
    %160 = vector.shape_cast %159 : vector<1x32x64xf32> to vector<32x64xf32>
    %cst_97 = arith.constant dense<0.000000e+00> : vector<16x64xf32>
    %161 = tpu.matmul %158, %160, %cst_97 {dimension_numbers = #tpu.dot_dimension_numbers<[1], [0], [0], [1], [0, 0, 1, 1], [], []>, precision = #tpu.contract_precision<fp32>} : vector<16x32xf32>, vector<32x64xf32>, vector<16x64xf32> -> vector<16x64xf32>
    %c0_98 = arith.constant 0 : index
    %c0_99 = arith.constant 0 : index
    %c0_100 = arith.constant 0 : index
    %162 = vector.load %arg20[%c0_98, %c0_99, %c0_100] : memref<2x1x64xf32, #tpu.memory_space<vmem>>, vector<1x1x64xf32>
    %163 = vector.shape_cast %162 : vector<1x1x64xf32> to vector<1x64xf32>
    %164 = vector.broadcast %163 : vector<1x64xf32> to vector<16x64xf32>
    %165 = arith.addf %161, %164 : vector<16x64xf32>
    %cst_101 = arith.constant 0.000000e+00 : f32
    %166 = vector.broadcast %cst_101 : f32 to vector<16x64xf32>
    %167 = arith.maximumf %165, %166 : vector<16x64xf32>
    %cst_102 = arith.constant dense<0.000000e+00> : vector<16x64xf32>
    %168 = tpu.matmul %157, %167, %cst_102 {dimension_numbers = #tpu.dot_dimension_numbers<[1], [0], [0], [1], [0, 0, 1, 1], [], []>, precision = #tpu.contract_precision<fp32>} : vector<16x16xf32>, vector<16x64xf32>, vector<16x64xf32> -> vector<16x64xf32>
    %c0_103 = arith.constant 0 : index
    %c0_104 = arith.constant 0 : index
    %c0_105 = arith.constant 0 : index
    %169 = vector.load %arg21[%c0_103, %c0_104, %c0_105] : memref<2x64x32xf32, #tpu.memory_space<vmem>>, vector<1x64x32xf32>
    %170 = vector.shape_cast %169 : vector<1x64x32xf32> to vector<64x32xf32>
    %cst_106 = arith.constant dense<0.000000e+00> : vector<16x32xf32>
    %171 = tpu.matmul %168, %170, %cst_106 {dimension_numbers = #tpu.dot_dimension_numbers<[1], [0], [0], [1], [0, 0, 1, 1], [], []>, precision = #tpu.contract_precision<fp32>} : vector<16x64xf32>, vector<64x32xf32>, vector<16x32xf32> -> vector<16x32xf32>
    %c0_107 = arith.constant 0 : index
    %c0_108 = arith.constant 0 : index
    %c0_109 = arith.constant 0 : index
    %172 = vector.load %arg22[%c0_107, %c0_108, %c0_109] : memref<2x1x32xf32, #tpu.memory_space<vmem>>, vector<1x1x32xf32>
    %173 = vector.shape_cast %172 : vector<1x1x32xf32> to vector<1x32xf32>
    %174 = vector.broadcast %173 : vector<1x32xf32> to vector<16x32xf32>
    %175 = arith.addf %171, %174 : vector<16x32xf32>
    %176 = arith.addf %130, %175 : vector<16x32xf32>
    %c0_110 = arith.constant 0 : index
    %c0_111 = arith.constant 0 : index
    %c0_112 = arith.constant 0 : index
    %177 = vector.load %arg24[%c0_110, %c0_111, %c0_112] : memref<2x1x32xf32, #tpu.memory_space<vmem>>, vector<1x1x32xf32>
    %178 = vector.shape_cast %177 : vector<1x1x32xf32> to vector<1x32xf32>
    %c0_113 = arith.constant 0 : index
    %c0_114 = arith.constant 0 : index
    %c0_115 = arith.constant 0 : index
    %c0_116 = arith.constant 0 : index
    %179 = vector.load %arg23[%c0_113, %c0_114, %c0_115, %c0_116] : memref<2x3x32x32xf32, #tpu.memory_space<vmem>>, vector<1x1x32x32xf32>
    %180 = vector.shape_cast %179 : vector<1x1x32x32xf32> to vector<32x32xf32>
    %cst_117 = arith.constant dense<0.000000e+00> : vector<16x32xf32>
    %181 = tpu.matmul %176, %180, %cst_117 {dimension_numbers = #tpu.dot_dimension_numbers<[1], [0], [0], [1], [0, 0, 1, 1], [], []>, precision = #tpu.contract_precision<fp32>} : vector<16x32xf32>, vector<32x32xf32>, vector<16x32xf32> -> vector<16x32xf32>
    %c1_118 = arith.constant 1 : index
    %c0_119 = arith.constant 0 : index
    %c0_120 = arith.constant 0 : index
    %182 = vector.load %arg1[%c1_118, %c0_119, %c0_120] : memref<3x16x16xf32, #tpu.memory_space<vmem>>, vector<1x16x16xf32>
    %183 = vector.shape_cast %182 : vector<1x16x16xf32> to vector<16x16xf32>
    %cst_121 = arith.constant dense<0.000000e+00> : vector<16x32xf32>
    %184 = tpu.matmul %183, %176, %cst_121 {dimension_numbers = #tpu.dot_dimension_numbers<[1], [0], [0], [1], [0, 0, 1, 1], [], []>, precision = #tpu.contract_precision<fp32>} : vector<16x16xf32>, vector<16x32xf32>, vector<16x32xf32> -> vector<16x32xf32>
    %c0_122 = arith.constant 0 : index
    %c1_123 = arith.constant 1 : index
    %c0_124 = arith.constant 0 : index
    %c0_125 = arith.constant 0 : index
    %185 = vector.load %arg23[%c0_122, %c1_123, %c0_124, %c0_125] : memref<2x3x32x32xf32, #tpu.memory_space<vmem>>, vector<1x1x32x32xf32>
    %186 = vector.shape_cast %185 : vector<1x1x32x32xf32> to vector<32x32xf32>
    %cst_126 = arith.constant dense<0.000000e+00> : vector<16x32xf32>
    %187 = tpu.matmul %184, %186, %cst_126 {dimension_numbers = #tpu.dot_dimension_numbers<[1], [0], [0], [1], [0, 0, 1, 1], [], []>, precision = #tpu.contract_precision<fp32>} : vector<16x32xf32>, vector<32x32xf32>, vector<16x32xf32> -> vector<16x32xf32>
    %188 = arith.addf %181, %187 : vector<16x32xf32>
    %c2_127 = arith.constant 2 : index
    %c0_128 = arith.constant 0 : index
    %c0_129 = arith.constant 0 : index
    %189 = vector.load %arg1[%c2_127, %c0_128, %c0_129] : memref<3x16x16xf32, #tpu.memory_space<vmem>>, vector<1x16x16xf32>
    %190 = vector.shape_cast %189 : vector<1x16x16xf32> to vector<16x16xf32>
    %cst_130 = arith.constant dense<0.000000e+00> : vector<16x32xf32>
    %191 = tpu.matmul %190, %176, %cst_130 {dimension_numbers = #tpu.dot_dimension_numbers<[1], [0], [0], [1], [0, 0, 1, 1], [], []>, precision = #tpu.contract_precision<fp32>} : vector<16x16xf32>, vector<16x32xf32>, vector<16x32xf32> -> vector<16x32xf32>
    %c0_131 = arith.constant 0 : index
    %c2_132 = arith.constant 2 : index
    %c0_133 = arith.constant 0 : index
    %c0_134 = arith.constant 0 : index
    %192 = vector.load %arg23[%c0_131, %c2_132, %c0_133, %c0_134] : memref<2x3x32x32xf32, #tpu.memory_space<vmem>>, vector<1x1x32x32xf32>
    %193 = vector.shape_cast %192 : vector<1x1x32x32xf32> to vector<32x32xf32>
    %cst_135 = arith.constant dense<0.000000e+00> : vector<16x32xf32>
    %194 = tpu.matmul %191, %193, %cst_135 {dimension_numbers = #tpu.dot_dimension_numbers<[1], [0], [0], [1], [0, 0, 1, 1], [], []>, precision = #tpu.contract_precision<fp32>} : vector<16x32xf32>, vector<32x32xf32>, vector<16x32xf32> -> vector<16x32xf32>
    %195 = arith.addf %188, %194 : vector<16x32xf32>
    %196 = vector.broadcast %178 : vector<1x32xf32> to vector<16x32xf32>
    %197 = arith.addf %195, %196 : vector<16x32xf32>
    %cst_136 = arith.constant 0.000000e+00 : f32
    %198 = vector.broadcast %cst_136 : f32 to vector<16x32xf32>
    %199 = arith.maximumf %197, %198 : vector<16x32xf32>
    %c0_137 = arith.constant 0 : index
    %c0_138 = arith.constant 0 : index
    %c0_139 = arith.constant 0 : index
    %200 = vector.load %arg26[%c0_137, %c0_138, %c0_139] : memref<2x1x32xf32, #tpu.memory_space<vmem>>, vector<1x1x32xf32>
    %201 = vector.shape_cast %200 : vector<1x1x32xf32> to vector<1x32xf32>
    %c0_140 = arith.constant 0 : index
    %c0_141 = arith.constant 0 : index
    %c0_142 = arith.constant 0 : index
    %c0_143 = arith.constant 0 : index
    %202 = vector.load %arg25[%c0_140, %c0_141, %c0_142, %c0_143] : memref<2x3x32x32xf32, #tpu.memory_space<vmem>>, vector<1x1x32x32xf32>
    %203 = vector.shape_cast %202 : vector<1x1x32x32xf32> to vector<32x32xf32>
    %cst_144 = arith.constant dense<0.000000e+00> : vector<16x32xf32>
    %204 = tpu.matmul %199, %203, %cst_144 {dimension_numbers = #tpu.dot_dimension_numbers<[1], [0], [0], [1], [0, 0, 1, 1], [], []>, precision = #tpu.contract_precision<fp32>} : vector<16x32xf32>, vector<32x32xf32>, vector<16x32xf32> -> vector<16x32xf32>
    %c1_145 = arith.constant 1 : index
    %c0_146 = arith.constant 0 : index
    %c0_147 = arith.constant 0 : index
    %205 = vector.load %arg1[%c1_145, %c0_146, %c0_147] : memref<3x16x16xf32, #tpu.memory_space<vmem>>, vector<1x16x16xf32>
    %206 = vector.shape_cast %205 : vector<1x16x16xf32> to vector<16x16xf32>
    %cst_148 = arith.constant dense<0.000000e+00> : vector<16x32xf32>
    %207 = tpu.matmul %206, %199, %cst_148 {dimension_numbers = #tpu.dot_dimension_numbers<[1], [0], [0], [1], [0, 0, 1, 1], [], []>, precision = #tpu.contract_precision<fp32>} : vector<16x16xf32>, vector<16x32xf32>, vector<16x32xf32> -> vector<16x32xf32>
    %c0_149 = arith.constant 0 : index
    %c1_150 = arith.constant 1 : index
    %c0_151 = arith.constant 0 : index
    %c0_152 = arith.constant 0 : index
    %208 = vector.load %arg25[%c0_149, %c1_150, %c0_151, %c0_152] : memref<2x3x32x32xf32, #tpu.memory_space<vmem>>, vector<1x1x32x32xf32>
    %209 = vector.shape_cast %208 : vector<1x1x32x32xf32> to vector<32x32xf32>
    %cst_153 = arith.constant dense<0.000000e+00> : vector<16x32xf32>
    %210 = tpu.matmul %207, %209, %cst_153 {dimension_numbers = #tpu.dot_dimension_numbers<[1], [0], [0], [1], [0, 0, 1, 1], [], []>, precision = #tpu.contract_precision<fp32>} : vector<16x32xf32>, vector<32x32xf32>, vector<16x32xf32> -> vector<16x32xf32>
    %211 = arith.addf %204, %210 : vector<16x32xf32>
    %c2_154 = arith.constant 2 : index
    %c0_155 = arith.constant 0 : index
    %c0_156 = arith.constant 0 : index
    %212 = vector.load %arg1[%c2_154, %c0_155, %c0_156] : memref<3x16x16xf32, #tpu.memory_space<vmem>>, vector<1x16x16xf32>
    %213 = vector.shape_cast %212 : vector<1x16x16xf32> to vector<16x16xf32>
    %cst_157 = arith.constant dense<0.000000e+00> : vector<16x32xf32>
    %214 = tpu.matmul %213, %199, %cst_157 {dimension_numbers = #tpu.dot_dimension_numbers<[1], [0], [0], [1], [0, 0, 1, 1], [], []>, precision = #tpu.contract_precision<fp32>} : vector<16x16xf32>, vector<16x32xf32>, vector<16x32xf32> -> vector<16x32xf32>
    %c0_158 = arith.constant 0 : index
    %c2_159 = arith.constant 2 : index
    %c0_160 = arith.constant 0 : index
    %c0_161 = arith.constant 0 : index
    %215 = vector.load %arg25[%c0_158, %c2_159, %c0_160, %c0_161] : memref<2x3x32x32xf32, #tpu.memory_space<vmem>>, vector<1x1x32x32xf32>
    %216 = vector.shape_cast %215 : vector<1x1x32x32xf32> to vector<32x32xf32>
    %cst_162 = arith.constant dense<0.000000e+00> : vector<16x32xf32>
    %217 = tpu.matmul %214, %216, %cst_162 {dimension_numbers = #tpu.dot_dimension_numbers<[1], [0], [0], [1], [0, 0, 1, 1], [], []>, precision = #tpu.contract_precision<fp32>} : vector<16x32xf32>, vector<32x32xf32>, vector<16x32xf32> -> vector<16x32xf32>
    %218 = arith.addf %211, %217 : vector<16x32xf32>
    %219 = vector.broadcast %201 : vector<1x32xf32> to vector<16x32xf32>
    %220 = arith.addf %218, %219 : vector<16x32xf32>
    %cst_163 = arith.constant 0.000000e+00 : f32
    %221 = vector.broadcast %cst_163 : f32 to vector<16x32xf32>
    %222 = arith.maximumf %220, %221 : vector<16x32xf32>
    %223 = arith.addf %176, %222 : vector<16x32xf32>
    %c1_164 = arith.constant 1 : index
    %c0_165 = arith.constant 0 : index
    %c0_166 = arith.constant 0 : index
    %224 = vector.load %arg6[%c1_164, %c0_165, %c0_166] : memref<2x1x32xf32, #tpu.memory_space<vmem>>, vector<1x1x32xf32>
    %225 = vector.shape_cast %224 : vector<1x1x32xf32> to vector<1x32xf32>
    %c1_167 = arith.constant 1 : index
    %c0_168 = arith.constant 0 : index
    %c0_169 = arith.constant 0 : index
    %226 = vector.load %arg7[%c1_167, %c0_168, %c0_169] : memref<2x1x32xf32, #tpu.memory_space<vmem>>, vector<1x1x32xf32>
    %227 = vector.shape_cast %226 : vector<1x1x32xf32> to vector<1x32xf32>
    %cst_170 = arith.constant dense<0.000000e+00> : vector<16xf32>
    %228 = vector.multi_reduction <add>, %223, %cst_170 [1] : vector<16x32xf32> to vector<16xf32>
    %229 = vector.shape_cast %228 : vector<16xf32> to vector<16x1xf32>
    %cst_171 = arith.constant 3.200000e+01 : f32
    %230 = vector.broadcast %cst_171 : f32 to vector<16x1xf32>
    %231 = arith.divf %229, %230 : vector<16x1xf32>
    %232 = vector.broadcast %231 : vector<16x1xf32> to vector<16x32xf32>
    %233 = arith.subf %223, %232 : vector<16x32xf32>
    %234 = arith.mulf %233, %233 : vector<16x32xf32>
    %cst_172 = arith.constant dense<0.000000e+00> : vector<16xf32>
    %235 = vector.multi_reduction <add>, %234, %cst_172 [1] : vector<16x32xf32> to vector<16xf32>
    %236 = vector.shape_cast %235 : vector<16xf32> to vector<16x1xf32>
    %cst_173 = arith.constant 0.0322580636 : f32
    %237 = vector.broadcast %cst_173 : f32 to vector<16x1xf32>
    %238 = arith.mulf %236, %237 : vector<16x1xf32>
    %239 = math.sqrt %238 : vector<16x1xf32>
    %cst_174 = arith.constant 9.99999997E-7 : f32
    %240 = vector.broadcast %cst_174 : f32 to vector<16x1xf32>
    %241 = arith.addf %239, %240 : vector<16x1xf32>
    %242 = tpu.reciprocal %241 {approx = true} : vector<16x1xf32> -> vector<16x1xf32>
    %243 = vector.broadcast %225 : vector<1x32xf32> to vector<16x32xf32>
    %244 = arith.mulf %243, %233 : vector<16x32xf32>
    %245 = vector.broadcast %242 : vector<16x1xf32> to vector<16x32xf32>
    %246 = arith.mulf %244, %245 : vector<16x32xf32>
    %247 = vector.broadcast %227 : vector<1x32xf32> to vector<16x32xf32>
    %248 = arith.addf %246, %247 : vector<16x32xf32>
    %c1_175 = arith.constant 1 : index
    %c0_176 = arith.constant 0 : index
    %c0_177 = arith.constant 0 : index
    %249 = vector.load %arg8[%c1_175, %c0_176, %c0_177] : memref<2x32x32xf32, #tpu.memory_space<vmem>>, vector<1x32x32xf32>
    %250 = vector.shape_cast %249 : vector<1x32x32xf32> to vector<32x32xf32>
    %cst_178 = arith.constant dense<0.000000e+00> : vector<16x32xf32>
    %251 = tpu.matmul %248, %250, %cst_178 {dimension_numbers = #tpu.dot_dimension_numbers<[1], [0], [0], [1], [0, 0, 1, 1], [], []>, precision = #tpu.contract_precision<fp32>} : vector<16x32xf32>, vector<32x32xf32>, vector<16x32xf32> -> vector<16x32xf32>
    %c1_179 = arith.constant 1 : index
    %c0_180 = arith.constant 0 : index
    %c0_181 = arith.constant 0 : index
    %252 = vector.load %arg9[%c1_179, %c0_180, %c0_181] : memref<2x1x32xf32, #tpu.memory_space<vmem>>, vector<1x1x32xf32>
    %253 = vector.shape_cast %252 : vector<1x1x32xf32> to vector<1x32xf32>
    %254 = vector.broadcast %253 : vector<1x32xf32> to vector<16x32xf32>
    %255 = arith.addf %251, %254 : vector<16x32xf32>
    %c1_182 = arith.constant 1 : index
    %c0_183 = arith.constant 0 : index
    %c0_184 = arith.constant 0 : index
    %256 = vector.load %arg10[%c1_182, %c0_183, %c0_184] : memref<2x32x32xf32, #tpu.memory_space<vmem>>, vector<1x32x32xf32>
    %257 = vector.shape_cast %256 : vector<1x32x32xf32> to vector<32x32xf32>
    %cst_185 = arith.constant dense<0.000000e+00> : vector<16x32xf32>
    %258 = tpu.matmul %248, %257, %cst_185 {dimension_numbers = #tpu.dot_dimension_numbers<[1], [0], [0], [1], [0, 0, 1, 1], [], []>, precision = #tpu.contract_precision<fp32>} : vector<16x32xf32>, vector<32x32xf32>, vector<16x32xf32> -> vector<16x32xf32>
    %c1_186 = arith.constant 1 : index
    %c0_187 = arith.constant 0 : index
    %c0_188 = arith.constant 0 : index
    %259 = vector.load %arg11[%c1_186, %c0_187, %c0_188] : memref<2x1x32xf32, #tpu.memory_space<vmem>>, vector<1x1x32xf32>
    %260 = vector.shape_cast %259 : vector<1x1x32xf32> to vector<1x32xf32>
    %261 = vector.broadcast %260 : vector<1x32xf32> to vector<16x32xf32>
    %262 = arith.addf %258, %261 : vector<16x32xf32>
    %c1_189 = arith.constant 1 : index
    %c0_190 = arith.constant 0 : index
    %c0_191 = arith.constant 0 : index
    %263 = vector.load %arg12[%c1_189, %c0_190, %c0_191] : memref<2x32x32xf32, #tpu.memory_space<vmem>>, vector<1x32x32xf32>
    %264 = vector.shape_cast %263 : vector<1x32x32xf32> to vector<32x32xf32>
    %cst_192 = arith.constant dense<0.000000e+00> : vector<16x32xf32>
    %265 = tpu.matmul %248, %264, %cst_192 {dimension_numbers = #tpu.dot_dimension_numbers<[1], [0], [0], [1], [0, 0, 1, 1], [], []>, precision = #tpu.contract_precision<fp32>} : vector<16x32xf32>, vector<32x32xf32>, vector<16x32xf32> -> vector<16x32xf32>
    %c1_193 = arith.constant 1 : index
    %c0_194 = arith.constant 0 : index
    %c0_195 = arith.constant 0 : index
    %266 = vector.load %arg13[%c1_193, %c0_194, %c0_195] : memref<2x1x32xf32, #tpu.memory_space<vmem>>, vector<1x1x32xf32>
    %267 = vector.shape_cast %266 : vector<1x1x32xf32> to vector<1x32xf32>
    %268 = vector.broadcast %267 : vector<1x32xf32> to vector<16x32xf32>
    %269 = arith.addf %265, %268 : vector<16x32xf32>
    %c1_196 = arith.constant 1 : index
    %c0_197 = arith.constant 0 : index
    %c0_198 = arith.constant 0 : index
    %270 = vector.load %arg14[%c1_196, %c0_197, %c0_198] : memref<2x32x32xf32, #tpu.memory_space<vmem>>, vector<1x32x32xf32>
    %271 = vector.shape_cast %270 : vector<1x32x32xf32> to vector<32x32xf32>
    %272 = vector.extract_strided_slice %255 {offsets = [0, 0], sizes = [16, 8], strides = [1, 1]} : vector<16x32xf32> to vector<16x8xf32>
    %273 = vector.extract_strided_slice %262 {offsets = [0, 0], sizes = [16, 8], strides = [1, 1]} : vector<16x32xf32> to vector<16x8xf32>
    %cst_199 = arith.constant dense<0.000000e+00> : vector<16x16xf32>
    %274 = tpu.matmul %272, %273, %cst_199 {dimension_numbers = #tpu.dot_dimension_numbers<[1], [1], [0], [0], [0, 0, 1, 0], [], []>, precision = #tpu.contract_precision<fp32>} : vector<16x8xf32>, vector<16x8xf32>, vector<16x16xf32> -> vector<16x16xf32>
    %275 = vector.extract_strided_slice %255 {offsets = [0, 8], sizes = [16, 8], strides = [1, 1]} : vector<16x32xf32> to vector<16x8xf32>
    %276 = vector.extract_strided_slice %262 {offsets = [0, 8], sizes = [16, 8], strides = [1, 1]} : vector<16x32xf32> to vector<16x8xf32>
    %cst_200 = arith.constant dense<0.000000e+00> : vector<16x16xf32>
    %277 = tpu.matmul %275, %276, %cst_200 {dimension_numbers = #tpu.dot_dimension_numbers<[1], [1], [0], [0], [0, 0, 1, 0], [], []>, precision = #tpu.contract_precision<fp32>} : vector<16x8xf32>, vector<16x8xf32>, vector<16x16xf32> -> vector<16x16xf32>
    %278 = vector.extract_strided_slice %255 {offsets = [0, 16], sizes = [16, 8], strides = [1, 1]} : vector<16x32xf32> to vector<16x8xf32>
    %279 = vector.extract_strided_slice %262 {offsets = [0, 16], sizes = [16, 8], strides = [1, 1]} : vector<16x32xf32> to vector<16x8xf32>
    %cst_201 = arith.constant dense<0.000000e+00> : vector<16x16xf32>
    %280 = tpu.matmul %278, %279, %cst_201 {dimension_numbers = #tpu.dot_dimension_numbers<[1], [1], [0], [0], [0, 0, 1, 0], [], []>, precision = #tpu.contract_precision<fp32>} : vector<16x8xf32>, vector<16x8xf32>, vector<16x16xf32> -> vector<16x16xf32>
    %281 = vector.extract_strided_slice %255 {offsets = [0, 24], sizes = [16, 8], strides = [1, 1]} : vector<16x32xf32> to vector<16x8xf32>
    %282 = vector.extract_strided_slice %262 {offsets = [0, 24], sizes = [16, 8], strides = [1, 1]} : vector<16x32xf32> to vector<16x8xf32>
    %cst_202 = arith.constant dense<0.000000e+00> : vector<16x16xf32>
    %283 = tpu.matmul %281, %282, %cst_202 {dimension_numbers = #tpu.dot_dimension_numbers<[1], [1], [0], [0], [0, 0, 1, 0], [], []>, precision = #tpu.contract_precision<fp32>} : vector<16x8xf32>, vector<16x8xf32>, vector<16x16xf32> -> vector<16x16xf32>
    %284 = tpu.concatenate %274, %277, %280, %283 in 0 : vector<16x16xf32>, vector<16x16xf32>, vector<16x16xf32>, vector<16x16xf32> -> vector<64x16xf32>
    %cst_203 = arith.constant 0.353553385 : f32
    %285 = vector.broadcast %cst_203 : f32 to vector<64x16xf32>
    %286 = arith.mulf %284, %285 : vector<64x16xf32>
    %cst_204 = arith.constant 0.000000e+00 : f32
    %287 = vector.broadcast %cst_204 : f32 to vector<1x16xf32>
    %288 = arith.cmpf oeq, %3, %287 : vector<1x16xf32>
    %cst_205 = arith.constant -1.000000e+09 : f32
    %289 = vector.shape_cast %288 : vector<1x16xi1> to vector<1x16xi1>
    %290 = vector.broadcast %289 : vector<1x16xi1> to vector<64x16xi1>
    %291 = vector.broadcast %cst_205 : f32 to vector<64x16xf32>
    %292 = arith.select %290, %291, %286 : vector<64x16xi1>, vector<64x16xf32>
    %cst_206 = arith.constant dense<0xFF800000> : vector<64xf32>
    %293 = vector.multi_reduction <maximumf>, %292, %cst_206 [1] : vector<64x16xf32> to vector<64xf32>
    %294 = vector.shape_cast %293 : vector<64xf32> to vector<64x1xf32>
    %295 = vector.broadcast %294 : vector<64x1xf32> to vector<64x16xf32>
    %296 = arith.subf %292, %295 : vector<64x16xf32>
    %297 = math.exp %296 : vector<64x16xf32>
    %cst_207 = arith.constant dense<0.000000e+00> : vector<64xf32>
    %298 = vector.multi_reduction <add>, %297, %cst_207 [1] : vector<64x16xf32> to vector<64xf32>
    %299 = vector.shape_cast %298 : vector<64xf32> to vector<64x1xf32>
    %300 = tpu.reciprocal %299 {approx = true} : vector<64x1xf32> -> vector<64x1xf32>
    %301 = vector.broadcast %300 : vector<64x1xf32> to vector<64x16xf32>
    %302 = arith.mulf %297, %301 : vector<64x16xf32>
    %c1_208 = arith.constant 1 : index
    %c0_209 = arith.constant 0 : index
    %c0_210 = arith.constant 0 : index
    %303 = vector.load %arg15[%c1_208, %c0_209, %c0_210] : memref<2x1x32xf32, #tpu.memory_space<vmem>>, vector<1x1x32xf32>
    %304 = vector.shape_cast %303 : vector<1x1x32xf32> to vector<1x32xf32>
    %305 = vector.extract_strided_slice %302 {offsets = [0, 0], sizes = [16, 16], strides = [1, 1]} : vector<64x16xf32> to vector<16x16xf32>
    %306 = vector.extract_strided_slice %269 {offsets = [0, 0], sizes = [16, 8], strides = [1, 1]} : vector<16x32xf32> to vector<16x8xf32>
    %cst_211 = arith.constant dense<0.000000e+00> : vector<16x8xf32>
    %307 = tpu.matmul %305, %306, %cst_211 {dimension_numbers = #tpu.dot_dimension_numbers<[1], [0], [0], [1], [0, 0, 1, 1], [], []>, precision = #tpu.contract_precision<fp32>} : vector<16x16xf32>, vector<16x8xf32>, vector<16x8xf32> -> vector<16x8xf32>
    %308 = vector.extract_strided_slice %271 {offsets = [0, 0], sizes = [8, 32], strides = [1, 1]} : vector<32x32xf32> to vector<8x32xf32>
    %cst_212 = arith.constant dense<0.000000e+00> : vector<16x32xf32>
    %309 = tpu.matmul %307, %308, %cst_212 {dimension_numbers = #tpu.dot_dimension_numbers<[1], [0], [0], [1], [0, 0, 1, 1], [], []>, precision = #tpu.contract_precision<fp32>} : vector<16x8xf32>, vector<8x32xf32>, vector<16x32xf32> -> vector<16x32xf32>
    %310 = vector.broadcast %304 : vector<1x32xf32> to vector<16x32xf32>
    %311 = arith.addf %310, %309 : vector<16x32xf32>
    %312 = vector.extract_strided_slice %302 {offsets = [16, 0], sizes = [16, 16], strides = [1, 1]} : vector<64x16xf32> to vector<16x16xf32>
    %313 = vector.extract_strided_slice %269 {offsets = [0, 8], sizes = [16, 8], strides = [1, 1]} : vector<16x32xf32> to vector<16x8xf32>
    %cst_213 = arith.constant dense<0.000000e+00> : vector<16x8xf32>
    %314 = tpu.matmul %312, %313, %cst_213 {dimension_numbers = #tpu.dot_dimension_numbers<[1], [0], [0], [1], [0, 0, 1, 1], [], []>, precision = #tpu.contract_precision<fp32>} : vector<16x16xf32>, vector<16x8xf32>, vector<16x8xf32> -> vector<16x8xf32>
    %315 = vector.extract_strided_slice %271 {offsets = [8, 0], sizes = [8, 32], strides = [1, 1]} : vector<32x32xf32> to vector<8x32xf32>
    %cst_214 = arith.constant dense<0.000000e+00> : vector<16x32xf32>
    %316 = tpu.matmul %314, %315, %cst_214 {dimension_numbers = #tpu.dot_dimension_numbers<[1], [0], [0], [1], [0, 0, 1, 1], [], []>, precision = #tpu.contract_precision<fp32>} : vector<16x8xf32>, vector<8x32xf32>, vector<16x32xf32> -> vector<16x32xf32>
    %317 = arith.addf %311, %316 : vector<16x32xf32>
    %318 = vector.extract_strided_slice %302 {offsets = [32, 0], sizes = [16, 16], strides = [1, 1]} : vector<64x16xf32> to vector<16x16xf32>
    %319 = vector.extract_strided_slice %269 {offsets = [0, 16], sizes = [16, 8], strides = [1, 1]} : vector<16x32xf32> to vector<16x8xf32>
    %cst_215 = arith.constant dense<0.000000e+00> : vector<16x8xf32>
    %320 = tpu.matmul %318, %319, %cst_215 {dimension_numbers = #tpu.dot_dimension_numbers<[1], [0], [0], [1], [0, 0, 1, 1], [], []>, precision = #tpu.contract_precision<fp32>} : vector<16x16xf32>, vector<16x8xf32>, vector<16x8xf32> -> vector<16x8xf32>
    %321 = vector.extract_strided_slice %271 {offsets = [16, 0], sizes = [8, 32], strides = [1, 1]} : vector<32x32xf32> to vector<8x32xf32>
    %cst_216 = arith.constant dense<0.000000e+00> : vector<16x32xf32>
    %322 = tpu.matmul %320, %321, %cst_216 {dimension_numbers = #tpu.dot_dimension_numbers<[1], [0], [0], [1], [0, 0, 1, 1], [], []>, precision = #tpu.contract_precision<fp32>} : vector<16x8xf32>, vector<8x32xf32>, vector<16x32xf32> -> vector<16x32xf32>
    %323 = arith.addf %317, %322 : vector<16x32xf32>
    %324 = vector.extract_strided_slice %302 {offsets = [48, 0], sizes = [16, 16], strides = [1, 1]} : vector<64x16xf32> to vector<16x16xf32>
    %325 = vector.extract_strided_slice %269 {offsets = [0, 24], sizes = [16, 8], strides = [1, 1]} : vector<16x32xf32> to vector<16x8xf32>
    %cst_217 = arith.constant dense<0.000000e+00> : vector<16x8xf32>
    %326 = tpu.matmul %324, %325, %cst_217 {dimension_numbers = #tpu.dot_dimension_numbers<[1], [0], [0], [1], [0, 0, 1, 1], [], []>, precision = #tpu.contract_precision<fp32>} : vector<16x16xf32>, vector<16x8xf32>, vector<16x8xf32> -> vector<16x8xf32>
    %327 = vector.extract_strided_slice %271 {offsets = [24, 0], sizes = [8, 32], strides = [1, 1]} : vector<32x32xf32> to vector<8x32xf32>
    %cst_218 = arith.constant dense<0.000000e+00> : vector<16x32xf32>
    %328 = tpu.matmul %326, %327, %cst_218 {dimension_numbers = #tpu.dot_dimension_numbers<[1], [0], [0], [1], [0, 0, 1, 1], [], []>, precision = #tpu.contract_precision<fp32>} : vector<16x8xf32>, vector<8x32xf32>, vector<16x32xf32> -> vector<16x32xf32>
    %329 = arith.addf %323, %328 : vector<16x32xf32>
    %330 = arith.addf %223, %329 : vector<16x32xf32>
    %c1_219 = arith.constant 1 : index
    %c0_220 = arith.constant 0 : index
    %c0_221 = arith.constant 0 : index
    %331 = vector.load %arg16[%c1_219, %c0_220, %c0_221] : memref<2x1x32xf32, #tpu.memory_space<vmem>>, vector<1x1x32xf32>
    %332 = vector.shape_cast %331 : vector<1x1x32xf32> to vector<1x32xf32>
    %c1_222 = arith.constant 1 : index
    %c0_223 = arith.constant 0 : index
    %c0_224 = arith.constant 0 : index
    %333 = vector.load %arg17[%c1_222, %c0_223, %c0_224] : memref<2x1x32xf32, #tpu.memory_space<vmem>>, vector<1x1x32xf32>
    %334 = vector.shape_cast %333 : vector<1x1x32xf32> to vector<1x32xf32>
    %cst_225 = arith.constant dense<0.000000e+00> : vector<16xf32>
    %335 = vector.multi_reduction <add>, %330, %cst_225 [1] : vector<16x32xf32> to vector<16xf32>
    %336 = vector.shape_cast %335 : vector<16xf32> to vector<16x1xf32>
    %cst_226 = arith.constant 3.200000e+01 : f32
    %337 = vector.broadcast %cst_226 : f32 to vector<16x1xf32>
    %338 = arith.divf %336, %337 : vector<16x1xf32>
    %339 = vector.broadcast %338 : vector<16x1xf32> to vector<16x32xf32>
    %340 = arith.subf %330, %339 : vector<16x32xf32>
    %341 = arith.mulf %340, %340 : vector<16x32xf32>
    %cst_227 = arith.constant dense<0.000000e+00> : vector<16xf32>
    %342 = vector.multi_reduction <add>, %341, %cst_227 [1] : vector<16x32xf32> to vector<16xf32>
    %343 = vector.shape_cast %342 : vector<16xf32> to vector<16x1xf32>
    %cst_228 = arith.constant 0.0322580636 : f32
    %344 = vector.broadcast %cst_228 : f32 to vector<16x1xf32>
    %345 = arith.mulf %343, %344 : vector<16x1xf32>
    %346 = math.sqrt %345 : vector<16x1xf32>
    %cst_229 = arith.constant 9.99999997E-7 : f32
    %347 = vector.broadcast %cst_229 : f32 to vector<16x1xf32>
    %348 = arith.addf %346, %347 : vector<16x1xf32>
    %349 = tpu.reciprocal %348 {approx = true} : vector<16x1xf32> -> vector<16x1xf32>
    %350 = vector.broadcast %332 : vector<1x32xf32> to vector<16x32xf32>
    %351 = arith.mulf %350, %340 : vector<16x32xf32>
    %352 = vector.broadcast %349 : vector<16x1xf32> to vector<16x32xf32>
    %353 = arith.mulf %351, %352 : vector<16x32xf32>
    %354 = vector.broadcast %334 : vector<1x32xf32> to vector<16x32xf32>
    %355 = arith.addf %353, %354 : vector<16x32xf32>
    %c1_230 = arith.constant 1 : index
    %c0_231 = arith.constant 0 : index
    %c0_232 = arith.constant 0 : index
    %356 = vector.load %arg18[%c1_230, %c0_231, %c0_232] : memref<2x16x16xf32, #tpu.memory_space<vmem>>, vector<1x16x16xf32>
    %357 = vector.shape_cast %356 : vector<1x16x16xf32> to vector<16x16xf32>
    %cst_233 = arith.constant dense<0.000000e+00> : vector<16x32xf32>
    %358 = tpu.matmul %357, %355, %cst_233 {dimension_numbers = #tpu.dot_dimension_numbers<[1], [0], [0], [1], [0, 0, 1, 1], [], []>, precision = #tpu.contract_precision<fp32>} : vector<16x16xf32>, vector<16x32xf32>, vector<16x32xf32> -> vector<16x32xf32>
    %c1_234 = arith.constant 1 : index
    %c0_235 = arith.constant 0 : index
    %c0_236 = arith.constant 0 : index
    %359 = vector.load %arg19[%c1_234, %c0_235, %c0_236] : memref<2x32x64xf32, #tpu.memory_space<vmem>>, vector<1x32x64xf32>
    %360 = vector.shape_cast %359 : vector<1x32x64xf32> to vector<32x64xf32>
    %cst_237 = arith.constant dense<0.000000e+00> : vector<16x64xf32>
    %361 = tpu.matmul %358, %360, %cst_237 {dimension_numbers = #tpu.dot_dimension_numbers<[1], [0], [0], [1], [0, 0, 1, 1], [], []>, precision = #tpu.contract_precision<fp32>} : vector<16x32xf32>, vector<32x64xf32>, vector<16x64xf32> -> vector<16x64xf32>
    %c1_238 = arith.constant 1 : index
    %c0_239 = arith.constant 0 : index
    %c0_240 = arith.constant 0 : index
    %362 = vector.load %arg20[%c1_238, %c0_239, %c0_240] : memref<2x1x64xf32, #tpu.memory_space<vmem>>, vector<1x1x64xf32>
    %363 = vector.shape_cast %362 : vector<1x1x64xf32> to vector<1x64xf32>
    %364 = vector.broadcast %363 : vector<1x64xf32> to vector<16x64xf32>
    %365 = arith.addf %361, %364 : vector<16x64xf32>
    %cst_241 = arith.constant 0.000000e+00 : f32
    %366 = vector.broadcast %cst_241 : f32 to vector<16x64xf32>
    %367 = arith.maximumf %365, %366 : vector<16x64xf32>
    %cst_242 = arith.constant dense<0.000000e+00> : vector<16x64xf32>
    %368 = tpu.matmul %357, %367, %cst_242 {dimension_numbers = #tpu.dot_dimension_numbers<[1], [0], [0], [1], [0, 0, 1, 1], [], []>, precision = #tpu.contract_precision<fp32>} : vector<16x16xf32>, vector<16x64xf32>, vector<16x64xf32> -> vector<16x64xf32>
    %c1_243 = arith.constant 1 : index
    %c0_244 = arith.constant 0 : index
    %c0_245 = arith.constant 0 : index
    %369 = vector.load %arg21[%c1_243, %c0_244, %c0_245] : memref<2x64x32xf32, #tpu.memory_space<vmem>>, vector<1x64x32xf32>
    %370 = vector.shape_cast %369 : vector<1x64x32xf32> to vector<64x32xf32>
    %cst_246 = arith.constant dense<0.000000e+00> : vector<16x32xf32>
    %371 = tpu.matmul %368, %370, %cst_246 {dimension_numbers = #tpu.dot_dimension_numbers<[1], [0], [0], [1], [0, 0, 1, 1], [], []>, precision = #tpu.contract_precision<fp32>} : vector<16x64xf32>, vector<64x32xf32>, vector<16x32xf32> -> vector<16x32xf32>
    %c1_247 = arith.constant 1 : index
    %c0_248 = arith.constant 0 : index
    %c0_249 = arith.constant 0 : index
    %372 = vector.load %arg22[%c1_247, %c0_248, %c0_249] : memref<2x1x32xf32, #tpu.memory_space<vmem>>, vector<1x1x32xf32>
    %373 = vector.shape_cast %372 : vector<1x1x32xf32> to vector<1x32xf32>
    %374 = vector.broadcast %373 : vector<1x32xf32> to vector<16x32xf32>
    %375 = arith.addf %371, %374 : vector<16x32xf32>
    %376 = arith.addf %330, %375 : vector<16x32xf32>
    %c1_250 = arith.constant 1 : index
    %c0_251 = arith.constant 0 : index
    %c0_252 = arith.constant 0 : index
    %377 = vector.load %arg24[%c1_250, %c0_251, %c0_252] : memref<2x1x32xf32, #tpu.memory_space<vmem>>, vector<1x1x32xf32>
    %378 = vector.shape_cast %377 : vector<1x1x32xf32> to vector<1x32xf32>
    %c1_253 = arith.constant 1 : index
    %c0_254 = arith.constant 0 : index
    %c0_255 = arith.constant 0 : index
    %c0_256 = arith.constant 0 : index
    %379 = vector.load %arg23[%c1_253, %c0_254, %c0_255, %c0_256] : memref<2x3x32x32xf32, #tpu.memory_space<vmem>>, vector<1x1x32x32xf32>
    %380 = vector.shape_cast %379 : vector<1x1x32x32xf32> to vector<32x32xf32>
    %cst_257 = arith.constant dense<0.000000e+00> : vector<16x32xf32>
    %381 = tpu.matmul %376, %380, %cst_257 {dimension_numbers = #tpu.dot_dimension_numbers<[1], [0], [0], [1], [0, 0, 1, 1], [], []>, precision = #tpu.contract_precision<fp32>} : vector<16x32xf32>, vector<32x32xf32>, vector<16x32xf32> -> vector<16x32xf32>
    %c1_258 = arith.constant 1 : index
    %c0_259 = arith.constant 0 : index
    %c0_260 = arith.constant 0 : index
    %382 = vector.load %arg1[%c1_258, %c0_259, %c0_260] : memref<3x16x16xf32, #tpu.memory_space<vmem>>, vector<1x16x16xf32>
    %383 = vector.shape_cast %382 : vector<1x16x16xf32> to vector<16x16xf32>
    %cst_261 = arith.constant dense<0.000000e+00> : vector<16x32xf32>
    %384 = tpu.matmul %383, %376, %cst_261 {dimension_numbers = #tpu.dot_dimension_numbers<[1], [0], [0], [1], [0, 0, 1, 1], [], []>, precision = #tpu.contract_precision<fp32>} : vector<16x16xf32>, vector<16x32xf32>, vector<16x32xf32> -> vector<16x32xf32>
    %c1_262 = arith.constant 1 : index
    %c1_263 = arith.constant 1 : index
    %c0_264 = arith.constant 0 : index
    %c0_265 = arith.constant 0 : index
    %385 = vector.load %arg23[%c1_262, %c1_263, %c0_264, %c0_265] : memref<2x3x32x32xf32, #tpu.memory_space<vmem>>, vector<1x1x32x32xf32>
    %386 = vector.shape_cast %385 : vector<1x1x32x32xf32> to vector<32x32xf32>
    %cst_266 = arith.constant dense<0.000000e+00> : vector<16x32xf32>
    %387 = tpu.matmul %384, %386, %cst_266 {dimension_numbers = #tpu.dot_dimension_numbers<[1], [0], [0], [1], [0, 0, 1, 1], [], []>, precision = #tpu.contract_precision<fp32>} : vector<16x32xf32>, vector<32x32xf32>, vector<16x32xf32> -> vector<16x32xf32>
    %388 = arith.addf %381, %387 : vector<16x32xf32>
    %c2_267 = arith.constant 2 : index
    %c0_268 = arith.constant 0 : index
    %c0_269 = arith.constant 0 : index
    %389 = vector.load %arg1[%c2_267, %c0_268, %c0_269] : memref<3x16x16xf32, #tpu.memory_space<vmem>>, vector<1x16x16xf32>
    %390 = vector.shape_cast %389 : vector<1x16x16xf32> to vector<16x16xf32>
    %cst_270 = arith.constant dense<0.000000e+00> : vector<16x32xf32>
    %391 = tpu.matmul %390, %376, %cst_270 {dimension_numbers = #tpu.dot_dimension_numbers<[1], [0], [0], [1], [0, 0, 1, 1], [], []>, precision = #tpu.contract_precision<fp32>} : vector<16x16xf32>, vector<16x32xf32>, vector<16x32xf32> -> vector<16x32xf32>
    %c1_271 = arith.constant 1 : index
    %c2_272 = arith.constant 2 : index
    %c0_273 = arith.constant 0 : index
    %c0_274 = arith.constant 0 : index
    %392 = vector.load %arg23[%c1_271, %c2_272, %c0_273, %c0_274] : memref<2x3x32x32xf32, #tpu.memory_space<vmem>>, vector<1x1x32x32xf32>
    %393 = vector.shape_cast %392 : vector<1x1x32x32xf32> to vector<32x32xf32>
    %cst_275 = arith.constant dense<0.000000e+00> : vector<16x32xf32>
    %394 = tpu.matmul %391, %393, %cst_275 {dimension_numbers = #tpu.dot_dimension_numbers<[1], [0], [0], [1], [0, 0, 1, 1], [], []>, precision = #tpu.contract_precision<fp32>} : vector<16x32xf32>, vector<32x32xf32>, vector<16x32xf32> -> vector<16x32xf32>
    %395 = arith.addf %388, %394 : vector<16x32xf32>
    %396 = vector.broadcast %378 : vector<1x32xf32> to vector<16x32xf32>
    %397 = arith.addf %395, %396 : vector<16x32xf32>
    %cst_276 = arith.constant 0.000000e+00 : f32
    %398 = vector.broadcast %cst_276 : f32 to vector<16x32xf32>
    %399 = arith.maximumf %397, %398 : vector<16x32xf32>
    %c1_277 = arith.constant 1 : index
    %c0_278 = arith.constant 0 : index
    %c0_279 = arith.constant 0 : index
    %400 = vector.load %arg26[%c1_277, %c0_278, %c0_279] : memref<2x1x32xf32, #tpu.memory_space<vmem>>, vector<1x1x32xf32>
    %401 = vector.shape_cast %400 : vector<1x1x32xf32> to vector<1x32xf32>
    %c1_280 = arith.constant 1 : index
    %c0_281 = arith.constant 0 : index
    %c0_282 = arith.constant 0 : index
    %c0_283 = arith.constant 0 : index
    %402 = vector.load %arg25[%c1_280, %c0_281, %c0_282, %c0_283] : memref<2x3x32x32xf32, #tpu.memory_space<vmem>>, vector<1x1x32x32xf32>
    %403 = vector.shape_cast %402 : vector<1x1x32x32xf32> to vector<32x32xf32>
    %cst_284 = arith.constant dense<0.000000e+00> : vector<16x32xf32>
    %404 = tpu.matmul %399, %403, %cst_284 {dimension_numbers = #tpu.dot_dimension_numbers<[1], [0], [0], [1], [0, 0, 1, 1], [], []>, precision = #tpu.contract_precision<fp32>} : vector<16x32xf32>, vector<32x32xf32>, vector<16x32xf32> -> vector<16x32xf32>
    %c1_285 = arith.constant 1 : index
    %c0_286 = arith.constant 0 : index
    %c0_287 = arith.constant 0 : index
    %405 = vector.load %arg1[%c1_285, %c0_286, %c0_287] : memref<3x16x16xf32, #tpu.memory_space<vmem>>, vector<1x16x16xf32>
    %406 = vector.shape_cast %405 : vector<1x16x16xf32> to vector<16x16xf32>
    %cst_288 = arith.constant dense<0.000000e+00> : vector<16x32xf32>
    %407 = tpu.matmul %406, %399, %cst_288 {dimension_numbers = #tpu.dot_dimension_numbers<[1], [0], [0], [1], [0, 0, 1, 1], [], []>, precision = #tpu.contract_precision<fp32>} : vector<16x16xf32>, vector<16x32xf32>, vector<16x32xf32> -> vector<16x32xf32>
    %c1_289 = arith.constant 1 : index
    %c1_290 = arith.constant 1 : index
    %c0_291 = arith.constant 0 : index
    %c0_292 = arith.constant 0 : index
    %408 = vector.load %arg25[%c1_289, %c1_290, %c0_291, %c0_292] : memref<2x3x32x32xf32, #tpu.memory_space<vmem>>, vector<1x1x32x32xf32>
    %409 = vector.shape_cast %408 : vector<1x1x32x32xf32> to vector<32x32xf32>
    %cst_293 = arith.constant dense<0.000000e+00> : vector<16x32xf32>
    %410 = tpu.matmul %407, %409, %cst_293 {dimension_numbers = #tpu.dot_dimension_numbers<[1], [0], [0], [1], [0, 0, 1, 1], [], []>, precision = #tpu.contract_precision<fp32>} : vector<16x32xf32>, vector<32x32xf32>, vector<16x32xf32> -> vector<16x32xf32>
    %411 = arith.addf %404, %410 : vector<16x32xf32>
    %c2_294 = arith.constant 2 : index
    %c0_295 = arith.constant 0 : index
    %c0_296 = arith.constant 0 : index
    %412 = vector.load %arg1[%c2_294, %c0_295, %c0_296] : memref<3x16x16xf32, #tpu.memory_space<vmem>>, vector<1x16x16xf32>
    %413 = vector.shape_cast %412 : vector<1x16x16xf32> to vector<16x16xf32>
    %cst_297 = arith.constant dense<0.000000e+00> : vector<16x32xf32>
    %414 = tpu.matmul %413, %399, %cst_297 {dimension_numbers = #tpu.dot_dimension_numbers<[1], [0], [0], [1], [0, 0, 1, 1], [], []>, precision = #tpu.contract_precision<fp32>} : vector<16x16xf32>, vector<16x32xf32>, vector<16x32xf32> -> vector<16x32xf32>
    %c1_298 = arith.constant 1 : index
    %c2_299 = arith.constant 2 : index
    %c0_300 = arith.constant 0 : index
    %c0_301 = arith.constant 0 : index
    %415 = vector.load %arg25[%c1_298, %c2_299, %c0_300, %c0_301] : memref<2x3x32x32xf32, #tpu.memory_space<vmem>>, vector<1x1x32x32xf32>
    %416 = vector.shape_cast %415 : vector<1x1x32x32xf32> to vector<32x32xf32>
    %cst_302 = arith.constant dense<0.000000e+00> : vector<16x32xf32>
    %417 = tpu.matmul %414, %416, %cst_302 {dimension_numbers = #tpu.dot_dimension_numbers<[1], [0], [0], [1], [0, 0, 1, 1], [], []>, precision = #tpu.contract_precision<fp32>} : vector<16x32xf32>, vector<32x32xf32>, vector<16x32xf32> -> vector<16x32xf32>
    %418 = arith.addf %411, %417 : vector<16x32xf32>
    %419 = vector.broadcast %401 : vector<1x32xf32> to vector<16x32xf32>
    %420 = arith.addf %418, %419 : vector<16x32xf32>
    %cst_303 = arith.constant 0.000000e+00 : f32
    %421 = vector.broadcast %cst_303 : f32 to vector<16x32xf32>
    %422 = arith.maximumf %420, %421 : vector<16x32xf32>
    %423 = arith.addf %376, %422 : vector<16x32xf32>
    %c0_304 = arith.constant 0 : index
    %c0_305 = arith.constant 0 : index
    %424 = vector.load %arg28[%c0_304, %c0_305] : memref<1x3xf32, #tpu.memory_space<vmem>>, vector<1x3xf32>
    %c0_306 = arith.constant 0 : index
    %c0_307 = arith.constant 0 : index
    %c0_308 = arith.constant 0 : index
    %425 = vector.load %arg27[%c0_306, %c0_307, %c0_308] : memref<3x32x3xf32, #tpu.memory_space<vmem>>, vector<1x32x3xf32>
    %426 = vector.shape_cast %425 : vector<1x32x3xf32> to vector<32x3xf32>
    %cst_309 = arith.constant dense<0.000000e+00> : vector<16x3xf32>
    %427 = tpu.matmul %423, %426, %cst_309 {dimension_numbers = #tpu.dot_dimension_numbers<[1], [0], [0], [1], [0, 0, 1, 1], [], []>, precision = #tpu.contract_precision<fp32>} : vector<16x32xf32>, vector<32x3xf32>, vector<16x3xf32> -> vector<16x3xf32>
    %c1_310 = arith.constant 1 : index
    %c0_311 = arith.constant 0 : index
    %c0_312 = arith.constant 0 : index
    %428 = vector.load %arg1[%c1_310, %c0_311, %c0_312] : memref<3x16x16xf32, #tpu.memory_space<vmem>>, vector<1x16x16xf32>
    %429 = vector.shape_cast %428 : vector<1x16x16xf32> to vector<16x16xf32>
    %cst_313 = arith.constant dense<0.000000e+00> : vector<16x32xf32>
    %430 = tpu.matmul %429, %423, %cst_313 {dimension_numbers = #tpu.dot_dimension_numbers<[1], [0], [0], [1], [0, 0, 1, 1], [], []>, precision = #tpu.contract_precision<fp32>} : vector<16x16xf32>, vector<16x32xf32>, vector<16x32xf32> -> vector<16x32xf32>
    %c1_314 = arith.constant 1 : index
    %c0_315 = arith.constant 0 : index
    %c0_316 = arith.constant 0 : index
    %431 = vector.load %arg27[%c1_314, %c0_315, %c0_316] : memref<3x32x3xf32, #tpu.memory_space<vmem>>, vector<1x32x3xf32>
    %432 = vector.shape_cast %431 : vector<1x32x3xf32> to vector<32x3xf32>
    %cst_317 = arith.constant dense<0.000000e+00> : vector<16x3xf32>
    %433 = tpu.matmul %430, %432, %cst_317 {dimension_numbers = #tpu.dot_dimension_numbers<[1], [0], [0], [1], [0, 0, 1, 1], [], []>, precision = #tpu.contract_precision<fp32>} : vector<16x32xf32>, vector<32x3xf32>, vector<16x3xf32> -> vector<16x3xf32>
    %434 = arith.addf %427, %433 : vector<16x3xf32>
    %c2_318 = arith.constant 2 : index
    %c0_319 = arith.constant 0 : index
    %c0_320 = arith.constant 0 : index
    %435 = vector.load %arg1[%c2_318, %c0_319, %c0_320] : memref<3x16x16xf32, #tpu.memory_space<vmem>>, vector<1x16x16xf32>
    %436 = vector.shape_cast %435 : vector<1x16x16xf32> to vector<16x16xf32>
    %cst_321 = arith.constant dense<0.000000e+00> : vector<16x32xf32>
    %437 = tpu.matmul %436, %423, %cst_321 {dimension_numbers = #tpu.dot_dimension_numbers<[1], [0], [0], [1], [0, 0, 1, 1], [], []>, precision = #tpu.contract_precision<fp32>} : vector<16x16xf32>, vector<16x32xf32>, vector<16x32xf32> -> vector<16x32xf32>
    %c2_322 = arith.constant 2 : index
    %c0_323 = arith.constant 0 : index
    %c0_324 = arith.constant 0 : index
    %438 = vector.load %arg27[%c2_322, %c0_323, %c0_324] : memref<3x32x3xf32, #tpu.memory_space<vmem>>, vector<1x32x3xf32>
    %439 = vector.shape_cast %438 : vector<1x32x3xf32> to vector<32x3xf32>
    %cst_325 = arith.constant dense<0.000000e+00> : vector<16x3xf32>
    %440 = tpu.matmul %437, %439, %cst_325 {dimension_numbers = #tpu.dot_dimension_numbers<[1], [0], [0], [1], [0, 0, 1, 1], [], []>, precision = #tpu.contract_precision<fp32>} : vector<16x32xf32>, vector<32x3xf32>, vector<16x3xf32> -> vector<16x3xf32>
    %441 = arith.addf %434, %440 : vector<16x3xf32>
    %442 = vector.broadcast %424 : vector<1x3xf32> to vector<16x3xf32>
    %443 = arith.addf %441, %442 : vector<16x3xf32>
    %c0_326 = arith.constant 0 : index
    %c0_327 = arith.constant 0 : index
    %c0_328 = arith.constant 0 : index
    %444 = vector.load %arg29[%c0_326, %c0_327, %c0_328] : memref<1x16x3xf32, #tpu.memory_space<vmem>>, vector<1x16x3xf32>
    %445 = vector.shape_cast %444 : vector<1x16x3xf32> to vector<16x3xf32>
    %446 = vector.shape_cast %443 : vector<16x3xf32> to vector<1x16x3xf32>
    tpu.vector_store %arg29[%c0_326, %c0_327, %c0_328], %446 {strides = array<i32>} : memref<1x16x3xf32, #tpu.memory_space<vmem>>, vector<1x16x3xf32>,
    return
  }
  func.func @transform_0(%arg0: i32) -> (i32, i32, i32) {
    %c0_i32 = arith.constant 0 : i32
    %c0_i32_0 = arith.constant 0 : i32
    %c0_i32_1 = arith.constant 0 : i32
    %c0_i32_2 = arith.constant 0 : i32
    return %c0_i32, %c0_i32_0, %c0_i32_1 : i32, i32, i32
  }
  func.func @transform_1(%arg0: i32) -> (i32, i32, i32) {
    %c0_i32 = arith.constant 0 : i32
    %c0_i32_0 = arith.constant 0 : i32
    %c0_i32_1 = arith.constant 0 : i32
    return %arg0, %c0_i32, %c0_i32_0 : i32, i32, i32
  }
  func.func @transform_2(%arg0: i32) -> (i32, i32, i32) {
    %c0_i32 = arith.constant 0 : i32
    %c0_i32_0 = arith.constant 0 : i32
    %c0_i32_1 = arith.constant 0 : i32
    return %arg0, %c0_i32, %c0_i32_0 : i32, i32, i32
  }
  func.func @transform_3(%arg0: i32) -> (i32, i32, i32) {
    %c0_i32 = arith.constant 0 : i32
    %c0_i32_0 = arith.constant 0 : i32
    %c0_i32_1 = arith.constant 0 : i32
    %c0_i32_2 = arith.constant 0 : i32
    return %c0_i32, %c0_i32_0, %c0_i32_1 : i32, i32, i32
  }
  func.func @transform_4(%arg0: i32) -> (i32, i32) {
    %c0_i32 = arith.constant 0 : i32
    %c0_i32_0 = arith.constant 0 : i32
    %c0_i32_1 = arith.constant 0 : i32
    return %c0_i32, %c0_i32_0 : i32, i32
  }
  func.func @transform_5(%arg0: i32) -> (i32, i32, i32) {
    %c0_i32 = arith.constant 0 : i32
    %c0_i32_0 = arith.constant 0 : i32
    %c0_i32_1 = arith.constant 0 : i32
    %c0_i32_2 = arith.constant 0 : i32
    return %c0_i32, %c0_i32_0, %c0_i32_1 : i32, i32, i32
  }
  func.func @transform_6(%arg0: i32) -> (i32, i32, i32) {
    %c0_i32 = arith.constant 0 : i32
    %c0_i32_0 = arith.constant 0 : i32
    %c0_i32_1 = arith.constant 0 : i32
    %c0_i32_2 = arith.constant 0 : i32
    return %c0_i32, %c0_i32_0, %c0_i32_1 : i32, i32, i32
  }
  func.func @transform_7(%arg0: i32) -> (i32, i32, i32) {
    %c0_i32 = arith.constant 0 : i32
    %c0_i32_0 = arith.constant 0 : i32
    %c0_i32_1 = arith.constant 0 : i32
    %c0_i32_2 = arith.constant 0 : i32
    return %c0_i32, %c0_i32_0, %c0_i32_1 : i32, i32, i32
  }
  func.func @transform_8(%arg0: i32) -> (i32, i32, i32) {
    %c0_i32 = arith.constant 0 : i32
    %c0_i32_0 = arith.constant 0 : i32
    %c0_i32_1 = arith.constant 0 : i32
    %c0_i32_2 = arith.constant 0 : i32
    return %c0_i32, %c0_i32_0, %c0_i32_1 : i32, i32, i32
  }
  func.func @transform_9(%arg0: i32) -> (i32, i32, i32) {
    %c0_i32 = arith.constant 0 : i32
    %c0_i32_0 = arith.constant 0 : i32
    %c0_i32_1 = arith.constant 0 : i32
    %c0_i32_2 = arith.constant 0 : i32
    return %c0_i32, %c0_i32_0, %c0_i32_1 : i32, i32, i32
  }
  func.func @transform_10(%arg0: i32) -> (i32, i32, i32) {
    %c0_i32 = arith.constant 0 : i32
    %c0_i32_0 = arith.constant 0 : i32
    %c0_i32_1 = arith.constant 0 : i32
    %c0_i32_2 = arith.constant 0 : i32
    return %c0_i32, %c0_i32_0, %c0_i32_1 : i32, i32, i32
  }
  func.func @transform_11(%arg0: i32) -> (i32, i32, i32) {
    %c0_i32 = arith.constant 0 : i32
    %c0_i32_0 = arith.constant 0 : i32
    %c0_i32_1 = arith.constant 0 : i32
    %c0_i32_2 = arith.constant 0 : i32
    return %c0_i32, %c0_i32_0, %c0_i32_1 : i32, i32, i32
  }
  func.func @transform_12(%arg0: i32) -> (i32, i32, i32) {
    %c0_i32 = arith.constant 0 : i32
    %c0_i32_0 = arith.constant 0 : i32
    %c0_i32_1 = arith.constant 0 : i32
    %c0_i32_2 = arith.constant 0 : i32
    return %c0_i32, %c0_i32_0, %c0_i32_1 : i32, i32, i32
  }
  func.func @transform_13(%arg0: i32) -> (i32, i32, i32) {
    %c0_i32 = arith.constant 0 : i32
    %c0_i32_0 = arith.constant 0 : i32
    %c0_i32_1 = arith.constant 0 : i32
    %c0_i32_2 = arith.constant 0 : i32
    return %c0_i32, %c0_i32_0, %c0_i32_1 : i32, i32, i32
  }
  func.func @transform_14(%arg0: i32) -> (i32, i32, i32) {
    %c0_i32 = arith.constant 0 : i32
    %c0_i32_0 = arith.constant 0 : i32
    %c0_i32_1 = arith.constant 0 : i32
    %c0_i32_2 = arith.constant 0 : i32
    return %c0_i32, %c0_i32_0, %c0_i32_1 : i32, i32, i32
  }
  func.func @transform_15(%arg0: i32) -> (i32, i32, i32) {
    %c0_i32 = arith.constant 0 : i32
    %c0_i32_0 = arith.constant 0 : i32
    %c0_i32_1 = arith.constant 0 : i32
    %c0_i32_2 = arith.constant 0 : i32
    return %c0_i32, %c0_i32_0, %c0_i32_1 : i32, i32, i32
  }
  func.func @transform_16(%arg0: i32) -> (i32, i32, i32) {
    %c0_i32 = arith.constant 0 : i32
    %c0_i32_0 = arith.constant 0 : i32
    %c0_i32_1 = arith.constant 0 : i32
    %c0_i32_2 = arith.constant 0 : i32
    return %c0_i32, %c0_i32_0, %c0_i32_1 : i32, i32, i32
  }
  func.func @transform_17(%arg0: i32) -> (i32, i32, i32) {
    %c0_i32 = arith.constant 0 : i32
    %c0_i32_0 = arith.constant 0 : i32
    %c0_i32_1 = arith.constant 0 : i32
    %c0_i32_2 = arith.constant 0 : i32
    return %c0_i32, %c0_i32_0, %c0_i32_1 : i32, i32, i32
  }
  func.func @transform_18(%arg0: i32) -> (i32, i32, i32) {
    %c0_i32 = arith.constant 0 : i32
    %c0_i32_0 = arith.constant 0 : i32
    %c0_i32_1 = arith.constant 0 : i32
    %c0_i32_2 = arith.constant 0 : i32
    return %c0_i32, %c0_i32_0, %c0_i32_1 : i32, i32, i32
  }
  func.func @transform_19(%arg0: i32) -> (i32, i32, i32) {
    %c0_i32 = arith.constant 0 : i32
    %c0_i32_0 = arith.constant 0 : i32
    %c0_i32_1 = arith.constant 0 : i32
    %c0_i32_2 = arith.constant 0 : i32
    return %c0_i32, %c0_i32_0, %c0_i32_1 : i32, i32, i32
  }
  func.func @transform_20(%arg0: i32) -> (i32, i32, i32) {
    %c0_i32 = arith.constant 0 : i32
    %c0_i32_0 = arith.constant 0 : i32
    %c0_i32_1 = arith.constant 0 : i32
    %c0_i32_2 = arith.constant 0 : i32
    return %c0_i32, %c0_i32_0, %c0_i32_1 : i32, i32, i32
  }
  func.func @transform_21(%arg0: i32) -> (i32, i32, i32) {
    %c0_i32 = arith.constant 0 : i32
    %c0_i32_0 = arith.constant 0 : i32
    %c0_i32_1 = arith.constant 0 : i32
    %c0_i32_2 = arith.constant 0 : i32
    return %c0_i32, %c0_i32_0, %c0_i32_1 : i32, i32, i32
  }
  func.func @transform_22(%arg0: i32) -> (i32, i32, i32, i32) {
    %c0_i32 = arith.constant 0 : i32
    %c0_i32_0 = arith.constant 0 : i32
    %c0_i32_1 = arith.constant 0 : i32
    %c0_i32_2 = arith.constant 0 : i32
    %c0_i32_3 = arith.constant 0 : i32
    return %c0_i32, %c0_i32_0, %c0_i32_1, %c0_i32_2 : i32, i32, i32, i32
  }
  func.func @transform_23(%arg0: i32) -> (i32, i32, i32) {
    %c0_i32 = arith.constant 0 : i32
    %c0_i32_0 = arith.constant 0 : i32
    %c0_i32_1 = arith.constant 0 : i32
    %c0_i32_2 = arith.constant 0 : i32
    return %c0_i32, %c0_i32_0, %c0_i32_1 : i32, i32, i32
  }
  func.func @transform_24(%arg0: i32) -> (i32, i32, i32, i32) {
    %c0_i32 = arith.constant 0 : i32
    %c0_i32_0 = arith.constant 0 : i32
    %c0_i32_1 = arith.constant 0 : i32
    %c0_i32_2 = arith.constant 0 : i32
    %c0_i32_3 = arith.constant 0 : i32
    return %c0_i32, %c0_i32_0, %c0_i32_1, %c0_i32_2 : i32, i32, i32, i32
  }
  func.func @transform_25(%arg0: i32) -> (i32, i32, i32) {
    %c0_i32 = arith.constant 0 : i32
    %c0_i32_0 = arith.constant 0 : i32
    %c0_i32_1 = arith.constant 0 : i32
    %c0_i32_2 = arith.constant 0 : i32
    return %c0_i32, %c0_i32_0, %c0_i32_1 : i32, i32, i32
  }
  func.func @transform_26(%arg0: i32) -> (i32, i32, i32) {
    %c0_i32 = arith.constant 0 : i32
    %c0_i32_0 = arith.constant 0 : i32
    %c0_i32_1 = arith.constant 0 : i32
    %c0_i32_2 = arith.constant 0 : i32
    return %c0_i32, %c0_i32_0, %c0_i32_1 : i32, i32, i32
  }
  func.func @transform_27(%arg0: i32) -> (i32, i32) {
    %c0_i32 = arith.constant 0 : i32
    %c0_i32_0 = arith.constant 0 : i32
    %c0_i32_1 = arith.constant 0 : i32
    return %c0_i32, %c0_i32_0 : i32, i32
  }
  func.func @transform_28(%arg0: i32) -> (i32, i32, i32) {
    %c0_i32 = arith.constant 0 : i32
    %c0_i32_0 = arith.constant 0 : i32
    %c0_i32_1 = arith.constant 0 : i32
    return %arg0, %c0_i32, %c0_i32_0 : i32, i32, i32
  }
}

</mosaic_0001>

<bundles_post_ra>
// kernel: gcnpose_forward.1
= control target key start
LH: loop header
LB: loop body
LE: loop exit
PB: predicated region body
PF: predicated region fallthrough
CT: control target
= control target key end

     0   :  { %s48664_s0 = inlined_call_operand.vmem [shape: f32[3,16,16], index: 0, kind: input, shape index: {}]   ;;  %s48665_s1 = inlined_call_operand.vmem [shape: f32[2,16,2], index: 1, kind: input, shape index: {}]   ;;  %s48666_s2 = inlined_call_operand.vmem [shape: f32[2,1,16], index: 2, kind: input, shape index: {}]   ;;  %s48667_s3 = inlined_call_operand.vmem [shape: f32[3,2,32], index: 3, kind: input, shape index: {}]   ;;  %s48668_s4 = inlined_call_operand.vmem [shape: f32[1,32], index: 4, kind: input, shape index: {}]   ;;  %s48669_s5 = inlined_call_operand.vmem [shape: f32[2,1,32], index: 5, kind: input, shape index: {}]   ;;  %s48670_s6 = inlined_call_operand.vmem [shape: f32[2,1,32], index: 6, kind: input, shape index: {}]   ;;  %s48671_s7 = inlined_call_operand.vmem [shape: f32[2,32,32], index: 7, kind: input, shape index: {}]   ;;  %s48672_s8 = inlined_call_operand.hbm [shape: f32[2,1,32], index: 8, kind: input, shape index: {}]   ;;  %s48673_s9 = inlined_call_operand.vmem [shape: f32[2,32,32], index: 9, kind: input, shape index: {}]   ;;  %s48674_s10 = inlined_call_operand.hbm [shape: f32[2,1,32], index: 10, kind: input, shape index: {}]   ;;  %s48675_s11 = inlined_call_operand.vmem [shape: f32[2,32,32], index: 11, kind: input, shape index: {}]   ;;  %s48676_s12 = inlined_call_operand.hbm [shape: f32[2,1,32], index: 12, kind: input, shape index: {}]   ;;  %s48677_s13 = inlined_call_operand.vmem [shape: f32[2,32,32], index: 13, kind: input, shape index: {}]   ;;  %s48678_s14 = inlined_call_operand.hbm [shape: f32[2,1,32], index: 14, kind: input, shape index: {}]   ;;  %s48679_s15 = inlined_call_operand.vmem [shape: f32[2,1,32], index: 15, kind: input, shape index: {}]   ;;  %s48680_s16 = inlined_call_operand.vmem [shape: f32[2,1,32], index: 16, kind: input, shape index: {}]   ;;  %s48681_s17 = inlined_call_operand.vmem [shape: f32[2,16,16], index: 17, kind: input, shape index: {}]   ;;  %s48682_s18 = inlined_call_operand.hbm [shape: f32[2,32,64], index: 18, kind: input, shape index: {}]   ;;  %s48683_s19 = inlined_call_operand.hbm [shape: f32[2,1,64], index: 19, kind: input, shape index: {}]   ;;  %s48684_s20 = inlined_call_operand.vmem [shape: f32[2,64,32], index: 20, kind: input, shape index: {}]   ;;  %s48685_s21 = inlined_call_operand.vmem [shape: f32[2,1,32], index: 21, kind: input, shape index: {}]   ;;  %s48686_s22 = inlined_call_operand.vmem [shape: f32[2,3,32,32], index: 22, kind: input, shape index: {}]   ;;  %s48687_s23 = inlined_call_operand.hbm [shape: f32[2,1,32], index: 23, kind: input, shape index: {}]   ;;  %s48688_s24 = inlined_call_operand.vmem [shape: f32[2,3,32,32], index: 24, kind: input, shape index: {}]   ;;  %s48689_s25 = inlined_call_operand.hbm [shape: f32[2,1,32], index: 25, kind: input, shape index: {}]   ;;  %s48690_s26 = inlined_call_operand.vmem [shape: f32[3,32,3], index: 26, kind: input, shape index: {}]   ;;  %s48691_s27 = inlined_call_operand.hbm [shape: f32[1,3], index: 27, kind: input, shape index: {}]   ;;  %s48692_s28 = inlined_call_operand.vmem [shape: f32[2,16,3], index: 28, kind: output, shape index: {}]  }
   0x1   :  { %48723 = sst [smem:[#allocation22_spill]] %s48664_s0 }
   0x2   :  { %48724 = sst [smem:[#allocation23_spill]] %s48665_s1 }
   0x3   :  { %48725 = sst [smem:[#allocation24_spill]] %s48666_s2 }
   0x4   :  { %48726 = sst [smem:[#allocation25_spill]] %s48667_s3 }
   0x5   :  { %48727 = sst [smem:[#allocation26_spill]] %s48668_s4 }
   0x6   :  { %48728 = sst [smem:[#allocation27_spill]] %s48669_s5 }
   0x7   :  { %48729 = sst [smem:[#allocation28_spill]] %s48670_s6 }
   0x8   :  { %48730 = sst [smem:[#allocation29_spill]] %s48671_s7 }
   0x9   :  { %48731 = sst [smem:[#allocation30_spill]] %s48672_s8 }
   0xa   :  { %48732 = sst [smem:[#allocation31_spill]] %s48673_s9 }
   0xb   :  { %48733 = sst [smem:[#allocation32_spill]] %s48674_s10 }
   0xc   :  { %48734 = sst [smem:[#allocation33_spill]] %s48675_s11 }
   0xd   :  { %48735 = sst [smem:[#allocation34_spill]] %s48676_s12 }
   0xe   :  { %48736 = sst [smem:[#allocation35_spill]] %s48685_s21 }
   0xf   :  { %48737 = sst [smem:[#allocation36_spill]] %s48686_s22 }
  0x10   :  { %48738 = sst [smem:[#allocation37_spill]] %s48688_s24 }
  0x11   :  { %48739 = sst [smem:[#allocation38_spill]] %s48690_s26 }
  0x12   :  { %48740 = sst [smem:[#allocation39_spill]] %s48692_s28 }
  0x13   :  { %33 = vsyncpa [#allocation3], 0 }
  0x14   :  { %34 = vsyncpa [#allocation5], 0 }
  0x15   :  { %35 = vsyncpa [#allocation8], 0 }
  0x16   :  { %36 = vsyncpa [#allocation11], 0 }
  0x17   :  { %37 = vsyncpa [#allocation14], 0  ;;  %s46058_s8 = smov 0  }
  0x18 LB: > { %48741 = sst [smem:[#allocation21_spill]] %s45894_s8  ;;  %s46064_s5 = sadd.s32 4294967295, %s45894_s8   ;;  %s45894_s8 = sphi %s46058_s8, %s43_s8  }
  0x19   : > { %p37135_p0 = scmp.ge.s32.totalorder %s45894_s8, 1  ;;  %p672_p1 = scmp.lt.s32.totalorder %s45894_s8, 3 }
  0x1a   : > { %p48708_p2 = scmp.eq.s32.totalorder %s46064_s5, 0  ;;  %s45896_s30 = smov [#allocation4]  }
  0x1b   : > { %p46069_p3 = pnand %p37135_p0, %p672_p1  ;;  %s718_s3 = sshll.u32 %s45896_s30, 4  ;;  %s46073_s3 = int_to_ptr.vmem [resolvable:$true] %s718_s3 }
  0x1c   : > { %s45897_s6 = smov [#allocation7]   ;;  %s45898_s11 = smov [#allocation10]  }
  0x1d   : > { %s48742_s9 = scalar_select %p46069_p3, 1, 0 }
  0x1e   : > { %p45449_p4 = pneg %p46069_p3  ;;  %s750_s10 = sshll.u32 %s45897_s6, 4  ;;  %s46077_s10 = int_to_ptr.vmem [resolvable:$true] %s750_s10 }
  0x1f   : > { %s785_s29 = sshll.u32 %s45898_s11, 4  ;;  %s45899_s2 = smov [#allocation13]   ;;  %s46085_s29 = int_to_ptr.vmem [resolvable:$true] %s785_s29 }
  0x20   : > { %p46081_p5 = pnand %p48708_p2, %p45449_p4  ;;  %s46087_s7 = sshll.u32 %s45899_s2, 4  ;;  %s824_s7 = int_to_ptr.vmem [resolvable:$true] %s46087_s7 }
  0x21   : > { %s48744_s4 = sld [smem:[#allocation32_spill]] }
  0x22   : > { %p46097_p7 = pneg %p46081_p5 }
  0x27   : > { %s45616_s30 = scalar_lea.hbm %s48744_s4, 32 }
  0x28   : > { %p45617_p6 = scmp.ne.s32.totalorder %s48744_s4, %s45616_s30  ;;  %p45623_p10 = scmp.lt.u32.totalorder %s45616_s30, %s48744_s4 }
  0x2a   : > { %p45619_p8 = pnand %p46097_p7, %p45617_p6 }
  0x2c   : > { %p45620_p9 = pneg %p45619_p8 }
  0x2e   : > { %p45625_p11 = pnand %p45623_p10, %p45620_p9 }
  0x30   : > { %45628 = shalt.err (!%p45625_p11)
}
  0x31   : > { %s45629_s8 = scalar_lea.vmem %s46073_s3, 32  ;;  %p45637_p1 = scmp.lt.s32.totalorder %s46073_s3, %s46073_s3 }
  0x32   : > { %p45630_p12 = scmp.ne.s32.totalorder %s46073_s3, %s45629_s8  ;;  %p45638_p4 = scmp.lt.s32.totalorder %s45629_s8, %s45629_s8 }
  0x34   : > { %p45632_p13 = pnand %p45630_p12, %p46097_p7  ;;  %p45639_p6 = por %p45638_p4, %p45637_p1 }
  0x36   : > { %p45633_p0 = pneg %p45632_p13 }
  0x38   : > { %p45640_p8 = pnand %p45639_p6, %p45633_p0 }
  0x3a   : > { %45643 = shalt.err (!%p45640_p8)
}
  0x3b   : > { %s48711_s12 = smov 16   ;;  %s48712_s1 = smov 1  }
  0x3c   : > { %45455 = dma.hbm_to_vmem [thread:$0]  (!%p46081_p5), %s48744_s4, 32, %s46073_s3, [#allocation5], %s48711_s12, %s48711_s12, %s48712_s1  }
  0x3d   : > { %s45644_s8 = scalar_lea.hbm %s48678_s14, 32 }
  0x3e   : > { %p45645_p9 = scmp.ne.s32.totalorder %s48678_s14, %s45644_s8  ;;  %p45651_p12 = scmp.lt.u32.totalorder %s45644_s8, %s48678_s14 }
  0x40   : > { %p45647_p10 = pnand %p45645_p9, %p46097_p7 }
  0x42   : > { %p45648_p11 = pneg %p45647_p10 }
  0x44   : > { %p45653_p13 = pnand %p45651_p12, %p45648_p11 }
  0x46   : > { %45656 = shalt.err (!%p45653_p13)
}
  0x47   : > { %s45657_s3 = scalar_lea.vmem %s46077_s10, 32  ;;  %p45665_p6 = scmp.lt.s32.totalorder %s46077_s10, %s46077_s10 }
  0x48   : > { %p45658_p0 = scmp.ne.s32.totalorder %s46077_s10, %s45657_s3  ;;  %p45666_p8 = scmp.lt.s32.totalorder %s45657_s3, %s45657_s3 }
  0x4a   : > { %p45660_p1 = pnand %p45658_p0, %p46097_p7  ;;  %p45667_p9 = por %p45666_p8, %p45665_p6 }
  0x4c   : > { %p45661_p4 = pneg %p45660_p1 }
  0x4e   : > { %p45668_p10 = pnand %p45667_p9, %p45661_p4 }
  0x50   : > { %45671 = shalt.err (!%p45668_p10)
}
  0x51   : > { %45461 = dma.hbm_to_vmem [thread:$0]  (!%p46081_p5), %s48678_s14, 32, %s46077_s10, [#allocation8], %s48711_s12, %s48711_s12, %s48712_s1  }
  0x52   : > { %s45672_s30 = scalar_lea.hbm %s48683_s19, 32 }
  0x53   : > { %p45673_p11 = scmp.ne.s32.totalorder %s48683_s19, %s45672_s30  ;;  %p45679_p0 = scmp.lt.u32.totalorder %s45672_s30, %s48683_s19 }
  0x55   : > { %p45675_p12 = pnand %p45673_p11, %p46097_p7 }
  0x57   : > { %p45676_p13 = pneg %p45675_p12 }
  0x59   : > { %p45681_p1 = pnand %p45679_p0, %p45676_p13 }
  0x5b   : > { %45684 = shalt.err (!%p45681_p1)
}
  0x5c   : > { %s45685_s10 = scalar_lea.vmem %s46085_s29, 32  ;;  %p45693_p9 = scmp.lt.s32.totalorder %s46085_s29, %s46085_s29 }
  0x5d   : > { %p45686_p4 = scmp.ne.s32.totalorder %s46085_s29, %s45685_s10  ;;  %p45694_p10 = scmp.lt.s32.totalorder %s45685_s10, %s45685_s10 }
  0x5f   : > { %p45688_p6 = pnand %p45686_p4, %p46097_p7  ;;  %p45695_p11 = por %p45694_p10, %p45693_p9 }
  0x61   : > { %p45689_p8 = pneg %p45688_p6 }
  0x63   : > { %p45696_p12 = pnand %p45695_p11, %p45689_p8 }
  0x65   : > { %45699 = shalt.err (!%p45696_p12)
}
  0x66   : > { %45467 = dma.hbm_to_vmem [thread:$0]  (!%p46081_p5), %s48683_s19, 32, %s46085_s29, [#allocation11], %s48711_s12, %s48711_s12, %s48712_s1  }
  0x67   : > { %s45700_s26 = scalar_lea.hbm %s48689_s25, 32 }
  0x68   : > { %p45701_p13 = scmp.ne.s32.totalorder %s48689_s25, %s45700_s26  ;;  %p45707_p4 = scmp.lt.u32.totalorder %s45700_s26, %s48689_s25 }
  0x6a   : > { %p45703_p0 = pnand %p45701_p13, %p46097_p7 }
  0x6c   : > { %p45704_p1 = pneg %p45703_p0 }
  0x6e   : > { %p45709_p6 = pnand %p45707_p4, %p45704_p1 }
  0x70   : > { %45712 = shalt.err (!%p45709_p6)
}
  0x71   : > { %s45713_s8 = scalar_lea.vmem %s824_s7, 32  ;;  %p45721_p11 = scmp.lt.s32.totalorder %s824_s7, %s824_s7 }
  0x72   : > { %p45714_p8 = scmp.ne.s32.totalorder %s824_s7, %s45713_s8  ;;  %p45722_p12 = scmp.lt.s32.totalorder %s45713_s8, %s45713_s8 }
  0x74   : > { %p45716_p9 = pnand %p45714_p8, %p46097_p7  ;;  %p45723_p2 = por %p45722_p12, %p45721_p11 }
  0x76   : > { %p45717_p10 = pneg %p45716_p9 }
  0x78   : > { %p45724_p3 = pnand %p45723_p2, %p45717_p10 }
  0x7a   : > { %45727 = shalt.err (!%p45724_p3)
}
  0x7b   : > { %45473 = dma.hbm_to_vmem [thread:$0]  (!%p46081_p5), %s48689_s25, 32, %s824_s7, [#allocation14], %s48711_s12, %s48711_s12, %s48712_s1  }
  0x7c   : > { %s45902_s3 = smov [#allocation2]   ;;  %s45903_s22 = smov [#allocation6]  }
  0x7d   : > { %s702_s21 = sshll.u32 %s45902_s3, 4  ;;  %s734_s24 = sshll.u32 %s45903_s22, 4  ;;  %s703_s21 = int_to_ptr.vmem [resolvable:$true] %s702_s21  ;;  %s735_s24 = int_to_ptr.vmem [resolvable:$true] %s734_s24 }
  0x7e   : > { %s48746_s6 = sld [smem:[#allocation30_spill]] }
  0x84   : > { %s45728_s11 = scalar_lea.hbm %s48746_s6, 32 }
  0x85   : > { %p45729_p2 = scmp.ne.s32.totalorder %s48746_s6, %s45728_s11  ;;  %p45735_p0 = scmp.lt.u32.totalorder %s45728_s11, %s48746_s6 }
  0x87   : > { %p45731_p3 = pnand %p45729_p2, %p46097_p7 }
  0x89   : > { %p45732_p13 = pneg %p45731_p3 }
  0x8b   : > { %p45737_p1 = pnand %p45735_p0, %p45732_p13 }
  0x8d   : > { %45740 = shalt.err (!%p45737_p1)
}
  0x8e   : > { %s45741_s7 = scalar_lea.vmem %s703_s21, 32  ;;  %p45749_p9 = scmp.lt.s32.totalorder %s703_s21, %s703_s21 }
  0x8f   : > { %p45742_p4 = scmp.ne.s32.totalorder %s703_s21, %s45741_s7  ;;  %p45750_p10 = scmp.lt.s32.totalorder %s45741_s7, %s45741_s7 }
  0x91   : > { %p45744_p6 = pnand %p45742_p4, %p46097_p7  ;;  %p45751_p11 = por %p45750_p10, %p45749_p9 }
  0x93   : > { %p45745_p8 = pneg %p45744_p6 }
  0x95   : > { %p45752_p12 = pnand %p45751_p11, %p45745_p8 }
  0x97   : > { %45755 = shalt.err (!%p45752_p12)
}
  0x98   : > { %45452 = dma.hbm_to_vmem [thread:$0]  (!%p46081_p5), %s48746_s6, 32, %s703_s21, [#allocation3], %s48711_s12, %s48711_s12, %s48712_s1  }
  0x99   : > { %s48747_s26 = sld [smem:[#allocation34_spill]] }
  0x9f   : > { %s45756_s30 = scalar_lea.hbm %s48747_s26, 32 }
  0xa0   : > { %p45757_p2 = scmp.ne.s32.totalorder %s48747_s26, %s45756_s30  ;;  %p45763_p0 = scmp.lt.u32.totalorder %s45756_s30, %s48747_s26 }
  0xa2   : > { %p45759_p3 = pnand %p45757_p2, %p46097_p7 }
  0xa4   : > { %p45760_p13 = pneg %p45759_p3 }
  0xa6   : > { %p45765_p1 = pnand %p45763_p0, %p45760_p13 }
  0xa8   : > { %45768 = shalt.err (!%p45765_p1)
}
  0xa9   : > { %s45769_s7 = scalar_lea.vmem %s735_s24, 32  ;;  %p45777_p9 = scmp.lt.s32.totalorder %s735_s24, %s735_s24 }
  0xaa   : > { %p45770_p4 = scmp.ne.s32.totalorder %s735_s24, %s45769_s7  ;;  %p45778_p10 = scmp.lt.s32.totalorder %s45769_s7, %s45769_s7 }
  0xac   : > { %p45772_p6 = pnand %p45770_p4, %p46097_p7  ;;  %p45779_p11 = por %p45778_p10, %p45777_p9 }
  0xae   : > { %p45773_p8 = pneg %p45772_p6 }
  0xb0   : > { %p45780_p12 = pnand %p45779_p11, %p45773_p8 }
  0xb2   : > { %45783 = shalt.err (!%p45780_p12)
}
  0xb3   : > { %45458 = dma.hbm_to_vmem [thread:$0]  (!%p46081_p5), %s48747_s26, 32, %s735_s24, [#allocation5], %s48711_s12, %s48711_s12, %s48712_s1  }
  0xb4   : > { %s45904_s10 = smov [#allocation9]   ;;  %s45784_s11 = scalar_lea.hbm %s48682_s18, 1024 }
  0xb5   : > { %s772_s3 = sshll.u32 %s45904_s10, 4  ;;  %p45785_p2 = scmp.ne.s32.totalorder %s48682_s18, %s45784_s11  ;;  %s773_s3 = int_to_ptr.vmem [resolvable:$true] %s772_s3 }
  0xb6   : > { %p45791_p0 = scmp.lt.u32.totalorder %s45784_s11, %s48682_s18 }
  0xb7   : > { %p45787_p3 = pnand %p45785_p2, %p46097_p7 }
  0xb9   : > { %p45788_p13 = pneg %p45787_p3 }
  0xbb   : > { %p45793_p1 = pnand %p45791_p0, %p45788_p13 }
  0xbd   : > { %45796 = shalt.err (!%p45793_p1)
}
  0xbe   : > { %s45797_s24 = scalar_lea.vmem %s773_s3, 1024  ;;  %p45805_p9 = scmp.lt.s32.totalorder %s773_s3, %s773_s3 }
  0xbf   : > { %p45798_p4 = scmp.ne.s32.totalorder %s773_s3, %s45797_s24  ;;  %p45806_p10 = scmp.lt.s32.totalorder %s45797_s24, %s45797_s24 }
  0xc1   : > { %p45800_p6 = pnand %p45798_p4, %p46097_p7  ;;  %p45807_p11 = por %p45806_p10, %p45805_p9 }
  0xc3   : > { %p45801_p8 = pneg %p45800_p6 }
  0xc5   : > { %p45808_p12 = pnand %p45807_p11, %p45801_p8 }
  0xc7   : > { %45811 = shalt.err (!%p45808_p12)
}
  0xc8   : > { %s45905_s21 = smov 128   ;;  %s45906_s4 = smov 8  }
  0xc9   : > { %45464 = dma.hbm_to_vmem [thread:$0]  (!%p46081_p5), %s48682_s18, 1024, %s773_s3, [#allocation8], %s45905_s21, %s45905_s21, %s45906_s4  }
  0xca   : > { %s45907_s30 = smov [#allocation12]   ;;  %s45908_s2 = smov [#allocation15]  }
  0xcb   : > { %s807_s11 = sshll.u32 %s45907_s30, 4  ;;  %s840_s8 = sshll.u32 %s45908_s2, 4  ;;  %s808_s11 = int_to_ptr.vmem [resolvable:$true] %s807_s11  ;;  %s46255_s8 = int_to_ptr.vmem [resolvable:$true] %s840_s8 }
  0xcc   : > { %s45812_s24 = scalar_lea.hbm %s48687_s23, 32 }
  0xcd   : > { %p45813_p2 = scmp.ne.s32.totalorder %s48687_s23, %s45812_s24  ;;  %p45819_p0 = scmp.lt.u32.totalorder %s45812_s24, %s48687_s23 }
  0xcf   : > { %p45815_p3 = pnand %p45813_p2, %p46097_p7 }
  0xd1   : > { %p45816_p13 = pneg %p45815_p3 }
  0xd3   : > { %p45821_p1 = pnand %p45819_p0, %p45816_p13 }
  0xd5   : > { %45824 = shalt.err (!%p45821_p1)
}
  0xd6   : > { %s45825_s21 = scalar_lea.vmem %s808_s11, 32  ;;  %p45833_p9 = scmp.lt.s32.totalorder %s808_s11, %s808_s11 }
  0xd7   : > { %p45826_p4 = scmp.ne.s32.totalorder %s808_s11, %s45825_s21  ;;  %p45834_p10 = scmp.lt.s32.totalorder %s45825_s21, %s45825_s21 }
  0xd9   : > { %p45828_p6 = pnand %p45826_p4, %p46097_p7  ;;  %p45835_p11 = por %p45834_p10, %p45833_p9 }
  0xdb   : > { %p45829_p8 = pneg %p45828_p6 }
  0xdd   : > { %p45836_p12 = pnand %p45835_p11, %p45829_p8 }
  0xdf   : > { %45839 = shalt.err (!%p45836_p12)
}
  0xe0   : > { %s48748_s12 = smov 1   ;;  %s48749_s1 = smov 16  }
  0xe1   : > { %45470 = dma.hbm_to_vmem [thread:$0]  (!%p46081_p5), %s48687_s23, 32, %s808_s11, [#allocation11], %s48749_s1, %s48749_s1, %s48748_s12  }
  0xe2   : > { %s45840_s29 = scalar_lea.hbm %s48691_s27, 16 }
  0xe3   : > { %p45841_p2 = scmp.ne.s32.totalorder %s48691_s27, %s45840_s29  ;;  %p45847_p0 = scmp.lt.u32.totalorder %s45840_s29, %s48691_s27 }
  0xe5   : > { %p45843_p3 = pnand %p45841_p2, %p46097_p7 }
  0xe7   : > { %p45844_p13 = pneg %p45843_p3 }
  0xe9   : > { %p45849_p1 = pnand %p45847_p0, %p45844_p13 }
  0xeb   : > { %45852 = shalt.err (!%p45849_p1)
}
  0xec   : > { %s45853_s11 = scalar_lea.vmem %s46255_s8, 16  ;;  %s45860_s21 = scalar_lea.vmem %s46255_s8, 32 }
  0xed   : > { %p45854_p4 = scmp.ne.s32.totalorder %s46255_s8, %s45853_s11  ;;  %p45861_p9 = scmp.lt.s32.totalorder %s46255_s8, %s46255_s8 }
  0xee   : > { %p45862_p10 = scmp.lt.s32.totalorder %s45860_s21, %s45853_s11 }
  0xef   : > { %p45856_p6 = pnand %p45854_p4, %p46097_p7 }
  0xf0   : > { %p45863_p11 = por %p45862_p10, %p45861_p9 }
  0xf1   : > { %p45857_p8 = pneg %p45856_p6 }
  0xf3   : > { %p45864_p12 = pnand %p45863_p11, %p45857_p8 }
  0xf5   : > { %45867 = shalt.err (!%p45864_p12)
}
  0xf6   : > { %45476 = dma.hbm_to_vmem [thread:$0]  (!%p46081_p5), %s48691_s27, 16, %s46255_s8, [#allocation14]  }
  0xf7   : > { %p48750_p2 = scmp.ne.s32.totalorder %s48742_s9, 0 }
  0xf8   : > { %p48751_p7 = scmp.eq.s32.totalorder (!%p48750_p2), %s46064_s5, 0 }
  0xf9   : > { %867 = sbr.rel (%p48750_p2) target bundleno = 11031 (0x2b17), region = 132 }
 0x100   : > { %45873 = dma.done.wait (%p48751_p7), [#allocation3], 32   ;;  %p48752_p3 = pmov %p48751_p7 }
 0x102   : > { %45875 = vsyncadd (%p48752_p3), [#allocation3], 4294967264  ;;  %p48753_p13 = pmov %p48752_p3 }
 0x103   : > { %p48754_p0 = pmov %p48752_p3 }
 0x104   : > { %45877 = dma.done.wait (%p48753_p13), [#allocation5], 64  }
 0x105   : > { %45879 = vsyncadd (%p48754_p0), [#allocation5], 4294967232  ;;  %p48755_p1 = pmov %p48754_p0 }
 0x106   : > { %p48756_p5 = pmov %p48754_p0 }
 0x107   : > { %45881 = dma.done.wait (%p48755_p1), [#allocation8], 1056  }
 0x108   : > { %45883 = vsyncadd (%p48756_p5), [#allocation8], 4294966240  ;;  %p48757_p4 = pmov %p48754_p0 }
 0x109   : > { %p48758_p6 = pmov %p48754_p0 }
 0x10a   : > { %45885 = dma.done.wait (%p48757_p4), [#allocation11], 64  }
 0x10b   : > { %45887 = vsyncadd (%p48758_p6), [#allocation11], 4294967232  ;;  %p48759_p8 = pmov %p48754_p0 }
 0x10c   : > { %p48760_p9 = pmov %p48754_p0 }
 0x10d   : > { %45889 = dma.done.wait (%p48759_p8), [#allocation14], 48  }
 0x10e   : > { %45891 = vsyncadd (%p48760_p9), [#allocation14], 4294967248  ;;  %p976_p10 = scmp.lt.s32.totalorder %s46064_s5, 1  ;;  %s48761_s8 = sld [smem:[#allocation23_spill]]  ;;  %vm997_vm0 = vcmask 130048   ;;  %vm1515_vm1 = vcmask 1041408  }
 0x10f   : > { %s48762_s2 = sld [smem:[#allocation22_spill]]  ;;  %s48763_s3 = sld [smem:[#allocation25_spill]]  ;;  %vm1508_vm2 = vcmask 15360   ;;  %vm3529_vm3 = vcmask 261120   ;;  %vm5214_vm8 = vcmask 64512   ;;  %vm13075_vm15 = vcmask 523264  }
 0x110   : > { %s48782_s5 = smov (!%p976_p10, %s46064_s5), 1  ;;  %s48764_s29 = sld [smem:[#allocation26_spill]] }
 0x111   : > { %s48713_s28 = sshll.u32 %s48782_s5, 4  ;;  %s48765_s10 = sld [smem:[#allocation31_spill]] }
 0x112   : > { %s48766_s22 = sld [smem:[#allocation29_spill]]  ;;  %s48767_s9 = sld [smem:[#allocation27_spill]] }
 0x113   : > { %s48769_s7 = sld [smem:[#allocation33_spill]]  ;;  %s48716_s30 = smov 112  }
 0x114   : > { %s980_s4 = scalar_lea.vmem %s48761_s8, %s48713_s28  ;;  %s48718_s8 = smov 120  }
 0x115   : > { %v46334_v0 = vld [vmem:[%s980_s4] sm:$0xff]  ;;  %v46336_v1 = vld [vmem:[%s980_s4 + $0x8] sm:$0xff]  ;;  %v37160_v2 = vld [vmem:[%s48762_s2 + $0x10] sm:$0xff]  ;;  %s48768_s4 = sld [smem:[#allocation28_spill]]  ;;  %s48770_s21 = sld [smem:[#allocation24_spill]] }
 0x116   : > { %v1005_v3 = vand.u32 4294901760, %v46334_v0  ;;  %v1008_v4 = vand.u32 4294901760, %v46336_v1  ;;  %v999_v5 = vsel %vm997_vm0, %v37160_v2, 0  ;;  %v37161_v6 = vld [vmem:[%s48762_s2 + $0x18] sm:$0xff]  ;;  %v37162_v30 = vld [vmem:[%s48763_s3 + $0x2] sm:$0x3] }
 0x117   : > { %v46347_v7 = vand.u32 4294901760, %v999_v5  ;;  %v1002_v8 = vsel %vm997_vm0, %v37161_v6, 0  ;;  %v1517_v31 = vsel %vm1515_vm1, %v37162_v30, 0  ;;  %v37163_v37 = vld [vmem:[%s48762_s2 + $0x20] sm:$0xff]  ;;  %v37164_v38 = vld [vmem:[%s48762_s2 + $0x28] sm:$0xff]  ;;  %v2009_v6 = vsel %vm1508_vm2, %v46334_v0, 0 }
 0x118   : > { %v46350_v9 = vpack.c.bf16 %v1008_v4, %v1005_v3  ;;  %v46352_v10 = vand.u32 4294901760, %v1002_v8  ;;  %v1093_v11 = vsub.f32 %v46334_v0, %v1005_v3  ;;  %v1100_v12 = vsub.f32 %v46336_v1, %v1008_v4  ;;  %v993_v3 = vld [vmem:[%s48763_s3] sm:$0x3]  ;;  %v37165_v0 = vld [vmem:[%s48763_s3 + $0x4] sm:$0x3]  ;;  %s48771_s1 = sld [smem:[#allocation35_spill]] }
 0x119   : > { %v46357_v13 = vsub.f32 %v999_v5, %v46347_v7  ;;  %v46410_v32 = vand.u32 4294901760, %v1517_v31  ;;  %v2510_v39 = vsel %vm997_vm0, %v37163_v37, 0  ;;  %v2513_v40 = vsel %vm997_vm0, %v37164_v38, 0  ;;  %s48772_s11 = sld [smem:[#allocation36_spill]]  ;;  %s48773_s0 = sld [smem:[#allocation37_spill]] }
 0x11a   : > { %42610 = vmatprep.subr.bf16.mxu0 %v46350_v9  ;;  %v46361_v14 = vsub.f32 %v1002_v8, %v46352_v10  ;;  %v1094_v15 = vand.u32 4294901760, %v1093_v11  ;;  %v1101_v16 = vand.u32 4294901760, %v1100_v12  ;;  %v46380_v28 = vpack.c.bf16 %v1100_v12, %v1093_v11  ;;  %s48774_s28 = smov 120   ;;  %s48776_s2 = smov 104  }
 0x11b   : > { %42612 = vmatpush3.bf16.msra.mxu0 %v46350_v9  ;;  %v46365_v17 = vand.u32 4294901760, %v46357_v13  ;;  %v1607_v33 = vsub.f32 %v1517_v31, %v46410_v32  ;;  %v46424_v41 = vand.u32 4294901760, %v2510_v39  ;;  %v46426_v42 = vand.u32 4294901760, %v2513_v40  ;;  %s983_s12 = scalar_lea.vmem %s48770_s21, %s48782_s5  ;;  %s48779_s24 = sld [smem:[#allocation39_spill]] }
 0x11c   : > { %v46368_v18 = vand.u32 4294901760, %v46361_v14  ;;  %v1095_v19 = vsub.f32 %v1093_v11, %v1094_v15  ;;  %v1102_v20 = vsub.f32 %v1100_v12, %v1101_v16  ;;  %v46392_v29 = vpack.c.bf16 %v1101_v16, %v1094_v15 }
 0x11d   : > { %v1074_v21 = vsub.f32 %v46357_v13, %v46365_v17  ;;  %v1608_v34 = vand.u32 4294901760, %v1607_v33  ;;  %v46429_v44 = vsub.f32 %v2510_v39, %v46424_v41  ;;  %v46434_v49 = vsub.f32 %v2513_v40, %v46426_v42 }
 0x11e   : > { %v1084_v22 = vsub.f32 %v46361_v14, %v46368_v18  ;;  %v1096_v23 = vand.u32 4294901760, %v1095_v19  ;;  %v1103_v24 = vand.u32 4294901760, %v1102_v20  ;;  %v2015_v4 = vsel %vm1515_vm1, %v993_v3, 0 }
 0x11f   : > { %v46374_v25 = vand.u32 4294901760, %v1074_v21  ;;  %v1609_v35 = vsub.f32 %v1607_v33, %v1608_v34  ;;  %v46437_v52 = vand.u32 4294901760, %v46429_v44  ;;  %v46440_v55 = vand.u32 4294901760, %v46434_v49 }
 0x120   : > { %v46376_v26 = vand.u32 4294901760, %v1084_v22  ;;  %v46378_v27 = vpack.c.bf16 %v1103_v24, %v1096_v23  ;;  %v2018_v5 = vand.u32 4294901760, %v2015_v4  ;;  %v2083_v8 = vand.u32 4294901760, %v2009_v6 }
 0x121   : > { %39193 = vmatprep.mubr.f32.mxu0 %v46374_v25  ;;  %v1610_v36 = vand.u32 4294901760, %v1609_v35  ;;  %v2585_v58 = vsub.f32 %v46429_v44, %v46437_v52  ;;  %v2595_v60 = vsub.f32 %v46434_v49, %v46440_v55  ;;  %v2012_v11 = vsel %vm1508_vm2, %v46336_v1, 0 }
 0x122   : > { %39194 = vmatmul.mubr.f32.vlgmr.msra.gmra.mrb[0].mxu0 %v46376_v26  ;;  %42614 = vmatprep.subr.bf16.mxu0 %v46378_v27  ;;  %v2093_v12 = vand.u32 4294901760, %v2012_v11  ;;  %v2084_v15 = vsub.f32 %v2009_v6, %v2083_v8  ;;  %v2105_v16 = vsub.f32 %v2015_v4, %v2018_v5  ;;  %v3026_v1 = vsel %vm1515_vm1, %v37165_v0, 0  ;;  %v4134_v0 = vld [vmem:[%s48765_s10 + $0x10] sm:$0xff] }
 0x123   : > { %42616 = vmatpush3.bf16.msra.mxu0 %v46378_v27  ;;  %39200 = vmatprep.mubr.f32.mxu0 %v46347_v7  ;;  %v46447_v63 = vand.u32 4294901760, %v2585_v58  ;;  %v46449_v2 = vand.u32 4294901760, %v2595_v60  ;;  %v3029_v30 = vand.u32 4294901760, %v3026_v1  ;;  %v37166_v58 = vld [vmem:[%s48764_s29] ss:$0 sm:$0xff]  ;;  %s48714_s29 = smov 104  }
 0x124   : > { %42618 = vmatprep.subr.bf16.mxu0 %v46380_v28  ;;  %39236 = vmatprep.subr.mxu1 %v1610_v36  ;;  %v2094_v19 = vsub.f32 %v2012_v11, %v2093_v12  ;;  %v2085_v20 = vand.u32 4294901760, %v2084_v15  ;;  %v2106_v21 = vand.u32 4294901760, %v2105_v16 }
 0x125   : > { %39237 = vmatpush3.msra.mxu1 %v1610_v36  ;;  %v3116_v31 = vsub.f32 %v3026_v1, %v3029_v30  ;;  %v4135_v1 = vld [vmem:[%s48765_s10 + $0x18] sm:$0xff] }
 0x126   : > { %39241 = vmatprep.subr.mxu1 %v1607_v33  ;;  %v2095_v22 = vand.u32 4294901760, %v2094_v19  ;;  %v2086_v23 = vsub.f32 %v2084_v15, %v2085_v20 }
 0x128   : > { %v2096_v24 = vsub.f32 %v2094_v19, %v2095_v22 }
 0x12a   : > { %39201 = vmatmul.mubr.f32.vlgmr.msra.gmra.mrb[0].mxu0 %v46352_v10 }
 0x12b   : > { %42620 = vmatpush3.bf16.msra.mxu0 %v46380_v28  ;;  %39207 = vmatprep.mubr.f32.mxu0 %v46357_v13 }
 0x12c   : > { %42622 = vmatprep.subr.bf16.mxu0 %v46350_v9 }
 0x132   : > { %39208 = vmatmul.mubr.f32.vlgmr.msra.gmra.mrb[0].mxu0 %v46361_v14 }
 0x133   : > { %42624 = vmatpush3.bf16.msra.mxu0 %v46350_v9  ;;  %39214 = vmatprep.mubr.f32.mxu0 %v46365_v17 }
 0x134   : > { %42626 = vmatprep.subr.bf16.mxu0 %v46392_v29 }
 0x13a   : > { %39215 = vmatmul.mubr.f32.vlgmr.msra.gmra.mrb[0].mxu0 %v46368_v18 }
 0x13b   : > { %42628 = vmatpush3.bf16.msra.mxu0 %v46392_v29  ;;  %39221 = vmatprep.mubr.f32.mxu0 %v46347_v7 }
 0x13c   : > { %42630 = vmatprep.subr.bf16.mxu0 %v46350_v9 }
 0x142   : > { %39222 = vmatmul.mubr.f32.vlgmr.msra.gmra.mrb[0].mxu0 %v46352_v10 }
 0x143   : > { %42632 = vmatpush3.bf16.msra.mxu0 %v46350_v9  ;;  %39228 = vmatprep.mubr.f32.mxu0 %v46347_v7 }
 0x144   : > { %39231 = vmatprep.subr.mxu0 %v46410_v32 }
 0x14a   : > { %39229 = vmatmul.mubr.f32.vlgmr.msra.gmra.mrb[0].mxu0 %v46352_v10 }
 0x14b   : > { %39232 = vmatpush3.msra.mxu0 %v46410_v32 }
 0x14c   : > { %42634 = vmatprep.subr.bf16.mxu0 %v46350_v9 }
 0x21d   : > { %v39230_v43 = vpop.f32.mrb[0].mxu0 }
 0x21e   : > { %v1513_v45 = vsel %vm1508_vm2, %v39230_v43, 0  ;;  %v1496_v46 = vpop.f32.mrb[1].mxu0 }
 0x21f   : > { %v1595_v47 = vand.u32 4294901760, %v1513_v45  ;;  %v1510_v48 = vsel %vm1508_vm2, %v1496_v46, 0 }
 0x220   : > { %v1585_v50 = vand.u32 4294901760, %v1510_v48 }
 0x221   : > { %v1596_v51 = vsub.f32 %v1513_v45, %v1595_v47 }
 0x222   : > { %v1586_v53 = vsub.f32 %v1510_v48, %v1585_v50  ;;  %39238 = vmatprep.mubr.f32.mxu1 %v1585_v50 }
 0x223   : > { %v1597_v54 = vand.u32 4294901760, %v1596_v51  ;;  %39239 = vmatmul.mubr.f32.vlgmr.msra.gmra.mrb[0].mxu1 %v1595_v47 }
 0x224   : > { %v1587_v56 = vand.u32 4294901760, %v1586_v53  ;;  %39243 = vmatprep.mubr.f32.mxu1 %v1586_v53  ;;  %39242 = vmatpush3.msra.mxu1 %v1607_v33 }
 0x225   : > { %v1598_v57 = vsub.f32 %v1596_v51, %v1597_v54  ;;  %39246 = vmatprep.subr.mxu1 %v46410_v32 }
 0x226   : > { %v1588_v59 = vsub.f32 %v1586_v53, %v1587_v56 }
 0x227   : > { %v1599_v62 = vand.u32 4294901760, %v1598_v57 }
 0x228   : > { %v1589_v61 = vand.u32 4294901760, %v1588_v59 }
 0x22a   : > { %39233 = vmatprep.mubr.f32.mxu0 %v1589_v61 }
 0x22b   : > { %39234 = vmatmul.mubr.f32.vlgmr.msra.gmra.mrb[2].mxu0 %v1599_v62  ;;  %39244 = vmatmul.mubr.f32.vlgmr.msra.gmra.mrb[0].mxu1 %v1596_v51 }
 0x22c   : > { %39248 = vmatprep.mubr.f32.mxu1 %v1587_v56  ;;  %42636 = vmatpush3.bf16.msra.mxu0 %v46350_v9 }
 0x22d   : > { %39295 = vmatprep.mubr.f32.mxu0 %v46447_v63  ;;  %39247 = vmatpush3.msra.mxu1 %v46410_v32 }
 0x22e   : > { %42638 = vmatprep.subr.bf16.mxu0 %v46378_v27  ;;  %39251 = vmatprep.subr.mxu1 %v1608_v34 }
 0x22f   : > { %39296 = vmatmul.mubr.f32.vlgmr.msra.gmra.mrb[4].mxu0 %v46449_v2 }
 0x230   : > { %42640 = vmatpush3.bf16.msra.mxu0 %v46378_v27  ;;  %39302 = vmatprep.mubr.f32.mxu0 %v46424_v41  ;;  %v2087_v27 = vand.u32 4294901760, %v2086_v23  ;;  %v4132_v23 = vld [vmem:[%s48765_s10] sm:$0xff] }
 0x231   : > { %42642 = vmatprep.subr.bf16.mxu0 %v46380_v28 }
 0x233   : > { %39249 = vmatmul.mubr.f32.vlgmr.msra.gmra.mrb[0].mxu1 %v1597_v54 }
 0x234   : > { %39253 = vmatprep.mubr.f32.mxu1 %v1585_v50  ;;  %39252 = vmatpush3.msra.mxu1 %v1608_v34 }
 0x235   : > { %39256 = vmatprep.subr.mxu1 %v46410_v32 }
 0x237   : > { %39303 = vmatmul.mubr.f32.vlgmr.msra.gmra.mrb[4].mxu0 %v46426_v42 }
 0x238   : > { %42644 = vmatpush3.bf16.msra.mxu0 %v46380_v28  ;;  %39309 = vmatprep.mubr.f32.mxu0 %v46429_v44 }
 0x239   : > { %42646 = vmatprep.subr.bf16.mxu0 %v46350_v9 }
 0x23b   : > { %39254 = vmatmul.mubr.f32.vlgmr.msra.gmra.mrb[0].mxu1 %v1595_v47 }
 0x23c   : > { %39258 = vmatprep.mubr.f32.mxu1 %v1585_v50  ;;  %39257 = vmatpush3.msra.mxu1 %v46410_v32  ;;  %v3117_v32 = vand.u32 4294901760, %v3116_v31 }
 0x23d   : > { %39261 = vmatprep.subr.mxu1 %v2018_v5 }
 0x23e   : > { %v3118_v33 = vsub.f32 %v3116_v31, %v3117_v32 }
 0x23f   : > { %39310 = vmatmul.mubr.f32.vlgmr.msra.gmra.mrb[4].mxu0 %v46434_v49 }
 0x240   : > { %42648 = vmatpush3.bf16.msra.mxu0 %v46350_v9  ;;  %39316 = vmatprep.mubr.f32.mxu0 %v46437_v52  ;;  %v3119_v34 = vand.u32 4294901760, %v3118_v33  ;;  %v4153_v33 = vand.u32 4294901760, %v4135_v1 }
 0x241   : > { %42650 = vmatprep.subr.bf16.mxu0 %v46392_v29 }
 0x243   : > { %39259 = vmatmul.mubr.f32.vlgmr.msra.gmra.mrb[0].mxu1 %v1595_v47 }
 0x244   : > { %39262 = vmatpush3.msra.mxu1 %v2018_v5  ;;  %39263 = vmatprep.mubr.f32.mxu1 %v2087_v27 }
 0x247   : > { %39317 = vmatmul.mubr.f32.vlgmr.msra.gmra.mrb[4].mxu0 %v46440_v55 }
 0x248   : > { %42652 = vmatpush3.bf16.msra.mxu0 %v46392_v29  ;;  %39323 = vmatprep.mubr.f32.mxu0 %v46424_v41  ;;  %v2097_v29 = vand.u32 4294901760, %v2096_v24  ;;  %v4144_v24 = vand.u32 4294901760, %v4132_v23 }
 0x249   : > { %42654 = vmatprep.subr.bf16.mxu0 %v46350_v9 }
 0x24b   : > { %39264 = vmatmul.mubr.f32.vlgmr.msra.gmra.mrb[0].mxu1 %v2097_v29 }
 0x24c   : > { %39268 = vmatprep.mubr.f32.mxu1 %v2083_v8 }
 0x24f   : > { %39324 = vmatmul.mubr.f32.vlgmr.msra.gmra.mrb[4].mxu0 %v46426_v42 }
 0x250   : > { %42656 = vmatpush3.bf16.msra.mxu0 %v46350_v9  ;;  %39330 = vmatprep.mubr.f32.mxu0 %v46424_v41  ;;  %v2107_v9 = vsub.f32 %v2105_v16, %v2106_v21 }
 0x252   : > { %v2108_v28 = vand.u32 4294901760, %v2107_v9  ;;  %v4133_v9 = vld [vmem:[%s48765_s10 + $0x8] sm:$0xff] }
 0x253   : > { %v4147_v27 = vand.u32 4294901760, %v4133_v9 }
 0x254   : > { %39266 = vmatprep.subr.mxu1 %v2108_v28 }
 0x255   : > { %39267 = vmatpush3.msra.mxu1 %v2108_v28  ;;  %v46520_v28 = vsub.f32 %v4132_v23, %v4144_v24  ;;  %v46522_v29 = vsub.f32 %v4133_v9, %v4147_v27 }
 0x256   : > { %39271 = vmatprep.subr.mxu1 %v2105_v16  ;;  %39269 = vmatmul.mubr.f32.vlgmr.msra.gmra.mrb[0].mxu1 %v2093_v12 }
 0x257   : > { %39331 = vmatmul.mubr.f32.vlgmr.msra.gmra.mrb[4].mxu0 %v46426_v42  ;;  %39272 = vmatpush3.msra.mxu1 %v2105_v16 }
 0x258   : > { %39273 = vmatprep.mubr.f32.mxu1 %v2084_v15  ;;  %39276 = vmatprep.subr.mxu1 %v2018_v5 }
 0x25e   : > { %39274 = vmatmul.mubr.f32.vlgmr.msra.gmra.mrb[0].mxu1 %v2094_v19 }
 0x25f   : > { %39277 = vmatpush3.msra.mxu1 %v2018_v5  ;;  %39278 = vmatprep.mubr.f32.mxu1 %v2085_v20 }
 0x260   : > { %39281 = vmatprep.subr.mxu1 %v2106_v21 }
 0x266   : > { %39279 = vmatmul.mubr.f32.vlgmr.msra.gmra.mrb[0].mxu1 %v2095_v22 }
 0x267   : > { %39282 = vmatpush3.msra.mxu1 %v2106_v21  ;;  %39283 = vmatprep.mubr.f32.mxu1 %v2083_v8 }
 0x268   : > { %39286 = vmatprep.subr.mxu1 %v2018_v5 }
 0x26e   : > { %39284 = vmatmul.mubr.f32.vlgmr.msra.gmra.mrb[0].mxu1 %v2093_v12 }
 0x26f   : > { %39287 = vmatpush3.msra.mxu1 %v2018_v5  ;;  %39288 = vmatprep.mubr.f32.mxu1 %v2083_v8 }
 0x270   : > { %39333 = vmatprep.subr.mxu1 %v3029_v30 }
 0x276   : > { %39289 = vmatmul.mubr.f32.vlgmr.msra.gmra.mrb[0].mxu1 %v2093_v12 }
 0x277   : > { %39334 = vmatpush3.msra.mxu1 %v3029_v30 }
 0x278   : > { %39338 = vmatprep.subr.mxu1 %v3119_v34 }
 0x2fe   : > { %v39235_v35 = vpop.f32.mrb[2].mxu0 }
 0x2ff   : > { %v1591_v36 = vpop.f32.mrb[3].mxu0 }
 0x32a   : > { %v39332_v37 = vpop.f32.mrb[4].mxu0 }
 0x32b   : > { %v3023_v38 = vsel %vm1508_vm2, %v39332_v37, 0  ;;  %v3007_v39 = vpop.f32.mrb[5].mxu0 }
 0x32c   : > { %v3104_v40 = vand.u32 4294901760, %v3023_v38  ;;  %v3020_v43 = vsel %vm1508_vm2, %v3007_v39, 0 }
 0x32d   : > { %v3094_v45 = vand.u32 4294901760, %v3020_v43 }
 0x32e   : > { %v3105_v46 = vsub.f32 %v3023_v38, %v3104_v40 }
 0x32f   : > { %v3095_v47 = vsub.f32 %v3020_v43, %v3094_v45  ;;  %v3588_v43 = vld [vmem:[%s48766_s22 + $0x8] sm:$0xff] }
 0x330   : > { %v3106_v48 = vand.u32 4294901760, %v3105_v46 }
 0x331   : > { %v3096_v50 = vand.u32 4294901760, %v3095_v47 }
 0x332   : > { %v3107_v51 = vsub.f32 %v3105_v46, %v3106_v48 }
 0x333   : > { %v3097_v53 = vsub.f32 %v3095_v47, %v3096_v50 }
 0x334   : > { %v3108_v56 = vand.u32 4294901760, %v3107_v51  ;;  %v46546_v51 = vpack.c.bf16 %v4147_v27, %v4144_v24 }
 0x335   : > { %v3098_v54 = vand.u32 4294901760, %v3097_v53 }
 0x337   : > { %39335 = vmatprep.mubr.f32.mxu1 %v3098_v54  ;;  %v3589_v54 = vld [vmem:[%s48766_s22 + $0x10] sm:$0xff] }
 0x338   : > { %39336 = vmatmul.mubr.f32.vlgmr.msra.gmra.mrb[0].mxu1 %v3108_v56  ;;  %v3590_v56 = vld [vmem:[%s48766_s22 + $0x18] sm:$0xff] }
 0x339   : > { %39340 = vmatprep.mubr.f32.mxu1 %v3094_v45  ;;  %39339 = vmatpush3.msra.mxu1 %v3119_v34 }
 0x33a   : > { %39343 = vmatprep.subr.mxu1 %v3116_v31 }
 0x340   : > { %39341 = vmatmul.mubr.f32.vlgmr.msra.gmra.mrb[0].mxu1 %v3104_v40 }
 0x341   : > { %39345 = vmatprep.mubr.f32.mxu1 %v3095_v47  ;;  %39344 = vmatpush3.msra.mxu1 %v3116_v31  ;;  %v4242_v31 = vand.u32 4294901760, %v46522_v29 }
 0x342   : > { %39348 = vmatprep.subr.mxu1 %v3029_v30 }
 0x348   : > { %39346 = vmatmul.mubr.f32.vlgmr.msra.gmra.mrb[0].mxu1 %v3105_v46  ;;  %v3608_v46 = vand.u32 4294901760, %v3588_v43 }
 0x349   : > { %39350 = vmatprep.mubr.f32.mxu1 %v3096_v50  ;;  %39349 = vmatpush3.msra.mxu1 %v3029_v30 }
 0x34a   : > { %39353 = vmatprep.subr.mxu1 %v3117_v32  ;;  %v3702_v50 = vsub.f32 %v3588_v43, %v3608_v46 }
 0x350   : > { %39351 = vmatmul.mubr.f32.vlgmr.msra.gmra.mrb[0].mxu1 %v3106_v48 }
 0x351   : > { %39355 = vmatprep.mubr.f32.mxu1 %v3094_v45  ;;  %39354 = vmatpush3.msra.mxu1 %v3117_v32  ;;  %v4150_v32 = vand.u32 4294901760, %v4134_v0 }
 0x352   : > { %39358 = vmatprep.subr.mxu1 %v3029_v30 }
 0x353   : > { %v46548_v53 = vpack.c.bf16 %v4153_v33, %v4150_v32 }
 0x358   : > { %39356 = vmatmul.mubr.f32.vlgmr.msra.gmra.mrb[0].mxu1 %v3104_v40 }
 0x359   : > { %39360 = vmatprep.mubr.f32.mxu1 %v3094_v45  ;;  %39359 = vmatpush3.msra.mxu1 %v3029_v30  ;;  %v4235_v30 = vand.u32 4294901760, %v46520_v28 }
 0x35b   : > { %v42737_v34 = vpack.c.bf16 %v4242_v31, %v4235_v30 }
 0x35d   : > { %42738 = vmatprep.subr.bf16.mxu1 %v42737_v34 }
 0x360   : > { %39361 = vmatmul.mubr.f32.vlgmr.msra.gmra.mrb[0].mxu1 %v3104_v40  ;;  %v3587_v40 = vld [vmem:[%s48766_s22] sm:$0xff] }
 0x361   : > { %42740 = vmatpush3.bf16.msra.mxu1 %v42737_v34  ;;  %v3605_v45 = vand.u32 4294901760, %v3587_v40  ;;  %v4236_v34 = vsub.f32 %v46520_v28, %v4235_v30 }
 0x363   : > { %v46544_v47 = vpack.c.bf16 %v3608_v46, %v3605_v45  ;;  %v3695_v48 = vsub.f32 %v3587_v40, %v3605_v45  ;;  %v4237_v40 = vand.u32 4294901760, %v4236_v34 }
 0x365   : > { %42658 = vmatprep.subr.bf16.mxu0 %v46544_v47 }
 0x366   : > { %42660 = vmatpush3.bf16.msra.mxu0 %v46544_v47 }
 0x433   : > { %v39362_v57 = vpop.f32.mrb[0].mxu1 }
 0x434   : > { %v44673_v59 = vadd.f32 %v39362_v57, %v39235_v35  ;;  %v3507_v60 = vpop.f32.mrb[1].mxu1  ;;  %v46532_v35 = vsub.f32 %v4134_v0, %v4150_v32  ;;  %v3611_v57 = vand.u32 4294901760, %v3589_v54  ;;  %v46568_v0 = vpack.c.bf16 %v3702_v50, %v3695_v48 }
 0x435   : > { %v44674_v61 = vadd.f32 %v3507_v60, %v1591_v36  ;;  %v46534_v36 = vsub.f32 %v4135_v1, %v4153_v33  ;;  %v3703_v60 = vand.u32 4294901760, %v3702_v50 }
 0x436   : > { %v46496_v3 = vadd.f32 %v44673_v59, %v37166_v58  ;;  %v4249_v37 = vand.u32 4294901760, %v46532_v35  ;;  %v3696_v59 = vand.u32 4294901760, %v3695_v48 }
 0x437   : > { %v46494_v62 = vadd.f32 %v44674_v61, %v37166_v58  ;;  %v4256_v38 = vand.u32 4294901760, %v46534_v36  ;;  %v3614_v58 = vand.u32 4294901760, %v3590_v56 }
 0x438   : > { %v3533_v5 = vsel %vm3529_vm3, %v46496_v3, 0.0  ;;  %v46572_v32 = vpack.c.bf16 %v3703_v60, %v3696_v59  ;;  %v4250_v46 = vsub.f32 %v46532_v35, %v4249_v37 }
 0x439   : > { %v3530_v4 = vsel %vm3529_vm3, %v46494_v62, 0.0  ;;  %v42741_v39 = vpack.c.bf16 %v4256_v38, %v4249_v37  ;;  %v46559_v61 = vpack.c.bf16 %v3614_v58, %v3611_v57 }
 0x43a   : > { %3531 = vadd.xlane.f32.xlu0 %v3530_v4  ;;  %v3697_v4 = vsub.f32 %v3695_v48, %v3696_v59  ;;  %v4251_v48 = vand.u32 4294901760, %v4250_v46 }
 0x43b   : > { %42742 = vmatprep.subr.bf16.mxu1 %v42741_v39  ;;  %42662 = vmatprep.subr.bf16.mxu0 %v46559_v61 }
 0x43c   : > { %42744 = vmatpush3.bf16.msra.mxu1 %v42741_v39  ;;  %42664 = vmatpush3.bf16.msra.mxu0 %v46559_v61  ;;  %v4243_v39 = vsub.f32 %v46522_v29, %v4242_v31 }
 0x43d   : > { %42746 = vmatprep.subr.bf16.mxu1 %v46546_v51 }
 0x43e   : > { %3534 = vadd.xlane.f32.xlu0 %v3533_v5  ;;  %v3704_v5 = vsub.f32 %v3702_v50, %v3703_v60  ;;  %v4244_v43 = vand.u32 4294901760, %v4243_v39 }
 0x440   : > { %v46578_v45 = vpack.c.bf16 %v4244_v43, %v4237_v40 }
 0x4c7   : > { %v3532_v6 = vpop.xlane.xlu0 %3531 }
 0x4c8   : > { %v3537_v8 = vmul.f32 0.03125, %v3532_v6  ;;  %v3709_v6 = vsub.f32 %v3589_v54, %v3611_v57  ;;  %v4257_v54 = vsub.f32 %v46534_v36, %v4256_v38 }
 0x4ca   : > { %v46503_v11 = vsub.f32 %v46494_v62, %v3537_v8  ;;  %v3716_v8 = vsub.f32 %v3590_v56, %v3614_v58  ;;  %v4258_v50 = vand.u32 4294901760, %v4257_v54 }
 0x4cb   : > { %v3535_v12 = vpop.xlane.xlu0 %3534 }
 0x4cc   : > { %v3538_v15 = vmul.f32 0.03125, %v3535_v12  ;;  %v3541_v16 = vmul.f32 %v46503_v11, %v46503_v11  ;;  %v3698_v12 = vand.u32 4294901760, %v3697_v4  ;;  %v46570_v1 = vpack.c.bf16 %v3716_v8, %v3709_v6 }
 0x4cd   : > { %v46582_v56 = vpack.c.bf16 %v4258_v50, %v4251_v48 }
 0x4ce   : > { %v46508_v19 = vsub.f32 %v46496_v3, %v3538_v15  ;;  %v3543_v20 = vsel %vm3529_vm3, %v3541_v16, 0.0  ;;  %v3705_v15 = vand.u32 4294901760, %v3704_v5  ;;  %v3710_v16 = vand.u32 4294901760, %v3709_v6 }
 0x4cf   : > { %3544 = vadd.xlane.f32.xlu1 %v3543_v20  ;;  %v3717_v20 = vand.u32 4294901760, %v3716_v8 }
 0x4d0   : > { %v3542_v21 = vmul.f32 %v46508_v19, %v46508_v19 }
 0x4d1   : > { %v3718_v23 = vsub.f32 %v3716_v8, %v3717_v20  ;;  %v46574_v33 = vpack.c.bf16 %v3717_v20, %v3710_v16 }
 0x4d2   : > { %v3546_v22 = vsel %vm3529_vm3, %v3542_v21, 0.0  ;;  %v46563_v21 = vpack.c.bf16 %v3705_v15, %v3698_v12 }
 0x4d3   : > { %3547 = vadd.xlane.f32.xlu1 %v3546_v22  ;;  %v3711_v22 = vsub.f32 %v3709_v6, %v3710_v16  ;;  %v3719_v24 = vand.u32 4294901760, %v3718_v23 }
 0x4d4   : > { %42666 = vmatprep.subr.bf16.mxu0 %v46563_v21 }
 0x4d5   : > { %v3712_v9 = vand.u32 4294901760, %v3711_v22  ;;  %v37167_v22 = vld [vmem:[%s48767_s9] ss:$0 sm:$0xff] }
 0x4d6   : > { %v3575_v23 = vmul.f32 %v37167_v22, %v46503_v11  ;;  %v3576_v39 = vmul.f32 %v37167_v22, %v46508_v19 }
 0x4d7   : > { %v46566_v27 = vpack.c.bf16 %v3719_v24, %v3712_v9  ;;  %v37168_v24 = vld [vmem:[%s48768_s4] ss:$0 sm:$0xff] }
 0x55c   : > { %v3545_v57 = vpop.xlane.xlu1 %3544 }
 0x55d   : > { %v3549_v58 = vmul.f32 0.032258064, %v3545_v57 }
 0x55f   : > { %45520 = vrsqrt.f32 %v3549_v58  ;;  %vm3553_vm4 = vcmp.eq.f32.partialorder %v3549_v58, inf  ;;  %v3556_v4 = vand.u32 2147483648, %v3549_v58  ;;  %vm3555_vm5 = vcmp.eq.f32.partialorder %v3549_v58, 0.0 }
 0x560   : > { %v3548_v59 = vpop.xlane.xlu1 %3547 }
 0x561   : > { %v3550_v60 = vmul.f32 0.032258064, %v3548_v59 }
 0x563   : > { %45522 = vrsqrt.f32 %v3550_v60  ;;  %vm3560_vm6 = vcmp.eq.f32.partialorder %v3550_v60, inf  ;;  %v3563_v12 = vand.u32 2147483648, %v3550_v60  ;;  %vm3562_vm7 = vcmp.eq.f32.partialorder %v3550_v60, 0.0 }
 0x569   : > { %v45521_v30 = vpop.eup %45520 }
 0x56a   : > { %v3552_v31 = vmul.f32 %v45521_v30, %v3549_v58 }
 0x56c   : > { %v3554_v5 = vsel %vm3553_vm4, %v3549_v58, %v3552_v31 }
 0x56d   : > { %v45523_v6 = vpop.eup %45522  ;;  %v3557_v37 = vsel %vm3555_vm5, %v3556_v4, %v3554_v5 }
 0x56e   : > { %v3565_v8 = vadd.f32 1e-06, %v3557_v37  ;;  %v3559_v38 = vmul.f32 %v45523_v6, %v3550_v60 }
 0x570   : > { %45524 = vrcp.f32 %v3565_v8  ;;  %v3561_v15 = vsel %vm3560_vm6, %v3550_v60, %v3559_v38 }
 0x571   : > { %v3564_v16 = vsel %vm3562_vm7, %v3563_v12, %v3561_v15 }
 0x572   : > { %v3566_v20 = vadd.f32 1e-06, %v3564_v16 }
 0x574   : > { %45526 = vrcp.f32 %v3566_v20 }
 0x57a   : > { %v45525_v9 = vpop.eup %45524 }
 0x57b   : > { %v3577_v34 = vmul.f32 %v45525_v9, %v3575_v23 }
 0x57d   : > { %v3585_v40 = vadd.f32 %v37168_v24, %v3577_v34 }
 0x57e   : > { %v45527_v43 = vpop.eup %45526 }
 0x57f   : > { %v3599_v46 = vsel %vm3529_vm3, %v3585_v40, 0  ;;  %v3578_v54 = vmul.f32 %v45527_v43, %v3576_v39 }
 0x580   : > { %v46593_v48 = vand.u32 4294901760, %v3599_v46 }
 0x581   : > { %v3586_v50 = vadd.f32 %v37168_v24, %v3578_v54 }
 0x582   : > { %39481 = vmatprep.mubr.f32.mxu1 %v46593_v48  ;;  %v46597_v11 = vsub.f32 %v3599_v46, %v46593_v48 }
 0x583   : > { %v3602_v57 = vsel %vm3529_vm3, %v3586_v50, 0 }
 0x584   : > { %v46600_v58 = vand.u32 4294901760, %v3602_v57  ;;  %v46603_v59 = vand.u32 4294901760, %v46597_v11 }
 0x586   : > { %39482 = vmatmul.mubr.f32.vlgmr.msra.gmra.mrb[2].mxu1 %v46600_v58  ;;  %v3676_v19 = vsub.f32 %v46597_v11, %v46603_v59  ;;  %v46609_v60 = vsub.f32 %v3602_v57, %v46600_v58  ;;  %v37169_v57 = vld [vmem:[#allocation2] ss:$0 sm:$0xff] }
 0x587   : > { %42748 = vmatpush3.bf16.msra.mxu1 %v46546_v51  ;;  %39492 = vmatprep.mubr.f32.mxu1 %v46593_v48 }
 0x588   : > { %v46613_v30 = vand.u32 4294901760, %v3676_v19  ;;  %42750 = vmatprep.subr.bf16.mxu1 %v46548_v53  ;;  %v46617_v31 = vand.u32 4294901760, %v46609_v60 }
 0x58a   : > { %39371 = vmatprep.mubr.f32.mxu0 %v46613_v30  ;;  %v3686_v4 = vsub.f32 %v46609_v60, %v46617_v31 }
 0x58b   : > { %42752 = vmatpush3.bf16.msra.mxu1 %v46548_v53 }
 0x58c   : > { %v46623_v5 = vand.u32 4294901760, %v3686_v4 }
 0x58e   : > { %39372 = vmatmul.mubr.f32.vlgmr.msra.gmra.mrb[6].mxu0 %v46623_v5  ;;  %39493 = vmatmul.mubr.f32.vlgmr.msra.gmra.mrb[2].mxu1 %v46600_v58 }
 0x58f   : > { %42668 = vmatpush3.bf16.msra.mxu0 %v46563_v21  ;;  %39382 = vmatprep.mubr.f32.mxu0 %v46593_v48  ;;  %v4672_v21 = vld [vmem:[%s48769_s7 + $0x8] sm:$0xff] }
 0x590   : > { %42670 = vmatprep.subr.bf16.mxu0 %v46566_v27 }
 0x593   : > { %42672 = vmatpush3.bf16.msra.mxu0 %v46566_v27  ;;  %v42725_v27 = vpack.c.bf16 %v46534_v36, %v46532_v35 }
 0x594   : > { %42674 = vmatprep.subr.bf16.mxu0 %v46568_v0 }
 0x596   : > { %39383 = vmatmul.mubr.f32.vlgmr.msra.gmra.mrb[6].mxu0 %v46600_v58 }
 0x597   : > { %42676 = vmatpush3.bf16.msra.mxu0 %v46568_v0  ;;  %39393 = vmatprep.mubr.f32.mxu0 %v46597_v11 }
 0x598   : > { %42678 = vmatprep.subr.bf16.mxu0 %v46570_v1 }
 0x59b   : > { %42680 = vmatpush3.bf16.msra.mxu0 %v46570_v1  ;;  %v4686_v1 = vand.u32 4294901760, %v4672_v21 }
 0x59c   : > { %42682 = vmatprep.subr.bf16.mxu0 %v46544_v47 }
 0x59d   : > { %v4780_v35 = vsub.f32 %v4672_v21, %v4686_v1  ;;  %v37170_v21 = vld [vmem:[#allocation4] ss:$0 sm:$0xff] }
 0x59e   : > { %39394 = vmatmul.mubr.f32.vlgmr.msra.gmra.mrb[6].mxu0 %v46609_v60 }
 0x59f   : > { %42684 = vmatpush3.bf16.msra.mxu0 %v46544_v47  ;;  %39404 = vmatprep.mubr.f32.mxu0 %v46603_v59 }
 0x5a0   : > { %42686 = vmatprep.subr.bf16.mxu0 %v46559_v61 }
 0x5a3   : > { %42688 = vmatpush3.bf16.msra.mxu0 %v46559_v61 }
 0x5a4   : > { %42690 = vmatprep.subr.bf16.mxu0 %v46572_v32 }
 0x5a6   : > { %39405 = vmatmul.mubr.f32.vlgmr.msra.gmra.mrb[6].mxu0 %v46617_v31 }
 0x5a7   : > { %42692 = vmatpush3.bf16.msra.mxu0 %v46572_v32  ;;  %39415 = vmatprep.mubr.f32.mxu0 %v46593_v48 }
 0x5a8   : > { %42694 = vmatprep.subr.bf16.mxu0 %v46574_v33 }
 0x5ab   : > { %42696 = vmatpush3.bf16.msra.mxu0 %v46574_v33 }
 0x5ac   : > { %42698 = vmatprep.subr.bf16.mxu0 %v46544_v47 }
 0x5ae   : > { %39416 = vmatmul.mubr.f32.vlgmr.msra.gmra.mrb[6].mxu0 %v46600_v58 }
 0x5af   : > { %42700 = vmatpush3.bf16.msra.mxu0 %v46544_v47  ;;  %39426 = vmatprep.mubr.f32.mxu0 %v46593_v48  ;;  %v42721_v47 = vpack.c.bf16 %v46522_v29, %v46520_v28  ;;  %v4673_v28 = vld [vmem:[%s48769_s7 + $0x10] sm:$0xff]  ;;  %v4674_v29 = vld [vmem:[%s48769_s7 + $0x18] sm:$0xff] }
 0x5b0   : > { %42702 = vmatprep.subr.bf16.mxu0 %v46559_v61  ;;  %v4689_v32 = vand.u32 4294901760, %v4673_v28  ;;  %v4692_v33 = vand.u32 4294901760, %v4674_v29 }
 0x5b2   : > { %v4787_v6 = vsub.f32 %v4673_v28, %v4689_v32  ;;  %v4794_v37 = vsub.f32 %v4674_v29, %v4692_v33  ;;  %v42757_v20 = vpack.c.bf16 %v4692_v33, %v4689_v32 }
 0x5b3   : > { %42704 = vmatpush3.bf16.msra.mxu0 %v46559_v61  ;;  %v4671_v61 = vld [vmem:[%s48769_s7] sm:$0xff] }
 0x5b4   : > { %42706 = vmatprep.subr.bf16.mxu0 %v46546_v51  ;;  %v4683_v0 = vand.u32 4294901760, %v4671_v61  ;;  %v4788_v15 = vand.u32 4294901760, %v4787_v6  ;;  %v4795_v16 = vand.u32 4294901760, %v4794_v37  ;;  %v42773_v43 = vpack.c.bf16 %v4794_v37, %v4787_v6 }
 0x5b6   : > { %39427 = vmatmul.mubr.f32.vlgmr.msra.gmra.mrb[6].mxu0 %v46600_v58  ;;  %v42753_v8 = vpack.c.bf16 %v4686_v1, %v4683_v0  ;;  %v4789_v9 = vsub.f32 %v4787_v6, %v4788_v15  ;;  %v4796_v24 = vsub.f32 %v4794_v37, %v4795_v16  ;;  %v42789_v54 = vpack.c.bf16 %v4795_v16, %v4788_v15 }
 0x5b7   : > { %42708 = vmatpush3.bf16.msra.mxu0 %v46546_v51  ;;  %39437 = vmatprep.mubr.f32.mxu0 %v46613_v30 }
 0x5b8   : > { %42710 = vmatprep.subr.bf16.mxu0 %v46548_v53  ;;  %v4790_v34 = vand.u32 4294901760, %v4789_v9  ;;  %v4797_v39 = vand.u32 4294901760, %v4796_v24 }
 0x5ba   : > { %v42765_v40 = vpack.c.bf16 %v4797_v39, %v4790_v34 }
 0x5bb   : > { %42712 = vmatpush3.bf16.msra.mxu0 %v46548_v53 }
 0x5bc   : > { %42714 = vmatprep.subr.bf16.mxu0 %v46578_v45 }
 0x5be   : > { %39438 = vmatmul.mubr.f32.vlgmr.msra.gmra.mrb[8].mxu0 %v46623_v5 }
 0x5bf   : > { %42716 = vmatpush3.bf16.msra.mxu0 %v46578_v45  ;;  %39448 = vmatprep.mubr.f32.mxu0 %v46593_v48  ;;  %v4773_v45 = vsub.f32 %v4671_v61, %v4683_v0 }
 0x5c0   : > { %42718 = vmatprep.subr.bf16.mxu0 %v46582_v56 }
 0x5c1   : > { %v4774_v36 = vand.u32 4294901760, %v4773_v45 }
 0x5c3   : > { %42720 = vmatpush3.bf16.msra.mxu0 %v46582_v56  ;;  %v4781_v56 = vand.u32 4294901760, %v4780_v35  ;;  %v4775_v38 = vsub.f32 %v4773_v45, %v4774_v36 }
 0x5c4   : > { %42722 = vmatprep.subr.bf16.mxu0 %v42721_v47 }
 0x5c5   : > { %v4782_v12 = vsub.f32 %v4780_v35, %v4781_v56  ;;  %v4776_v22 = vand.u32 4294901760, %v4775_v38  ;;  %v42785_v46 = vpack.c.bf16 %v4781_v56, %v4774_v36 }
 0x5c6   : > { %39449 = vmatmul.mubr.f32.vlgmr.msra.gmra.mrb[8].mxu0 %v46600_v58 }
 0x5c7   : > { %42724 = vmatpush3.bf16.msra.mxu0 %v42721_v47  ;;  %39459 = vmatprep.mubr.f32.mxu0 %v46597_v11  ;;  %v4783_v23 = vand.u32 4294901760, %v4782_v12 }
 0x5c8   : > { %42726 = vmatprep.subr.bf16.mxu0 %v42725_v27 }
 0x5cb   : > { %42728 = vmatpush3.bf16.msra.mxu0 %v42725_v27 }
 0x5cc   : > { %42730 = vmatprep.subr.bf16.mxu0 %v46546_v51 }
 0x5ce   : > { %39460 = vmatmul.mubr.f32.vlgmr.msra.gmra.mrb[8].mxu0 %v46609_v60 }
 0x5cf   : > { %42732 = vmatpush3.bf16.msra.mxu0 %v46546_v51  ;;  %39470 = vmatprep.mubr.f32.mxu0 %v46603_v59  ;;  %v42761_v51 = vpack.c.bf16 %v4783_v23, %v4776_v22 }
 0x5d0   : > { %42734 = vmatprep.subr.bf16.mxu0 %v46548_v53 }
 0x5d3   : > { %42736 = vmatpush3.bf16.msra.mxu0 %v46548_v53  ;;  %v42769_v53 = vpack.c.bf16 %v4780_v35, %v4773_v45 }
 0x5d4   : > { %42754 = vmatprep.subr.bf16.mxu0 %v42753_v8 }
 0x5d6   : > { %39471 = vmatmul.mubr.f32.vlgmr.msra.gmra.mrb[8].mxu0 %v46617_v31 }
 0x5d7   : > { %42756 = vmatpush3.bf16.msra.mxu0 %v42753_v8  ;;  %39503 = vmatprep.mubr.f32.mxu0 %v46613_v30 }
 0x5d8   : > { %42758 = vmatprep.subr.bf16.mxu0 %v42757_v20 }
 0x5db   : > { %42760 = vmatpush3.bf16.msra.mxu0 %v42757_v20 }
 0x5dc   : > { %42762 = vmatprep.subr.bf16.mxu0 %v42761_v51 }
 0x5de   : > { %39504 = vmatmul.mubr.f32.vlgmr.msra.gmra.mrb[10].mxu0 %v46623_v5 }
 0x5df   : > { %42764 = vmatpush3.bf16.msra.mxu0 %v42761_v51  ;;  %39514 = vmatprep.mubr.f32.mxu0 %v46593_v48 }
 0x5e0   : > { %42766 = vmatprep.subr.bf16.mxu0 %v42765_v40 }
 0x5e3   : > { %42768 = vmatpush3.bf16.msra.mxu0 %v42765_v40 }
 0x5e4   : > { %42770 = vmatprep.subr.bf16.mxu0 %v42769_v53 }
 0x5e6   : > { %39515 = vmatmul.mubr.f32.vlgmr.msra.gmra.mrb[10].mxu0 %v46600_v58 }
 0x5e7   : > { %42772 = vmatpush3.bf16.msra.mxu0 %v42769_v53  ;;  %39525 = vmatprep.mubr.f32.mxu0 %v46597_v11  ;;  %v37171_v53 = vld [vmem:[#allocation6] ss:$0 sm:$0xff] }
 0x5e8   : > { %42774 = vmatprep.subr.bf16.mxu0 %v42773_v43 }
 0x5eb   : > { %42776 = vmatpush3.bf16.msra.mxu0 %v42773_v43 }
 0x5ec   : > { %42778 = vmatprep.subr.bf16.mxu0 %v42753_v8 }
 0x5ee   : > { %39526 = vmatmul.mubr.f32.vlgmr.msra.gmra.mrb[10].mxu0 %v46609_v60 }
 0x5ef   : > { %42780 = vmatpush3.bf16.msra.mxu0 %v42753_v8  ;;  %39536 = vmatprep.mubr.f32.mxu0 %v46603_v59 }
 0x5f0   : > { %42782 = vmatprep.subr.bf16.mxu0 %v42757_v20 }
 0x5f3   : > { %42784 = vmatpush3.bf16.msra.mxu0 %v42757_v20 }
 0x5f4   : > { %42786 = vmatprep.subr.bf16.mxu0 %v42785_v46 }
 0x5f6   : > { %39537 = vmatmul.mubr.f32.vlgmr.msra.gmra.mrb[10].mxu0 %v46617_v31 }
 0x5f7   : > { %42788 = vmatpush3.bf16.msra.mxu0 %v42785_v46  ;;  %39547 = vmatprep.mubr.f32.mxu0 %v46593_v48 }
 0x5f8   : > { %42790 = vmatprep.subr.bf16.mxu0 %v42789_v54 }
 0x5fb   : > { %42792 = vmatpush3.bf16.msra.mxu0 %v42789_v54 }
 0x5fc   : > { %42794 = vmatprep.subr.bf16.mxu0 %v42753_v8 }
 0x5fe   : > { %39548 = vmatmul.mubr.f32.vlgmr.msra.gmra.mrb[10].mxu0 %v46600_v58 }
 0x5ff   : > { %42796 = vmatpush3.bf16.msra.mxu0 %v42753_v8  ;;  %39558 = vmatprep.mubr.f32.mxu0 %v46593_v48 }
 0x600   : > { %42798 = vmatprep.subr.bf16.mxu0 %v42757_v20 }
 0x603   : > { %42800 = vmatpush3.bf16.msra.mxu0 %v42757_v20 }
 0x606   : > { %39559 = vmatmul.mubr.f32.vlgmr.msra.gmra.mrb[10].mxu0 %v46600_v58 }
 0x661   : > { %v39494_v50 = vpop.f32.mrb[2].mxu1 }
 0x662   : > { %v4661_v11 = vpop.f32.mrb[3].mxu1 }
 0x689   : > { %v39428_v59 = vpop.f32.mrb[6].mxu0 }
 0x68a   : > { %v4122_v19 = vpop.f32.mrb[7].mxu0  ;;  %v44675_v58 = vadd.f32 %v39428_v59, %v37169_v57 }
 0x68b   : > { %v44676_v60 = vadd.f32 %v37169_v57, %v4122_v19 }
 0x68c   : > { %v5219_v61 = vsel %vm5214_vm8, %v44675_v58, 0 }
 0x68d   : > { %v5216_v30 = vsel %vm5214_vm8, %v44676_v60, 0  ;;  %v46713_v0 = vand.u32 4294901760, %v5219_v61 }
 0x68e   : > { %v46705_v31 = vand.u32 4294901760, %v5216_v30 }
 0x68f   : > { %v5305_v45 = vsub.f32 %v5219_v61, %v46713_v0 }
 0x690   : > { %v46708_v4 = vsub.f32 %v5216_v30, %v46705_v31 }
 0x691   : > { %v5306_v38 = vand.u32 4294901760, %v5305_v45 }
 0x692   : > { %v5296_v48 = vand.u32 4294901760, %v46708_v4 }
 0x693   : > { %v5307_v23 = vsub.f32 %v5305_v45, %v5306_v38 }
 0x694   : > { %v5297_v5 = vsub.f32 %v46708_v4, %v5296_v48 }
 0x695   : > { %v5308_v39 = vand.u32 4294901760, %v5307_v23 }
 0x696   : > { %v5298_v47 = vand.u32 4294901760, %v5297_v5 }
 0x698   : > { %39565 = vmatprep.mubr.f32.mxu1 %v5298_v47 }
 0x6a9   : > { %v39472_v27 = vpop.f32.mrb[8].mxu0 }
 0x6aa   : > { %v44677_v1 = vadd.f32 %v39472_v27, %v37170_v21  ;;  %v4489_v28 = vpop.f32.mrb[9].mxu0 }
 0x6ab   : > { %v44679_v29 = vadd.f32 %v37170_v21, %v4489_v28 }
 0x6ac   : > { %v44678_v32 = vadd.f32 %v44677_v1, %v39494_v50 }
 0x6ad   : > { %v44680_v33 = vadd.f32 %v44679_v29, %v4661_v11 }
 0x6ae   : > { %v5225_v35 = vsel %vm5214_vm8, %v44678_v32, 0  ;;  %5735 = vrot.lane.b32.xlu1 %v44678_v32, %s48718_s8 }
 0x6af   : > { %v5231_v36 = vand.u32 4294901760, %v5225_v35  ;;  %v5222_v56 = vsel %vm5214_vm8, %v44680_v33, 0  ;;  %5733 = vrot.lane.b32.xlu0 %v44680_v33, %s48718_s8 }
 0x6b0   : > { %v5228_v6 = vand.u32 4294901760, %v5222_v56 }
 0x6b1   : > { %v5323_v37 = vsub.f32 %v5225_v35, %v5231_v36 }
 0x6b2   : > { %v42801_v8 = vpack.c.bf16 %v5231_v36, %v5228_v6  ;;  %5729 = vrot.lane.b32.xlu1 %v44676_v60, %s48718_s8  ;;  %v5316_v12 = vsub.f32 %v5222_v56, %v5228_v6 }
 0x6b3   : > { %6251 = vrot.lane.b32.xlu0 %v44680_v33, %s48716_s30  ;;  %v5324_v15 = vand.u32 4294901760, %v5323_v37 }
 0x6b4   : > { %42802 = vmatprep.subr.bf16.mxu1 %v42801_v8  ;;  %v5317_v16 = vand.u32 4294901760, %v5316_v12  ;;  %v42809_v20 = vpack.c.bf16 %v5323_v37, %v5316_v12 }
 0x6b5   : > { %42804 = vmatpush3.bf16.xpose.msra.mxu1 %v42801_v8  ;;  %v5325_v22 = vsub.f32 %v5323_v37, %v5324_v15 }
 0x6b6   : > { %5731 = vrot.lane.b32.xlu1 %v44675_v58, %s48718_s8  ;;  %v5318_v9 = vsub.f32 %v5316_v12, %v5317_v16  ;;  %v42817_v24 = vpack.c.bf16 %v5324_v15, %v5317_v16 }
 0x6b7   : > { %6247 = vrot.lane.b32.xlu0 %v44676_v60, %s48716_s30  ;;  %v5326_v51 = vand.u32 4294901760, %v5325_v22 }
 0x6b8   : > { %v5319_v34 = vand.u32 4294901760, %v5318_v9 }
 0x6ba   : > { %6253 = vrot.lane.b32.xlu1 %v44678_v32, %s48716_s30  ;;  %v42805_v40 = vpack.c.bf16 %v5326_v51, %v5319_v34 }
 0x6bb   : > { %6769 = vrot.lane.b32.xlu0 %v44680_v33, %s48714_s29 }
 0x6bc   : > { %39566 = vmatmul.mubr.f32.vlgmr.msra.gmra.mrb[4].mxu1 %v5308_v39  ;;  %42806 = vmatprep.subr.bf16.mxu1 %v42805_v40 }
 0x6bd   : > { %42808 = vmatpush3.bf16.xpose.msra.mxu1 %v42805_v40  ;;  %39572 = vmatprep.mubr.f32.mxu1 %v46705_v31 }
 0x6be   : > { %6249 = vrot.lane.b32.xlu1 %v44675_v58, %s48716_s30  ;;  %42810 = vmatprep.subr.bf16.mxu1 %v42809_v20 }
 0x6bf   : > { %6765 = vrot.lane.b32.xlu0 %v44676_v60, %s48714_s29 }
 0x6c2   : > { %6771 = vrot.lane.b32.xlu1 %v44678_v32, %s48714_s29 }
 0x6c4   : > { %39573 = vmatmul.mubr.f32.vlgmr.msra.gmra.mrb[4].mxu1 %v46713_v0 }
 0x6c5   : > { %42812 = vmatpush3.bf16.xpose.msra.mxu1 %v42809_v20  ;;  %39579 = vmatprep.mubr.f32.mxu1 %v46708_v4 }
 0x6c6   : > { %6767 = vrot.lane.b32.xlu1 %v44675_v58, %s48714_s29  ;;  %42814 = vmatprep.subr.bf16.mxu1 %v42801_v8 }
 0x6cc   : > { %39580 = vmatmul.mubr.f32.vlgmr.msra.gmra.mrb[4].mxu1 %v5305_v45 }
 0x6cd   : > { %42816 = vmatpush3.bf16.xpose.msra.mxu1 %v42801_v8  ;;  %39586 = vmatprep.mubr.f32.mxu1 %v5296_v48 }
 0x6ce   : > { %42818 = vmatprep.subr.bf16.mxu1 %v42817_v24 }
 0x6d4   : > { %39587 = vmatmul.mubr.f32.vlgmr.msra.gmra.mrb[4].mxu1 %v5306_v38 }
 0x6d5   : > { %42820 = vmatpush3.bf16.xpose.msra.mxu1 %v42817_v24  ;;  %39593 = vmatprep.mubr.f32.mxu1 %v46705_v31 }
 0x6d6   : > { %42822 = vmatprep.subr.bf16.mxu1 %v42801_v8 }
 0x6d9   : > { %v39560_v43 = vpop.f32.mrb[10].mxu0 }
 0x6da   : > { %v46734_v46 = vadd.f32 %v39560_v43, %v37171_v53  ;;  %v5200_v54 = vpop.f32.mrb[11].mxu0 }
 0x6db   : > { %v46736_v50 = vadd.f32 %v37171_v53, %v5200_v54 }
 0x6dc   : > { %v7405_v11 = vand.u32 4294901760, %v46734_v46  ;;  %39594 = vmatmul.mubr.f32.vlgmr.msra.gmra.mrb[4].mxu1 %v46713_v0 }
 0x6dd   : > { %v7402_v57 = vand.u32 4294901760, %v46736_v50  ;;  %42824 = vmatpush3.bf16.xpose.msra.mxu1 %v42801_v8  ;;  %39600 = vmatprep.mubr.f32.mxu1 %v46705_v31 }
 0x6de   : > { %v46745_v59 = vsub.f32 %v46734_v46, %v7405_v11 }
 0x6df   : > { %v46750_v19 = vsub.f32 %v46736_v50, %v7402_v57 }
 0x6e0   : > { %v7498_v60 = vand.u32 4294901760, %v46745_v59 }
 0x6e1   : > { %v7491_v30 = vand.u32 4294901760, %v46750_v19  ;;  %v46756_v4 = vpack.c.bf16 %v46745_v59, %v46750_v19 }
 0x6e3   : > { %v46762_v31 = vpack.c.bf16 %v7498_v60, %v7491_v30 }
 0x6e4   : > { %39601 = vmatmul.mubr.f32.vlgmr.msra.gmra.mrb[4].mxu1 %v46713_v0 }
 0x720   : > { %v5736_v48 = vpop.permute.xlu1 %5735 }
 0x721   : > { %v5743_v5 = vsel %vm5214_vm8, %v5736_v48, 0  ;;  %v5734_v47 = vpop.permute.xlu0 %5733 }
 0x722   : > { %v5749_v58 = vand.u32 4294901760, %v5743_v5  ;;  %v5741_v61 = vsel %vm5214_vm8, %v5734_v47, 0 }
 0x723   : > { %v5746_v21 = vand.u32 4294901760, %v5741_v61 }
 0x724   : > { %v46767_v27 = vsub.f32 %v5743_v5, %v5749_v58  ;;  %v5730_v1 = vpop.permute.xlu1 %5729 }
 0x725   : > { %v46769_v28 = vpack.c.bf16 %v5749_v58, %v5746_v21  ;;  %v46771_v29 = vsub.f32 %v5741_v61, %v5746_v21  ;;  %v5737_v32 = vsel %vm5214_vm8, %v5730_v1, 0  ;;  %v6252_v33 = vpop.permute.xlu0 %6251 }
 0x726   : > { %v5842_v0 = vand.u32 4294901760, %v46767_v27  ;;  %v46775_v45 = vand.u32 4294901760, %v5737_v32  ;;  %v6259_v35 = vsel %vm5214_vm8, %v6252_v33, 0 }
 0x727   : > { %v5835_v36 = vand.u32 4294901760, %v46771_v29  ;;  %v6264_v56 = vand.u32 4294901760, %v6259_v35  ;;  %42826 = vmatprep.subr.bf16.mxu0 %v46769_v28 }
 0x728   : > { %v5843_v6 = vsub.f32 %v46767_v27, %v5842_v0  ;;  %v46784_v37 = vsub.f32 %v5737_v32, %v46775_v45  ;;  %42828 = vmatpush3.bf16.xpose.msra.mxu0 %v46769_v28  ;;  %v5732_v8 = vpop.permute.xlu1 %5731 }
 0x729   : > { %v5836_v38 = vsub.f32 %v46771_v29, %v5835_v36  ;;  %v46790_v12 = vsub.f32 %v6259_v35, %v6264_v56  ;;  %v5739_v15 = vsel %vm5214_vm8, %v5732_v8, 0  ;;  %v6248_v16 = vpop.permute.xlu0 %6247 }
 0x72a   : > { %v5814_v20 = vand.u32 4294901760, %v46784_v37  ;;  %v46794_v22 = vand.u32 4294901760, %v5739_v15  ;;  %v6255_v23 = vsel %vm5214_vm8, %v6248_v16, 0  ;;  %v5844_v9 = vand.u32 4294901760, %v5843_v6 }
 0x72b   : > { %v46797_v24 = vand.u32 4294901760, %v6255_v23  ;;  %v5837_v51 = vand.u32 4294901760, %v5836_v38  ;;  %v6353_v48 = vand.u32 4294901760, %v46790_v12 }
 0x72c   : > { %v46800_v34 = vsub.f32 %v5739_v15, %v46794_v22  ;;  %v6254_v39 = vpop.permute.xlu1 %6253  ;;  %v5815_v40 = vsub.f32 %v46784_v37, %v5814_v20 }
 0x72d   : > { %v46806_v53 = vsub.f32 %v6255_v23, %v46797_v24  ;;  %v6261_v43 = vsel %vm5214_vm8, %v6254_v39, 0  ;;  %v42829_v54 = vpack.c.bf16 %v5844_v9, %v5837_v51  ;;  %v6354_v8 = vsub.f32 %v46790_v12, %v6353_v48 }
 0x72e   : > { %v5824_v5 = vand.u32 4294901760, %v46800_v34  ;;  %v6267_v47 = vand.u32 4294901760, %v6261_v43  ;;  %v5816_v58 = vand.u32 4294901760, %v5815_v40  ;;  %v42833_v51 = vpack.c.bf16 %v46767_v27, %v46771_v29 }
 0x72f   : > { %v6332_v61 = vand.u32 4294901760, %v46806_v53  ;;  %42830 = vmatprep.subr.bf16.mxu0 %v42829_v54  ;;  %v6355_v40 = vand.u32 4294901760, %v6354_v8 }
 0x730   : > { %v5825_v21 = vsub.f32 %v46800_v34, %v5824_v5  ;;  %v46813_v1 = vpack.c.bf16 %v6267_v47, %v6264_v56  ;;  %v6359_v32 = vsub.f32 %v6261_v43, %v6267_v47  ;;  %39607 = vmatprep.mubr.f32.mxu0 %v5816_v58  ;;  %v6250_v33 = vpop.permute.xlu1 %6249 }
 0x731   : > { %v6257_v35 = vsel %vm5214_vm8, %v6250_v33, 0  ;;  %v6333_v6 = vsub.f32 %v46806_v53, %v6332_v61 }
 0x732   : > { %v5826_v38 = vand.u32 4294901760, %v5825_v21  ;;  %v6360_v15 = vand.u32 4294901760, %v6359_v32  ;;  %v46822_v16 = vand.u32 4294901760, %v6257_v35  ;;  %42850 = vmatprep.subr.bf16.mxu1 %v46813_v1  ;;  %v42857_v33 = vpack.c.bf16 %v6359_v32, %v46790_v12 }
 0x733   : > { %42852 = vmatpush3.bf16.xpose.msra.mxu1 %v46813_v1  ;;  %v6334_v56 = vand.u32 4294901760, %v6333_v6  ;;  %v42841_v6 = vpack.c.bf16 %v5842_v0, %v5835_v36 }
 0x734   : > { %v6361_v23 = vsub.f32 %v6359_v32, %v6360_v15  ;;  %v6341_v9 = vsub.f32 %v6257_v35, %v46822_v16  ;;  %39608 = vmatmul.mubr.f32.vlgmr.msra.gmra.mrb[12].mxu0 %v5826_v38  ;;  %v6772_v35 = vpop.permute.xlu1 %6771 }
 0x735   : > { %42832 = vmatpush3.bf16.xpose.msra.mxu0 %v42829_v54  ;;  %39614 = vmatprep.mubr.f32.mxu0 %v46775_v45  ;;  %v6770_v54 = vpop.permute.xlu0 %6769  ;;  %v6779_v8 = vsel %vm5214_vm8, %v6772_v35, 0 }
 0x736   : > { %v6342_v39 = vand.u32 4294901760, %v6341_v9  ;;  %42834 = vmatprep.subr.bf16.mxu0 %v42833_v51  ;;  %39649 = vmatprep.mubr.f32.mxu1 %v6334_v56  ;;  %v6362_v43 = vand.u32 4294901760, %v6361_v23  ;;  %v6785_v27 = vand.u32 4294901760, %v6779_v8 }
 0x738   : > { %v6343_v47 = vsub.f32 %v6341_v9, %v6342_v39  ;;  %v42853_v58 = vpack.c.bf16 %v6362_v43, %v6355_v40  ;;  %v6768_v38 = vpop.permute.xlu1 %6767  ;;  %v46851_v56 = vsub.f32 %v6779_v8, %v6785_v27 }
 0x739   : > { %v6766_v32 = vpop.permute.xlu0 %6765  ;;  %v6775_v23 = vsel %vm5214_vm8, %v6768_v38, 0 }
 0x73a   : > { %v6344_v21 = vand.u32 4294901760, %v6343_v47  ;;  %42854 = vmatprep.subr.bf16.mxu1 %v42853_v58  ;;  %v6773_v29 = vsel %vm5214_vm8, %v6766_v32, 0 }
 0x73b   : > { %v46849_v36 = vand.u32 4294901760, %v6773_v29 }
 0x73c   : > { %39615 = vmatmul.mubr.f32.vlgmr.msra.gmra.mrb[12].mxu0 %v46794_v22  ;;  %39650 = vmatmul.mubr.f32.vlgmr.msra.gmra.mrb[6].mxu1 %v6344_v21 }
 0x73d   : > { %42836 = vmatpush3.bf16.xpose.msra.mxu0 %v42833_v51  ;;  %42856 = vmatpush3.bf16.xpose.msra.mxu1 %v42853_v58  ;;  %v6858_v51 = vand.u32 4294901760, %v6775_v23 }
 0x73e   : > { %39621 = vmatprep.mubr.f32.mxu0 %v46784_v37  ;;  %42838 = vmatprep.subr.bf16.mxu0 %v46769_v28  ;;  %v42865_v37 = vpack.c.bf16 %v6360_v15, %v6353_v48 }
 0x73f   : > { %39656 = vmatprep.mubr.f32.mxu1 %v46797_v24  ;;  %42858 = vmatprep.subr.bf16.mxu1 %v42857_v33  ;;  %v6859_v15 = vsub.f32 %v6775_v23, %v6858_v51 }
 0x741   : > { %v6860_v58 = vand.u32 4294901760, %v6859_v15 }
 0x743   : > { %v6861_v35 = vsub.f32 %v6859_v15, %v6860_v58 }
 0x744   : > { %39622 = vmatmul.mubr.f32.vlgmr.msra.gmra.mrb[12].mxu0 %v46800_v34  ;;  %39657 = vmatmul.mubr.f32.vlgmr.msra.gmra.mrb[6].mxu1 %v46822_v16  ;;  %v6777_v34 = vsel %vm5214_vm8, %v6770_v54, 0  ;;  %v7499_v54 = vsub.f32 %v46745_v59, %v7498_v60  ;;  %v7293_v60 = vlaneseq }
 0x745   : > { %42840 = vmatpush3.bf16.xpose.msra.mxu0 %v46769_v28  ;;  %42860 = vmatpush3.bf16.xpose.msra.mxu1 %v42857_v33  ;;  %v6782_v0 = vand.u32 4294901760, %v6777_v34  ;;  %v7492_v33 = vsub.f32 %v46750_v19, %v7491_v30  ;;  %v991_v30 = vld [vmem:[%s983_s12] sm:$0x1]  ;;  %s48777_s12 = sld [smem:[#allocation38_spill]] }
 0x746   : > { %39628 = vmatprep.mubr.f32.mxu0 %v5814_v20  ;;  %42842 = vmatprep.subr.bf16.mxu0 %v42841_v6  ;;  %vm7291_vm9 = vcmp.eq.f32.partialorder %v991_v30, 0.0 }
 0x747   : > { %39663 = vmatprep.mubr.f32.mxu1 %v46806_v53  ;;  %42862 = vmatprep.subr.bf16.mxu1 %v46813_v1  ;;  %v6870_v20 = vsub.f32 %v6777_v34, %v6782_v0  ;;  %v42873_v12 = vpack.c.bf16 %v6785_v27, %v6782_v0 }
 0x749   : > { %v6871_v40 = vand.u32 4294901760, %v6870_v20 }
 0x74b   : > { %v6872_v53 = vsub.f32 %v6870_v20, %v6871_v40 }
 0x74c   : > { %39629 = vmatmul.mubr.f32.vlgmr.msra.gmra.mrb[12].mxu0 %v5824_v5  ;;  %39664 = vmatmul.mubr.f32.vlgmr.msra.gmra.mrb[6].mxu1 %v6341_v9  ;;  %v6849_v5 = vsub.f32 %v6773_v29, %v46849_v36  ;;  %v6878_v9 = vand.u32 4294901760, %v46851_v56 }
 0x74d   : > { %42844 = vmatpush3.bf16.xpose.msra.mxu0 %v42841_v6  ;;  %42864 = vmatpush3.bf16.xpose.msra.mxu1 %v46813_v1  ;;  %v6873_v21 = vand.u32 4294901760, %v6872_v53  ;;  %v45912_v6 = vmov 0  }
 0x74e   : > { %39635 = vmatprep.mubr.f32.mxu0 %v46775_v45  ;;  %42846 = vmatprep.subr.bf16.mxu0 %v46769_v28  ;;  %v6850_v43 = vand.u32 4294901760, %v6849_v5  ;;  %v6879_v48 = vsub.f32 %v46851_v56, %v6878_v9  ;;  %v42889_v59 = vpack.c.bf16 %v6878_v9, %v6871_v40  ;;  %v7292_v32 = vsel %vm7291_vm9, 1, %v45912_v6 }
 0x74f   : > { %39670 = vmatprep.mubr.f32.mxu1 %v6332_v61  ;;  %42866 = vmatprep.subr.bf16.mxu1 %v42865_v37 }
 0x750   : > { %v6851_v61 = vsub.f32 %v6849_v5, %v6850_v43  ;;  %v6880_v47 = vand.u32 4294901760, %v6879_v48 }
 0x754   : > { %39636 = vmatmul.mubr.f32.vlgmr.msra.gmra.mrb[12].mxu0 %v46794_v22  ;;  %39671 = vmatmul.mubr.f32.vlgmr.msra.gmra.mrb[6].mxu1 %v6342_v39  ;;  %v46873_v39 = vpack.c.bf16 %v7405_v11, %v7402_v57  ;;  %v7493_v11 = vand.u32 4294901760, %v7492_v33  ;;  %v7500_v57 = vand.u32 4294901760, %v7499_v54 }
 0x755   : > { %42848 = vmatpush3.bf16.xpose.msra.mxu0 %v46769_v28  ;;  %42868 = vmatpush3.bf16.xpose.msra.mxu1 %v42865_v37  ;;  %v6852_v28 = vand.u32 4294901760, %v6851_v61 }
 0x756   : > { %39642 = vmatprep.mubr.f32.mxu0 %v46775_v45  ;;  %39677 = vmatprep.mubr.f32.mxu1 %v46797_v24  ;;  %v42877_v45 = vpack.c.bf16 %v6880_v47, %v6873_v21  ;;  %v46889_v19 = vpack.c.bf16 %v7500_v57, %v7493_v11 }
 0x757   : > { %42870 = vmatprep.subr.bf16.mxu1 %v46813_v1  ;;  %42874 = vmatprep.subr.bf16.mxu0 %v42873_v12 }
 0x75c   : > { %39643 = vmatmul.mubr.f32.vlgmr.msra.gmra.mrb[12].mxu0 %v46794_v22  ;;  %39678 = vmatmul.mubr.f32.vlgmr.msra.gmra.mrb[6].mxu1 %v46822_v16  ;;  %v6862_v22 = vand.u32 4294901760, %v6861_v35 }
 0x75d   : > { %42872 = vmatpush3.bf16.xpose.msra.mxu1 %v46813_v1  ;;  %42876 = vmatpush3.bf16.xpose.msra.mxu0 %v42873_v12  ;;  %v42881_v1 = vpack.c.bf16 %v46851_v56, %v6870_v20 }
 0x75e   : > { %39684 = vmatprep.mubr.f32.mxu1 %v46797_v24  ;;  %39691 = vmatprep.mubr.f32.mxu0 %v6852_v28  ;;  %v7294_v24 = vshrl.u32 %v7293_v60, 7 }
 0x75f   : > { %42878 = vmatprep.subr.bf16.mxu0 %v42877_v45  ;;  %42898 = vmatprep.subr.bf16.mxu1 %v46873_v39 }
 0x764   : > { %39692 = vmatmul.mubr.f32.vlgmr.msra.gmra.mrb[14].mxu0 %v6862_v22  ;;  %39685 = vmatmul.mubr.f32.vlgmr.msra.gmra.mrb[6].mxu1 %v46822_v16  ;;  %v7295_v16 = vsub.s32 0, %v7294_v24 }
 0x765   : > { %42880 = vmatpush3.bf16.xpose.msra.mxu0 %v42877_v45  ;;  %39698 = vmatprep.mubr.f32.mxu0 %v46849_v36 }
 0x766   : > { %42900 = vmatpush3.bf16.msra.mxu1 %v46873_v39  ;;  %42882 = vmatprep.subr.bf16.mxu0 %v42881_v1  ;;  %v46899_v8 = vrot.slane %v7292_v32, %v7295_v16 }
 0x767   : > { %42902 = vmatprep.subr.bf16.mxu1 %v46889_v19 }
 0x768   : > { %vm7297_vm10 = vcmp.eq.s32.totalorder %v46899_v8, 1 }
 0x76c   : > { %39699 = vmatmul.mubr.f32.vlgmr.msra.gmra.mrb[14].mxu0 %v6858_v51 }
 0x76d   : > { %42884 = vmatpush3.bf16.xpose.msra.mxu0 %v42881_v1  ;;  %39705 = vmatprep.mubr.f32.mxu0 %v6849_v5 }
 0x76e   : > { %42886 = vmatprep.subr.bf16.mxu0 %v42873_v12 }
 0x774   : > { %39706 = vmatmul.mubr.f32.vlgmr.msra.gmra.mrb[14].mxu0 %v6859_v15 }
 0x775   : > { %42888 = vmatpush3.bf16.xpose.msra.mxu0 %v42873_v12  ;;  %39712 = vmatprep.mubr.f32.mxu0 %v6850_v43 }
 0x776   : > { %42890 = vmatprep.subr.bf16.mxu0 %v42889_v59 }
 0x77c   : > { %39713 = vmatmul.mubr.f32.vlgmr.msra.gmra.mrb[14].mxu0 %v6860_v58 }
 0x77d   : > { %42892 = vmatpush3.bf16.xpose.msra.mxu0 %v42889_v59  ;;  %39719 = vmatprep.mubr.f32.mxu0 %v46849_v36 }
 0x77e   : > { %42894 = vmatprep.subr.bf16.mxu0 %v42873_v12 }
 0x784   : > { %39720 = vmatmul.mubr.f32.vlgmr.msra.gmra.mrb[14].mxu0 %v6858_v51 }
 0x785   : > { %42896 = vmatpush3.bf16.xpose.msra.mxu0 %v42873_v12  ;;  %39726 = vmatprep.mubr.f32.mxu0 %v46849_v36 }
 0x78c   : > { %39727 = vmatmul.mubr.f32.vlgmr.msra.gmra.mrb[14].mxu0 %v6858_v51 }
 0x7b7   : > { %v39602_v34 = vpop.f32.mrb[4].mxu1 }
 0x7b8   : > { %v7284_v29 = vmul.f32 0.35355338, %v39602_v34  ;;  %v5719_v27 = vpop.f32.mrb[5].mxu1 }
 0x7b9   : > { %v7283_v0 = vmul.f32 0.35355338, %v5719_v27 }
 0x7ba   : > { %v7299_v36 = vsel %vm7297_vm10, -1e+09, %v7284_v29 }
 0x7bb   : > { %v7309_v38 = vsel %vm997_vm0, %v7299_v36, -inf  ;;  %v7298_v56 = vsel %vm7297_vm10, -1e+09, %v7283_v0 }
 0x7bc   : > { %7310 = vmax.xlane.f32.xlu1 %v7309_v38  ;;  %v7306_v37 = vsel %vm997_vm0, %v7298_v56, -inf }
 0x7bd   : > { %7307 = vmax.xlane.f32.xlu0 %v7306_v37 }
 0x82f   : > { %v39644_v20 = vpop.f32.mrb[12].mxu0 }
 0x830   : > { %v6237_v23 = vpop.f32.mrb[13].mxu0  ;;  %v7286_v5 = vmul.f32 0.35355338, %v39644_v20 }
 0x831   : > { %v7285_v9 = vmul.f32 0.35355338, %v6237_v23 }
 0x832   : > { %v7301_v43 = vsel %vm7297_vm10, -1e+09, %v7286_v5 }
 0x833   : > { %v7300_v51 = vsel %vm7297_vm10, -1e+09, %v7285_v9  ;;  %v7315_v15 = vsel %vm997_vm0, %v7301_v43, -inf }
 0x834   : > { %v7312_v40 = vsel %vm997_vm0, %v7300_v51, -inf }
 0x835   : > { %7313 = vmax.xlane.f32.xlu0 %v7312_v40 }
 0x837   : > { %v39686_v12 = vpop.f32.mrb[6].mxu1 }
 0x838   : > { %v6755_v48 = vpop.f32.mrb[7].mxu1  ;;  %v7288_v45 = vmul.f32 0.35355338, %v39686_v12 }
 0x839   : > { %7316 = vmax.xlane.f32.xlu0 %v7315_v15  ;;  %v7287_v33 = vmul.f32 0.35355338, %v6755_v48 }
 0x83a   : > { %v7303_v22 = vsel %vm7297_vm10, -1e+09, %v7288_v45 }
 0x83b   : > { %v7302_v1 = vsel %vm7297_vm10, -1e+09, %v7287_v33  ;;  %v7321_v59 = vsel %vm997_vm0, %v7303_v22, -inf }
 0x83c   : > { %v7318_v60 = vsel %vm997_vm0, %v7302_v1, -inf }
 0x849   : > { %v7311_v53 = vpop.xlane.xlu1 %7310 }
 0x84a   : > { %v7331_v61 = vsub.f32 %v7299_v36, %v7311_v53  ;;  %v7308_v47 = vpop.xlane.xlu0 %7307 }
 0x84b   : > { %v7330_v58 = vsub.f32 %v7298_v56, %v7308_v47 }
 0x84c   : > { %v7340_v21 = vmul.f32 1.442695, %v7331_v61 }
 0x84d   : > { %v7338_v28 = vmul.f32 1.442695, %v7330_v58 }
 0x84e   : > { %45528 = vpow2.f32 %v7340_v21 }
 0x84f   : > { %45530 = vpow2.f32 %v7338_v28 }
 0x858   : > { %v45529_v54 = vpop.eup %45528 }
 0x859   : > { %v45531_v35 = vpop.eup %45530  ;;  %v7357_v11 = vsel %vm997_vm0, %v45529_v54, 0.0 }
 0x85a   : > { %7358 = vadd.xlane.f32.xlu1 %v7357_v11  ;;  %v7354_v57 = vsel %vm997_vm0, %v45531_v35, 0.0 }
 0x85b   : > { %7355 = vadd.xlane.f32.xlu0 %v7354_v57 }
 0x85e   : > { %7322 = vmax.xlane.f32.xlu1 %v7321_v59 }
 0x85f   : > { %v39728_v30 = vpop.f32.mrb[14].mxu0  ;;  %7319 = vmax.xlane.f32.xlu0 %v7318_v60 }
 0x860   : > { %v7290_v24 = vmul.f32 0.35355338, %v39728_v30  ;;  %v7273_v16 = vpop.f32.mrb[15].mxu0 }
 0x861   : > { %v7289_v6 = vmul.f32 0.35355338, %v7273_v16 }
 0x862   : > { %v46924_v32 = vsel %vm7297_vm10, -1e+09, %v7290_v24 }
 0x863   : > { %v7327_v34 = vsel %vm997_vm0, %v46924_v32, -inf  ;;  %v46930_v29 = vsel %vm7297_vm10, -1e+09, %v7289_v6 }
 0x864   : > { %7328 = vmax.xlane.f32.xlu1 %v7327_v34  ;;  %v7324_v27 = vsel %vm997_vm0, %v46930_v29, -inf }
 0x865   : > { %7325 = vmax.xlane.f32.xlu0 %v7324_v27 }
 0x8c2   : > { %v7314_v0 = vpop.xlane.xlu0 %7313 }
 0x8c3   : > { %v7332_v36 = vsub.f32 %v7300_v51, %v7314_v0 }
 0x8c5   : > { %v7342_v38 = vmul.f32 1.442695, %v7332_v36 }
 0x8c6   : > { %v7317_v56 = vpop.xlane.xlu0 %7316 }
 0x8c7   : > { %45532 = vpow2.f32 %v7342_v38  ;;  %v7333_v37 = vsub.f32 %v7301_v43, %v7317_v56 }
 0x8c9   : > { %v7344_v20 = vmul.f32 1.442695, %v7333_v37 }
 0x8cb   : > { %45534 = vpow2.f32 %v7344_v20 }
 0x8d1   : > { %v46934_v23 = vpop.eup %45532 }
 0x8d2   : > { %v7360_v5 = vsel %vm997_vm0, %v46934_v23, 0.0 }
 0x8d3   : > { %7361 = vadd.xlane.f32.xlu0 %v7360_v5 }
 0x8d5   : > { %v46938_v9 = vpop.eup %45534 }
 0x8d6   : > { %v7363_v40 = vsel %vm997_vm0, %v46938_v9, 0.0 }
 0x8d7   : > { %7364 = vadd.xlane.f32.xlu1 %v7363_v40 }
 0x8e7   : > { %v7359_v12 = vpop.xlane.xlu1 %7358 }
 0x8e8   : > { %45536 = vrcp.f32 %v7359_v12  ;;  %v7356_v51 = vpop.xlane.xlu0 %7355  ;;  %8410 = vrot.lane.b32.xlu1 %v46734_v46, %s48718_s8 }
 0x8e9   : > { %45538 = vrcp.f32 %v7356_v51  ;;  %8408 = vrot.lane.b32.xlu0 %v46736_v50, %s48718_s8 }
 0x8eb   : > { %v7323_v43 = vpop.xlane.xlu1 %7322 }
 0x8ec   : > { %v7335_v15 = vsub.f32 %v7303_v22, %v7323_v43  ;;  %v7320_v47 = vpop.xlane.xlu0 %7319 }
 0x8ed   : > { %v7334_v45 = vsub.f32 %v7302_v1, %v7320_v47 }
 0x8ee   : > { %v7348_v28 = vmul.f32 1.442695, %v7335_v15 }
 0x8ef   : > { %v7346_v30 = vmul.f32 1.442695, %v7334_v45 }
 0x8f0   : > { %45540 = vpow2.f32 %v7348_v28 }
 0x8f1   : > { %45542 = vpow2.f32 %v7346_v30 }
 0x8f2   : > { %v45537_v48 = vpop.eup %45536  ;;  %v7326_v36 = vpop.xlane.xlu0 %7325 }
 0x8f3   : > { %v45539_v53 = vpop.eup %45538  ;;  %v7387_v61 = vmul.f32 %v45537_v48, %v45529_v54 }
 0x8f4   : > { %v7386_v58 = vmul.f32 %v45539_v53, %v45531_v35 }
 0x8f5   : > { %v7399_v21 = vsel %vm997_vm0, %v7387_v61, 0 }
 0x8f6   : > { %v7396_v33 = vsel %vm997_vm0, %v7386_v58, 0  ;;  %v7478_v11 = vand.u32 4294901760, %v7399_v21 }
 0x8f7   : > { %v7468_v57 = vand.u32 4294901760, %v7396_v33 }
 0x8f8   : > { %v7479_v59 = vsub.f32 %v7399_v21, %v7478_v11 }
 0x8f9   : > { %v7469_v60 = vsub.f32 %v7396_v33, %v7468_v57 }
 0x8fa   : > { %v7480_v24 = vand.u32 4294901760, %v7479_v59  ;;  %v46949_v35 = vpop.eup %45540 }
 0x8fb   : > { %v7470_v16 = vand.u32 4294901760, %v7469_v60  ;;  %v7369_v1 = vsel %vm997_vm0, %v46949_v35, 0.0  ;;  %v46954_v27 = vpop.eup %45542 }
 0x8fc   : > { %v7481_v6 = vsub.f32 %v7479_v59, %v7480_v24  ;;  %v7366_v0 = vsel %vm997_vm0, %v46954_v27, 0.0 }
 0x8fd   : > { %v7471_v22 = vsub.f32 %v7469_v60, %v7470_v16 }
 0x8fe   : > { %v7482_v34 = vand.u32 4294901760, %v7481_v6 }
 0x8ff   : > { %v7472_v54 = vand.u32 4294901760, %v7471_v22 }
 0x901   : > { %39733 = vmatprep.mubr.f32.mxu1 %v7472_v54 }
 0x902   : > { %39734 = vmatmul.mubr.f32.vlgmr.msra.gmra.mrb[8].mxu1 %v7482_v34 }
 0x903   : > { %42904 = vmatpush3.bf16.msra.mxu1 %v46889_v19  ;;  %39740 = vmatprep.mubr.f32.mxu1 %v7468_v57 }
 0x904   : > { %42906 = vmatprep.subr.bf16.mxu1 %v46756_v4 }
 0x908   : > { %7370 = vadd.xlane.f32.xlu0 %v7369_v1 }
 0x90a   : > { %39741 = vmatmul.mubr.f32.vlgmr.msra.gmra.mrb[8].mxu1 %v7478_v11 }
 0x90b   : > { %42908 = vmatpush3.bf16.msra.mxu1 %v46756_v4  ;;  %39747 = vmatprep.mubr.f32.mxu1 %v7469_v60  ;;  %v7329_v4 = vpop.xlane.xlu1 %7328 }
 0x90c   : > { %42910 = vmatprep.subr.bf16.mxu1 %v46873_v39  ;;  %7367 = vadd.xlane.f32.xlu1 %v7366_v0  ;;  %v7337_v19 = vsub.f32 %v46924_v32, %v7329_v4 }
 0x90e   : > { %v7352_v38 = vmul.f32 1.442695, %v7337_v19 }
 0x910   : > { %45544 = vpow2.f32 %v7352_v38 }
 0x912   : > { %39748 = vmatmul.mubr.f32.vlgmr.msra.gmra.mrb[8].mxu1 %v7479_v59 }
 0x913   : > { %42912 = vmatpush3.bf16.msra.mxu1 %v46873_v39  ;;  %39754 = vmatprep.mubr.f32.mxu1 %v7470_v16 }
 0x914   : > { %42914 = vmatprep.subr.bf16.mxu1 %v46762_v31 }
 0x91a   : > { %39755 = vmatmul.mubr.f32.vlgmr.msra.gmra.mrb[8].mxu1 %v7480_v24  ;;  %v46971_v37 = vpop.eup %45544 }
 0x91b   : > { %42916 = vmatpush3.bf16.msra.mxu1 %v46762_v31  ;;  %39761 = vmatprep.mubr.f32.mxu1 %v7468_v57  ;;  %v7336_v31 = vsub.f32 %v46930_v29, %v7326_v36  ;;  %v7375_v20 = vsel %vm997_vm0, %v46971_v37, 0.0 }
 0x91c   : > { %42918 = vmatprep.subr.bf16.mxu1 %v46873_v39 }
 0x91d   : > { %9421 = vrot.lane.b32.xlu1 %v46734_v46, %s48716_s30  ;;  %v7350_v56 = vmul.f32 1.442695, %v7336_v31 }
 0x91e   : > { %9419 = vrot.lane.b32.xlu0 %v46736_v50, %s48716_s30 }
 0x91f   : > { %45546 = vpow2.f32 %v7350_v56 }
 0x922   : > { %39762 = vmatmul.mubr.f32.vlgmr.msra.gmra.mrb[8].mxu1 %v7478_v11 }
 0x923   : > { %42920 = vmatpush3.bf16.msra.mxu1 %v46873_v39  ;;  %39768 = vmatprep.mubr.f32.mxu1 %v7468_v57 }
 0x929   : > { %v46975_v5 = vpop.eup %45546 }
 0x92a   : > { %39769 = vmatmul.mubr.f32.vlgmr.msra.gmra.mrb[8].mxu1 %v7478_v11  ;;  %v7372_v39 = vsel %vm997_vm0, %v46975_v5, 0.0 }
 0x93d   : > { %7376 = vadd.xlane.f32.xlu0 %v7375_v20 }
 0x941   : > { %7373 = vadd.xlane.f32.xlu1 %v7372_v39 }
 0x952   : > { %10432 = vrot.lane.b32.xlu1 %v46734_v46, %s48714_s29 }
 0x953   : > { %10430 = vrot.lane.b32.xlu0 %v46736_v50, %s48714_s29  ;;  %s48775_s29 = smov 112  }
 0x960   : > { %v7362_v32 = vpop.xlane.xlu0 %7361 }
 0x961   : > { %45548 = vrcp.f32 %v7362_v32 }
 0x964   : > { %v7365_v29 = vpop.xlane.xlu1 %7364  ;;  %v8409_v40 = vpop.permute.xlu0 %8408 }
 0x965   : > { %45550 = vrcp.f32 %v7365_v29  ;;  %v8421_v12 = vand.u32 4294901760, %v8409_v40 }
 0x967   : > { %v8509_v51 = vsub.f32 %v8409_v40, %v8421_v12 }
 0x968   : > { %v8411_v43 = vpop.permute.xlu1 %8410 }
 0x969   : > { %v8510_v48 = vand.u32 4294901760, %v8509_v51  ;;  %v8424_v15 = vand.u32 4294901760, %v8411_v43 }
 0x96b   : > { %v45549_v53 = vpop.eup %45548  ;;  %v46983_v61 = vpack.c.bf16 %v8424_v15, %v8421_v12  ;;  %v8516_v47 = vsub.f32 %v8411_v43, %v8424_v15  ;;  %v8511_v46 = vsub.f32 %v8509_v51, %v8510_v48 }
 0x96c   : > { %v7388_v58 = vmul.f32 %v45549_v53, %v46934_v23 }
 0x96d   : > { %v8517_v21 = vand.u32 4294901760, %v8516_v47  ;;  %42922 = vmatprep.subr.bf16.mxu0 %v46983_v61  ;;  %v8512_v57 = vand.u32 4294901760, %v8511_v46  ;;  %v42929_v4 = vpack.c.bf16 %v8516_v47, %v8509_v51 }
 0x96e   : > { %42924 = vmatpush3.bf16.msra.mxu0 %v46983_v61  ;;  %v8415_v50 = vsel %vm997_vm0, %v7388_v58, 0 }
 0x96f   : > { %v45551_v28 = vpop.eup %45550  ;;  %v8518_v45 = vsub.f32 %v8516_v47, %v8517_v21  ;;  %v8487_v33 = vand.u32 4294901760, %v8415_v50  ;;  %v42937_v38 = vpack.c.bf16 %v8517_v21, %v8510_v48 }
 0x970   : > { %v7389_v11 = vmul.f32 %v45551_v28, %v46938_v9  ;;  %v5210_v9 = vld [vmem:[%s48677_s13] sm:$0xff] }
 0x971   : > { %v8519_v59 = vand.u32 4294901760, %v8518_v45  ;;  %v8488_v60 = vsub.f32 %v8415_v50, %v8487_v33  ;;  %v46995_v19 = vand.u32 4294901760, %v5210_v9 }
 0x972   : > { %v8418_v30 = vsel %vm997_vm0, %v7389_v11, 0 }
 0x973   : > { %v42925_v24 = vpack.c.bf16 %v8519_v59, %v8512_v57  ;;  %v8489_v23 = vand.u32 4294901760, %v8488_v60  ;;  %v8497_v16 = vand.u32 4294901760, %v8418_v30  ;;  %39771 = vmatprep.subr.mxu1 %v46995_v19  ;;  %v46999_v36 = vsub.f32 %v5210_v9, %v46995_v19 }
 0x974   : > { %39772 = vmatpush3.msra.mxu1 %v46995_v19 }
 0x975   : > { %42926 = vmatprep.subr.bf16.mxu0 %v42925_v24  ;;  %v8490_v6 = vsub.f32 %v8488_v60, %v8489_v23  ;;  %v8498_v22 = vsub.f32 %v8418_v30, %v8497_v16  ;;  %v47003_v31 = vand.u32 4294901760, %v46999_v36 }
 0x977   : > { %v8491_v54 = vand.u32 4294901760, %v8490_v6  ;;  %v8499_v34 = vand.u32 4294901760, %v8498_v22  ;;  %v7999_v56 = vsub.f32 %v46999_v36, %v47003_v31 }
 0x979   : > { %39805 = vmatprep.mubr.f32.mxu0 %v8491_v54  ;;  %v8500_v1 = vsub.f32 %v8498_v22, %v8499_v34  ;;  %v47008_v20 = vand.u32 4294901760, %v7999_v56 }
 0x97b   : > { %v8501_v0 = vand.u32 4294901760, %v8500_v1  ;;  %39776 = vmatprep.subr.mxu1 %v47008_v20 }
 0x97d   : > { %39806 = vmatmul.mubr.f32.vlgmr.msra.gmra.mrb[16].mxu0 %v8501_v0 }
 0x97e   : > { %42928 = vmatpush3.bf16.msra.mxu0 %v42925_v24  ;;  %39812 = vmatprep.mubr.f32.mxu0 %v8487_v33 }
 0x97f   : > { %42930 = vmatprep.subr.bf16.mxu0 %v42929_v4 }
 0x985   : > { %39813 = vmatmul.mubr.f32.vlgmr.msra.gmra.mrb[16].mxu0 %v8497_v16 }
 0x986   : > { %42932 = vmatpush3.bf16.msra.mxu0 %v42929_v4  ;;  %39819 = vmatprep.mubr.f32.mxu0 %v8488_v60 }
 0x987   : > { %42934 = vmatprep.subr.bf16.mxu0 %v46983_v61 }
 0x98d   : > { %39820 = vmatmul.mubr.f32.vlgmr.msra.gmra.mrb[16].mxu0 %v8498_v22 }
 0x98e   : > { %42936 = vmatpush3.bf16.msra.mxu0 %v46983_v61  ;;  %39826 = vmatprep.mubr.f32.mxu0 %v8489_v23 }
 0x98f   : > { %42938 = vmatprep.subr.bf16.mxu0 %v42937_v38 }
 0x995   : > { %39827 = vmatmul.mubr.f32.vlgmr.msra.gmra.mrb[16].mxu0 %v8499_v34  ;;  %v7371_v39 = vpop.xlane.xlu0 %7370 }
 0x996   : > { %42940 = vmatpush3.bf16.msra.mxu0 %v42937_v38  ;;  %45552 = vrcp.f32 %v7371_v39  ;;  %39833 = vmatprep.mubr.f32.mxu0 %v8487_v33 }
 0x997   : > { %42942 = vmatprep.subr.bf16.mxu0 %v46983_v61 }
 0x999   : > { %v7368_v32 = vpop.xlane.xlu1 %7367  ;;  %v9420_v29 = vpop.permute.xlu0 %9419 }
 0x99a   : > { %45554 = vrcp.f32 %v7368_v32  ;;  %v9432_v40 = vand.u32 4294901760, %v9420_v29 }
 0x99c   : > { %v9520_v12 = vsub.f32 %v9420_v29, %v9432_v40 }
 0x99d   : > { %v9422_v51 = vpop.permute.xlu1 %9421  ;;  %39834 = vmatmul.mubr.f32.vlgmr.msra.gmra.mrb[16].mxu0 %v8497_v16 }
 0x99e   : > { %v9521_v43 = vand.u32 4294901760, %v9520_v12  ;;  %v9435_v48 = vand.u32 4294901760, %v9422_v51  ;;  %42944 = vmatpush3.bf16.msra.mxu0 %v46983_v61  ;;  %39840 = vmatprep.mubr.f32.mxu0 %v8487_v33 }
 0x9a0   : > { %v45553_v15 = vpop.eup %45552  ;;  %v42945_v53 = vpack.c.bf16 %v9435_v48, %v9432_v40  ;;  %v9527_v47 = vsub.f32 %v9422_v51, %v9435_v48  ;;  %v9522_v46 = vsub.f32 %v9520_v12, %v9521_v43 }
 0x9a1   : > { %v7391_v58 = vmul.f32 %v45553_v15, %v46949_v35 }
 0x9a2   : > { %v9528_v21 = vand.u32 4294901760, %v9527_v47  ;;  %42946 = vmatprep.subr.bf16.mxu0 %v42945_v53  ;;  %v9523_v59 = vand.u32 4294901760, %v9522_v46 }
 0x9a3   : > { %v9429_v50 = vsel %vm997_vm0, %v7391_v58, 0 }
 0x9a4   : > { %v45555_v28 = vpop.eup %45554  ;;  %v9529_v45 = vsub.f32 %v9527_v47, %v9528_v21  ;;  %v9508_v11 = vand.u32 4294901760, %v9429_v50 }
 0x9a5   : > { %v7390_v57 = vmul.f32 %v45555_v28, %v46954_v27  ;;  %39841 = vmatmul.mubr.f32.vlgmr.msra.gmra.mrb[16].mxu0 %v8497_v16  ;;  %v42953_v27 = vpack.c.bf16 %v9527_v47, %v9520_v12  ;;  %v42961_v16 = vpack.c.bf16 %v9528_v21, %v9521_v43 }
 0x9a6   : > { %42948 = vmatpush3.bf16.msra.mxu0 %v42945_v53  ;;  %v9530_v61 = vand.u32 4294901760, %v9529_v45  ;;  %v9509_v33 = vsub.f32 %v9429_v50, %v9508_v11 }
 0x9a7   : > { %v9426_v60 = vsel %vm997_vm0, %v7390_v57, 0 }
 0x9a8   : > { %v42949_v30 = vpack.c.bf16 %v9530_v61, %v9523_v59  ;;  %v9498_v24 = vand.u32 4294901760, %v9426_v60  ;;  %v9510_v35 = vand.u32 4294901760, %v9509_v33 }
 0x9aa   : > { %42950 = vmatprep.subr.bf16.mxu0 %v42949_v30  ;;  %v9499_v23 = vsub.f32 %v9426_v60, %v9498_v24  ;;  %v9511_v22 = vsub.f32 %v9509_v33, %v9510_v35 }
 0x9ac   : > { %v9500_v6 = vand.u32 4294901760, %v9499_v23  ;;  %v9512_v1 = vand.u32 4294901760, %v9511_v22 }
 0x9ae   : > { %v9501_v54 = vsub.f32 %v9499_v23, %v9500_v6 }
 0x9b0   : > { %v9502_v34 = vand.u32 4294901760, %v9501_v54 }
 0x9b2   : > { %39877 = vmatprep.mubr.f32.mxu0 %v9502_v34 }
 0x9b3   : > { %39878 = vmatmul.mubr.f32.vlgmr.msra.gmra.mrb[18].mxu0 %v9512_v1 }
 0x9b4   : > { %42952 = vmatpush3.bf16.msra.mxu0 %v42949_v30  ;;  %39884 = vmatprep.mubr.f32.mxu0 %v9498_v24 }
 0x9b5   : > { %42954 = vmatprep.subr.bf16.mxu0 %v42953_v27 }
 0x9bb   : > { %39885 = vmatmul.mubr.f32.vlgmr.msra.gmra.mrb[18].mxu0 %v9508_v11 }
 0x9bc   : > { %42956 = vmatpush3.bf16.msra.mxu0 %v42953_v27  ;;  %39891 = vmatprep.mubr.f32.mxu0 %v9499_v23 }
 0x9bd   : > { %42958 = vmatprep.subr.bf16.mxu0 %v42945_v53 }
 0x9c3   : > { %39892 = vmatmul.mubr.f32.vlgmr.msra.gmra.mrb[18].mxu0 %v9509_v33 }
 0x9c4   : > { %42960 = vmatpush3.bf16.msra.mxu0 %v42945_v53  ;;  %39898 = vmatprep.mubr.f32.mxu0 %v9500_v6 }
 0x9c5   : > { %42962 = vmatprep.subr.bf16.mxu0 %v42961_v16 }
 0x9ca   : > { %v7377_v0 = vpop.xlane.xlu0 %7376 }
 0x9cb   : > { %45556 = vrcp.f32 %v7377_v0  ;;  %39899 = vmatmul.mubr.f32.vlgmr.msra.gmra.mrb[18].mxu0 %v9510_v35 }
 0x9cc   : > { %42964 = vmatpush3.bf16.msra.mxu0 %v42961_v16  ;;  %39905 = vmatprep.mubr.f32.mxu0 %v9498_v24 }
 0x9cd   : > { %42966 = vmatprep.subr.bf16.mxu0 %v42945_v53 }
 0x9ce   : > { %v7374_v4 = vpop.xlane.xlu1 %7373  ;;  %v10431_v9 = vpop.permute.xlu0 %10430 }
 0x9cf   : > { %45558 = vrcp.f32 %v7374_v4  ;;  %v10443_v38 = vand.u32 4294901760, %v10431_v9 }
 0x9d1   : > { %v10531_v56 = vsub.f32 %v10431_v9, %v10443_v38 }
 0x9d2   : > { %v10433_v39 = vpop.permute.xlu1 %10432 }
 0x9d3   : > { %v10532_v32 = vand.u32 4294901760, %v10531_v56  ;;  %v10446_v29 = vand.u32 4294901760, %v10433_v39  ;;  %39906 = vmatmul.mubr.f32.vlgmr.msra.gmra.mrb[18].mxu0 %v9508_v11 }
 0x9d4   : > { %42968 = vmatpush3.bf16.msra.mxu0 %v42945_v53  ;;  %39912 = vmatprep.mubr.f32.mxu0 %v9498_v24 }
 0x9d5   : > { %v45557_v40 = vpop.eup %45556  ;;  %v42969_v12 = vpack.c.bf16 %v10446_v29, %v10443_v38  ;;  %v10538_v51 = vsub.f32 %v10433_v39, %v10446_v29  ;;  %v10533_v48 = vsub.f32 %v10531_v56, %v10532_v32  ;;  %v5211_v29 = vld [vmem:[%s48677_s13 + $0x8] sm:$0xff] }
 0x9d6   : > { %v7393_v43 = vmul.f32 %v45557_v40, %v46971_v37 }
 0x9d7   : > { %v10539_v15 = vand.u32 4294901760, %v10538_v51  ;;  %42970 = vmatprep.subr.bf16.mxu0 %v42969_v12  ;;  %v10534_v28 = vand.u32 4294901760, %v10533_v48 }
 0x9d8   : > { %v10440_v47 = vsel %vm997_vm0, %v7393_v43, 0 }
 0x9d9   : > { %v45559_v58 = vpop.eup %45558  ;;  %v10540_v46 = vsub.f32 %v10538_v51, %v10539_v15  ;;  %v10519_v21 = vand.u32 4294901760, %v10440_v47 }
 0x9da   : > { %v7392_v50 = vmul.f32 %v45559_v58, %v46975_v5  ;;  %v42977_v5 = vpack.c.bf16 %v10538_v51, %v10531_v56 }
 0x9db   : > { %39913 = vmatmul.mubr.f32.vlgmr.msra.gmra.mrb[18].mxu0 %v9508_v11  ;;  %v10541_v45 = vand.u32 4294901760, %v10540_v46  ;;  %v10520_v53 = vsub.f32 %v10440_v47, %v10519_v21  ;;  %v42985_v11 = vpack.c.bf16 %v10539_v15, %v10532_v32 }
 0x9dc   : > { %42972 = vmatpush3.bf16.msra.mxu0 %v42969_v12  ;;  %v10437_v57 = vsel %vm997_vm0, %v7392_v50, 0 }
 0x9dd   : > { %v42973_v59 = vpack.c.bf16 %v10541_v45, %v10534_v28  ;;  %v10509_v61 = vand.u32 4294901760, %v10437_v57  ;;  %v10521_v37 = vand.u32 4294901760, %v10520_v53 }
 0x9df   : > { %42974 = vmatprep.subr.bf16.mxu0 %v42973_v59  ;;  %v10510_v33 = vsub.f32 %v10437_v57, %v10509_v61  ;;  %v10522_v30 = vsub.f32 %v10520_v53, %v10521_v37 }
 0x9e1   : > { %v10511_v60 = vand.u32 4294901760, %v10510_v33  ;;  %v10523_v23 = vand.u32 4294901760, %v10522_v30 }
 0x9e3   : > { %v10512_v24 = vsub.f32 %v10510_v33, %v10511_v60 }
 0x9e5   : > { %v10513_v35 = vand.u32 4294901760, %v10512_v24 }
 0x9e7   : > { %39949 = vmatprep.mubr.f32.mxu0 %v10513_v35 }
 0x9e8   : > { %39950 = vmatmul.mubr.f32.vlgmr.msra.gmra.mrb[20].mxu0 %v10523_v23 }
 0x9e9   : > { %42976 = vmatpush3.bf16.msra.mxu0 %v42973_v59  ;;  %39956 = vmatprep.mubr.f32.mxu0 %v10509_v61  ;;  %v5212_v59 = vld [vmem:[%s48677_s13 + $0x10] sm:$0xff] }
 0x9ea   : > { %42978 = vmatprep.subr.bf16.mxu0 %v42977_v5 }
 0x9f0   : > { %39957 = vmatmul.mubr.f32.vlgmr.msra.gmra.mrb[20].mxu0 %v10519_v21 }
 0x9f1   : > { %42980 = vmatpush3.bf16.msra.mxu0 %v42977_v5  ;;  %39963 = vmatprep.mubr.f32.mxu0 %v10510_v33 }
 0x9f2   : > { %42982 = vmatprep.subr.bf16.mxu0 %v42969_v12 }
 0x9f8   : > { %39964 = vmatmul.mubr.f32.vlgmr.msra.gmra.mrb[20].mxu0 %v10520_v53 }
 0x9f9   : > { %42984 = vmatpush3.bf16.msra.mxu0 %v42969_v12  ;;  %39970 = vmatprep.mubr.f32.mxu0 %v10511_v60 }
 0x9fa   : > { %42986 = vmatprep.subr.bf16.mxu0 %v42985_v11 }
 0x9fd   : > { %v39770_v6 = vpop.f32.mrb[8].mxu1 }
 0x9fe   : > { %v7907_v22 = vsel %vm5214_vm8, %v39770_v6, 0  ;;  %v7893_v54 = vpop.f32.mrb[9].mxu1 }
 0x9ff   : > { %v7985_v34 = vand.u32 4294901760, %v7907_v22  ;;  %v7904_v1 = vsel %vm5214_vm8, %v7893_v54, 0 }
 0xa00   : > { %v7975_v27 = vand.u32 4294901760, %v7904_v1  ;;  %39971 = vmatmul.mubr.f32.vlgmr.msra.gmra.mrb[20].mxu0 %v10521_v37 }
 0xa01   : > { %v7986_v16 = vsub.f32 %v7907_v22, %v7985_v34  ;;  %42988 = vmatpush3.bf16.msra.mxu0 %v42985_v11  ;;  %39977 = vmatprep.mubr.f32.mxu0 %v10509_v61 }
 0xa02   : > { %v7976_v0 = vsub.f32 %v7904_v1, %v7975_v27  ;;  %42990 = vmatprep.subr.bf16.mxu0 %v42969_v12 }
 0xa03   : > { %v7987_v4 = vand.u32 4294901760, %v7986_v16 }
 0xa04   : > { %v7977_v9 = vand.u32 4294901760, %v7976_v0 }
 0xa05   : > { %v7988_v38 = vsub.f32 %v7986_v16, %v7987_v4 }
 0xa06   : > { %v7978_v56 = vsub.f32 %v7976_v0, %v7977_v9 }
 0xa07   : > { %v7989_v32 = vand.u32 4294901760, %v7988_v38 }
 0xa08   : > { %39978 = vmatmul.mubr.f32.vlgmr.msra.gmra.mrb[20].mxu0 %v10519_v21  ;;  %v7979_v39 = vand.u32 4294901760, %v7978_v56 }
 0xa09   : > { %42992 = vmatpush3.bf16.msra.mxu0 %v42969_v12  ;;  %39984 = vmatprep.mubr.f32.mxu0 %v10509_v61  ;;  %v9940_v61 = vand.u32 4294901760, %v5212_v59 }
 0xa0a   : > { %39773 = vmatprep.mubr.f32.mxu1 %v7979_v39 }
 0xa0b   : > { %39774 = vmatmul.mubr.f32.vlgmr.msra.gmra.mrb[10].mxu1 %v7989_v32  ;;  %v10027_v37 = vsub.f32 %v5212_v59, %v9940_v61 }
 0xa0c   : > { %39778 = vmatprep.mubr.f32.mxu1 %v7975_v27  ;;  %39777 = vmatpush3.msra.mxu1 %v47008_v20  ;;  %v8929_v20 = vand.u32 4294901760, %v5211_v29 }
 0xa0d   : > { %39781 = vmatprep.subr.mxu1 %v46999_v36  ;;  %v10028_v33 = vand.u32 4294901760, %v10027_v37 }
 0xa0f   : > { %v10029_v60 = vsub.f32 %v10027_v37, %v10028_v33 }
 0xa10   : > { %39985 = vmatmul.mubr.f32.vlgmr.msra.gmra.mrb[20].mxu0 %v10519_v21 }
 0xa11   : > { %v10030_v30 = vand.u32 4294901760, %v10029_v60 }
 0xa13   : > { %39779 = vmatmul.mubr.f32.vlgmr.msra.gmra.mrb[10].mxu1 %v7985_v34 }
 0xa14   : > { %39783 = vmatprep.mubr.f32.mxu1 %v7976_v0  ;;  %39782 = vmatpush3.msra.mxu1 %v46999_v36  ;;  %v9016_v36 = vsub.f32 %v5211_v29, %v8929_v20 }
 0xa15   : > { %39786 = vmatprep.subr.mxu1 %v46995_v19 }
 0xa16   : > { %v9017_v40 = vand.u32 4294901760, %v9016_v36 }
 0xa18   : > { %v9018_v12 = vsub.f32 %v9016_v36, %v9017_v40 }
 0xa1a   : > { %v9019_v51 = vand.u32 4294901760, %v9018_v12 }
 0xa1b   : > { %39784 = vmatmul.mubr.f32.vlgmr.msra.gmra.mrb[10].mxu1 %v7986_v16 }
 0xa1c   : > { %39788 = vmatprep.mubr.f32.mxu1 %v7977_v9  ;;  %39787 = vmatpush3.msra.mxu1 %v46995_v19  ;;  %v5213_v9 = vld [vmem:[%s48677_s13 + $0x18] sm:$0xff] }
 0xa1d   : > { %39791 = vmatprep.subr.mxu1 %v47003_v31  ;;  %v10951_v38 = vand.u32 4294901760, %v5213_v9 }
 0xa1f   : > { %v11038_v56 = vsub.f32 %v5213_v9, %v10951_v38 }
 0xa21   : > { %v11039_v39 = vand.u32 4294901760, %v11038_v56 }
 0xa23   : > { %39789 = vmatmul.mubr.f32.vlgmr.msra.gmra.mrb[10].mxu1 %v7987_v4  ;;  %v11040_v32 = vsub.f32 %v11038_v56, %v11039_v39 }
 0xa24   : > { %39793 = vmatprep.mubr.f32.mxu1 %v7975_v27  ;;  %39792 = vmatpush3.msra.mxu1 %v47003_v31 }
 0xa25   : > { %39796 = vmatprep.subr.mxu1 %v46995_v19  ;;  %v11041_v29 = vand.u32 4294901760, %v11040_v32 }
 0xa2b   : > { %39794 = vmatmul.mubr.f32.vlgmr.msra.gmra.mrb[10].mxu1 %v7985_v34 }
 0xa2c   : > { %39798 = vmatprep.mubr.f32.mxu1 %v7975_v27  ;;  %39797 = vmatpush3.msra.mxu1 %v46995_v19 }
 0xa2d   : > { %39843 = vmatprep.subr.mxu1 %v8929_v20 }
 0xa33   : > { %39799 = vmatmul.mubr.f32.vlgmr.msra.gmra.mrb[10].mxu1 %v7985_v34 }
 0xa34   : > { %39844 = vmatpush3.msra.mxu1 %v8929_v20 }
 0xa35   : > { %39848 = vmatprep.subr.mxu1 %v9019_v51 }
 0xa78   : > { %v39842_v43 = vpop.f32.mrb[16].mxu0 }
 0xa79   : > { %v8926_v48 = vsel %vm5214_vm8, %v39842_v43, 0  ;;  %v8912_v15 = vpop.f32.mrb[17].mxu0 }
 0xa7a   : > { %v9004_v47 = vand.u32 4294901760, %v8926_v48  ;;  %v8923_v31 = vsel %vm5214_vm8, %v8912_v15, 0 }
 0xa7b   : > { %v8994_v58 = vand.u32 4294901760, %v8923_v31 }
 0xa7c   : > { %v9005_v46 = vsub.f32 %v8926_v48, %v9004_v47 }
 0xa7d   : > { %v8995_v21 = vsub.f32 %v8923_v31, %v8994_v58 }
 0xa7e   : > { %v9006_v50 = vand.u32 4294901760, %v9005_v46 }
 0xa7f   : > { %v8996_v28 = vand.u32 4294901760, %v8995_v21 }
 0xa80   : > { %v9007_v45 = vsub.f32 %v9005_v46, %v9006_v50 }
 0xa81   : > { %v8997_v19 = vsub.f32 %v8995_v21, %v8996_v28 }
 0xa82   : > { %v9008_v57 = vand.u32 4294901760, %v9007_v45 }
 0xa83   : > { %v8998_v53 = vand.u32 4294901760, %v8997_v19 }
 0xa85   : > { %39845 = vmatprep.mubr.f32.mxu1 %v8998_v53 }
 0xa86   : > { %39846 = vmatmul.mubr.f32.vlgmr.msra.gmra.mrb[10].mxu1 %v9008_v57 }
 0xa87   : > { %39850 = vmatprep.mubr.f32.mxu1 %v8994_v58  ;;  %39849 = vmatpush3.msra.mxu1 %v9019_v51 }
 0xa88   : > { %39853 = vmatprep.subr.mxu1 %v9016_v36 }
 0xa8e   : > { %39851 = vmatmul.mubr.f32.vlgmr.msra.gmra.mrb[10].mxu1 %v9004_v47 }
 0xa8f   : > { %39855 = vmatprep.mubr.f32.mxu1 %v8995_v21  ;;  %39854 = vmatpush3.msra.mxu1 %v9016_v36 }
 0xa90   : > { %39858 = vmatprep.subr.mxu1 %v8929_v20 }
 0xa96   : > { %39856 = vmatmul.mubr.f32.vlgmr.msra.gmra.mrb[10].mxu1 %v9005_v46 }
 0xa97   : > { %39860 = vmatprep.mubr.f32.mxu1 %v8996_v28  ;;  %39859 = vmatpush3.msra.mxu1 %v8929_v20  ;;  %v37172_v28 = vld [vmem:[#allocation7] ss:$0 sm:$0xff] }
 0xa98   : > { %39863 = vmatprep.subr.mxu1 %v9017_v40 }
 0xa9e   : > { %39861 = vmatmul.mubr.f32.vlgmr.msra.gmra.mrb[10].mxu1 %v9006_v50 }
 0xa9f   : > { %39865 = vmatprep.mubr.f32.mxu1 %v8994_v58  ;;  %39864 = vmatpush3.msra.mxu1 %v9017_v40 }
 0xaa0   : > { %39868 = vmatprep.subr.mxu1 %v8929_v20 }
 0xaa6   : > { %39866 = vmatmul.mubr.f32.vlgmr.msra.gmra.mrb[10].mxu1 %v9004_v47 }
 0xaa7   : > { %39870 = vmatprep.mubr.f32.mxu1 %v8994_v58  ;;  %39869 = vmatpush3.msra.mxu1 %v8929_v20 }
 0xaa8   : > { %39915 = vmatprep.subr.mxu1 %v9940_v61 }
 0xaae   : > { %39871 = vmatmul.mubr.f32.vlgmr.msra.gmra.mrb[10].mxu1 %v9004_v47  ;;  %v39914_v24 = vpop.f32.mrb[18].mxu0 }
 0xaaf   : > { %v9937_v35 = vsel %vm5214_vm8, %v39914_v24, 0  ;;  %v9923_v23 = vpop.f32.mrb[19].mxu0  ;;  %39916 = vmatpush3.msra.mxu1 %v9940_v61 }
 0xab0   : > { %v10015_v5 = vand.u32 4294901760, %v9937_v35  ;;  %v9934_v11 = vsel %vm5214_vm8, %v9923_v23, 0  ;;  %39920 = vmatprep.subr.mxu1 %v10030_v30 }
 0xab1   : > { %v10005_v6 = vand.u32 4294901760, %v9934_v11 }
 0xab2   : > { %v10016_v22 = vsub.f32 %v9937_v35, %v10015_v5 }
 0xab3   : > { %v10006_v54 = vsub.f32 %v9934_v11, %v10005_v6 }
 0xab4   : > { %v10017_v34 = vand.u32 4294901760, %v10016_v22 }
 0xab5   : > { %v10007_v1 = vand.u32 4294901760, %v10006_v54 }
 0xab6   : > { %v10018_v27 = vsub.f32 %v10016_v22, %v10017_v34 }
 0xab7   : > { %v10008_v16 = vsub.f32 %v10006_v54, %v10007_v1 }
 0xab8   : > { %v10019_v4 = vand.u32 4294901760, %v10018_v27 }
 0xab9   : > { %v10009_v0 = vand.u32 4294901760, %v10008_v16 }
 0xabb   : > { %39917 = vmatprep.mubr.f32.mxu1 %v10009_v0 }
 0xabc   : > { %39918 = vmatmul.mubr.f32.vlgmr.msra.gmra.mrb[10].mxu1 %v10019_v4 }
 0xabd   : > { %39922 = vmatprep.mubr.f32.mxu1 %v10005_v6  ;;  %39921 = vmatpush3.msra.mxu1 %v10030_v30 }
 0xabe   : > { %39925 = vmatprep.subr.mxu1 %v10027_v37 }
 0xac4   : > { %39923 = vmatmul.mubr.f32.vlgmr.msra.gmra.mrb[10].mxu1 %v10015_v5 }
 0xac5   : > { %39927 = vmatprep.mubr.f32.mxu1 %v10006_v54  ;;  %39926 = vmatpush3.msra.mxu1 %v10027_v37 }
 0xac6   : > { %39930 = vmatprep.subr.mxu1 %v9940_v61 }
 0xacc   : > { %39928 = vmatmul.mubr.f32.vlgmr.msra.gmra.mrb[10].mxu1 %v10016_v22  ;;  %v11501_v22 = vld [vmem:[%s48681_s17] sm:$0xff] }
 0xacd   : > { %39932 = vmatprep.mubr.f32.mxu1 %v10007_v1  ;;  %39931 = vmatpush3.msra.mxu1 %v9940_v61  ;;  %v11504_v54 = vsel %vm997_vm0, %v11501_v22, 0 }
 0xace   : > { %39935 = vmatprep.subr.mxu1 %v10028_v33 }
 0xad4   : > { %39933 = vmatmul.mubr.f32.vlgmr.msra.gmra.mrb[10].mxu1 %v10017_v34  ;;  %v47065_v34 = vand.u32 4294901760, %v11504_v54 }
 0xad5   : > { %39937 = vmatprep.mubr.f32.mxu1 %v10005_v6  ;;  %39936 = vmatpush3.msra.mxu1 %v10028_v33 }
 0xad6   : > { %39940 = vmatprep.subr.mxu1 %v9940_v61  ;;  %v47068_v1 = vsub.f32 %v11504_v54, %v47065_v34 }
 0xad8   : > { %v47071_v27 = vand.u32 4294901760, %v47068_v1 }
 0xada   : > { %v11579_v16 = vsub.f32 %v47068_v1, %v47071_v27 }
 0xadc   : > { %39938 = vmatmul.mubr.f32.vlgmr.msra.gmra.mrb[10].mxu1 %v10015_v5  ;;  %v47075_v0 = vand.u32 4294901760, %v11579_v16 }
 0xadd   : > { %39942 = vmatprep.mubr.f32.mxu1 %v10005_v6  ;;  %39941 = vmatpush3.msra.mxu1 %v9940_v61 }
 0xade   : > { %39987 = vmatprep.subr.mxu1 %v10951_v38  ;;  %40021 = vmatprep.mubr.f32.mxu0 %v47075_v0 }
 0xae3   : > { %v39986_v20 = vpop.f32.mrb[20].mxu0 }
 0xae4   : > { %v10948_v36 = vsel %vm5214_vm8, %v39986_v20, 0  ;;  %39943 = vmatmul.mubr.f32.vlgmr.msra.gmra.mrb[10].mxu1 %v10015_v5  ;;  %v10934_v40 = vpop.f32.mrb[21].mxu0 }
 0xae5   : > { %v11026_v12 = vand.u32 4294901760, %v10948_v36  ;;  %v10945_v51 = vsel %vm5214_vm8, %v10934_v40, 0  ;;  %39988 = vmatpush3.msra.mxu1 %v10951_v38 }
 0xae6   : > { %v11016_v43 = vand.u32 4294901760, %v10945_v51  ;;  %39992 = vmatprep.subr.mxu1 %v11041_v29 }
 0xae7   : > { %v11027_v48 = vsub.f32 %v10948_v36, %v11026_v12 }
 0xae8   : > { %v11017_v15 = vsub.f32 %v10945_v51, %v11016_v43 }
 0xae9   : > { %v11028_v47 = vand.u32 4294901760, %v11027_v48 }
 0xaea   : > { %v11018_v31 = vand.u32 4294901760, %v11017_v15 }
 0xaeb   : > { %v11029_v58 = vsub.f32 %v11027_v48, %v11028_v47 }
 0xaec   : > { %v11019_v46 = vsub.f32 %v11017_v15, %v11018_v31 }
 0xaed   : > { %v11030_v50 = vand.u32 4294901760, %v11029_v58 }
 0xaee   : > { %v11020_v21 = vand.u32 4294901760, %v11019_v46 }
 0xaf0   : > { %39989 = vmatprep.mubr.f32.mxu1 %v11020_v21  ;;  %v37173_v21 = vld [vmem:[%s48679_s15] ss:$0 sm:$0xff] }
 0xaf1   : > { %39990 = vmatmul.mubr.f32.vlgmr.msra.gmra.mrb[10].mxu1 %v11030_v50 }
 0xaf2   : > { %39994 = vmatprep.mubr.f32.mxu1 %v11016_v43  ;;  %39993 = vmatpush3.msra.mxu1 %v11041_v29 }
 0xaf3   : > { %39997 = vmatprep.subr.mxu1 %v11038_v56 }
 0xaf9   : > { %39995 = vmatmul.mubr.f32.vlgmr.msra.gmra.mrb[10].mxu1 %v11026_v12 }
 0xafa   : > { %39999 = vmatprep.mubr.f32.mxu1 %v11017_v15  ;;  %39998 = vmatpush3.msra.mxu1 %v11038_v56 }
 0xafb   : > { %40002 = vmatprep.subr.mxu1 %v10951_v38 }
 0xb01   : > { %40000 = vmatmul.mubr.f32.vlgmr.msra.gmra.mrb[10].mxu1 %v11027_v48 }
 0xb02   : > { %40004 = vmatprep.mubr.f32.mxu1 %v11018_v31  ;;  %40003 = vmatpush3.msra.mxu1 %v10951_v38 }
 0xb03   : > { %40007 = vmatprep.subr.mxu1 %v11039_v39 }
 0xb09   : > { %40005 = vmatmul.mubr.f32.vlgmr.msra.gmra.mrb[10].mxu1 %v11028_v47  ;;  %v11502_v47 = vld [vmem:[%s48681_s17 + $0x8] sm:$0xff] }
 0xb0a   : > { %40009 = vmatprep.mubr.f32.mxu1 %v11016_v43  ;;  %40008 = vmatpush3.msra.mxu1 %v11039_v39  ;;  %v11507_v58 = vsel %vm997_vm0, %v11502_v47, 0 }
 0xb0b   : > { %40012 = vmatprep.subr.mxu1 %v10951_v38  ;;  %v47082_v46 = vand.u32 4294901760, %v11507_v58 }
 0xb0d   : > { %v47088_v50 = vsub.f32 %v11507_v58, %v47082_v46 }
 0xb11   : > { %40010 = vmatmul.mubr.f32.vlgmr.msra.gmra.mrb[10].mxu1 %v11026_v12 }
 0xb12   : > { %40014 = vmatprep.mubr.f32.mxu1 %v11016_v43  ;;  %40013 = vmatpush3.msra.mxu1 %v10951_v38 }
 0xb19   : > { %40015 = vmatmul.mubr.f32.vlgmr.msra.gmra.mrb[10].mxu1 %v11026_v12 }
 0xbec   : > { %v40016_v45 = vpop.f32.mrb[10].mxu1 }
 0xbed   : > { %v44683_v19 = vadd.f32 %v40016_v45, %v37172_v28  ;;  %v11429_v53 = vpop.f32.mrb[11].mxu1 }
 0xbee   : > { %v44684_v57 = vadd.f32 %v37172_v28, %v11429_v53  ;;  %v37174_v53 = vld [vmem:[%s48680_s16] ss:$0 sm:$0xff] }
 0xbef   : > { %v47048_v59 = vadd.f32 %v44683_v19, %v46496_v3 }
 0xbf0   : > { %v47051_v61 = vadd.f32 %v44684_v57, %v46494_v62 }
 0xbf1   : > { %v11448_v37 = vsel %vm3529_vm3, %v47048_v59, 0.0 }
 0xbf2   : > { %11449 = vadd.xlane.f32.xlu0 %v11448_v37  ;;  %v11445_v33 = vsel %vm3529_vm3, %v47051_v61, 0.0 }
 0xbf3   : > { %11446 = vadd.xlane.f32.xlu1 %v11445_v33 }
 0xc7f   : > { %v11450_v60 = vpop.xlane.xlu0 %11449 }
 0xc80   : > { %v11452_v30 = vmul.f32 0.03125, %v11450_v60  ;;  %v11447_v24 = vpop.xlane.xlu1 %11446  ;;  %v47094_v60 = vand.u32 4294901760, %v47088_v50 }
 0xc81   : > { %v11451_v35 = vmul.f32 0.03125, %v11447_v24 }
 0xc82   : > { %v11454_v23 = vsub.f32 %v47048_v59, %v11452_v30 }
 0xc83   : > { %v11453_v3 = vsub.f32 %v47051_v61, %v11451_v35 }
 0xc84   : > { %v11456_v5 = vmul.f32 %v11454_v23, %v11454_v23  ;;  %v11490_v28 = vmul.f32 %v37173_v21, %v11454_v23 }
 0xc85   : > { %v11455_v11 = vmul.f32 %v11453_v3, %v11453_v3  ;;  %v11489_v19 = vmul.f32 %v37173_v21, %v11453_v3 }
 0xc86   : > { %v11460_v62 = vsel %vm3529_vm3, %v11456_v5, 0.0 }
 0xc87   : > { %11461 = vadd.xlane.f32.xlu1 %v11460_v62  ;;  %v11457_v6 = vsel %vm3529_vm3, %v11455_v11, 0.0  ;;  %v11589_v11 = vsub.f32 %v47088_v50, %v47094_v60 }
 0xc88   : > { %11458 = vadd.xlane.f32.xlu0 %v11457_v6 }
 0xc89   : > { %v47098_v22 = vand.u32 4294901760, %v11589_v11 }
 0xd14   : > { %v11462_v4 = vpop.xlane.xlu1 %11461 }
 0xd15   : > { %v11464_v9 = vmul.f32 0.032258064, %v11462_v4  ;;  %v11459_v38 = vpop.xlane.xlu0 %11458 }
 0xd16   : > { %v11463_v56 = vmul.f32 0.032258064, %v11459_v38 }
 0xd17   : > { %45560 = vrsqrt.f32 %v11464_v9  ;;  %vm11474_vm11 = vcmp.eq.f32.partialorder %v11464_v9, inf  ;;  %v11477_v20 = vand.u32 2147483648, %v11464_v9  ;;  %vm11476_vm12 = vcmp.eq.f32.partialorder %v11464_v9, 0.0 }
 0xd18   : > { %45562 = vrsqrt.f32 %v11463_v56  ;;  %vm11467_vm13 = vcmp.eq.f32.partialorder %v11463_v56, inf  ;;  %v11470_v12 = vand.u32 2147483648, %v11463_v56  ;;  %vm11469_vm14 = vcmp.eq.f32.partialorder %v11463_v56, 0.0 }
 0xd21   : > { %v45561_v39 = vpop.eup %45560 }
 0xd22   : > { %v45563_v32 = vpop.eup %45562  ;;  %v11473_v29 = vmul.f32 %v45561_v39, %v11464_v9 }
 0xd23   : > { %v11466_v36 = vmul.f32 %v45563_v32, %v11463_v56 }
 0xd24   : > { %v11475_v40 = vsel %vm11474_vm11, %v11464_v9, %v11473_v29  ;;  %v12011_v29 = vld [vmem:[#allocation9] sm:$0xff] }
 0xd25   : > { %v11478_v51 = vsel %vm11476_vm12, %v11477_v20, %v11475_v40  ;;  %v11468_v43 = vsel %vm11467_vm13, %v11463_v56, %v11466_v36  ;;  %v12012_v20 = vld [vmem:[#allocation9 + $0x8] sm:$0xff]  ;;  %v12029_v36 = vand.u32 4294901760, %v12011_v29 }
 0xd26   : > { %v11480_v48 = vadd.f32 1e-06, %v11478_v51  ;;  %v11471_v15 = vsel %vm11469_vm14, %v11470_v12, %v11468_v43  ;;  %v12032_v40 = vand.u32 4294901760, %v12012_v20 }
 0xd27   : > { %v11479_v31 = vadd.f32 1e-06, %v11471_v15  ;;  %v12119_v51 = vsub.f32 %v12011_v29, %v12029_v36  ;;  %v12014_v15 = vld [vmem:[#allocation9 + $0x18] sm:$0xff] }
 0xd28   : > { %45564 = vrcp.f32 %v11480_v48  ;;  %v47112_v12 = vpack.c.bf16 %v12032_v40, %v12029_v36  ;;  %v12126_v43 = vsub.f32 %v12012_v20, %v12032_v40  ;;  %v12013_v48 = vld [vmem:[#allocation9 + $0x10] sm:$0xff] }
 0xd29   : > { %45566 = vrcp.f32 %v11479_v31  ;;  %v12035_v47 = vand.u32 4294901760, %v12013_v48  ;;  %v12038_v31 = vand.u32 4294901760, %v12014_v15  ;;  %v12120_v58 = vand.u32 4294901760, %v12119_v51 }
 0xd2a   : > { %43018 = vmatprep.subr.bf16.mxu1 %v47112_v12  ;;  %v12127_v21 = vand.u32 4294901760, %v12126_v43 }
 0xd2b   : > { %43020 = vmatpush3.bf16.msra.mxu1 %v47112_v12 }
 0xd32   : > { %v45565_v45 = vpop.eup %45564 }
 0xd33   : > { %v45567_v57 = vpop.eup %45566  ;;  %v11492_v37 = vmul.f32 %v45565_v45, %v11490_v28  ;;  %v47116_v28 = vpack.c.bf16 %v12038_v31, %v12035_v47  ;;  %v12128_v45 = vsub.f32 %v12126_v43, %v12127_v21 }
 0xd34   : > { %v11491_v33 = vmul.f32 %v45567_v57, %v11489_v19  ;;  %v12133_v19 = vsub.f32 %v12013_v48, %v12035_v47 }
 0xd35   : > { %v11500_v30 = vadd.f32 %v37174_v53, %v11492_v37  ;;  %43022 = vmatprep.subr.bf16.mxu1 %v47116_v28  ;;  %v12129_v37 = vand.u32 4294901760, %v12128_v45 }
 0xd36   : > { %v11499_v24 = vadd.f32 %v37174_v53, %v11491_v33  ;;  %v12140_v53 = vsub.f32 %v12014_v15, %v12038_v31  ;;  %v12134_v33 = vand.u32 4294901760, %v12133_v19  ;;  %43024 = vmatpush3.bf16.msra.mxu1 %v47116_v28 }
 0xd37   : > { %v11513_v35 = vand.u32 4294901760, %v11500_v30 }
 0xd38   : > { %v11510_v5 = vand.u32 4294901760, %v11499_v24 }
 0xd39   : > { %v11605_v23 = vsub.f32 %v11500_v30, %v11513_v35  ;;  %v12141_v30 = vand.u32 4294901760, %v12140_v53 }
 0xd3a   : > { %v42993_v62 = vpack.c.bf16 %v11513_v35, %v11510_v5  ;;  %v11598_v3 = vsub.f32 %v11499_v24, %v11510_v5  ;;  %v12135_v35 = vsub.f32 %v12133_v19, %v12134_v33 }
 0xd3b   : > { %v11606_v6 = vand.u32 4294901760, %v11605_v23  ;;  %v12142_v5 = vsub.f32 %v12140_v53, %v12141_v30 }
 0xd3c   : > { %42994 = vmatprep.subr.bf16.mxu0 %v42993_v62  ;;  %v11599_v54 = vand.u32 4294901760, %v11598_v3  ;;  %v43001_v16 = vpack.c.bf16 %v11605_v23, %v11598_v3  ;;  %v12136_v11 = vand.u32 4294901760, %v12135_v35 }
 0xd3d   : > { %42996 = vmatpush3.bf16.msra.mxu0 %v42993_v62  ;;  %v11607_v4 = vsub.f32 %v11605_v23, %v11606_v6  ;;  %v12143_v23 = vand.u32 4294901760, %v12142_v5 }
 0xd3e   : > { %v11600_v9 = vsub.f32 %v11598_v3, %v11599_v54  ;;  %v43009_v38 = vpack.c.bf16 %v11606_v6, %v11599_v54  ;;  %v43033_v3 = vpack.c.bf16 %v12126_v43, %v12119_v51  ;;  %v43037_v6 = vpack.c.bf16 %v12140_v53, %v12133_v19 }
 0xd3f   : > { %v11608_v56 = vand.u32 4294901760, %v11607_v4  ;;  %v43049_v54 = vpack.c.bf16 %v12127_v21, %v12120_v58 }
 0xd40   : > { %40022 = vmatmul.mubr.f32.vlgmr.msra.gmra.mrb[22].mxu0 %v47098_v22  ;;  %v11601_v39 = vand.u32 4294901760, %v11600_v9 }
 0xd41   : > { %40028 = vmatprep.mubr.f32.mxu0 %v47065_v34 }
 0xd42   : > { %v42997_v32 = vpack.c.bf16 %v11608_v56, %v11601_v39 }
 0xd44   : > { %42998 = vmatprep.subr.bf16.mxu0 %v42997_v32 }
 0xd45   : > { %43000 = vmatpush3.bf16.msra.mxu0 %v42997_v32 }
 0xd46   : > { %43002 = vmatprep.subr.bf16.mxu0 %v43001_v16 }
 0xd48   : > { %40029 = vmatmul.mubr.f32.vlgmr.msra.gmra.mrb[22].mxu0 %v47082_v46 }
 0xd49   : > { %43004 = vmatpush3.bf16.msra.mxu0 %v43001_v16  ;;  %40035 = vmatprep.mubr.f32.mxu0 %v47068_v1  ;;  %v43053_v16 = vpack.c.bf16 %v12141_v30, %v12134_v33 }
 0xd4a   : > { %43006 = vmatprep.subr.bf16.mxu0 %v42993_v62 }
 0xd50   : > { %40036 = vmatmul.mubr.f32.vlgmr.msra.gmra.mrb[22].mxu0 %v47088_v50 }
 0xd51   : > { %43008 = vmatpush3.bf16.msra.mxu0 %v42993_v62  ;;  %40042 = vmatprep.mubr.f32.mxu0 %v47071_v27 }
 0xd52   : > { %43010 = vmatprep.subr.bf16.mxu0 %v43009_v38 }
 0xd58   : > { %40043 = vmatmul.mubr.f32.vlgmr.msra.gmra.mrb[22].mxu0 %v47094_v60 }
 0xd59   : > { %43012 = vmatpush3.bf16.msra.mxu0 %v43009_v38  ;;  %40049 = vmatprep.mubr.f32.mxu0 %v47065_v34 }
 0xd5a   : > { %43014 = vmatprep.subr.bf16.mxu0 %v42993_v62 }
 0xd60   : > { %40050 = vmatmul.mubr.f32.vlgmr.msra.gmra.mrb[22].mxu0 %v47082_v46 }
 0xd61   : > { %43016 = vmatpush3.bf16.msra.mxu0 %v42993_v62  ;;  %40056 = vmatprep.mubr.f32.mxu0 %v47065_v34  ;;  %v43029_v62 = vpack.c.bf16 %v12143_v23, %v12136_v11 }
 0xd68   : > { %40057 = vmatmul.mubr.f32.vlgmr.msra.gmra.mrb[22].mxu0 %v47082_v46 }
 0xd69   : > { %40129 = vmatprep.mubr.f32.mxu0 %v47075_v0  ;;  %v12121_v0 = vsub.f32 %v12119_v51, %v12120_v58  ;;  %v37175_v51 = vld [vmem:[#allocation10] ss:$0 sm:$0xff] }
 0xd6b   : > { %v12122_v57 = vand.u32 4294901760, %v12121_v0 }
 0xd6d   : > { %v43025_v24 = vpack.c.bf16 %v12129_v37, %v12122_v57 }
 0xd6f   : > { %43026 = vmatprep.subr.bf16.mxu1 %v43025_v24 }
 0xe3b   : > { %v40058_v4 = vpop.f32.mrb[22].mxu0 }
 0xe3c   : > { %v12026_v9 = vsel %vm3529_vm3, %v40058_v4, 0  ;;  %v12001_v38 = vpop.f32.mrb[23].mxu0 }
 0xe3d   : > { %v12107_v56 = vand.u32 4294901760, %v12026_v9  ;;  %v12023_v39 = vsel %vm3529_vm3, %v12001_v38, 0 }
 0xe3e   : > { %v12097_v32 = vand.u32 4294901760, %v12023_v39 }
 0xe3f   : > { %v12108_v29 = vsub.f32 %v12026_v9, %v12107_v56 }
 0xe40   : > { %v12098_v20 = vsub.f32 %v12023_v39, %v12097_v32 }
 0xe41   : > { %v12109_v36 = vand.u32 4294901760, %v12108_v29 }
 0xe42   : > { %v12099_v40 = vand.u32 4294901760, %v12098_v20 }
 0xe43   : > { %v12110_v48 = vsub.f32 %v12108_v29, %v12109_v36 }
 0xe44   : > { %v12100_v15 = vsub.f32 %v12098_v20, %v12099_v40 }
 0xe45   : > { %v12111_v31 = vand.u32 4294901760, %v12110_v48 }
 0xe46   : > { %v12101_v47 = vand.u32 4294901760, %v12100_v15 }
 0xe48   : > { %40067 = vmatprep.mubr.f32.mxu1 %v12101_v47 }
 0xe49   : > { %40068 = vmatmul.mubr.f32.vlgmr.msra.gmra.mrb[12].mxu1 %v12111_v31 }
 0xe4a   : > { %43028 = vmatpush3.bf16.msra.mxu1 %v43025_v24  ;;  %40078 = vmatprep.mubr.f32.mxu1 %v12097_v32 }
 0xe4b   : > { %43030 = vmatprep.subr.bf16.mxu1 %v43029_v62 }
 0xe4e   : > { %43032 = vmatpush3.bf16.msra.mxu1 %v43029_v62 }
 0xe4f   : > { %43034 = vmatprep.subr.bf16.mxu1 %v43033_v3 }
 0xe51   : > { %40079 = vmatmul.mubr.f32.vlgmr.msra.gmra.mrb[12].mxu1 %v12107_v56 }
 0xe52   : > { %43036 = vmatpush3.bf16.msra.mxu1 %v43033_v3  ;;  %40089 = vmatprep.mubr.f32.mxu1 %v12098_v20  ;;  %v13066_v20 = vld [vmem:[%s48684_s20 + $0x30] sm:$0xff] }
 0xe53   : > { %43038 = vmatprep.subr.bf16.mxu1 %v43037_v6 }
 0xe56   : > { %43040 = vmatpush3.bf16.msra.mxu1 %v43037_v6  ;;  %v13061_v6 = vld [vmem:[%s48684_s20 + $0x8] sm:$0xff] }
 0xe57   : > { %43042 = vmatprep.subr.bf16.mxu1 %v47112_v12 }
 0xe59   : > { %40090 = vmatmul.mubr.f32.vlgmr.msra.gmra.mrb[12].mxu1 %v12108_v29 }
 0xe5a   : > { %43044 = vmatpush3.bf16.msra.mxu1 %v47112_v12  ;;  %40100 = vmatprep.mubr.f32.mxu1 %v12099_v40  ;;  %v13101_v40 = vand.u32 4294901760, %v13066_v20 }
 0xe5b   : > { %43046 = vmatprep.subr.bf16.mxu1 %v47116_v28 }
 0xe5e   : > { %43048 = vmatpush3.bf16.msra.mxu1 %v47116_v28 }
 0xe5f   : > { %43050 = vmatprep.subr.bf16.mxu1 %v43049_v54 }
 0xe61   : > { %40101 = vmatmul.mubr.f32.vlgmr.msra.gmra.mrb[12].mxu1 %v12109_v36  ;;  %v13067_v36 = vld [vmem:[%s48684_s20 + $0x38] sm:$0xff] }
 0xe62   : > { %43052 = vmatpush3.bf16.msra.mxu1 %v43049_v54  ;;  %40111 = vmatprep.mubr.f32.mxu1 %v12097_v32  ;;  %v13104_v48 = vand.u32 4294901760, %v13067_v36 }
 0xe63   : > { %43054 = vmatprep.subr.bf16.mxu1 %v43053_v16 }
 0xe64   : > { %v47178_v31 = vpack.c.bf16 %v13104_v48, %v13101_v40 }
 0xe66   : > { %43056 = vmatpush3.bf16.msra.mxu1 %v43053_v16 }
 0xe67   : > { %43058 = vmatprep.subr.bf16.mxu1 %v47112_v12 }
 0xe69   : > { %40112 = vmatmul.mubr.f32.vlgmr.msra.gmra.mrb[12].mxu1 %v12107_v56 }
 0xe6a   : > { %43060 = vmatpush3.bf16.msra.mxu1 %v47112_v12  ;;  %40122 = vmatprep.mubr.f32.mxu1 %v12097_v32 }
 0xe6b   : > { %43062 = vmatprep.subr.bf16.mxu1 %v47116_v28 }
 0xe6e   : > { %43064 = vmatpush3.bf16.msra.mxu1 %v47116_v28 }
 0xe71   : > { %40123 = vmatmul.mubr.f32.vlgmr.msra.gmra.mrb[12].mxu1 %v12107_v56 }
 0xe72   : > { %40285 = vmatprep.mubr.f32.mxu1 %v46374_v25 }
 0xf44   : > { %v40124_v43 = vpop.f32.mrb[12].mxu1 }
 0xf45   : > { %v44685_v58 = vadd.f32 %v40124_v43, %v37175_v51  ;;  %v12546_v21 = vpop.f32.mrb[13].mxu1 }
 0xf46   : > { %v44686_v0 = vadd.f32 %v37175_v51, %v12546_v21 }
 0xf47   : > { %v12557_v45 = vmax.f32 %v44685_v58, 0.0 }
 0xf48   : > { %v12556_v19 = vmax.f32 %v44686_v0, 0.0 }
 0xf49   : > { %v12562_v53 = vand.u32 4294901760, %v12557_v45 }
 0xf4a   : > { %v12559_v57 = vand.u32 4294901760, %v12556_v19 }
 0xf4b   : > { %v12654_v37 = vsub.f32 %v12557_v45, %v12562_v53 }
 0xf4c   : > { %v43065_v33 = vpack.c.bf16 %v12562_v53, %v12559_v57  ;;  %v12647_v12 = vsub.f32 %v12556_v19, %v12559_v57 }
 0xf4d   : > { %v12655_v30 = vand.u32 4294901760, %v12654_v37 }
 0xf4e   : > { %v12648_v24 = vand.u32 4294901760, %v12647_v12  ;;  %43066 = vmatprep.subr.bf16.mxu0 %v43065_v33  ;;  %v43073_v35 = vpack.c.bf16 %v12654_v37, %v12647_v12 }
 0xf4f   : > { %43068 = vmatpush3.bf16.msra.mxu0 %v43065_v33  ;;  %v12656_v28 = vsub.f32 %v12654_v37, %v12655_v30 }
 0xf50   : > { %v12649_v5 = vsub.f32 %v12647_v12, %v12648_v24  ;;  %v43081_v11 = vpack.c.bf16 %v12655_v30, %v12648_v24 }
 0xf51   : > { %v12657_v23 = vand.u32 4294901760, %v12656_v28 }
 0xf52   : > { %40130 = vmatmul.mubr.f32.vlgmr.msra.gmra.mrb[24].mxu0 %v47098_v22  ;;  %v12650_v62 = vand.u32 4294901760, %v12649_v5  ;;  %v13060_v22 = vld [vmem:[%s48684_s20] sm:$0xff] }
 0xf53   : > { %40136 = vmatprep.mubr.f32.mxu0 %v47065_v34 }
 0xf54   : > { %v43069_v3 = vpack.c.bf16 %v12657_v23, %v12650_v62  ;;  %v13219_v62 = vsub.f32 %v13066_v20, %v13101_v40 }
 0xf56   : > { %43070 = vmatprep.subr.bf16.mxu0 %v43069_v3 }
 0xf57   : > { %43072 = vmatpush3.bf16.msra.mxu0 %v43069_v3  ;;  %v13226_v3 = vsub.f32 %v13067_v36, %v13104_v48 }
 0xf58   : > { %43074 = vmatprep.subr.bf16.mxu0 %v43073_v35 }
 0xf5a   : > { %40137 = vmatmul.mubr.f32.vlgmr.msra.gmra.mrb[24].mxu0 %v47082_v46 }
 0xf5b   : > { %43076 = vmatpush3.bf16.msra.mxu0 %v43073_v35  ;;  %40143 = vmatprep.mubr.f32.mxu0 %v47068_v1  ;;  %v13083_v1 = vand.u32 4294901760, %v13060_v22 }
 0xf5c   : > { %43078 = vmatprep.subr.bf16.mxu0 %v43065_v33 }
 0xf5d   : > { %v13177_v32 = vsub.f32 %v13060_v22, %v13083_v1 }
 0xf5f   : > { %v13178_v15 = vand.u32 4294901760, %v13177_v32 }
 0xf61   : > { %v13179_v51 = vsub.f32 %v13177_v32, %v13178_v15 }
 0xf62   : > { %40144 = vmatmul.mubr.f32.vlgmr.msra.gmra.mrb[24].mxu0 %v47088_v50  ;;  %v13086_v50 = vand.u32 4294901760, %v13061_v6 }
 0xf63   : > { %43080 = vmatpush3.bf16.msra.mxu0 %v43065_v33  ;;  %40150 = vmatprep.mubr.f32.mxu0 %v47071_v27  ;;  %v13062_v27 = vld [vmem:[%s48684_s20 + $0x10] sm:$0xff]  ;;  %v13180_v0 = vand.u32 4294901760, %v13179_v51 }
 0xf64   : > { %43082 = vmatprep.subr.bf16.mxu0 %v43081_v11  ;;  %v47145_v54 = vpack.c.bf16 %v13086_v50, %v13083_v1  ;;  %v13089_v16 = vand.u32 4294901760, %v13062_v27  ;;  %v13184_v29 = vsub.f32 %v13061_v6, %v13086_v50  ;;  %v13220_v50 = vand.u32 4294901760, %v13219_v62 }
 0xf66   : > { %v13185_v47 = vand.u32 4294901760, %v13184_v29  ;;  %v13191_v58 = vsub.f32 %v13062_v27, %v13089_v16  ;;  %v13227_v27 = vand.u32 4294901760, %v13226_v3 }
 0xf68   : > { %v13186_v43 = vsub.f32 %v13184_v29, %v13185_v47  ;;  %v13192_v19 = vand.u32 4294901760, %v13191_v58  ;;  %v43165_v20 = vpack.c.bf16 %v13227_v27, %v13220_v50 }
 0xf6a   : > { %40151 = vmatmul.mubr.f32.vlgmr.msra.gmra.mrb[24].mxu0 %v47094_v60  ;;  %v13063_v60 = vld [vmem:[%s48684_s20 + $0x18] sm:$0xff]  ;;  %v13187_v45 = vand.u32 4294901760, %v13186_v43  ;;  %v13193_v37 = vsub.f32 %v13191_v58, %v13192_v19 }
 0xf6b   : > { %43084 = vmatpush3.bf16.msra.mxu0 %v43081_v11  ;;  %40157 = vmatprep.mubr.f32.mxu0 %v47065_v34  ;;  %v13092_v4 = vand.u32 4294901760, %v13063_v60 }
 0xf6c   : > { %43086 = vmatprep.subr.bf16.mxu0 %v43065_v33  ;;  %v43105_v57 = vpack.c.bf16 %v13187_v45, %v13180_v0  ;;  %v13194_v24 = vand.u32 4294901760, %v13193_v37  ;;  %v43133_v0 = vpack.c.bf16 %v13226_v3, %v13219_v62  ;;  %v43153_v45 = vpack.c.bf16 %v13185_v47, %v13178_v15 }
 0xf6d   : > { %v47158_v9 = vpack.c.bf16 %v13092_v4, %v13089_v16  ;;  %v13198_v21 = vsub.f32 %v13063_v60, %v13092_v4  ;;  %v13221_v16 = vsub.f32 %v13219_v62, %v13220_v50  ;;  %v13228_v4 = vsub.f32 %v13226_v3, %v13227_v27 }
 0xf6f   : > { %v13199_v53 = vand.u32 4294901760, %v13198_v21  ;;  %v43125_v51 = vpack.c.bf16 %v13198_v21, %v13191_v58 }
 0xf71   : > { %v13200_v30 = vsub.f32 %v13198_v21, %v13199_v53  ;;  %v43157_v37 = vpack.c.bf16 %v13199_v53, %v13192_v19 }
 0xf72   : > { %40158 = vmatmul.mubr.f32.vlgmr.msra.gmra.mrb[24].mxu0 %v47082_v46 }
 0xf73   : > { %43088 = vmatpush3.bf16.msra.mxu0 %v43065_v33  ;;  %40164 = vmatprep.mubr.f32.mxu0 %v47065_v34  ;;  %v13064_v34 = vld [vmem:[%s48684_s20 + $0x20] sm:$0xff]  ;;  %v13201_v5 = vand.u32 4294901760, %v13200_v30 }
 0xf74   : > { %43090 = vmatprep.subr.bf16.mxu0 %v47145_v54  ;;  %v13095_v38 = vand.u32 4294901760, %v13064_v34 }
 0xf75   : > { %v43109_v22 = vpack.c.bf16 %v13201_v5, %v13194_v24 }
 0xf76   : > { %v13205_v33 = vsub.f32 %v13064_v34, %v13095_v38  ;;  %v13222_v34 = vand.u32 4294901760, %v13221_v16 }
 0xf78   : > { %v13206_v35 = vand.u32 4294901760, %v13205_v33 }
 0xf7a   : > { %40165 = vmatmul.mubr.f32.vlgmr.msra.gmra.mrb[24].mxu0 %v47082_v46  ;;  %v13065_v46 = vld [vmem:[%s48684_s20 + $0x28] sm:$0xff]  ;;  %v13207_v11 = vsub.f32 %v13205_v33, %v13206_v35 }
 0xf7b   : > { %43092 = vmatpush3.bf16.msra.mxu0 %v47145_v54  ;;  %v13098_v56 = vand.u32 4294901760, %v13065_v46 }
 0xf7c   : > { %43094 = vmatprep.subr.bf16.mxu0 %v47158_v9  ;;  %v13208_v6 = vand.u32 4294901760, %v13207_v11 }
 0xf7d   : > { %v47168_v39 = vpack.c.bf16 %v13098_v56, %v13095_v38  ;;  %v13212_v12 = vsub.f32 %v13065_v46, %v13098_v56  ;;  %v13229_v46 = vand.u32 4294901760, %v13228_v4  ;;  %v43121_v56 = vpack.c.bf16 %v13184_v29, %v13177_v32  ;;  %v37177_v4 = vld [vmem:[%s48772_s11 + $0x20] sm:$0xff] }
 0xf7f   : > { %43096 = vmatpush3.bf16.msra.mxu0 %v47158_v9  ;;  %v13213_v28 = vand.u32 4294901760, %v13212_v12  ;;  %v43117_v38 = vpack.c.bf16 %v13229_v46, %v13222_v34  ;;  %v43129_v43 = vpack.c.bf16 %v13212_v12, %v13205_v33  ;;  %v37178_v34 = vld [vmem:[%s48772_s11 + $0x28] sm:$0xff]  ;;  %v14183_v46 = vand.u32 4294901760, %v37177_v4 }
 0xf80   : > { %43098 = vmatprep.subr.bf16.mxu0 %v47168_v39 }
 0xf81   : > { %v13214_v23 = vsub.f32 %v13212_v12, %v13213_v28  ;;  %v43161_v30 = vpack.c.bf16 %v13213_v28, %v13206_v35 }
 0xf83   : > { %43100 = vmatpush3.bf16.msra.mxu0 %v47168_v39  ;;  %v13215_v1 = vand.u32 4294901760, %v13214_v23 }
 0xf84   : > { %43102 = vmatprep.subr.bf16.mxu0 %v47178_v31 }
 0xf85   : > { %v43113_v60 = vpack.c.bf16 %v13215_v1, %v13208_v6 }
 0xf87   : > { %43104 = vmatpush3.bf16.msra.mxu0 %v47178_v31 }
 0xf88   : > { %43106 = vmatprep.subr.bf16.mxu0 %v43105_v57 }
0x104d   : > { %v40166_v36 = vpop.f32.mrb[24].mxu0 }
0x104e   : > { %v13080_v40 = vsel %vm13075_vm15, %v40166_v36, 0  ;;  %v13050_v48 = vpop.f32.mrb[25].mxu0 }
0x104f   : > { %v13165_v24 = vand.u32 4294901760, %v13080_v40  ;;  %v13077_v5 = vsel %vm13075_vm15, %v13050_v48, 0 }
0x1050   : > { %v13155_v11 = vand.u32 4294901760, %v13077_v5 }
0x1051   : > { %v13166_v23 = vsub.f32 %v13080_v40, %v13165_v24 }
0x1052   : > { %v13156_v6 = vsub.f32 %v13077_v5, %v13155_v11 }
0x1053   : > { %v13167_v1 = vand.u32 4294901760, %v13166_v23 }
0x1054   : > { %v13157_v32 = vand.u32 4294901760, %v13156_v6 }
0x1055   : > { %v13168_v29 = vsub.f32 %v13166_v23, %v13167_v1 }
0x1056   : > { %v13158_v58 = vsub.f32 %v13156_v6, %v13157_v32 }
0x1057   : > { %v13169_v15 = vand.u32 4294901760, %v13168_v29 }
0x1058   : > { %v13159_v21 = vand.u32 4294901760, %v13158_v58 }
0x105a   : > { %40183 = vmatprep.mubr.f32.mxu0 %v13159_v21 }
0x105b   : > { %40184 = vmatmul.mubr.f32.vlgmr.msra.gmra.mrb[26].mxu0 %v13169_v15 }
0x105c   : > { %43108 = vmatpush3.bf16.msra.mxu0 %v43105_v57  ;;  %40202 = vmatprep.mubr.f32.mxu0 %v13155_v11 }
0x105d   : > { %43110 = vmatprep.subr.bf16.mxu0 %v43109_v22 }
0x1060   : > { %43112 = vmatpush3.bf16.msra.mxu0 %v43109_v22 }
0x1061   : > { %43114 = vmatprep.subr.bf16.mxu0 %v43113_v60 }
0x1064   : > { %43116 = vmatpush3.bf16.msra.mxu0 %v43113_v60 }
0x1065   : > { %43118 = vmatprep.subr.bf16.mxu0 %v43117_v38 }
0x1068   : > { %43120 = vmatpush3.bf16.msra.mxu0 %v43117_v38  ;;  %v14186_v38 = vand.u32 4294901760, %v37178_v34 }
0x1069   : > { %43122 = vmatprep.subr.bf16.mxu0 %v43121_v56 }
0x106b   : > { %40203 = vmatmul.mubr.f32.vlgmr.msra.gmra.mrb[26].mxu0 %v13165_v24 }
0x106c   : > { %43124 = vmatpush3.bf16.msra.mxu0 %v43121_v56  ;;  %40221 = vmatprep.mubr.f32.mxu0 %v13156_v6  ;;  %v47243_v56 = vpack.c.bf16 %v14186_v38, %v14183_v46 }
0x106d   : > { %43126 = vmatprep.subr.bf16.mxu0 %v43125_v51 }
0x1070   : > { %43128 = vmatpush3.bf16.msra.mxu0 %v43125_v51  ;;  %v14273_v51 = vsub.f32 %v37177_v4, %v14183_v46 }
0x1071   : > { %43130 = vmatprep.subr.bf16.mxu0 %v43129_v43 }
0x1074   : > { %43132 = vmatpush3.bf16.msra.mxu0 %v43129_v43  ;;  %v14280_v43 = vsub.f32 %v37178_v34, %v14186_v38  ;;  %v13665_v38 = vld [vmem:[%s48772_s11] sm:$0xff] }
0x1075   : > { %43134 = vmatprep.subr.bf16.mxu0 %v43133_v0 }
0x1076   : > { %v14281_v36 = vand.u32 4294901760, %v14280_v43 }
0x1078   : > { %43136 = vmatpush3.bf16.msra.mxu0 %v43133_v0  ;;  %v37179_v0 = vld [vmem:[%s48772_s11 + $0x30] sm:$0xff] }
0x1079   : > { %43138 = vmatprep.subr.bf16.mxu0 %v47145_v54 }
0x107b   : > { %40222 = vmatmul.mubr.f32.vlgmr.msra.gmra.mrb[26].mxu0 %v13166_v23 }
0x107c   : > { %43140 = vmatpush3.bf16.msra.mxu0 %v47145_v54  ;;  %40240 = vmatprep.mubr.f32.mxu0 %v13157_v32 }
0x107d   : > { %43142 = vmatprep.subr.bf16.mxu0 %v47158_v9 }
0x1080   : > { %43144 = vmatpush3.bf16.msra.mxu0 %v47158_v9 }
0x1081   : > { %43146 = vmatprep.subr.bf16.mxu0 %v47168_v39 }
0x1084   : > { %43148 = vmatpush3.bf16.msra.mxu0 %v47168_v39 }
0x1085   : > { %43150 = vmatprep.subr.bf16.mxu0 %v47178_v31 }
0x1088   : > { %43152 = vmatpush3.bf16.msra.mxu0 %v47178_v31 }
0x1089   : > { %43154 = vmatprep.subr.bf16.mxu0 %v43153_v45 }
0x108b   : > { %40241 = vmatmul.mubr.f32.vlgmr.msra.gmra.mrb[26].mxu0 %v13167_v1 }
0x108c   : > { %43156 = vmatpush3.bf16.msra.mxu0 %v43153_v45  ;;  %40259 = vmatprep.mubr.f32.mxu0 %v13155_v11  ;;  %v37180_v45 = vld [vmem:[%s48772_s11 + $0x38] sm:$0xff] }
0x108d   : > { %43158 = vmatprep.subr.bf16.mxu0 %v43157_v37 }
0x1090   : > { %43160 = vmatpush3.bf16.msra.mxu0 %v43157_v37  ;;  %v14189_v37 = vand.u32 4294901760, %v37179_v0 }
0x1091   : > { %43162 = vmatprep.subr.bf16.mxu0 %v43161_v30 }
0x1092   : > { %v14287_v5 = vsub.f32 %v37179_v0, %v14189_v37  ;;  %v14717_v0 = vand.u32 4294901760, %v13665_v38 }
0x1094   : > { %43164 = vmatpush3.bf16.msra.mxu0 %v43161_v30  ;;  %v14192_v30 = vand.u32 4294901760, %v37180_v45  ;;  %v14288_v1 = vand.u32 4294901760, %v14287_v5 }
0x1095   : > { %43166 = vmatprep.subr.bf16.mxu0 %v43165_v20 }
0x1096   : > { %v47253_v40 = vpack.c.bf16 %v14192_v30, %v14189_v37  ;;  %v14289_v58 = vsub.f32 %v14287_v5, %v14288_v1 }
0x1098   : > { %43168 = vmatpush3.bf16.msra.mxu0 %v43165_v20  ;;  %v14274_v20 = vand.u32 4294901760, %v14273_v51  ;;  %v14290_v15 = vand.u32 4294901760, %v14289_v58 }
0x1099   : > { %43170 = vmatprep.subr.bf16.mxu0 %v47145_v54 }
0x109a   : > { %v14275_v48 = vsub.f32 %v14273_v51, %v14274_v20 }
0x109b   : > { %40260 = vmatmul.mubr.f32.vlgmr.msra.gmra.mrb[26].mxu0 %v13165_v24 }
0x109c   : > { %43172 = vmatpush3.bf16.msra.mxu0 %v47145_v54  ;;  %40278 = vmatprep.mubr.f32.mxu0 %v13155_v11  ;;  %v37176_v54 = vld [vmem:[%s48771_s1] ss:$0 sm:$0xff]  ;;  %v14294_v11 = vsub.f32 %v37180_v45, %v14192_v30  ;;  %v14276_v23 = vand.u32 4294901760, %v14275_v48  ;;  %v13667_v30 = vld [vmem:[%s48772_s11 + $0x10] sm:$0xff] }
0x109d   : > { %43174 = vmatprep.subr.bf16.mxu0 %v47158_v9  ;;  %v14723_v48 = vand.u32 4294901760, %v13667_v30 }
0x109e   : > { %v14295_v32 = vand.u32 4294901760, %v14294_v11 }
0x10a0   : > { %43176 = vmatpush3.bf16.msra.mxu0 %v47158_v9  ;;  %v14296_v21 = vsub.f32 %v14294_v11, %v14295_v32 }
0x10a1   : > { %43178 = vmatprep.subr.bf16.mxu0 %v47168_v39 }
0x10a4   : > { %43180 = vmatpush3.bf16.msra.mxu0 %v47168_v39 }
0x10a5   : > { %43182 = vmatprep.subr.bf16.mxu0 %v47178_v31 }
0x10a8   : > { %43184 = vmatpush3.bf16.msra.mxu0 %v47178_v31 }
0x10ab   : > { %40279 = vmatmul.mubr.f32.vlgmr.msra.gmra.mrb[26].mxu0 %v13165_v24  ;;  %v14282_v24 = vsub.f32 %v14280_v43, %v14281_v36 }
0x10ac   : > { %40459 = vmatprep.mubr.f32.mxu0 %v46447_v63 }
0x10ad   : > { %v14283_v6 = vand.u32 4294901760, %v14282_v24 }
0x10af   : > { %v43217_v29 = vpack.c.bf16 %v14283_v6, %v14276_v23 }
0x117e   : > { %v40280_v47 = vpop.f32.mrb[26].mxu0 }
0x117f   : > { %v44687_v19 = vadd.f32 %v40280_v47, %v37176_v54  ;;  %v13652_v53 = vpop.f32.mrb[27].mxu0 }
0x1180   : > { %v44688_v57 = vadd.f32 %v37176_v54, %v13652_v53  ;;  %v14297_v54 = vand.u32 4294901760, %v14296_v21  ;;  %v43229_v53 = vpack.c.bf16 %v14294_v11, %v14287_v5  ;;  %v14807_v5 = vsub.f32 %v13665_v38, %v14717_v0  ;;  %v37181_v38 = vld [vmem:[%s48772_s11 + $0x40] sm:$0xff] }
0x1181   : > { %v47205_v9 = vadd.f32 %v44687_v19, %v47048_v59  ;;  %v43225_v19 = vpack.c.bf16 %v14280_v43, %v14273_v51  ;;  %v13666_v51 = vld [vmem:[%s48772_s11 + $0x8] sm:$0xff] }
0x1182   : > { %v47208_v39 = vadd.f32 %v44688_v57, %v47051_v61  ;;  %v43221_v47 = vpack.c.bf16 %v14297_v54, %v14290_v15  ;;  %v43241_v57 = vpack.c.bf16 %v14281_v36, %v14274_v20  ;;  %v14720_v45 = vand.u32 4294901760, %v13666_v51  ;;  %v13668_v20 = vld [vmem:[%s48772_s11 + $0x18] sm:$0xff] }
0x1183   : > { %v13673_v33 = vand.u32 4294901760, %v47205_v9  ;;  %v14714_v36 = vsel %vm3529_vm3, %v47205_v9, 0  ;;  %v14726_v24 = vand.u32 4294901760, %v13668_v20 }
0x1184   : > { %v13670_v31 = vand.u32 4294901760, %v47208_v39  ;;  %v14711_v43 = vsel %vm3529_vm3, %v47208_v39, 0  ;;  %v14814_v11 = vsub.f32 %v13666_v51, %v14720_v45  ;;  %v47290_v6 = vand.u32 4294901760, %v14714_v36  ;;  %v37182_v51 = vld [vmem:[%s48772_s11 + $0x48] sm:$0xff] }
0x1185   : > { %v13765_v12 = vsub.f32 %v47205_v9, %v13673_v33  ;;  %v47279_v37 = vand.u32 4294901760, %v14711_v43  ;;  %v14828_v58 = vsub.f32 %v13668_v20, %v14726_v24  ;;  %v47296_v54 = vpack.c.bf16 %v14720_v45, %v14717_v0 }
0x1186   : > { %v43185_v35 = vpack.c.bf16 %v13673_v33, %v13670_v31  ;;  %v13758_v28 = vsub.f32 %v47208_v39, %v13670_v31  ;;  %v43245_v33 = vpack.c.bf16 %v14295_v32, %v14288_v1  ;;  %v14808_v1 = vand.u32 4294901760, %v14807_v5 }
0x1187   : > { %v13766_v62 = vand.u32 4294901760, %v13765_v12  ;;  %v14786_v23 = vsub.f32 %v14711_v43, %v47279_v37  ;;  %v14815_v32 = vand.u32 4294901760, %v14814_v11  ;;  %v14796_v15 = vsub.f32 %v14714_v36, %v47290_v6  ;;  %v37183_v36 = vld [vmem:[%s48772_s11 + $0x50] sm:$0xff] }
0x1188   : > { %43186 = vmatprep.subr.bf16.mxu1 %v43185_v35  ;;  %43306 = vmatprep.subr.bf16.mxu0 %v43185_v35  ;;  %v13759_v3 = vand.u32 4294901760, %v13758_v28  ;;  %v43193_v60 = vpack.c.bf16 %v13765_v12, %v13758_v28  ;;  %v15758_v0 = vand.u32 4294901760, %v37181_v38 }
0x1189   : > { %43188 = vmatpush3.bf16.msra.mxu1 %v43185_v35  ;;  %43308 = vmatpush3.bf16.msra.mxu0 %v43185_v35  ;;  %v13767_v59 = vsub.f32 %v13765_v12, %v13766_v62  ;;  %v14787_v21 = vand.u32 4294901760, %v14786_v23 }
0x118a   : > { %v13760_v22 = vsub.f32 %v13758_v28, %v13759_v3  ;;  %v43201_v16 = vpack.c.bf16 %v13766_v62, %v13759_v3 }
0x118b   : > { %v13768_v50 = vand.u32 4294901760, %v13767_v59 }
0x118c   : > { %40286 = vmatmul.mubr.f32.vlgmr.msra.gmra.mrb[14].mxu1 %v46376_v26  ;;  %40460 = vmatmul.mubr.f32.vlgmr.msra.gmra.mrb[28].mxu0 %v46449_v2  ;;  %v13761_v61 = vand.u32 4294901760, %v13760_v22 }
0x118d   : > { %40292 = vmatprep.mubr.f32.mxu1 %v46347_v7  ;;  %40466 = vmatprep.mubr.f32.mxu0 %v46424_v41 }
0x118e   : > { %v43189_v27 = vpack.c.bf16 %v13768_v50, %v13761_v61 }
0x1190   : > { %43190 = vmatprep.subr.bf16.mxu1 %v43189_v27  ;;  %43310 = vmatprep.subr.bf16.mxu0 %v43189_v27 }
0x1191   : > { %43192 = vmatpush3.bf16.msra.mxu1 %v43189_v27  ;;  %43312 = vmatpush3.bf16.msra.mxu0 %v43189_v27 }
0x1192   : > { %43194 = vmatprep.subr.bf16.mxu1 %v43193_v60  ;;  %43314 = vmatprep.subr.bf16.mxu0 %v43193_v60 }
0x1194   : > { %40293 = vmatmul.mubr.f32.vlgmr.msra.gmra.mrb[14].mxu1 %v46352_v10  ;;  %40467 = vmatmul.mubr.f32.vlgmr.msra.gmra.mrb[28].mxu0 %v46426_v42 }
0x1195   : > { %43196 = vmatpush3.bf16.msra.mxu1 %v43193_v60  ;;  %43316 = vmatpush3.bf16.msra.mxu0 %v43193_v60 }
0x1196   : > { %43198 = vmatprep.subr.bf16.mxu1 %v43185_v35  ;;  %43318 = vmatprep.subr.bf16.mxu0 %v43185_v35 }
0x1197   : > { %40299 = vmatprep.mubr.f32.mxu1 %v46357_v13  ;;  %40473 = vmatprep.mubr.f32.mxu0 %v46429_v44 }
0x119c   : > { %40300 = vmatmul.mubr.f32.vlgmr.msra.gmra.mrb[14].mxu1 %v46361_v14  ;;  %40474 = vmatmul.mubr.f32.vlgmr.msra.gmra.mrb[28].mxu0 %v46434_v49 }
0x119d   : > { %43200 = vmatpush3.bf16.msra.mxu1 %v43185_v35  ;;  %43320 = vmatpush3.bf16.msra.mxu0 %v43185_v35 }
0x119e   : > { %43202 = vmatprep.subr.bf16.mxu1 %v43201_v16  ;;  %43322 = vmatprep.subr.bf16.mxu0 %v43201_v16 }
0x119f   : > { %40306 = vmatprep.mubr.f32.mxu1 %v46365_v17  ;;  %40480 = vmatprep.mubr.f32.mxu0 %v46437_v52 }
0x11a4   : > { %40307 = vmatmul.mubr.f32.vlgmr.msra.gmra.mrb[14].mxu1 %v46368_v18  ;;  %40481 = vmatmul.mubr.f32.vlgmr.msra.gmra.mrb[28].mxu0 %v46440_v55 }
0x11a5   : > { %43204 = vmatpush3.bf16.msra.mxu1 %v43201_v16  ;;  %43324 = vmatpush3.bf16.msra.mxu0 %v43201_v16 }
0x11a6   : > { %43206 = vmatprep.subr.bf16.mxu1 %v43185_v35  ;;  %43326 = vmatprep.subr.bf16.mxu0 %v43185_v35 }
0x11a7   : > { %40313 = vmatprep.mubr.f32.mxu1 %v46347_v7  ;;  %40487 = vmatprep.mubr.f32.mxu0 %v46424_v41 }
0x11ac   : > { %40314 = vmatmul.mubr.f32.vlgmr.msra.gmra.mrb[14].mxu1 %v46352_v10  ;;  %40488 = vmatmul.mubr.f32.vlgmr.msra.gmra.mrb[28].mxu0 %v46426_v42 }
0x11ad   : > { %43208 = vmatpush3.bf16.msra.mxu1 %v43185_v35  ;;  %43328 = vmatpush3.bf16.msra.mxu0 %v43185_v35 }
0x11ae   : > { %40320 = vmatprep.mubr.f32.mxu1 %v46347_v7  ;;  %40494 = vmatprep.mubr.f32.mxu0 %v46424_v41 }
0x11af   : > { %43210 = vmatprep.subr.bf16.mxu1 %v47243_v56 }
0x11b4   : > { %40321 = vmatmul.mubr.f32.vlgmr.msra.gmra.mrb[14].mxu1 %v46352_v10  ;;  %40495 = vmatmul.mubr.f32.vlgmr.msra.gmra.mrb[28].mxu0 %v46426_v42 }
0x11b5   : > { %40567 = vmatprep.mubr.f32.mxu0 %v46374_v25  ;;  %43212 = vmatpush3.bf16.msra.mxu1 %v47243_v56 }
0x11b6   : > { %43214 = vmatprep.subr.bf16.mxu1 %v47253_v40 }
0x11b9   : > { %43216 = vmatpush3.bf16.msra.mxu1 %v47253_v40 }
0x11ba   : > { %43218 = vmatprep.subr.bf16.mxu1 %v43217_v29 }
0x1287   : > { %v40322_v31 = vpop.f32.mrb[14].mxu1  ;;  %v47257_v12 = vpop.f32.mrb[28].mxu0 }
0x1288   : > { %v14180_v35 = vsel %vm3529_vm3, %v40322_v31, 0  ;;  %v14161_v28 = vpop.f32.mrb[15].mxu1  ;;  %v47260_v62 = vpop.f32.mrb[29].mxu0  ;;  %v47300_v31 = vpack.c.bf16 %v14726_v24, %v14723_v48  ;;  %v15764_v24 = vand.u32 4294901760, %v37183_v36 }
0x1289   : > { %v47262_v3 = vand.u32 4294901760, %v14180_v35  ;;  %v14177_v59 = vsel %vm3529_vm3, %v14161_v28, 0  ;;  %v15752_v43 = vsel %vm3529_vm3, %v47260_v62, 0  ;;  %v47330_v62 = vsub.f32 %v37181_v38, %v15758_v0  ;;  %v37185_v38 = vld [vmem:[#allocation12] ss:$0 sm:$0xff] }
0x128a   : > { %v14251_v22 = vand.u32 4294901760, %v14177_v59  ;;  %v47321_v20 = vand.u32 4294901760, %v15752_v43 }
0x128b   : > { %v14262_v50 = vsub.f32 %v14180_v35, %v47262_v3  ;;  %v14797_v35 = vand.u32 4294901760, %v14796_v15 }
0x128c   : > { %v14252_v61 = vsub.f32 %v14177_v59, %v14251_v22 }
0x128d   : > { %v14263_v27 = vand.u32 4294901760, %v14262_v50 }
0x128e   : > { %v14253_v60 = vand.u32 4294901760, %v14252_v61 }
0x128f   : > { %v14264_v16 = vsub.f32 %v14262_v50, %v14263_v27 }
0x1290   : > { %v14254_v4 = vsub.f32 %v14252_v61, %v14253_v60 }
0x1291   : > { %v14265_v46 = vand.u32 4294901760, %v14264_v16 }
0x1292   : > { %v14255_v34 = vand.u32 4294901760, %v14254_v4 }
0x1294   : > { %40331 = vmatprep.mubr.f32.mxu1 %v14255_v34 }
0x1295   : > { %40332 = vmatmul.mubr.f32.vlgmr.msra.gmra.mrb[16].mxu1 %v14265_v46  ;;  %v43289_v46 = vpack.c.bf16 %v14815_v32, %v14808_v1 }
0x1296   : > { %43220 = vmatpush3.bf16.msra.mxu1 %v43217_v29  ;;  %40342 = vmatprep.mubr.f32.mxu1 %v14251_v22  ;;  %v14821_v29 = vsub.f32 %v13667_v30, %v14723_v48  ;;  %v15761_v30 = vand.u32 4294901760, %v37182_v51  ;;  %v37184_v48 = vld [vmem:[%s48772_s11 + $0x58] sm:$0xff] }
0x1297   : > { %43222 = vmatprep.subr.bf16.mxu1 %v43221_v47 }
0x1298   : > { %v43277_v34 = vpack.c.bf16 %v14828_v58, %v14821_v29 }
0x129a   : > { %43224 = vmatpush3.bf16.msra.mxu1 %v43221_v47  ;;  %v14809_v47 = vsub.f32 %v14807_v5, %v14808_v1  ;;  %v15827_v1 = vsub.f32 %v15752_v43, %v47321_v20 }
0x129b   : > { %43226 = vmatprep.subr.bf16.mxu1 %v43225_v19 }
0x129c   : > { %v14810_v28 = vand.u32 4294901760, %v14809_v47  ;;  %v15828_v47 = vand.u32 4294901760, %v15827_v1 }
0x129d   : > { %40343 = vmatmul.mubr.f32.vlgmr.msra.gmra.mrb[16].mxu1 %v47262_v3 }
0x129e   : > { %43228 = vmatpush3.bf16.msra.mxu1 %v43225_v19  ;;  %40353 = vmatprep.mubr.f32.mxu1 %v14252_v61  ;;  %v14816_v19 = vsub.f32 %v14814_v11, %v14815_v32  ;;  %v14798_v61 = vsub.f32 %v14796_v15, %v14797_v35  ;;  %v15849_v32 = vand.u32 4294901760, %v47330_v62 }
0x129f   : > { %43230 = vmatprep.subr.bf16.mxu1 %v43229_v53 }
0x12a0   : > { %v14817_v59 = vand.u32 4294901760, %v14816_v19  ;;  %v14799_v16 = vand.u32 4294901760, %v14798_v61  ;;  %v15850_v19 = vsub.f32 %v47330_v62, %v15849_v32 }
0x12a2   : > { %43232 = vmatpush3.bf16.msra.mxu1 %v43229_v53  ;;  %v14822_v53 = vand.u32 4294901760, %v14821_v29 }
0x12a3   : > { %43234 = vmatprep.subr.bf16.mxu1 %v47243_v56 }
0x12a5   : > { %40354 = vmatmul.mubr.f32.vlgmr.msra.gmra.mrb[16].mxu1 %v14262_v50 }
0x12a6   : > { %43236 = vmatpush3.bf16.msra.mxu1 %v47243_v56  ;;  %40364 = vmatprep.mubr.f32.mxu1 %v14253_v60 }
0x12a7   : > { %43238 = vmatprep.subr.bf16.mxu1 %v47253_v40 }
0x12aa   : > { %43240 = vmatpush3.bf16.msra.mxu1 %v47253_v40 }
0x12ab   : > { %43242 = vmatprep.subr.bf16.mxu1 %v43241_v57 }
0x12ad   : > { %40365 = vmatmul.mubr.f32.vlgmr.msra.gmra.mrb[16].mxu1 %v14263_v27  ;;  %v43265_v27 = vpack.c.bf16 %v14817_v59, %v14810_v28  ;;  %v15829_v28 = vsub.f32 %v15827_v1, %v15828_v47 }
0x12ae   : > { %43244 = vmatpush3.bf16.msra.mxu1 %v43241_v57  ;;  %40375 = vmatprep.mubr.f32.mxu1 %v14251_v22  ;;  %v14829_v57 = vand.u32 4294901760, %v14828_v58 }
0x12af   : > { %43246 = vmatprep.subr.bf16.mxu1 %v43245_v33  ;;  %v15830_v61 = vand.u32 4294901760, %v15829_v28 }
0x12b0   : > { %v43293_v45 = vpack.c.bf16 %v14829_v57, %v14822_v53 }
0x12b2   : > { %43248 = vmatpush3.bf16.msra.mxu1 %v43245_v33  ;;  %v14788_v33 = vsub.f32 %v14786_v23, %v14787_v21 }
0x12b3   : > { %43250 = vmatprep.subr.bf16.mxu1 %v47243_v56 }
0x12b4   : > { %v14789_v50 = vand.u32 4294901760, %v14788_v33 }
0x12b5   : > { %40376 = vmatmul.mubr.f32.vlgmr.msra.gmra.mrb[16].mxu1 %v47262_v3 }
0x12b6   : > { %43252 = vmatpush3.bf16.msra.mxu1 %v47243_v56  ;;  %40386 = vmatprep.mubr.f32.mxu1 %v14251_v22  ;;  %v14823_v56 = vsub.f32 %v14821_v29, %v14822_v53  ;;  %v14830_v22 = vsub.f32 %v14828_v58, %v14829_v57 }
0x12b7   : > { %43254 = vmatprep.subr.bf16.mxu1 %v47253_v40 }
0x12b8   : > { %v14831_v60 = vand.u32 4294901760, %v14830_v22 }
0x12ba   : > { %43256 = vmatpush3.bf16.msra.mxu1 %v47253_v40  ;;  %v14824_v40 = vand.u32 4294901760, %v14823_v56  ;;  %v15851_v56 = vand.u32 4294901760, %v15850_v19  ;;  %v37187_v19 = vld [vmem:[%s48773_s0 + $0x28] sm:$0xff] }
0x12bb   : > { %43258 = vmatprep.subr.bf16.mxu1 %v47296_v54 }
0x12bc   : > { %v43269_v4 = vpack.c.bf16 %v14831_v60, %v14824_v40 }
0x12bd   : > { %40387 = vmatmul.mubr.f32.vlgmr.msra.gmra.mrb[16].mxu1 %v47262_v3  ;;  %v43273_v3 = vpack.c.bf16 %v14814_v11, %v14807_v5  ;;  %v15767_v5 = vand.u32 4294901760, %v37184_v48  ;;  %v15855_v11 = vsub.f32 %v37182_v51, %v15761_v30 }
0x12be   : > { %43260 = vmatpush3.bf16.msra.mxu1 %v47296_v54  ;;  %40397 = vmatprep.mubr.f32.mxu1 %v14789_v50 }
0x12bf   : > { %43262 = vmatprep.subr.bf16.mxu1 %v47300_v31  ;;  %v15856_v58 = vand.u32 4294901760, %v15855_v11  ;;  %v43333_v59 = vpack.c.bf16 %v15767_v5, %v15764_v24 }
0x12c1   : > { %v15857_v57 = vsub.f32 %v15855_v11, %v15856_v58 }
0x12c2   : > { %43264 = vmatpush3.bf16.msra.mxu1 %v47300_v31 }
0x12c3   : > { %43266 = vmatprep.subr.bf16.mxu1 %v43265_v27 }
0x12c5   : > { %40398 = vmatmul.mubr.f32.vlgmr.msra.gmra.mrb[16].mxu1 %v14799_v16 }
0x12c6   : > { %43268 = vmatpush3.bf16.msra.mxu1 %v43265_v27  ;;  %40408 = vmatprep.mubr.f32.mxu1 %v47279_v37 }
0x12c7   : > { %43270 = vmatprep.subr.bf16.mxu1 %v43269_v4 }
0x12ca   : > { %43272 = vmatpush3.bf16.msra.mxu1 %v43269_v4 }
0x12cb   : > { %43274 = vmatprep.subr.bf16.mxu1 %v43273_v3 }
0x12cd   : > { %40409 = vmatmul.mubr.f32.vlgmr.msra.gmra.mrb[16].mxu1 %v47290_v6 }
0x12ce   : > { %43276 = vmatpush3.bf16.msra.mxu1 %v43273_v3  ;;  %40419 = vmatprep.mubr.f32.mxu1 %v14786_v23  ;;  %v15755_v23 = vsel %vm3529_vm3, %v47257_v12, 0  ;;  %v43329_v12 = vpack.c.bf16 %v15761_v30, %v15758_v0  ;;  %v43345_v3 = vpack.c.bf16 %v15855_v11, %v47330_v62 }
0x12cf   : > { %43278 = vmatprep.subr.bf16.mxu1 %v43277_v34  ;;  %v47336_v29 = vand.u32 4294901760, %v15755_v23 }
0x12d1   : > { %v15837_v53 = vsub.f32 %v15755_v23, %v47336_v29 }
0x12d2   : > { %43280 = vmatpush3.bf16.msra.mxu1 %v43277_v34  ;;  %v43361_v34 = vpack.c.bf16 %v15856_v58, %v15849_v32 }
0x12d3   : > { %43282 = vmatprep.subr.bf16.mxu1 %v47296_v54  ;;  %v15838_v22 = vand.u32 4294901760, %v15837_v53 }
0x12d5   : > { %40420 = vmatmul.mubr.f32.vlgmr.msra.gmra.mrb[16].mxu1 %v14796_v15  ;;  %v15869_v15 = vsub.f32 %v37184_v48, %v15767_v5  ;;  %v15839_v27 = vsub.f32 %v15837_v53, %v15838_v22 }
0x12d6   : > { %43284 = vmatpush3.bf16.msra.mxu1 %v47296_v54  ;;  %40430 = vmatprep.mubr.f32.mxu1 %v14787_v21  ;;  %v15862_v21 = vsub.f32 %v37183_v36, %v15764_v24 }
0x12d7   : > { %43286 = vmatprep.subr.bf16.mxu1 %v47300_v31  ;;  %v15840_v4 = vand.u32 4294901760, %v15839_v27 }
0x12d8   : > { %v15863_v33 = vand.u32 4294901760, %v15862_v21 }
0x12da   : > { %43288 = vmatpush3.bf16.msra.mxu1 %v47300_v31  ;;  %v15864_v50 = vsub.f32 %v15862_v21, %v15863_v33 }
0x12db   : > { %43290 = vmatprep.subr.bf16.mxu1 %v43289_v46 }
0x12dc   : > { %v15865_v60 = vand.u32 4294901760, %v15864_v50 }
0x12dd   : > { %40431 = vmatmul.mubr.f32.vlgmr.msra.gmra.mrb[16].mxu1 %v14797_v35  ;;  %v15870_v35 = vand.u32 4294901760, %v15869_v15 }
0x12de   : > { %43292 = vmatpush3.bf16.msra.mxu1 %v43289_v46  ;;  %40441 = vmatprep.mubr.f32.mxu1 %v47279_v37 }
0x12df   : > { %43294 = vmatprep.subr.bf16.mxu1 %v43293_v45  ;;  %v43365_v46 = vpack.c.bf16 %v15870_v35, %v15863_v33 }
0x12e2   : > { %43296 = vmatpush3.bf16.msra.mxu1 %v43293_v45 }
0x12e3   : > { %43298 = vmatprep.subr.bf16.mxu1 %v47296_v54 }
0x12e5   : > { %40442 = vmatmul.mubr.f32.vlgmr.msra.gmra.mrb[16].mxu1 %v47290_v6 }
0x12e6   : > { %43300 = vmatpush3.bf16.msra.mxu1 %v47296_v54  ;;  %40452 = vmatprep.mubr.f32.mxu1 %v47279_v37  ;;  %v15858_v54 = vand.u32 4294901760, %v15857_v57  ;;  %v15871_v37 = vsub.f32 %v15869_v15, %v15870_v35  ;;  %v16819_v57 = vand.u32 4294901760, %v37187_v19 }
0x12e7   : > { %43302 = vmatprep.subr.bf16.mxu1 %v47300_v31 }
0x12e8   : > { %v43337_v40 = vpack.c.bf16 %v15858_v54, %v15851_v56  ;;  %v15872_v16 = vand.u32 4294901760, %v15871_v37  ;;  %v16913_v28 = vsub.f32 %v37187_v19, %v16819_v57  ;;  %v37189_v56 = vld [vmem:[%s48773_s0 + $0x38] sm:$0xff] }
0x12e9   : > { %v16825_v54 = vand.u32 4294901760, %v37189_v56 }
0x12ea   : > { %43304 = vmatpush3.bf16.msra.mxu1 %v47300_v31  ;;  %v43341_v31 = vpack.c.bf16 %v15872_v16, %v15865_v60  ;;  %v16914_v37 = vand.u32 4294901760, %v16913_v28 }
0x12eb   : > { %43330 = vmatprep.subr.bf16.mxu1 %v43329_v12  ;;  %v16927_v16 = vsub.f32 %v37189_v56, %v16825_v54 }
0x12ed   : > { %40453 = vmatmul.mubr.f32.vlgmr.msra.gmra.mrb[16].mxu1 %v47290_v6  ;;  %v43349_v6 = vpack.c.bf16 %v15869_v15, %v15862_v21 }
0x12ee   : > { %43332 = vmatpush3.bf16.msra.mxu1 %v43329_v12  ;;  %40505 = vmatprep.mubr.f32.mxu1 %v15830_v61 }
0x12ef   : > { %43334 = vmatprep.subr.bf16.mxu1 %v43333_v59 }
0x12f2   : > { %43336 = vmatpush3.bf16.msra.mxu1 %v43333_v59 }
0x12f3   : > { %43338 = vmatprep.subr.bf16.mxu1 %v43337_v40 }
0x12f5   : > { %40506 = vmatmul.mubr.f32.vlgmr.msra.gmra.mrb[16].mxu1 %v15840_v4 }
0x12f6   : > { %43340 = vmatpush3.bf16.msra.mxu1 %v43337_v40  ;;  %40516 = vmatprep.mubr.f32.mxu1 %v47321_v20  ;;  %v16915_v40 = vsub.f32 %v16913_v28, %v16914_v37 }
0x12f7   : > { %43342 = vmatprep.subr.bf16.mxu1 %v43341_v31 }
0x12fa   : > { %43344 = vmatpush3.bf16.msra.mxu1 %v43341_v31  ;;  %v16916_v31 = vand.u32 4294901760, %v16915_v40 }
0x12fb   : > { %43346 = vmatprep.subr.bf16.mxu1 %v43345_v3 }
0x12fd   : > { %40517 = vmatmul.mubr.f32.vlgmr.msra.gmra.mrb[16].mxu1 %v47336_v29 }
0x12fe   : > { %43348 = vmatpush3.bf16.msra.mxu1 %v43345_v3  ;;  %40527 = vmatprep.mubr.f32.mxu1 %v15827_v1 }
0x12ff   : > { %43350 = vmatprep.subr.bf16.mxu1 %v43349_v6 }
0x1302   : > { %43352 = vmatpush3.bf16.msra.mxu1 %v43349_v6  ;;  %v16928_v6 = vand.u32 4294901760, %v16927_v16 }
0x1303   : > { %43354 = vmatprep.subr.bf16.mxu1 %v43329_v12 }
0x1305   : > { %40528 = vmatmul.mubr.f32.vlgmr.msra.gmra.mrb[16].mxu1 %v15837_v53 }
0x1306   : > { %43356 = vmatpush3.bf16.msra.mxu1 %v43329_v12  ;;  %40538 = vmatprep.mubr.f32.mxu1 %v15828_v47 }
0x1307   : > { %43358 = vmatprep.subr.bf16.mxu1 %v43333_v59 }
0x130a   : > { %43360 = vmatpush3.bf16.msra.mxu1 %v43333_v59 }
0x130b   : > { %43362 = vmatprep.subr.bf16.mxu1 %v43361_v34 }
0x130d   : > { %40539 = vmatmul.mubr.f32.vlgmr.msra.gmra.mrb[16].mxu1 %v15838_v22 }
0x130e   : > { %43364 = vmatpush3.bf16.msra.mxu1 %v43361_v34  ;;  %40549 = vmatprep.mubr.f32.mxu1 %v47321_v20 }
0x130f   : > { %43366 = vmatprep.subr.bf16.mxu1 %v43365_v46 }
0x1312   : > { %43368 = vmatpush3.bf16.msra.mxu1 %v43365_v46 }
0x1313   : > { %43370 = vmatprep.subr.bf16.mxu1 %v43329_v12 }
0x1315   : > { %40550 = vmatmul.mubr.f32.vlgmr.msra.gmra.mrb[16].mxu1 %v47336_v29 }
0x1316   : > { %43372 = vmatpush3.bf16.msra.mxu1 %v43329_v12  ;;  %40560 = vmatprep.mubr.f32.mxu1 %v47321_v20  ;;  %v37186_v12 = vld [vmem:[%s48773_s0 + $0x20] sm:$0xff] }
0x1317   : > { %43374 = vmatprep.subr.bf16.mxu1 %v43333_v59  ;;  %v16816_v53 = vand.u32 4294901760, %v37186_v12 }
0x1319   : > { %v47391_v33 = vpack.c.bf16 %v16819_v57, %v16816_v53  ;;  %v16906_v35 = vsub.f32 %v37186_v12, %v16816_v53 }
0x131a   : > { %43376 = vmatpush3.bf16.msra.mxu1 %v43333_v59  ;;  %v37188_v59 = vld [vmem:[%s48773_s0 + $0x30] sm:$0xff] }
0x131b   : > { %v16822_v22 = vand.u32 4294901760, %v37188_v59  ;;  %v16907_v50 = vand.u32 4294901760, %v16906_v35 }
0x131d   : > { %40561 = vmatmul.mubr.f32.vlgmr.msra.gmra.mrb[16].mxu1 %v47336_v29  ;;  %v47401_v61 = vpack.c.bf16 %v16825_v54, %v16822_v22  ;;  %v16908_v27 = vsub.f32 %v16906_v35, %v16907_v50  ;;  %v16920_v60 = vsub.f32 %v37188_v59, %v16822_v22  ;;  %v16299_v59 = vld [vmem:[%s48773_s0 + $0x8] sm:$0xff] }
0x131e   : > { %40741 = vmatprep.mubr.f32.mxu1 %v46447_v63  ;;  %v17353_v54 = vand.u32 4294901760, %v16299_v59 }
0x131f   : > { %v16909_v4 = vand.u32 4294901760, %v16908_v27  ;;  %v16921_v3 = vand.u32 4294901760, %v16920_v60  ;;  %v16301_v27 = vld [vmem:[%s48773_s0 + $0x18] sm:$0xff] }
0x1321   : > { %v43409_v34 = vpack.c.bf16 %v16916_v31, %v16909_v4  ;;  %v16922_v46 = vsub.f32 %v16920_v60, %v16921_v3  ;;  %v17447_v4 = vsub.f32 %v16299_v59, %v17353_v54  ;;  %v37191_v59 = vld [vmem:[%s48773_s0 + $0x48] sm:$0xff] }
0x13f0   : > { %v40562_v51 = vpop.f32.mrb[16].mxu1 }
0x13f1   : > { %v16294_v43 = vadd.f32 %v40562_v51, %v37185_v38  ;;  %v16275_v0 = vpop.f32.mrb[17].mxu1  ;;  %v16923_v51 = vand.u32 4294901760, %v16922_v46 }
0x13f2   : > { %v16293_v45 = vadd.f32 %v37185_v38, %v16275_v0  ;;  %v16929_v38 = vsub.f32 %v16927_v16, %v16928_v6 }
0x13f3   : > { %v47355_v30 = vmax.f32 %v16294_v43, 0.0 }
0x13f4   : > { %v47357_v36 = vmax.f32 %v16293_v45, 0.0  ;;  %v16930_v43 = vand.u32 4294901760, %v16929_v38  ;;  %v43417_v45 = vpack.c.bf16 %v16913_v28, %v16906_v35  ;;  %v16298_v28 = vld [vmem:[%s48773_s0] sm:$0xff] }
0x13f5   : > { %v16306_v48 = vand.u32 4294901760, %v47355_v30  ;;  %v17350_v22 = vand.u32 4294901760, %v16298_v28  ;;  %v17347_v40 = vsel %vm3529_vm3, %v47355_v30, 0 }
0x13f6   : > { %v16303_v62 = vand.u32 4294901760, %v47357_v36  ;;  %v43413_v0 = vpack.c.bf16 %v16930_v43, %v16923_v51  ;;  %v17344_v56 = vsel %vm3529_vm3, %v47357_v36, 0 }
0x13f7   : > { %v16398_v20 = vsub.f32 %v47355_v30, %v16306_v48  ;;  %v47444_v43 = vpack.c.bf16 %v17353_v54, %v17350_v22 }
0x13f8   : > { %v43377_v24 = vpack.c.bf16 %v16306_v48, %v16303_v62  ;;  %v16391_v5 = vsub.f32 %v47357_v36, %v16303_v62  ;;  %v43421_v48 = vpack.c.bf16 %v16927_v16, %v16920_v60  ;;  %v43433_v62 = vpack.c.bf16 %v16914_v37, %v16907_v50  ;;  %v16300_v37 = vld [vmem:[%s48773_s0 + $0x10] sm:$0xff] }
0x13f9   : > { %v16399_v11 = vand.u32 4294901760, %v16398_v20  ;;  %v47427_v50 = vand.u32 4294901760, %v17344_v56  ;;  %v17356_v36 = vand.u32 4294901760, %v16300_v37  ;;  %v17359_v60 = vand.u32 4294901760, %v16301_v27 }
0x13fa   : > { %v16392_v23 = vand.u32 4294901760, %v16391_v5  ;;  %43378 = vmatprep.subr.bf16.mxu0 %v43377_v24  ;;  %43498 = vmatprep.subr.bf16.mxu1 %v43377_v24  ;;  %v43385_v1 = vpack.c.bf16 %v16398_v20, %v16391_v5  ;;  %v17440_v16 = vsub.f32 %v16298_v28, %v17350_v22  ;;  %v37190_v28 = vld [vmem:[%s48773_s0 + $0x40] sm:$0xff] }
0x13fb   : > { %43380 = vmatpush3.bf16.msra.mxu0 %v43377_v24  ;;  %43500 = vmatpush3.bf16.msra.mxu1 %v43377_v24  ;;  %v16400_v32 = vsub.f32 %v16398_v20, %v16399_v11  ;;  %v43437_v20 = vpack.c.bf16 %v16928_v6, %v16921_v3  ;;  %v17419_v31 = vsub.f32 %v17344_v56, %v47427_v50  ;;  %v47438_v3 = vand.u32 4294901760, %v17347_v40 }
0x13fc   : > { %v16393_v29 = vsub.f32 %v16391_v5, %v16392_v23  ;;  %v43393_v58 = vpack.c.bf16 %v16399_v11, %v16392_v23  ;;  %v17441_v6 = vand.u32 4294901760, %v17440_v16  ;;  %v17454_v46 = vsub.f32 %v16300_v37, %v17356_v36 }
0x13fd   : > { %v16401_v21 = vand.u32 4294901760, %v16400_v32  ;;  %v17461_v38 = vsub.f32 %v16301_v27, %v17359_v60  ;;  %v17420_v51 = vand.u32 4294901760, %v17419_v31  ;;  %v17429_v30 = vsub.f32 %v17347_v40, %v47438_v3  ;;  %v37192_v40 = vld [vmem:[%s48773_s0 + $0x50] sm:$0xff] }
0x13fe   : > { %40568 = vmatmul.mubr.f32.vlgmr.msra.gmra.mrb[30].mxu0 %v46376_v26  ;;  %40742 = vmatmul.mubr.f32.vlgmr.msra.gmra.mrb[18].mxu1 %v46449_v2  ;;  %v16394_v15 = vand.u32 4294901760, %v16393_v29  ;;  %v18391_v22 = vand.u32 4294901760, %v37190_v28  ;;  %v18394_v37 = vand.u32 4294901760, %v37191_v59 }
0x13ff   : > { %40574 = vmatprep.mubr.f32.mxu0 %v46347_v7  ;;  %40748 = vmatprep.mubr.f32.mxu1 %v46424_v41 }
0x1400   : > { %v43381_v47 = vpack.c.bf16 %v16401_v21, %v16394_v15 }
0x1402   : > { %43382 = vmatprep.subr.bf16.mxu0 %v43381_v47  ;;  %43502 = vmatprep.subr.bf16.mxu1 %v43381_v47 }
0x1403   : > { %43384 = vmatpush3.bf16.msra.mxu0 %v43381_v47  ;;  %43504 = vmatpush3.bf16.msra.mxu1 %v43381_v47 }
0x1404   : > { %43386 = vmatprep.subr.bf16.mxu0 %v43385_v1  ;;  %43506 = vmatprep.subr.bf16.mxu1 %v43385_v1 }
0x1406   : > { %40575 = vmatmul.mubr.f32.vlgmr.msra.gmra.mrb[30].mxu0 %v46352_v10  ;;  %40749 = vmatmul.mubr.f32.vlgmr.msra.gmra.mrb[18].mxu1 %v46426_v42 }
0x1407   : > { %43388 = vmatpush3.bf16.msra.mxu0 %v43385_v1  ;;  %43508 = vmatpush3.bf16.msra.mxu1 %v43385_v1 }
0x1408   : > { %43390 = vmatprep.subr.bf16.mxu0 %v43377_v24  ;;  %43510 = vmatprep.subr.bf16.mxu1 %v43377_v24 }
0x1409   : > { %40581 = vmatprep.mubr.f32.mxu0 %v46357_v13  ;;  %40755 = vmatprep.mubr.f32.mxu1 %v46429_v44 }
0x140e   : > { %40582 = vmatmul.mubr.f32.vlgmr.msra.gmra.mrb[30].mxu0 %v46361_v14  ;;  %40756 = vmatmul.mubr.f32.vlgmr.msra.gmra.mrb[18].mxu1 %v46434_v49 }
0x140f   : > { %43392 = vmatpush3.bf16.msra.mxu0 %v43377_v24  ;;  %43512 = vmatpush3.bf16.msra.mxu1 %v43377_v24 }
0x1410   : > { %43394 = vmatprep.subr.bf16.mxu0 %v43393_v58  ;;  %43514 = vmatprep.subr.bf16.mxu1 %v43393_v58 }
0x1411   : > { %40588 = vmatprep.mubr.f32.mxu0 %v46365_v17  ;;  %40762 = vmatprep.mubr.f32.mxu1 %v46437_v52 }
0x1416   : > { %40589 = vmatmul.mubr.f32.vlgmr.msra.gmra.mrb[30].mxu0 %v46368_v18  ;;  %40763 = vmatmul.mubr.f32.vlgmr.msra.gmra.mrb[18].mxu1 %v46440_v55 }
0x1417   : > { %43396 = vmatpush3.bf16.msra.mxu0 %v43393_v58  ;;  %43516 = vmatpush3.bf16.msra.mxu1 %v43393_v58 }
0x1418   : > { %43398 = vmatprep.subr.bf16.mxu0 %v43377_v24  ;;  %43518 = vmatprep.subr.bf16.mxu1 %v43377_v24 }
0x1419   : > { %40595 = vmatprep.mubr.f32.mxu0 %v46347_v7  ;;  %40769 = vmatprep.mubr.f32.mxu1 %v46424_v41 }
0x141e   : > { %40596 = vmatmul.mubr.f32.vlgmr.msra.gmra.mrb[30].mxu0 %v46352_v10  ;;  %40770 = vmatmul.mubr.f32.vlgmr.msra.gmra.mrb[18].mxu1 %v46426_v42 }
0x141f   : > { %43400 = vmatpush3.bf16.msra.mxu0 %v43377_v24  ;;  %43520 = vmatpush3.bf16.msra.mxu1 %v43377_v24 }
0x1420   : > { %40602 = vmatprep.mubr.f32.mxu0 %v46347_v7  ;;  %40776 = vmatprep.mubr.f32.mxu1 %v46424_v41 }
0x1421   : > { %43402 = vmatprep.subr.bf16.mxu0 %v47391_v33 }
0x1426   : > { %40603 = vmatmul.mubr.f32.vlgmr.msra.gmra.mrb[30].mxu0 %v46352_v10  ;;  %40777 = vmatmul.mubr.f32.vlgmr.msra.gmra.mrb[18].mxu1 %v46426_v42 }
0x1427   : > { %43404 = vmatpush3.bf16.msra.mxu0 %v47391_v33 }
0x1428   : > { %43406 = vmatprep.subr.bf16.mxu0 %v47401_v61 }
0x142b   : > { %43408 = vmatpush3.bf16.msra.mxu0 %v47401_v61 }
0x142c   : > { %43410 = vmatprep.subr.bf16.mxu0 %v43409_v34 }
0x14f9   : > { %v40604_v24 = vpop.f32.mrb[30].mxu0  ;;  %v47405_v5 = vpop.f32.mrb[18].mxu1 }
0x14fa   : > { %v16813_v11 = vsel %vm3529_vm3, %v40604_v24, 0  ;;  %v16794_v23 = vpop.f32.mrb[31].mxu0  ;;  %v47408_v1 = vpop.f32.mrb[19].mxu1  ;;  %v47448_v24 = vpack.c.bf16 %v17359_v60, %v17356_v36  ;;  %v37193_v36 = vld [vmem:[%s48773_s0 + $0x58] sm:$0xff]  ;;  %v18397_v60 = vand.u32 4294901760, %v37192_v40 }
0x14fb   : > { %v47410_v32 = vand.u32 4294901760, %v16813_v11  ;;  %v16810_v29 = vsel %vm3529_vm3, %v16794_v23, 0  ;;  %v18385_v56 = vsel %vm3529_vm3, %v47408_v1, 0  ;;  %v47478_v1 = vsub.f32 %v37190_v28, %v18391_v22  ;;  %v37194_v28 = vld [vmem:[#allocation13] ss:$0 sm:$0xff] }
0x14fc   : > { %v16884_v58 = vand.u32 4294901760, %v16810_v29  ;;  %v47469_v27 = vand.u32 4294901760, %v18385_v56 }
0x14fd   : > { %v16895_v21 = vsub.f32 %v16813_v11, %v47410_v32  ;;  %v17430_v11 = vand.u32 4294901760, %v17429_v30 }
0x14fe   : > { %v16885_v15 = vsub.f32 %v16810_v29, %v16884_v58 }
0x14ff   : > { %v16896_v47 = vand.u32 4294901760, %v16895_v21 }
0x1500   : > { %v16886_v12 = vand.u32 4294901760, %v16885_v15 }
0x1501   : > { %v16897_v19 = vsub.f32 %v16895_v21, %v16896_v47 }
0x1502   : > { %v16887_v53 = vsub.f32 %v16885_v15, %v16886_v12 }
0x1503   : > { %v16898_v35 = vand.u32 4294901760, %v16897_v19 }
0x1504   : > { %v16888_v57 = vand.u32 4294901760, %v16887_v53 }
0x1506   : > { %40613 = vmatprep.mubr.f32.mxu0 %v16888_v57  ;;  %v43469_v57 = vpack.c.bf16 %v17461_v38, %v17454_v46 }
0x1507   : > { %40614 = vmatmul.mubr.f32.vlgmr.msra.gmra.mrb[32].mxu0 %v16898_v35 }
0x1508   : > { %43412 = vmatpush3.bf16.msra.mxu0 %v43409_v34  ;;  %40624 = vmatprep.mubr.f32.mxu0 %v16884_v58  ;;  %v17448_v34 = vand.u32 4294901760, %v17447_v4 }
0x1509   : > { %43414 = vmatprep.subr.bf16.mxu0 %v43413_v0 }
0x150a   : > { %v43481_v35 = vpack.c.bf16 %v17448_v34, %v17441_v6 }
0x150c   : > { %43416 = vmatpush3.bf16.msra.mxu0 %v43413_v0  ;;  %v17442_v0 = vsub.f32 %v17440_v16, %v17441_v6  ;;  %v18460_v6 = vsub.f32 %v18385_v56, %v47469_v27 }
0x150d   : > { %43418 = vmatprep.subr.bf16.mxu0 %v43417_v45 }
0x150e   : > { %v17443_v23 = vand.u32 4294901760, %v17442_v0  ;;  %v18461_v0 = vand.u32 4294901760, %v18460_v6 }
0x150f   : > { %40625 = vmatmul.mubr.f32.vlgmr.msra.gmra.mrb[32].mxu0 %v47410_v32 }
0x1510   : > { %43420 = vmatpush3.bf16.msra.mxu0 %v43417_v45  ;;  %40635 = vmatprep.mubr.f32.mxu0 %v16885_v15  ;;  %v17449_v45 = vsub.f32 %v17447_v4, %v17448_v34  ;;  %v17431_v15 = vsub.f32 %v17429_v30, %v17430_v11  ;;  %v18482_v34 = vand.u32 4294901760, %v47478_v1 }
0x1511   : > { %43422 = vmatprep.subr.bf16.mxu0 %v43421_v48 }
0x1512   : > { %v17450_v29 = vand.u32 4294901760, %v17449_v45  ;;  %v17432_v19 = vand.u32 4294901760, %v17431_v15  ;;  %v18483_v45 = vsub.f32 %v47478_v1, %v18482_v34 }
0x1514   : > { %43424 = vmatpush3.bf16.msra.mxu0 %v43421_v48  ;;  %v17455_v48 = vand.u32 4294901760, %v17454_v46 }
0x1515   : > { %43426 = vmatprep.subr.bf16.mxu0 %v47391_v33 }
0x1517   : > { %40636 = vmatmul.mubr.f32.vlgmr.msra.gmra.mrb[32].mxu0 %v16895_v21 }
0x1518   : > { %43428 = vmatpush3.bf16.msra.mxu0 %v47391_v33  ;;  %40646 = vmatprep.mubr.f32.mxu0 %v16886_v12 }
0x1519   : > { %43430 = vmatprep.subr.bf16.mxu0 %v47401_v61 }
0x151c   : > { %43432 = vmatpush3.bf16.msra.mxu0 %v47401_v61 }
0x151d   : > { %43434 = vmatprep.subr.bf16.mxu0 %v43433_v62 }
0x151f   : > { %40647 = vmatmul.mubr.f32.vlgmr.msra.gmra.mrb[32].mxu0 %v16896_v47  ;;  %v43457_v47 = vpack.c.bf16 %v17450_v29, %v17443_v23  ;;  %v18462_v23 = vsub.f32 %v18460_v6, %v18461_v0 }
0x1520   : > { %43436 = vmatpush3.bf16.msra.mxu0 %v43433_v62  ;;  %40657 = vmatprep.mubr.f32.mxu0 %v16884_v58  ;;  %v17462_v62 = vand.u32 4294901760, %v17461_v38 }
0x1521   : > { %43438 = vmatprep.subr.bf16.mxu0 %v43437_v20  ;;  %v18463_v15 = vand.u32 4294901760, %v18462_v23  ;;  %v37202_v23 = vld [vmem:[%s48766_s22 + $0x38] sm:$0xff] }
0x1522   : > { %v43485_v54 = vpack.c.bf16 %v17462_v62, %v17455_v48 }
0x1524   : > { %43440 = vmatpush3.bf16.msra.mxu0 %v43437_v20  ;;  %v17421_v20 = vsub.f32 %v17419_v31, %v17420_v51 }
0x1525   : > { %43442 = vmatprep.subr.bf16.mxu0 %v47391_v33 }
0x1526   : > { %v17422_v21 = vand.u32 4294901760, %v17421_v20 }
0x1527   : > { %40658 = vmatmul.mubr.f32.vlgmr.msra.gmra.mrb[32].mxu0 %v47410_v32 }
0x1528   : > { %43444 = vmatpush3.bf16.msra.mxu0 %v47391_v33  ;;  %40668 = vmatprep.mubr.f32.mxu0 %v16884_v58  ;;  %v17456_v33 = vsub.f32 %v17454_v46, %v17455_v48  ;;  %v17463_v58 = vsub.f32 %v17461_v38, %v17462_v62 }
0x1529   : > { %43446 = vmatprep.subr.bf16.mxu0 %v47401_v61 }
0x152a   : > { %v17464_v12 = vand.u32 4294901760, %v17463_v58 }
0x152c   : > { %43448 = vmatpush3.bf16.msra.mxu0 %v47401_v61  ;;  %v17457_v61 = vand.u32 4294901760, %v17456_v33  ;;  %v18484_v33 = vand.u32 4294901760, %v18483_v45 }
0x152d   : > { %43450 = vmatprep.subr.bf16.mxu0 %v47444_v43 }
0x152e   : > { %v43461_v53 = vpack.c.bf16 %v17464_v12, %v17457_v61 }
0x152f   : > { %40669 = vmatmul.mubr.f32.vlgmr.msra.gmra.mrb[32].mxu0 %v47410_v32  ;;  %v43465_v32 = vpack.c.bf16 %v17447_v4, %v17440_v16  ;;  %v18400_v16 = vand.u32 4294901760, %v37193_v36  ;;  %v18488_v4 = vsub.f32 %v37191_v59, %v18394_v37 }
0x1530   : > { %43452 = vmatpush3.bf16.msra.mxu0 %v47444_v43  ;;  %40679 = vmatprep.mubr.f32.mxu0 %v17422_v21 }
0x1531   : > { %43454 = vmatprep.subr.bf16.mxu0 %v47448_v24  ;;  %v18489_v38 = vand.u32 4294901760, %v18488_v4  ;;  %v43525_v29 = vpack.c.bf16 %v18400_v16, %v18397_v60 }
0x1533   : > { %v18490_v62 = vsub.f32 %v18488_v4, %v18489_v38 }
0x1534   : > { %43456 = vmatpush3.bf16.msra.mxu0 %v47448_v24 }
0x1535   : > { %43458 = vmatprep.subr.bf16.mxu0 %v43457_v47 }
0x1537   : > { %40680 = vmatmul.mubr.f32.vlgmr.msra.gmra.mrb[32].mxu0 %v17432_v19 }
0x1538   : > { %43460 = vmatpush3.bf16.msra.mxu0 %v43457_v47  ;;  %40690 = vmatprep.mubr.f32.mxu0 %v47427_v50 }
0x1539   : > { %43462 = vmatprep.subr.bf16.mxu0 %v43461_v53 }
0x153c   : > { %43464 = vmatpush3.bf16.msra.mxu0 %v43461_v53 }
0x153d   : > { %43466 = vmatprep.subr.bf16.mxu0 %v43465_v32 }
0x153f   : > { %40691 = vmatmul.mubr.f32.vlgmr.msra.gmra.mrb[32].mxu0 %v47438_v3 }
0x1540   : > { %43468 = vmatpush3.bf16.msra.mxu0 %v43465_v32  ;;  %40701 = vmatprep.mubr.f32.mxu0 %v17419_v31  ;;  %v18388_v31 = vsel %vm3529_vm3, %v47405_v5, 0  ;;  %v43521_v5 = vpack.c.bf16 %v18394_v37, %v18391_v22  ;;  %v43537_v32 = vpack.c.bf16 %v18488_v4, %v47478_v1 }
0x1541   : > { %43470 = vmatprep.subr.bf16.mxu0 %v43469_v57  ;;  %v47484_v46 = vand.u32 4294901760, %v18388_v31 }
0x1543   : > { %v18470_v48 = vsub.f32 %v18388_v31, %v47484_v46 }
0x1544   : > { %43472 = vmatpush3.bf16.msra.mxu0 %v43469_v57  ;;  %v43553_v57 = vpack.c.bf16 %v18489_v38, %v18482_v34 }
0x1545   : > { %43474 = vmatprep.subr.bf16.mxu0 %v47444_v43  ;;  %v18471_v58 = vand.u32 4294901760, %v18470_v48 }
0x1547   : > { %40702 = vmatmul.mubr.f32.vlgmr.msra.gmra.mrb[32].mxu0 %v17429_v30  ;;  %v18502_v30 = vsub.f32 %v37193_v36, %v18400_v16  ;;  %v18472_v47 = vsub.f32 %v18470_v48, %v18471_v58 }
0x1548   : > { %43476 = vmatpush3.bf16.msra.mxu0 %v47444_v43  ;;  %40712 = vmatprep.mubr.f32.mxu0 %v17420_v51  ;;  %v18495_v51 = vsub.f32 %v37192_v40, %v18397_v60 }
0x1549   : > { %43478 = vmatprep.subr.bf16.mxu0 %v47448_v24  ;;  %v18473_v53 = vand.u32 4294901760, %v18472_v47 }
0x154a   : > { %v18496_v20 = vand.u32 4294901760, %v18495_v51 }
0x154c   : > { %43480 = vmatpush3.bf16.msra.mxu0 %v47448_v24  ;;  %v18497_v21 = vsub.f32 %v18495_v51, %v18496_v20 }
0x154d   : > { %43482 = vmatprep.subr.bf16.mxu0 %v43481_v35 }
0x154e   : > { %v18498_v12 = vand.u32 4294901760, %v18497_v21  ;;  %v37212_v21 = vld [vmem:[%s48769_s7 + $0x38] sm:$0xff] }
0x154f   : > { %40713 = vmatmul.mubr.f32.vlgmr.msra.gmra.mrb[32].mxu0 %v17430_v11  ;;  %v18503_v11 = vand.u32 4294901760, %v18502_v30  ;;  %v20103_v47 = vand.u32 4294901760, %v37212_v21 }
0x1550   : > { %43484 = vmatpush3.bf16.msra.mxu0 %v43481_v35  ;;  %40723 = vmatprep.mubr.f32.mxu0 %v47427_v50 }
0x1551   : > { %43486 = vmatprep.subr.bf16.mxu0 %v43485_v54  ;;  %v43557_v35 = vpack.c.bf16 %v18503_v11, %v18496_v20 }
0x1554   : > { %43488 = vmatpush3.bf16.msra.mxu0 %v43485_v54 }
0x1555   : > { %43490 = vmatprep.subr.bf16.mxu0 %v47444_v43 }
0x1557   : > { %40724 = vmatmul.mubr.f32.vlgmr.msra.gmra.mrb[32].mxu0 %v47438_v3 }
0x1558   : > { %43492 = vmatpush3.bf16.msra.mxu0 %v47444_v43  ;;  %40734 = vmatprep.mubr.f32.mxu0 %v47427_v50  ;;  %v18491_v43 = vand.u32 4294901760, %v18490_v62  ;;  %v18504_v50 = vsub.f32 %v18502_v30, %v18503_v11  ;;  %v37210_v62 = vld [vmem:[%s48769_s7 + $0x28] sm:$0xff]  ;;  %v37201_v11 = vld [vmem:[%s48766_s22 + $0x30] sm:$0xff] }
0x1559   : > { %43494 = vmatprep.subr.bf16.mxu0 %v47448_v24 }
0x155a   : > { %v43529_v61 = vpack.c.bf16 %v18491_v43, %v18484_v33  ;;  %v18505_v19 = vand.u32 4294901760, %v18504_v50  ;;  %v19018_v33 = vand.u32 4294901760, %v37201_v11  ;;  %v37211_v43 = vld [vmem:[%s48769_s7 + $0x30] sm:$0xff] }
0x155c   : > { %43496 = vmatpush3.bf16.msra.mxu0 %v47448_v24  ;;  %v43533_v24 = vpack.c.bf16 %v18505_v19, %v18498_v12 }
0x155d   : > { %43522 = vmatprep.subr.bf16.mxu0 %v43521_v5 }
0x155f   : > { %40735 = vmatmul.mubr.f32.vlgmr.msra.gmra.mrb[32].mxu0 %v47438_v3  ;;  %v43541_v3 = vpack.c.bf16 %v18502_v30, %v18495_v51  ;;  %v37199_v30 = vld [vmem:[%s48766_s22 + $0x20] sm:$0xff] }
0x1560   : > { %43524 = vmatpush3.bf16.msra.mxu0 %v43521_v5  ;;  %40787 = vmatprep.mubr.f32.mxu0 %v18463_v15  ;;  %v19012_v45 = vand.u32 4294901760, %v37199_v30  ;;  %v20100_v15 = vand.u32 4294901760, %v37211_v43 }
0x1561   : > { %43526 = vmatprep.subr.bf16.mxu0 %v43525_v29 }
0x1562   : > { %v47555_v19 = vpack.c.bf16 %v20103_v47, %v20100_v15 }
0x1564   : > { %43528 = vmatpush3.bf16.msra.mxu0 %v43525_v29 }
0x1565   : > { %43530 = vmatprep.subr.bf16.mxu0 %v43529_v61 }
0x1567   : > { %40788 = vmatmul.mubr.f32.vlgmr.msra.gmra.mrb[32].mxu0 %v18473_v53  ;;  %v19102_v53 = vsub.f32 %v37199_v30, %v19012_v45 }
0x1568   : > { %43532 = vmatpush3.bf16.msra.mxu0 %v43529_v61  ;;  %40798 = vmatprep.mubr.f32.mxu0 %v47469_v27 }
0x1569   : > { %43534 = vmatprep.subr.bf16.mxu0 %v43533_v24 }
0x156c   : > { %43536 = vmatpush3.bf16.msra.mxu0 %v43533_v24 }
0x156d   : > { %43538 = vmatprep.subr.bf16.mxu0 %v43537_v32 }
0x156f   : > { %40799 = vmatmul.mubr.f32.vlgmr.msra.gmra.mrb[32].mxu0 %v47484_v46 }
0x1570   : > { %43540 = vmatpush3.bf16.msra.mxu0 %v43537_v32  ;;  %40809 = vmatprep.mubr.f32.mxu0 %v18460_v6 }
0x1571   : > { %43542 = vmatprep.subr.bf16.mxu0 %v43541_v3 }
0x1574   : > { %43544 = vmatpush3.bf16.msra.mxu0 %v43541_v3 }
0x1575   : > { %43546 = vmatprep.subr.bf16.mxu0 %v43521_v5 }
0x1577   : > { %40810 = vmatmul.mubr.f32.vlgmr.msra.gmra.mrb[32].mxu0 %v18470_v48 }
0x1578   : > { %43548 = vmatpush3.bf16.msra.mxu0 %v43521_v5  ;;  %40820 = vmatprep.mubr.f32.mxu0 %v18461_v0  ;;  %v37200_v0 = vld [vmem:[%s48766_s22 + $0x28] sm:$0xff] }
0x1579   : > { %43550 = vmatprep.subr.bf16.mxu0 %v43525_v29  ;;  %v19015_v48 = vand.u32 4294901760, %v37200_v0 }
0x157b   : > { %v47548_v50 = vpack.c.bf16 %v19015_v48, %v19012_v45  ;;  %v19109_v24 = vsub.f32 %v37200_v0, %v19015_v48 }
0x157c   : > { %43552 = vmatpush3.bf16.msra.mxu0 %v43525_v29 }
0x157d   : > { %43554 = vmatprep.subr.bf16.mxu0 %v43553_v57  ;;  %43570 = vmatprep.subr.bf16.mxu1 %v47548_v50 }
0x157e   : > { %43572 = vmatpush3.bf16.msra.mxu1 %v47548_v50 }
0x157f   : > { %40821 = vmatmul.mubr.f32.vlgmr.msra.gmra.mrb[32].mxu0 %v18471_v58  ;;  %v19021_v58 = vand.u32 4294901760, %v37202_v23 }
0x1580   : > { %43556 = vmatpush3.bf16.msra.mxu0 %v43553_v57  ;;  %40831 = vmatprep.mubr.f32.mxu0 %v47469_v27  ;;  %v19103_v57 = vand.u32 4294901760, %v19102_v53 }
0x1581   : > { %43558 = vmatprep.subr.bf16.mxu0 %v43557_v35  ;;  %v47552_v12 = vpack.c.bf16 %v19021_v58, %v19018_v33 }
0x1583   : > { %43574 = vmatprep.subr.bf16.mxu1 %v47552_v12 }
0x1584   : > { %43560 = vmatpush3.bf16.msra.mxu0 %v43557_v35  ;;  %43576 = vmatpush3.bf16.msra.mxu1 %v47552_v12  ;;  %v19110_v35 = vand.u32 4294901760, %v19109_v24 }
0x1585   : > { %43562 = vmatprep.subr.bf16.mxu0 %v43521_v5 }
0x1587   : > { %40832 = vmatmul.mubr.f32.vlgmr.msra.gmra.mrb[32].mxu0 %v47484_v46 }
0x1588   : > { %43564 = vmatpush3.bf16.msra.mxu0 %v43521_v5  ;;  %40842 = vmatprep.mubr.f32.mxu0 %v47469_v27  ;;  %v37209_v5 = vld [vmem:[%s48769_s7 + $0x20] sm:$0xff] }
0x1589   : > { %43566 = vmatprep.subr.bf16.mxu0 %v43525_v29  ;;  %v20094_v20 = vand.u32 4294901760, %v37209_v5 }
0x158b   : > { %v20184_v32 = vsub.f32 %v37209_v5, %v20094_v20 }
0x158c   : > { %43568 = vmatpush3.bf16.msra.mxu0 %v43525_v29  ;;  %v20097_v29 = vand.u32 4294901760, %v37210_v62 }
0x158e   : > { %v47550_v61 = vpack.c.bf16 %v20097_v29, %v20094_v20  ;;  %v20191_v3 = vsub.f32 %v37210_v62, %v20097_v29 }
0x158f   : > { %40843 = vmatmul.mubr.f32.vlgmr.msra.gmra.mrb[32].mxu0 %v47484_v46 }
0x1590   : > { %43666 = vmatprep.subr.bf16.mxu0 %v47550_v61 }
0x1591   : > { %43668 = vmatpush3.bf16.msra.mxu0 %v47550_v61 }
0x1592   : > { %43670 = vmatprep.subr.bf16.mxu0 %v47555_v19 }
0x1595   : > { %43672 = vmatpush3.bf16.msra.mxu0 %v47555_v19 }
0x1662   : > { %v40844_v59 = vpop.f32.mrb[32].mxu0 }
0x1663   : > { %v18927_v56 = vadd.f32 %v40844_v59, %v37194_v28  ;;  %v18908_v22 = vpop.f32.mrb[33].mxu0  ;;  %v20192_v59 = vand.u32 4294901760, %v20191_v3 }
0x1664   : > { %v18926_v54 = vadd.f32 %v37194_v28, %v18908_v22  ;;  %v20185_v28 = vand.u32 4294901760, %v20184_v32  ;;  %v19111_v22 = vsub.f32 %v19109_v24, %v19110_v35 }
0x1665   : > { %v18929_v37 = vmax.f32 %v18927_v56, 0.0  ;;  %v19104_v56 = vsub.f32 %v19102_v53, %v19103_v57 }
0x1666   : > { %v18928_v40 = vmax.f32 %v18926_v54, 0.0  ;;  %v19116_v54 = vsub.f32 %v37201_v11, %v19018_v33 }
0x1667   : > { %v47503_v36 = vadd.f32 %v18929_v37, %v47205_v9  ;;  %v19123_v37 = vsub.f32 %v37202_v23, %v19021_v58 }
0x1668   : > { %v47506_v1 = vadd.f32 %v18928_v40, %v47208_v39  ;;  %v20186_v40 = vsub.f32 %v20184_v32, %v20185_v28 }
0x1669   : > { %v18939_v27 = vsel %vm3529_vm3, %v47503_v36, 0.0 }
0x166a   : > { %18940 = vadd.xlane.f32.xlu1 %v18939_v27  ;;  %v18936_v60 = vsel %vm3529_vm3, %v47506_v1, 0.0  ;;  %v20193_v27 = vsub.f32 %v20191_v3, %v20192_v59 }
0x166b   : > { %18937 = vadd.xlane.f32.xlu0 %v18936_v60  ;;  %v20198_v60 = vsub.f32 %v37211_v43, %v20100_v15  ;;  %v47576_v15 = vpack.c.bf16 %v20191_v3, %v20184_v32 }
0x16f7   : > { %v18941_v16 = vpop.xlane.xlu1 %18940 }
0x16f8   : > { %v18943_v4 = vmul.f32 0.03125, %v18941_v16  ;;  %v18938_v31 = vpop.xlane.xlu0 %18937  ;;  %v20205_v16 = vsub.f32 %v37212_v21, %v20103_v47  ;;  %v47574_v21 = vpack.c.bf16 %v19109_v24, %v19102_v53  ;;  %v47578_v47 = vpack.c.bf16 %v19123_v37, %v19116_v54 }
0x16f9   : > { %v18942_v6 = vmul.f32 0.03125, %v18938_v31  ;;  %v19112_v31 = vand.u32 4294901760, %v19111_v22  ;;  %v47582_v22 = vpack.c.bf16 %v19110_v35, %v19103_v57 }
0x16fa   : > { %v47513_v34 = vsub.f32 %v47503_v36, %v18943_v4  ;;  %v19105_v4 = vand.u32 4294901760, %v19104_v56  ;;  %v20206_v30 = vand.u32 4294901760, %v20205_v16  ;;  %v47580_v56 = vpack.c.bf16 %v20205_v16, %v20198_v60 }
0x16fb   : > { %v47516_v9 = vsub.f32 %v47506_v1, %v18942_v6  ;;  %v19117_v6 = vand.u32 4294901760, %v19116_v54 }
0x16fc   : > { %v18947_v39 = vmul.f32 %v47513_v34, %v47513_v34  ;;  %v47564_v0 = vpack.c.bf16 %v19112_v31, %v19105_v4  ;;  %v20207_v20 = vsub.f32 %v20205_v16, %v20206_v30 }
0x16fd   : > { %v18946_v46 = vmul.f32 %v47516_v9, %v47516_v9  ;;  %v19118_v5 = vsub.f32 %v19116_v54, %v19117_v6 }
0x16fe   : > { %v18951_v38 = vsel %vm3529_vm3, %v18947_v39, 0.0  ;;  %v19124_v39 = vand.u32 4294901760, %v19123_v37  ;;  %43578 = vmatprep.subr.bf16.mxu1 %v47564_v0  ;;  %v20208_v33 = vand.u32 4294901760, %v20207_v20 }
0x16ff   : > { %18952 = vadd.xlane.f32.xlu1 %v18951_v38  ;;  %v18948_v51 = vsel %vm3529_vm3, %v18946_v46, 0.0  ;;  %v20187_v46 = vand.u32 4294901760, %v20186_v40  ;;  %v20194_v38 = vand.u32 4294901760, %v20193_v27  ;;  %v19119_v11 = vand.u32 4294901760, %v19118_v5 }
0x1700   : > { %18949 = vadd.xlane.f32.xlu0 %v18948_v51  ;;  %v20199_v51 = vand.u32 4294901760, %v20198_v60  ;;  %v19125_v45 = vsub.f32 %v19123_v37, %v19124_v39  ;;  %v47584_v40 = vpack.c.bf16 %v20192_v59, %v20185_v28  ;;  %v47586_v27 = vpack.c.bf16 %v19124_v39, %v19117_v6  ;;  %v37197_v6 = vld [vmem:[%s48767_s9 + $0x1] ss:$0 sm:$0xff] }
0x1701   : > { %v47566_v48 = vpack.c.bf16 %v20194_v38, %v20187_v46  ;;  %v18981_v39 = vmul.f32 %v37197_v6, %v47513_v34 }
0x1702   : > { %v20200_v62 = vsub.f32 %v20198_v60, %v20199_v51  ;;  %v19126_v23 = vand.u32 4294901760, %v19125_v45  ;;  %v47588_v4 = vpack.c.bf16 %v20206_v30, %v20199_v51  ;;  %v18980_v30 = vmul.f32 %v37197_v6, %v47516_v9  ;;  %v37198_v45 = vld [vmem:[%s48768_s4 + $0x1] ss:$0 sm:$0xff] }
0x1703   : > { %43674 = vmatprep.subr.bf16.mxu0 %v47566_v48 }
0x1704   : > { %v20201_v29 = vand.u32 4294901760, %v20200_v62  ;;  %v47570_v58 = vpack.c.bf16 %v19126_v23, %v19119_v11 }
0x1706   : > { %v47572_v43 = vpack.c.bf16 %v20208_v33, %v20201_v29 }
0x178c   : > { %v18953_v31 = vpop.xlane.xlu1 %18952 }
0x178d   : > { %v18955_v46 = vmul.f32 0.032258064, %v18953_v31  ;;  %v18950_v38 = vpop.xlane.xlu0 %18949 }
0x178e   : > { %v18954_v5 = vmul.f32 0.032258064, %v18950_v38 }
0x178f   : > { %45568 = vrsqrt.f32 %v18955_v46  ;;  %vm18965_vm1 = vcmp.eq.f32.partialorder %v18955_v46, inf  ;;  %v18968_v3 = vand.u32 2147483648, %v18955_v46  ;;  %vm18967_vm2 = vcmp.eq.f32.partialorder %v18955_v46, 0.0 }
0x1790   : > { %45570 = vrsqrt.f32 %v18954_v5  ;;  %vm18958_vm4 = vcmp.eq.f32.partialorder %v18954_v5, inf  ;;  %v18961_v35 = vand.u32 2147483648, %v18954_v5  ;;  %vm18960_vm5 = vcmp.eq.f32.partialorder %v18954_v5, 0.0 }
0x1799   : > { %v45569_v53 = vpop.eup %45568 }
0x179a   : > { %v45571_v24 = vpop.eup %45570  ;;  %v18964_v32 = vmul.f32 %v45569_v53, %v18955_v46 }
0x179b   : > { %v18957_v54 = vmul.f32 %v45571_v24, %v18954_v5 }
0x179c   : > { %v18966_v57 = vsel %vm18965_vm1, %v18955_v46, %v18964_v32 }
0x179d   : > { %v18969_v28 = vsel %vm18967_vm2, %v18968_v3, %v18966_v57  ;;  %v18959_v59 = vsel %vm18958_vm4, %v18954_v5, %v18957_v54 }
0x179e   : > { %v18971_v37 = vadd.f32 1e-06, %v18969_v28  ;;  %v18962_v60 = vsel %vm18960_vm5, %v18961_v35, %v18959_v59 }
0x179f   : > { %v18970_v16 = vadd.f32 1e-06, %v18962_v60 }
0x17a0   : > { %45572 = vrcp.f32 %v18971_v37 }
0x17a1   : > { %45574 = vrcp.f32 %v18970_v16 }
0x17aa   : > { %v45573_v51 = vpop.eup %45572 }
0x17ab   : > { %v45575_v62 = vpop.eup %45574  ;;  %v18983_v20 = vmul.f32 %v45573_v51, %v18981_v39 }
0x17ac   : > { %v18982_v11 = vmul.f32 %v45575_v62, %v18980_v30 }
0x17ad   : > { %v18991_v23 = vadd.f32 %v37198_v45, %v18983_v20 }
0x17ae   : > { %v18990_v29 = vadd.f32 %v37198_v45, %v18982_v11 }
0x17af   : > { %v19009_v33 = vsel %vm3529_vm3, %v18991_v23, 0 }
0x17b0   : > { %v19006_v31 = vsel %vm3529_vm3, %v18990_v29, 0  ;;  %v47600_v46 = vand.u32 4294901760, %v19009_v33  ;;  %v37203_v29 = vld [vmem:[#allocation2 + $0x1] ss:$0 sm:$0xff] }
0x17b1   : > { %v47602_v38 = vand.u32 4294901760, %v19006_v31 }
0x17b2   : > { %v47605_v34 = vsub.f32 %v19009_v33, %v47600_v46  ;;  %v37213_v33 = vld [vmem:[#allocation6 + $0x1] ss:$0 sm:$0xff] }
0x17b3   : > { %v47608_v9 = vsub.f32 %v19006_v31, %v47602_v38 }
0x17b4   : > { %v47611_v5 = vand.u32 4294901760, %v47605_v34 }
0x17b5   : > { %v47614_v53 = vand.u32 4294901760, %v47608_v9 }
0x17b6   : > { %v19093_v24 = vsub.f32 %v47605_v34, %v47611_v5 }
0x17b7   : > { %v19083_v32 = vsub.f32 %v47608_v9, %v47614_v53 }
0x17b8   : > { %v47622_v54 = vand.u32 4294901760, %v19093_v24 }
0x17b9   : > { %v47620_v3 = vand.u32 4294901760, %v19083_v32 }
0x17bb   : > { %40853 = vmatprep.mubr.f32.mxu1 %v47620_v3  ;;  %40985 = vmatprep.mubr.f32.mxu0 %v47620_v3 }
0x17bc   : > { %40854 = vmatmul.mubr.f32.vlgmr.msra.gmra.mrb[20].mxu1 %v47622_v54  ;;  %40986 = vmatmul.mubr.f32.vlgmr.msra.gmra.mrb[34].mxu0 %v47622_v54 }
0x17bd   : > { %43580 = vmatpush3.bf16.msra.mxu1 %v47564_v0  ;;  %40864 = vmatprep.mubr.f32.mxu1 %v47602_v38  ;;  %v37204_v0 = vld [vmem:[%s48765_s10 + $0x20] sm:$0xff] }
0x17be   : > { %43676 = vmatpush3.bf16.msra.mxu0 %v47566_v48  ;;  %40996 = vmatprep.mubr.f32.mxu0 %v47602_v38  ;;  %v37205_v48 = vld [vmem:[%s48765_s10 + $0x28] sm:$0xff] }
0x17bf   : > { %43582 = vmatprep.subr.bf16.mxu1 %v47570_v58  ;;  %43678 = vmatprep.subr.bf16.mxu0 %v47572_v43 }
0x17c1   : > { %43584 = vmatpush3.bf16.msra.mxu1 %v47570_v58  ;;  %v19553_v58 = vand.u32 4294901760, %v37204_v0 }
0x17c2   : > { %43680 = vmatpush3.bf16.msra.mxu0 %v47572_v43  ;;  %43586 = vmatprep.subr.bf16.mxu1 %v47574_v21  ;;  %v19556_v43 = vand.u32 4294901760, %v37205_v48 }
0x17c3   : > { %43682 = vmatprep.subr.bf16.mxu0 %v47576_v15  ;;  %v47679_v57 = vsub.f32 %v37204_v0, %v19553_v58 }
0x17c4   : > { %40865 = vmatmul.mubr.f32.vlgmr.msra.gmra.mrb[20].mxu1 %v47600_v46  ;;  %v47681_v35 = vsub.f32 %v37205_v48, %v19556_v43  ;;  %v43617_v37 = vpack.c.bf16 %v19556_v43, %v19553_v58 }
0x17c5   : > { %43588 = vmatpush3.bf16.msra.mxu1 %v47574_v21  ;;  %40997 = vmatmul.mubr.f32.vlgmr.msra.gmra.mrb[34].mxu0 %v47600_v46  ;;  %v37206_v21 = vld [vmem:[%s48765_s10 + $0x30] sm:$0xff] }
0x17c6   : > { %40875 = vmatprep.mubr.f32.mxu1 %v47608_v9  ;;  %43684 = vmatpush3.bf16.msra.mxu0 %v47576_v15  ;;  %v37207_v15 = vld [vmem:[%s48765_s10 + $0x38] sm:$0xff] }
0x17c7   : > { %41007 = vmatprep.mubr.f32.mxu0 %v47608_v9  ;;  %43590 = vmatprep.subr.bf16.mxu1 %v47578_v47 }
0x17c8   : > { %43686 = vmatprep.subr.bf16.mxu0 %v47580_v56 }
0x17c9   : > { %43592 = vmatpush3.bf16.msra.mxu1 %v47578_v47  ;;  %v19559_v47 = vand.u32 4294901760, %v37206_v21 }
0x17ca   : > { %43688 = vmatpush3.bf16.msra.mxu0 %v47580_v56  ;;  %43594 = vmatprep.subr.bf16.mxu1 %v47548_v50  ;;  %v19562_v56 = vand.u32 4294901760, %v37207_v15 }
0x17cb   : > { %43690 = vmatprep.subr.bf16.mxu0 %v47550_v61  ;;  %v19657_v28 = vsub.f32 %v37206_v21, %v19559_v47 }
0x17cc   : > { %40876 = vmatmul.mubr.f32.vlgmr.msra.gmra.mrb[20].mxu1 %v47605_v34  ;;  %v19664_v59 = vsub.f32 %v37207_v15, %v19562_v56 }
0x17cd   : > { %43596 = vmatpush3.bf16.msra.mxu1 %v47548_v50  ;;  %41008 = vmatmul.mubr.f32.vlgmr.msra.gmra.mrb[34].mxu0 %v47605_v34  ;;  %v19658_v60 = vand.u32 4294901760, %v19657_v28 }
0x17ce   : > { %40886 = vmatprep.mubr.f32.mxu1 %v47614_v53  ;;  %43692 = vmatpush3.bf16.msra.mxu0 %v47550_v61  ;;  %v19665_v16 = vand.u32 4294901760, %v19664_v59  ;;  %v43637_v20 = vpack.c.bf16 %v19664_v59, %v19657_v28 }
0x17cf   : > { %41018 = vmatprep.mubr.f32.mxu0 %v47614_v53  ;;  %43598 = vmatprep.subr.bf16.mxu1 %v47552_v12  ;;  %v19659_v39 = vsub.f32 %v19657_v28, %v19658_v60  ;;  %v37208_v28 = vld [vmem:[#allocation4 + $0x1] ss:$0 sm:$0xff] }
0x17d0   : > { %43694 = vmatprep.subr.bf16.mxu0 %v47555_v19  ;;  %v19666_v51 = vsub.f32 %v19664_v59, %v19665_v16  ;;  %v43653_v23 = vpack.c.bf16 %v19665_v16, %v19658_v60 }
0x17d1   : > { %43600 = vmatpush3.bf16.msra.mxu1 %v47552_v12  ;;  %v19660_v45 = vand.u32 4294901760, %v19659_v39 }
0x17d2   : > { %43696 = vmatpush3.bf16.msra.mxu0 %v47555_v19  ;;  %43602 = vmatprep.subr.bf16.mxu1 %v47582_v22  ;;  %v19667_v62 = vand.u32 4294901760, %v19666_v51 }
0x17d3   : > { %43698 = vmatprep.subr.bf16.mxu0 %v47584_v40 }
0x17d4   : > { %40887 = vmatmul.mubr.f32.vlgmr.msra.gmra.mrb[20].mxu1 %v47611_v5 }
0x17d5   : > { %43604 = vmatpush3.bf16.msra.mxu1 %v47582_v22  ;;  %41019 = vmatmul.mubr.f32.vlgmr.msra.gmra.mrb[34].mxu0 %v47611_v5  ;;  %v19644_v22 = vand.u32 4294901760, %v47679_v57 }
0x17d6   : > { %40897 = vmatprep.mubr.f32.mxu1 %v47602_v38  ;;  %43700 = vmatpush3.bf16.msra.mxu0 %v47584_v40  ;;  %v19651_v40 = vand.u32 4294901760, %v47681_v35 }
0x17d7   : > { %41029 = vmatprep.mubr.f32.mxu0 %v47602_v38  ;;  %43606 = vmatprep.subr.bf16.mxu1 %v47586_v27 }
0x17d8   : > { %43702 = vmatprep.subr.bf16.mxu0 %v47588_v4  ;;  %v43649_v11 = vpack.c.bf16 %v19651_v40, %v19644_v22 }
0x17d9   : > { %43608 = vmatpush3.bf16.msra.mxu1 %v47586_v27  ;;  %v19645_v27 = vsub.f32 %v47679_v57, %v19644_v22 }
0x17da   : > { %43704 = vmatpush3.bf16.msra.mxu0 %v47588_v4  ;;  %43610 = vmatprep.subr.bf16.mxu1 %v47548_v50  ;;  %v19652_v4 = vsub.f32 %v47681_v35, %v19651_v40 }
0x17db   : > { %43706 = vmatprep.subr.bf16.mxu0 %v47550_v61  ;;  %v19646_v6 = vand.u32 4294901760, %v19645_v27 }
0x17dc   : > { %40898 = vmatmul.mubr.f32.vlgmr.msra.gmra.mrb[20].mxu1 %v47600_v46 }
0x17dd   : > { %43612 = vmatpush3.bf16.msra.mxu1 %v47548_v50  ;;  %41030 = vmatmul.mubr.f32.vlgmr.msra.gmra.mrb[34].mxu0 %v47600_v46  ;;  %v43621_v50 = vpack.c.bf16 %v19562_v56, %v19559_v47 }
0x17de   : > { %40908 = vmatprep.mubr.f32.mxu1 %v47602_v38  ;;  %43708 = vmatpush3.bf16.msra.mxu0 %v47550_v61  ;;  %v19653_v61 = vand.u32 4294901760, %v19652_v4 }
0x17df   : > { %41040 = vmatprep.mubr.f32.mxu0 %v47602_v38  ;;  %43614 = vmatprep.subr.bf16.mxu1 %v47552_v12 }
0x17e0   : > { %43710 = vmatprep.subr.bf16.mxu0 %v47555_v19  ;;  %v43625_v30 = vpack.c.bf16 %v19653_v61, %v19646_v6 }
0x17e1   : > { %43616 = vmatpush3.bf16.msra.mxu1 %v47552_v12  ;;  %v43629_v12 = vpack.c.bf16 %v19667_v62, %v19660_v45 }
0x17e2   : > { %43712 = vmatpush3.bf16.msra.mxu0 %v47555_v19  ;;  %43618 = vmatprep.subr.bf16.mxu1 %v43617_v37  ;;  %v43633_v19 = vpack.c.bf16 %v47681_v35, %v47679_v57 }
0x17e4   : > { %40909 = vmatmul.mubr.f32.vlgmr.msra.gmra.mrb[20].mxu1 %v47600_v46 }
0x17e5   : > { %43620 = vmatpush3.bf16.msra.mxu1 %v43617_v37  ;;  %41041 = vmatmul.mubr.f32.vlgmr.msra.gmra.mrb[34].mxu0 %v47600_v46 }
0x17e6   : > { %40919 = vmatprep.mubr.f32.mxu1 %v47620_v3  ;;  %43622 = vmatprep.subr.bf16.mxu1 %v43621_v50 }
0x17e9   : > { %43624 = vmatpush3.bf16.msra.mxu1 %v43621_v50 }
0x17ea   : > { %43626 = vmatprep.subr.bf16.mxu1 %v43625_v30 }
0x17ec   : > { %40920 = vmatmul.mubr.f32.vlgmr.msra.gmra.mrb[22].mxu1 %v47622_v54 }
0x17ed   : > { %43628 = vmatpush3.bf16.msra.mxu1 %v43625_v30  ;;  %40930 = vmatprep.mubr.f32.mxu1 %v47602_v38 }
0x17ee   : > { %43630 = vmatprep.subr.bf16.mxu1 %v43629_v12 }
0x17f1   : > { %43632 = vmatpush3.bf16.msra.mxu1 %v43629_v12 }
0x17f2   : > { %43634 = vmatprep.subr.bf16.mxu1 %v43633_v19 }
0x17f4   : > { %40931 = vmatmul.mubr.f32.vlgmr.msra.gmra.mrb[22].mxu1 %v47600_v46 }
0x17f5   : > { %43636 = vmatpush3.bf16.msra.mxu1 %v43633_v19  ;;  %40941 = vmatprep.mubr.f32.mxu1 %v47608_v9 }
0x17f6   : > { %43638 = vmatprep.subr.bf16.mxu1 %v43637_v20 }
0x17f9   : > { %43640 = vmatpush3.bf16.msra.mxu1 %v43637_v20 }
0x17fa   : > { %43642 = vmatprep.subr.bf16.mxu1 %v43617_v37 }
0x17fc   : > { %40942 = vmatmul.mubr.f32.vlgmr.msra.gmra.mrb[22].mxu1 %v47605_v34 }
0x17fd   : > { %43644 = vmatpush3.bf16.msra.mxu1 %v43617_v37  ;;  %40952 = vmatprep.mubr.f32.mxu1 %v47614_v53 }
0x17fe   : > { %43646 = vmatprep.subr.bf16.mxu1 %v43621_v50 }
0x1801   : > { %43648 = vmatpush3.bf16.msra.mxu1 %v43621_v50 }
0x1802   : > { %43650 = vmatprep.subr.bf16.mxu1 %v43649_v11 }
0x1804   : > { %40953 = vmatmul.mubr.f32.vlgmr.msra.gmra.mrb[22].mxu1 %v47611_v5 }
0x1805   : > { %43652 = vmatpush3.bf16.msra.mxu1 %v43649_v11  ;;  %40963 = vmatprep.mubr.f32.mxu1 %v47602_v38 }
0x1806   : > { %43654 = vmatprep.subr.bf16.mxu1 %v43653_v23 }
0x1809   : > { %43656 = vmatpush3.bf16.msra.mxu1 %v43653_v23 }
0x180a   : > { %43658 = vmatprep.subr.bf16.mxu1 %v43617_v37 }
0x180c   : > { %40964 = vmatmul.mubr.f32.vlgmr.msra.gmra.mrb[22].mxu1 %v47600_v46 }
0x180d   : > { %43660 = vmatpush3.bf16.msra.mxu1 %v43617_v37  ;;  %40974 = vmatprep.mubr.f32.mxu1 %v47602_v38 }
0x180e   : > { %43662 = vmatprep.subr.bf16.mxu1 %v43621_v50 }
0x1811   : > { %43664 = vmatpush3.bf16.msra.mxu1 %v43621_v50 }
0x1814   : > { %40975 = vmatmul.mubr.f32.vlgmr.msra.gmra.mrb[22].mxu1 %v47600_v46 }
0x18b7   : > { %v40910_v31 = vpop.f32.mrb[20].mxu1 }
0x18b8   : > { %v41042_v34 = vpop.f32.mrb[34].mxu0  ;;  %v19529_v9 = vpop.f32.mrb[21].mxu1  ;;  %v44689_v22 = vadd.f32 %v40910_v31, %v37203_v29 }
0x18b9   : > { %v47720_v5 = vadd.f32 %v41042_v34, %v37213_v33  ;;  %v44690_v53 = vadd.f32 %v37203_v29, %v19529_v9  ;;  %v20611_v24 = vpop.f32.mrb[35].mxu0 }
0x18ba   : > { %v47722_v32 = vadd.f32 %v37213_v33, %v20611_v24  ;;  %v20630_v40 = vsel %vm5214_vm8, %v44689_v22, 0 }
0x18bb   : > { %v22810_v3 = vand.u32 4294901760, %v47720_v5  ;;  %v20627_v54 = vsel %vm5214_vm8, %v44690_v53, 0  ;;  %v20715_v59 = vand.u32 4294901760, %v20630_v40 }
0x18bc   : > { %v47726_v38 = vand.u32 4294901760, %v20627_v54  ;;  %v22807_v0 = vand.u32 4294901760, %v47722_v32 }
0x18bd   : > { %v47732_v46 = vsub.f32 %v47720_v5, %v22810_v3  ;;  %v20716_v16 = vsub.f32 %v20630_v40, %v20715_v59 }
0x18be   : > { %v47735_v48 = vsub.f32 %v20627_v54, %v47726_v38  ;;  %v47740_v58 = vsub.f32 %v47722_v32, %v22807_v0 }
0x18bf   : > { %v22903_v43 = vand.u32 4294901760, %v47732_v46  ;;  %v20717_v62 = vand.u32 4294901760, %v20716_v16 }
0x18c0   : > { %v20707_v21 = vand.u32 4294901760, %v47735_v48  ;;  %v22896_v15 = vand.u32 4294901760, %v47740_v58  ;;  %v47747_v47 = vpack.c.bf16 %v47732_v46, %v47740_v58 }
0x18c1   : > { %v20718_v23 = vsub.f32 %v20716_v16, %v20717_v62 }
0x18c2   : > { %v20708_v56 = vsub.f32 %v47735_v48, %v20707_v21  ;;  %v47754_v57 = vpack.c.bf16 %v22903_v43, %v22896_v15 }
0x18c3   : > { %v20719_v9 = vand.u32 4294901760, %v20718_v23 }
0x18c4   : > { %v20709_v35 = vand.u32 4294901760, %v20708_v56 }
0x18c6   : > { %41047 = vmatprep.mubr.f32.mxu1 %v20709_v35 }
0x18e7   : > { %v40976_v37 = vpop.f32.mrb[22].mxu1 }
0x18e8   : > { %v44691_v27 = vadd.f32 %v40976_v37, %v37208_v28  ;;  %v20070_v4 = vpop.f32.mrb[23].mxu1 }
0x18e9   : > { %v44692_v60 = vadd.f32 %v37208_v28, %v20070_v4 }
0x18ea   : > { %v20636_v50 = vsel %vm5214_vm8, %v44691_v27, 0  ;;  %21146 = vrot.lane.b32.xlu1 %v44691_v27, %s48774_s28 }
0x18eb   : > { %v20642_v6 = vand.u32 4294901760, %v20636_v50  ;;  %v20633_v61 = vsel %vm5214_vm8, %v44692_v60, 0  ;;  %21144 = vrot.lane.b32.xlu0 %v44692_v60, %s48774_s28 }
0x18ec   : > { %v20639_v39 = vand.u32 4294901760, %v20633_v61 }
0x18ed   : > { %v20734_v51 = vsub.f32 %v20636_v50, %v20642_v6 }
0x18ee   : > { %v43713_v30 = vpack.c.bf16 %v20642_v6, %v20639_v39  ;;  %v20727_v45 = vsub.f32 %v20633_v61, %v20639_v39  ;;  %21140 = vrot.lane.b32.xlu1 %v44690_v53, %s48774_s28 }
0x18ef   : > { %21662 = vrot.lane.b32.xlu0 %v44692_v60, %s48775_s29  ;;  %v20735_v12 = vand.u32 4294901760, %v20734_v51 }
0x18f0   : > { %43714 = vmatprep.subr.bf16.mxu1 %v43713_v30  ;;  %v20728_v19 = vand.u32 4294901760, %v20727_v45  ;;  %v43721_v20 = vpack.c.bf16 %v20734_v51, %v20727_v45 }
0x18f1   : > { %43716 = vmatpush3.bf16.xpose.msra.mxu1 %v43713_v30  ;;  %v20736_v11 = vsub.f32 %v20734_v51, %v20735_v12 }
0x18f2   : > { %21142 = vrot.lane.b32.xlu1 %v44689_v22, %s48774_s28  ;;  %v20729_v29 = vsub.f32 %v20727_v45, %v20728_v19  ;;  %v43729_v33 = vpack.c.bf16 %v20735_v12, %v20728_v19 }
0x18f3   : > { %21658 = vrot.lane.b32.xlu0 %v44690_v53, %s48775_s29  ;;  %v20737_v31 = vand.u32 4294901760, %v20736_v11 }
0x18f4   : > { %v20730_v34 = vand.u32 4294901760, %v20729_v29 }
0x18f6   : > { %21664 = vrot.lane.b32.xlu1 %v44691_v27, %s48775_s29  ;;  %v43717_v24 = vpack.c.bf16 %v20737_v31, %v20730_v34 }
0x18f7   : > { %22180 = vrot.lane.b32.xlu0 %v44692_v60, %s48776_s2 }
0x18f8   : > { %41048 = vmatmul.mubr.f32.vlgmr.msra.gmra.mrb[24].mxu1 %v20719_v9  ;;  %43718 = vmatprep.subr.bf16.mxu1 %v43717_v24 }
0x18f9   : > { %43720 = vmatpush3.bf16.xpose.msra.mxu1 %v43717_v24  ;;  %41054 = vmatprep.mubr.f32.mxu1 %v47726_v38 }
0x18fa   : > { %21660 = vrot.lane.b32.xlu1 %v44689_v22, %s48775_s29  ;;  %43722 = vmatprep.subr.bf16.mxu1 %v43721_v20 }
0x18fb   : > { %22176 = vrot.lane.b32.xlu0 %v44690_v53, %s48776_s2 }
0x18fe   : > { %22182 = vrot.lane.b32.xlu1 %v44691_v27, %s48776_s2 }
0x1900   : > { %41055 = vmatmul.mubr.f32.vlgmr.msra.gmra.mrb[24].mxu1 %v20715_v59 }
0x1901   : > { %43724 = vmatpush3.bf16.xpose.msra.mxu1 %v43721_v20  ;;  %41061 = vmatprep.mubr.f32.mxu1 %v47735_v48 }
0x1902   : > { %22178 = vrot.lane.b32.xlu1 %v44689_v22, %s48776_s2  ;;  %43726 = vmatprep.subr.bf16.mxu1 %v43713_v30 }
0x1908   : > { %41062 = vmatmul.mubr.f32.vlgmr.msra.gmra.mrb[24].mxu1 %v20716_v16 }
0x1909   : > { %43728 = vmatpush3.bf16.xpose.msra.mxu1 %v43713_v30  ;;  %41068 = vmatprep.mubr.f32.mxu1 %v20707_v21 }
0x190a   : > { %43730 = vmatprep.subr.bf16.mxu1 %v43729_v33 }
0x1910   : > { %41069 = vmatmul.mubr.f32.vlgmr.msra.gmra.mrb[24].mxu1 %v20717_v62 }
0x1911   : > { %43732 = vmatpush3.bf16.xpose.msra.mxu1 %v43729_v33  ;;  %41075 = vmatprep.mubr.f32.mxu1 %v47726_v38 }
0x1912   : > { %43734 = vmatprep.subr.bf16.mxu1 %v43713_v30 }
0x1918   : > { %41076 = vmatmul.mubr.f32.vlgmr.msra.gmra.mrb[24].mxu1 %v20715_v59 }
0x1919   : > { %43736 = vmatpush3.bf16.xpose.msra.mxu1 %v43713_v30  ;;  %41082 = vmatprep.mubr.f32.mxu1 %v47726_v38 }
0x1920   : > { %41083 = vmatmul.mubr.f32.vlgmr.msra.gmra.mrb[24].mxu1 %v20715_v59 }
0x195c   : > { %v21147_v53 = vpop.permute.xlu1 %21146 }
0x195d   : > { %v21154_v54 = vsel %vm5214_vm8, %v21147_v53, 0  ;;  %v21145_v48 = vpop.permute.xlu0 %21144 }
0x195e   : > { %v21160_v56 = vand.u32 4294901760, %v21154_v54  ;;  %v21152_v35 = vsel %vm5214_vm8, %v21145_v48, 0 }
0x195f   : > { %v21157_v22 = vand.u32 4294901760, %v21152_v35 }
0x1960   : > { %v47777_v21 = vsub.f32 %v21154_v54, %v21160_v56  ;;  %v21141_v40 = vpop.permute.xlu1 %21140 }
0x1961   : > { %v47779_v28 = vpack.c.bf16 %v21160_v56, %v21157_v22  ;;  %v47781_v37 = vsub.f32 %v21152_v35, %v21157_v22  ;;  %v21148_v27 = vsel %vm5214_vm8, %v21141_v40, 0  ;;  %v21663_v4 = vpop.permute.xlu0 %21662 }
0x1962   : > { %v21253_v38 = vand.u32 4294901760, %v47777_v21  ;;  %v47785_v59 = vand.u32 4294901760, %v21148_v27  ;;  %v21670_v60 = vsel %vm5214_vm8, %v21663_v4, 0 }
0x1963   : > { %v21246_v16 = vand.u32 4294901760, %v47781_v37  ;;  %v21675_v50 = vand.u32 4294901760, %v21670_v60  ;;  %43738 = vmatprep.subr.bf16.mxu0 %v47779_v28 }
0x1964   : > { %v21254_v6 = vsub.f32 %v47777_v21, %v21253_v38  ;;  %v47794_v61 = vsub.f32 %v21148_v27, %v47785_v59  ;;  %43740 = vmatpush3.bf16.xpose.msra.mxu0 %v47779_v28  ;;  %v21143_v39 = vpop.permute.xlu1 %21142 }
0x1965   : > { %v21247_v51 = vsub.f32 %v47781_v37, %v21246_v16  ;;  %v47800_v30 = vsub.f32 %v21670_v60, %v21675_v50  ;;  %v21150_v45 = vsel %vm5214_vm8, %v21143_v39, 0  ;;  %v21659_v62 = vpop.permute.xlu0 %21658 }
0x1966   : > { %v21225_v12 = vand.u32 4294901760, %v47794_v61  ;;  %v47804_v19 = vand.u32 4294901760, %v21150_v45  ;;  %v21666_v20 = vsel %vm5214_vm8, %v21659_v62, 0  ;;  %v21255_v11 = vand.u32 4294901760, %v21254_v6 }
0x1967   : > { %v47807_v23 = vand.u32 4294901760, %v21666_v20  ;;  %v21248_v29 = vand.u32 4294901760, %v21247_v51  ;;  %v21764_v54 = vand.u32 4294901760, %v47800_v30 }
0x1968   : > { %v47810_v33 = vsub.f32 %v21150_v45, %v47804_v19  ;;  %v21665_v31 = vpop.permute.xlu1 %21664  ;;  %v21226_v34 = vsub.f32 %v47794_v61, %v21225_v12 }
0x1969   : > { %v47816_v9 = vsub.f32 %v21666_v20, %v47807_v23  ;;  %v21672_v24 = vsel %vm5214_vm8, %v21665_v31, 0  ;;  %v43741_v53 = vpack.c.bf16 %v21255_v11, %v21248_v29  ;;  %v21765_v51 = vsub.f32 %v47800_v30, %v21764_v54 }
0x196a   : > { %v21235_v48 = vand.u32 4294901760, %v47810_v33  ;;  %v21678_v56 = vand.u32 4294901760, %v21672_v24  ;;  %v21227_v35 = vand.u32 4294901760, %v21226_v34  ;;  %v43745_v31 = vpack.c.bf16 %v47777_v21, %v47781_v37 }
0x196b   : > { %v21743_v22 = vand.u32 4294901760, %v47816_v9  ;;  %43742 = vmatprep.subr.bf16.mxu0 %v43741_v53 }
0x196c   : > { %v21236_v40 = vsub.f32 %v47810_v33, %v21235_v48  ;;  %v47823_v27 = vpack.c.bf16 %v21678_v56, %v21675_v50  ;;  %v21770_v4 = vsub.f32 %v21672_v24, %v21678_v56  ;;  %41089 = vmatprep.mubr.f32.mxu0 %v21227_v35  ;;  %v21661_v60 = vpop.permute.xlu1 %21660  ;;  %v21766_v24 = vand.u32 4294901760, %v21765_v51 }
0x196d   : > { %v21668_v6 = vsel %vm5214_vm8, %v21661_v60, 0  ;;  %v21744_v39 = vsub.f32 %v47816_v9, %v21743_v22  ;;  %v43753_v51 = vpack.c.bf16 %v21253_v38, %v21246_v16 }
0x196e   : > { %v21237_v45 = vand.u32 4294901760, %v21236_v40  ;;  %v21771_v62 = vand.u32 4294901760, %v21770_v4  ;;  %v47832_v20 = vand.u32 4294901760, %v21668_v6  ;;  %43762 = vmatprep.subr.bf16.mxu1 %v47823_v27 }
0x196f   : > { %43764 = vmatpush3.bf16.xpose.msra.mxu1 %v47823_v27  ;;  %v21745_v50 = vand.u32 4294901760, %v21744_v39 }
0x1970   : > { %v21772_v11 = vsub.f32 %v21770_v4, %v21771_v62  ;;  %v21752_v29 = vsub.f32 %v21668_v6, %v47832_v20  ;;  %41090 = vmatmul.mubr.f32.vlgmr.msra.gmra.mrb[36].mxu0 %v21237_v45  ;;  %v43769_v6 = vpack.c.bf16 %v21770_v4, %v47800_v30  ;;  %v22183_v39 = vpop.permute.xlu1 %22182 }
0x1971   : > { %43744 = vmatpush3.bf16.xpose.msra.mxu0 %v43741_v53  ;;  %41096 = vmatprep.mubr.f32.mxu0 %v47785_v59  ;;  %v22181_v53 = vpop.permute.xlu0 %22180  ;;  %v22190_v45 = vsel %vm5214_vm8, %v22183_v39, 0  ;;  %v22904_v39 = vsub.f32 %v47732_v46, %v22903_v43 }
0x1972   : > { %v21753_v34 = vand.u32 4294901760, %v21752_v29  ;;  %43746 = vmatprep.subr.bf16.mxu0 %v43745_v31  ;;  %41131 = vmatprep.mubr.f32.mxu1 %v21745_v50  ;;  %v21773_v56 = vand.u32 4294901760, %v21772_v11  ;;  %v22196_v21 = vand.u32 4294901760, %v22190_v45 }
0x1974   : > { %v21754_v35 = vsub.f32 %v21752_v29, %v21753_v34  ;;  %v43765_v40 = vpack.c.bf16 %v21773_v56, %v21766_v24  ;;  %v22179_v50 = vpop.permute.xlu1 %22178  ;;  %v47861_v11 = vsub.f32 %v22190_v45, %v22196_v21 }
0x1975   : > { %v22177_v4 = vpop.permute.xlu0 %22176 }
0x1976   : > { %v21755_v60 = vand.u32 4294901760, %v21754_v35  ;;  %43766 = vmatprep.subr.bf16.mxu1 %v43765_v40  ;;  %v22184_v37 = vsel %vm5214_vm8, %v22177_v4, 0 }
0x1977   : > { %v47859_v16 = vand.u32 4294901760, %v22184_v37 }
0x1978   : > { %41097 = vmatmul.mubr.f32.vlgmr.msra.gmra.mrb[36].mxu0 %v47804_v19  ;;  %41132 = vmatmul.mubr.f32.vlgmr.msra.gmra.mrb[26].mxu1 %v21755_v60 }
0x1979   : > { %43748 = vmatpush3.bf16.xpose.msra.mxu0 %v43745_v31  ;;  %43768 = vmatpush3.bf16.xpose.msra.mxu1 %v43765_v40  ;;  %v22186_v31 = vsel %vm5214_vm8, %v22179_v50, 0 }
0x197a   : > { %41103 = vmatprep.mubr.f32.mxu0 %v47794_v61  ;;  %43750 = vmatprep.subr.bf16.mxu0 %v47779_v28  ;;  %v43777_v61 = vpack.c.bf16 %v21771_v62, %v21764_v54  ;;  %v22269_v24 = vand.u32 4294901760, %v22186_v31 }
0x197b   : > { %41138 = vmatprep.mubr.f32.mxu1 %v47807_v23  ;;  %43770 = vmatprep.subr.bf16.mxu1 %v43769_v6 }
0x197c   : > { %v22270_v62 = vsub.f32 %v22186_v31, %v22269_v24 }
0x197e   : > { %v22271_v60 = vand.u32 4294901760, %v22270_v62 }
0x1980   : > { %41104 = vmatmul.mubr.f32.vlgmr.msra.gmra.mrb[36].mxu0 %v47810_v33  ;;  %41139 = vmatmul.mubr.f32.vlgmr.msra.gmra.mrb[26].mxu1 %v47832_v20  ;;  %v22188_v33 = vsel %vm5214_vm8, %v22181_v53, 0  ;;  %v22897_v53 = vsub.f32 %v47740_v58, %v22896_v15 }
0x1981   : > { %43752 = vmatpush3.bf16.xpose.msra.mxu0 %v47779_v28  ;;  %43772 = vmatpush3.bf16.xpose.msra.mxu1 %v43769_v6  ;;  %v22193_v38 = vand.u32 4294901760, %v22188_v33 }
0x1982   : > { %41110 = vmatprep.mubr.f32.mxu0 %v21225_v12  ;;  %43754 = vmatprep.subr.bf16.mxu0 %v43753_v51 }
0x1983   : > { %41145 = vmatprep.mubr.f32.mxu1 %v47816_v9  ;;  %43774 = vmatprep.subr.bf16.mxu1 %v47823_v27  ;;  %v22281_v12 = vsub.f32 %v22188_v33, %v22193_v38  ;;  %v43785_v30 = vpack.c.bf16 %v22196_v21, %v22193_v38 }
0x1985   : > { %v22282_v56 = vand.u32 4294901760, %v22281_v12 }
0x1987   : > { %v22283_v9 = vsub.f32 %v22281_v12, %v22282_v56 }
0x1988   : > { %41111 = vmatmul.mubr.f32.vlgmr.msra.gmra.mrb[36].mxu0 %v21235_v48  ;;  %41146 = vmatmul.mubr.f32.vlgmr.msra.gmra.mrb[26].mxu1 %v21752_v29  ;;  %v22260_v48 = vsub.f32 %v22184_v37, %v47859_v16  ;;  %v22289_v29 = vand.u32 4294901760, %v47861_v11 }
0x1989   : > { %43756 = vmatpush3.bf16.xpose.msra.mxu0 %v43753_v51  ;;  %43776 = vmatpush3.bf16.xpose.msra.mxu1 %v47823_v27  ;;  %v22284_v6 = vand.u32 4294901760, %v22283_v9  ;;  %v22272_v51 = vsub.f32 %v22270_v62, %v22271_v60 }
0x198a   : > { %41117 = vmatprep.mubr.f32.mxu0 %v47785_v59  ;;  %43758 = vmatprep.subr.bf16.mxu0 %v47779_v28  ;;  %v22261_v35 = vand.u32 4294901760, %v22260_v48  ;;  %v22290_v54 = vsub.f32 %v47861_v11, %v22289_v29  ;;  %v43801_v46 = vpack.c.bf16 %v22289_v29, %v22282_v56 }
0x198b   : > { %41152 = vmatprep.mubr.f32.mxu1 %v21743_v22  ;;  %43778 = vmatprep.subr.bf16.mxu1 %v43777_v61 }
0x198c   : > { %v22262_v22 = vsub.f32 %v22260_v48, %v22261_v35  ;;  %v22291_v40 = vand.u32 4294901760, %v22290_v54 }
0x1990   : > { %41118 = vmatmul.mubr.f32.vlgmr.msra.gmra.mrb[36].mxu0 %v47804_v19  ;;  %41153 = vmatmul.mubr.f32.vlgmr.msra.gmra.mrb[26].mxu1 %v21753_v34  ;;  %v47883_v34 = vpack.c.bf16 %v22810_v3, %v22807_v0  ;;  %v22898_v3 = vand.u32 4294901760, %v22897_v53  ;;  %v22905_v0 = vand.u32 4294901760, %v22904_v39 }
0x1991   : > { %43760 = vmatpush3.bf16.xpose.msra.mxu0 %v47779_v28  ;;  %43780 = vmatpush3.bf16.xpose.msra.mxu1 %v43777_v61  ;;  %v22263_v28 = vand.u32 4294901760, %v22262_v22 }
0x1992   : > { %41124 = vmatprep.mubr.f32.mxu0 %v47785_v59  ;;  %41159 = vmatprep.mubr.f32.mxu1 %v47807_v23  ;;  %v43789_v59 = vpack.c.bf16 %v22291_v40, %v22284_v6  ;;  %v47899_v58 = vpack.c.bf16 %v22905_v0, %v22898_v3 }
0x1993   : > { %43782 = vmatprep.subr.bf16.mxu1 %v47823_v27  ;;  %43786 = vmatprep.subr.bf16.mxu0 %v43785_v30 }
0x1998   : > { %41125 = vmatmul.mubr.f32.vlgmr.msra.gmra.mrb[36].mxu0 %v47804_v19  ;;  %41160 = vmatmul.mubr.f32.vlgmr.msra.gmra.mrb[26].mxu1 %v47832_v20  ;;  %v22273_v19 = vand.u32 4294901760, %v22272_v51 }
0x1999   : > { %43784 = vmatpush3.bf16.xpose.msra.mxu1 %v47823_v27  ;;  %43788 = vmatpush3.bf16.xpose.msra.mxu0 %v43785_v30  ;;  %v43793_v27 = vpack.c.bf16 %v47861_v11, %v22281_v12 }
0x199a   : > { %41166 = vmatprep.mubr.f32.mxu1 %v47807_v23  ;;  %41173 = vmatprep.mubr.f32.mxu0 %v22263_v28 }
0x199b   : > { %43790 = vmatprep.subr.bf16.mxu0 %v43789_v59  ;;  %43810 = vmatprep.subr.bf16.mxu1 %v47883_v34 }
0x19a0   : > { %41174 = vmatmul.mubr.f32.vlgmr.msra.gmra.mrb[38].mxu0 %v22273_v19  ;;  %41167 = vmatmul.mubr.f32.vlgmr.msra.gmra.mrb[26].mxu1 %v47832_v20 }
0x19a1   : > { %43792 = vmatpush3.bf16.xpose.msra.mxu0 %v43789_v59  ;;  %41180 = vmatprep.mubr.f32.mxu0 %v47859_v16 }
0x19a2   : > { %43812 = vmatpush3.bf16.msra.mxu1 %v47883_v34  ;;  %43794 = vmatprep.subr.bf16.mxu0 %v43793_v27 }
0x19a3   : > { %43814 = vmatprep.subr.bf16.mxu1 %v47899_v58 }
0x19a8   : > { %41181 = vmatmul.mubr.f32.vlgmr.msra.gmra.mrb[38].mxu0 %v22269_v24 }
0x19a9   : > { %43796 = vmatpush3.bf16.xpose.msra.mxu0 %v43793_v27  ;;  %41187 = vmatprep.mubr.f32.mxu0 %v22260_v48 }
0x19aa   : > { %43798 = vmatprep.subr.bf16.mxu0 %v43785_v30 }
0x19b0   : > { %41188 = vmatmul.mubr.f32.vlgmr.msra.gmra.mrb[38].mxu0 %v22270_v62 }
0x19b1   : > { %43800 = vmatpush3.bf16.xpose.msra.mxu0 %v43785_v30  ;;  %41194 = vmatprep.mubr.f32.mxu0 %v22261_v35 }
0x19b2   : > { %43802 = vmatprep.subr.bf16.mxu0 %v43801_v46 }
0x19b8   : > { %41195 = vmatmul.mubr.f32.vlgmr.msra.gmra.mrb[38].mxu0 %v22271_v60 }
0x19b9   : > { %43804 = vmatpush3.bf16.xpose.msra.mxu0 %v43801_v46  ;;  %41201 = vmatprep.mubr.f32.mxu0 %v47859_v16 }
0x19ba   : > { %43806 = vmatprep.subr.bf16.mxu0 %v43785_v30 }
0x19c0   : > { %41202 = vmatmul.mubr.f32.vlgmr.msra.gmra.mrb[38].mxu0 %v22269_v24 }
0x19c1   : > { %43808 = vmatpush3.bf16.xpose.msra.mxu0 %v43785_v30  ;;  %41208 = vmatprep.mubr.f32.mxu0 %v47859_v16 }
0x19c8   : > { %41209 = vmatmul.mubr.f32.vlgmr.msra.gmra.mrb[38].mxu0 %v22269_v24 }
0x19f3   : > { %v41084_v43 = vpop.f32.mrb[24].mxu1 }
0x19f4   : > { %v22695_v15 = vmul.f32 0.35355338, %v41084_v43  ;;  %v21130_v23 = vpop.f32.mrb[25].mxu1 }
0x19f5   : > { %v22694_v20 = vmul.f32 0.35355338, %v21130_v23 }
0x19f6   : > { %v22703_v4 = vsel %vm7297_vm10, -1e+09, %v22695_v15 }
0x19f7   : > { %v22713_v45 = vsel %vm997_vm0, %v22703_v4, -inf  ;;  %v22702_v33 = vsel %vm7297_vm10, -1e+09, %v22694_v20 }
0x19f8   : > { %22714 = vmax.xlane.f32.xlu1 %v22713_v45  ;;  %v22710_v37 = vsel %vm997_vm0, %v22702_v33, -inf }
0x19f9   : > { %22711 = vmax.xlane.f32.xlu0 %v22710_v37 }
0x1a6b   : > { %v41126_v21 = vpop.f32.mrb[36].mxu0 }
0x1a6c   : > { %v21648_v38 = vpop.f32.mrb[37].mxu0  ;;  %v22697_v16 = vmul.f32 0.35355338, %v41126_v21 }
0x1a6d   : > { %v22696_v50 = vmul.f32 0.35355338, %v21648_v38 }
0x1a6e   : > { %v22705_v12 = vsel %vm7297_vm10, -1e+09, %v22697_v16 }
0x1a6f   : > { %v22704_v11 = vsel %vm7297_vm10, -1e+09, %v22696_v50  ;;  %v22719_v29 = vsel %vm997_vm0, %v22705_v12, -inf }
0x1a70   : > { %v22716_v61 = vsel %vm997_vm0, %v22704_v11, -inf }
0x1a71   : > { %22717 = vmax.xlane.f32.xlu0 %v22716_v61 }
0x1a73   : > { %v41168_v31 = vpop.f32.mrb[26].mxu1 }
0x1a74   : > { %v22166_v48 = vpop.f32.mrb[27].mxu1  ;;  %v22699_v9 = vmul.f32 0.35355338, %v41168_v31 }
0x1a75   : > { %22720 = vmax.xlane.f32.xlu0 %v22719_v29  ;;  %v22698_v22 = vmul.f32 0.35355338, %v22166_v48 }
0x1a76   : > { %v22707_v59 = vsel %vm7297_vm10, -1e+09, %v22699_v9 }
0x1a77   : > { %v22706_v53 = vsel %vm7297_vm10, -1e+09, %v22698_v22  ;;  %v22725_v39 = vsel %vm997_vm0, %v22707_v59, -inf }
0x1a78   : > { %v22722_v51 = vsel %vm997_vm0, %v22706_v53, -inf }
0x1a85   : > { %v22715_v24 = vpop.xlane.xlu1 %22714 }
0x1a86   : > { %v22735_v56 = vsub.f32 %v22703_v4, %v22715_v24  ;;  %v22712_v35 = vpop.xlane.xlu0 %22711 }
0x1a87   : > { %v22734_v30 = vsub.f32 %v22702_v33, %v22712_v35 }
0x1a88   : > { %v22744_v54 = vmul.f32 1.442695, %v22735_v56 }
0x1a89   : > { %v22742_v62 = vmul.f32 1.442695, %v22734_v30 }
0x1a8a   : > { %45576 = vpow2.f32 %v22744_v54 }
0x1a8b   : > { %45578 = vpow2.f32 %v22742_v62 }
0x1a94   : > { %v45577_v40 = vpop.eup %45576 }
0x1a95   : > { %v45579_v60 = vpop.eup %45578  ;;  %v22761_v6 = vsel %vm997_vm0, %v45577_v40, 0.0 }
0x1a96   : > { %22762 = vadd.xlane.f32.xlu1 %v22761_v6  ;;  %v22758_v28 = vsel %vm997_vm0, %v45579_v60, 0.0 }
0x1a97   : > { %22759 = vadd.xlane.f32.xlu0 %v22758_v28 }
0x1a9a   : > { %22726 = vmax.xlane.f32.xlu1 %v22725_v39 }
0x1a9b   : > { %v41210_v3 = vpop.f32.mrb[38].mxu0  ;;  %22723 = vmax.xlane.f32.xlu0 %v22722_v51 }
0x1a9c   : > { %v22701_v0 = vmul.f32 0.35355338, %v41210_v3  ;;  %v22684_v19 = vpop.f32.mrb[39].mxu0 }
0x1a9d   : > { %v22700_v27 = vmul.f32 0.35355338, %v22684_v19 }
0x1a9e   : > { %v47927_v46 = vsel %vm7297_vm10, -1e+09, %v22701_v0 }
0x1a9f   : > { %v22731_v43 = vsel %vm997_vm0, %v47927_v46, -inf  ;;  %v47933_v15 = vsel %vm7297_vm10, -1e+09, %v22700_v27 }
0x1aa0   : > { %22732 = vmax.xlane.f32.xlu1 %v22731_v43  ;;  %v22728_v23 = vsel %vm997_vm0, %v47933_v15, -inf }
0x1aa1   : > { %22729 = vmax.xlane.f32.xlu0 %v22728_v23 }
0x1afe   : > { %v22718_v20 = vpop.xlane.xlu0 %22717 }
0x1aff   : > { %v22736_v4 = vsub.f32 %v22704_v11, %v22718_v20 }
0x1b01   : > { %v22746_v45 = vmul.f32 1.442695, %v22736_v4 }
0x1b02   : > { %v22721_v33 = vpop.xlane.xlu0 %22720 }
0x1b03   : > { %45580 = vpow2.f32 %v22746_v45  ;;  %v22737_v37 = vsub.f32 %v22705_v12, %v22721_v33 }
0x1b05   : > { %v22748_v21 = vmul.f32 1.442695, %v22737_v37 }
0x1b07   : > { %45582 = vpow2.f32 %v22748_v21 }
0x1b0d   : > { %v47937_v38 = vpop.eup %45580 }
0x1b0e   : > { %v22764_v8 = vsel %vm997_vm0, %v47937_v38, 0.0 }
0x1b0f   : > { %22765 = vadd.xlane.f32.xlu0 %v22764_v8 }
0x1b11   : > { %v47941_v16 = vpop.eup %45582 }
0x1b12   : > { %v22767_v50 = vsel %vm997_vm0, %v47941_v16, 0.0 }
0x1b13   : > { %22768 = vadd.xlane.f32.xlu1 %v22767_v50 }
0x1b23   : > { %v22763_v61 = vpop.xlane.xlu1 %22762 }
0x1b24   : > { %45584 = vrcp.f32 %v22763_v61  ;;  %v22760_v11 = vpop.xlane.xlu0 %22759  ;;  %23815 = vrot.lane.b32.xlu1 %v47720_v5, %s48774_s28 }
0x1b25   : > { %45586 = vrcp.f32 %v22760_v11  ;;  %23813 = vrot.lane.b32.xlu0 %v47722_v32, %s48774_s28 }
0x1b27   : > { %v22727_v12 = vpop.xlane.xlu1 %22726 }
0x1b28   : > { %v22739_v48 = vsub.f32 %v22707_v59, %v22727_v12  ;;  %v22724_v56 = vpop.xlane.xlu0 %22723 }
0x1b29   : > { %v22738_v62 = vsub.f32 %v22706_v53, %v22724_v56 }
0x1b2a   : > { %v22752_v54 = vmul.f32 1.442695, %v22739_v48 }
0x1b2b   : > { %v22750_v51 = vmul.f32 1.442695, %v22738_v62 }
0x1b2c   : > { %45588 = vpow2.f32 %v22752_v54 }
0x1b2d   : > { %45590 = vpow2.f32 %v22750_v51 }
0x1b2e   : > { %v45585_v31 = vpop.eup %45584  ;;  %v22730_v20 = vpop.xlane.xlu0 %22729 }
0x1b2f   : > { %v45587_v29 = vpop.eup %45586  ;;  %v22791_v24 = vmul.f32 %v45585_v31, %v45577_v40 }
0x1b30   : > { %v22790_v35 = vmul.f32 %v45587_v29, %v45579_v60 }
0x1b31   : > { %v22804_v30 = vsel %vm997_vm0, %v22791_v24, 0 }
0x1b32   : > { %v22801_v9 = vsel %vm997_vm0, %v22790_v35, 0  ;;  %v22883_v22 = vand.u32 4294901760, %v22804_v30 }
0x1b33   : > { %v22873_v6 = vand.u32 4294901760, %v22801_v9 }
0x1b34   : > { %v22884_v28 = vsub.f32 %v22804_v30, %v22883_v22 }
0x1b35   : > { %v22874_v39 = vsub.f32 %v22801_v9, %v22873_v6 }
0x1b36   : > { %v22885_v3 = vand.u32 4294901760, %v22884_v28  ;;  %v47952_v60 = vpop.eup %45588 }
0x1b37   : > { %v22875_v0 = vand.u32 4294901760, %v22874_v39  ;;  %v22773_v53 = vsel %vm997_vm0, %v47952_v60, 0.0  ;;  %v47957_v43 = vpop.eup %45590 }
0x1b38   : > { %v22886_v19 = vsub.f32 %v22884_v28, %v22885_v3  ;;  %v22770_v23 = vsel %vm997_vm0, %v47957_v43, 0.0 }
0x1b39   : > { %v22876_v59 = vsub.f32 %v22874_v39, %v22875_v0 }
0x1b3a   : > { %v22887_v27 = vand.u32 4294901760, %v22886_v19 }
0x1b3b   : > { %v22877_v40 = vand.u32 4294901760, %v22876_v59 }
0x1b3d   : > { %41215 = vmatprep.mubr.f32.mxu1 %v22877_v40 }
0x1b3e   : > { %41216 = vmatmul.mubr.f32.vlgmr.msra.gmra.mrb[28].mxu1 %v22887_v27 }
0x1b3f   : > { %43816 = vmatpush3.bf16.msra.mxu1 %v47899_v58  ;;  %41222 = vmatprep.mubr.f32.mxu1 %v22873_v6 }
0x1b40   : > { %43818 = vmatprep.subr.bf16.mxu1 %v47747_v47 }
0x1b44   : > { %22774 = vadd.xlane.f32.xlu0 %v22773_v53 }
0x1b46   : > { %41223 = vmatmul.mubr.f32.vlgmr.msra.gmra.mrb[28].mxu1 %v22883_v22 }
0x1b47   : > { %43820 = vmatpush3.bf16.msra.mxu1 %v47747_v47  ;;  %41229 = vmatprep.mubr.f32.mxu1 %v22874_v39  ;;  %v22733_v47 = vpop.xlane.xlu1 %22732 }
0x1b48   : > { %43822 = vmatprep.subr.bf16.mxu1 %v47883_v34  ;;  %22771 = vadd.xlane.f32.xlu1 %v22770_v23  ;;  %v22741_v58 = vsub.f32 %v47927_v46, %v22733_v47 }
0x1b4a   : > { %v22756_v4 = vmul.f32 1.442695, %v22741_v58 }
0x1b4c   : > { %45592 = vpow2.f32 %v22756_v4 }
0x1b4e   : > { %41230 = vmatmul.mubr.f32.vlgmr.msra.gmra.mrb[28].mxu1 %v22884_v28 }
0x1b4f   : > { %43824 = vmatpush3.bf16.msra.mxu1 %v47883_v34  ;;  %41236 = vmatprep.mubr.f32.mxu1 %v22875_v0 }
0x1b50   : > { %43826 = vmatprep.subr.bf16.mxu1 %v47754_v57 }
0x1b56   : > { %41237 = vmatmul.mubr.f32.vlgmr.msra.gmra.mrb[28].mxu1 %v22885_v3  ;;  %v47974_v33 = vpop.eup %45592 }
0x1b57   : > { %43828 = vmatpush3.bf16.msra.mxu1 %v47754_v57  ;;  %41243 = vmatprep.mubr.f32.mxu1 %v22873_v6  ;;  %v22740_v57 = vsub.f32 %v47933_v15, %v22730_v20  ;;  %v22779_v37 = vsel %vm997_vm0, %v47974_v33, 0.0 }
0x1b58   : > { %43830 = vmatprep.subr.bf16.mxu1 %v47883_v34 }
0x1b59   : > { %24826 = vrot.lane.b32.xlu1 %v47720_v5, %s48775_s29  ;;  %v22754_v45 = vmul.f32 1.442695, %v22740_v57 }
0x1b5a   : > { %24824 = vrot.lane.b32.xlu0 %v47722_v32, %s48775_s29 }
0x1b5b   : > { %45594 = vpow2.f32 %v22754_v45 }
0x1b5e   : > { %41244 = vmatmul.mubr.f32.vlgmr.msra.gmra.mrb[28].mxu1 %v22883_v22 }
0x1b5f   : > { %43832 = vmatpush3.bf16.msra.mxu1 %v47883_v34  ;;  %41250 = vmatprep.mubr.f32.mxu1 %v22873_v6 }
0x1b65   : > { %v47978_v21 = vpop.eup %45594 }
0x1b66   : > { %41251 = vmatmul.mubr.f32.vlgmr.msra.gmra.mrb[28].mxu1 %v22883_v22  ;;  %v22776_v34 = vsel %vm997_vm0, %v47978_v21, 0.0 }
0x1b79   : > { %22780 = vadd.xlane.f32.xlu0 %v22779_v37 }
0x1b7d   : > { %22777 = vadd.xlane.f32.xlu1 %v22776_v34 }
0x1b8e   : > { %25837 = vrot.lane.b32.xlu1 %v47720_v5, %s48776_s2 }
0x1b8f   : > { %25835 = vrot.lane.b32.xlu0 %v47722_v32, %s48776_s2  ;;  %s48778_s2 = sshll.u32 %s48782_s5, 4 }
0x1b90   : > { %s988_s21 = scalar_lea.vmem %s48779_s24, %s48778_s2 }
0x1b9c   : > { %v22766_v46 = vpop.xlane.xlu0 %22765 }
0x1b9d   : > { %45596 = vrcp.f32 %v22766_v46 }
0x1ba0   : > { %v22769_v15 = vpop.xlane.xlu1 %22768  ;;  %v23814_v8 = vpop.permute.xlu0 %23813 }
0x1ba1   : > { %45598 = vrcp.f32 %v22769_v15  ;;  %v23826_v50 = vand.u32 4294901760, %v23814_v8 }
0x1ba3   : > { %v23914_v61 = vsub.f32 %v23814_v8, %v23826_v50 }
0x1ba4   : > { %v23816_v11 = vpop.permute.xlu1 %23815 }
0x1ba5   : > { %v23915_v12 = vand.u32 4294901760, %v23914_v61  ;;  %v23829_v31 = vand.u32 4294901760, %v23816_v11 }
0x1ba7   : > { %v45597_v48 = vpop.eup %45596  ;;  %v47986_v29 = vpack.c.bf16 %v23829_v31, %v23826_v50  ;;  %v23921_v24 = vsub.f32 %v23816_v11, %v23829_v31  ;;  %v23916_v5 = vsub.f32 %v23914_v61, %v23915_v12 }
0x1ba8   : > { %v22792_v56 = vmul.f32 %v45597_v48, %v47937_v38 }
0x1ba9   : > { %v23922_v35 = vand.u32 4294901760, %v23921_v24  ;;  %43834 = vmatprep.subr.bf16.mxu0 %v47986_v29  ;;  %v23917_v22 = vand.u32 4294901760, %v23916_v5  ;;  %v43841_v23 = vpack.c.bf16 %v23921_v24, %v23914_v61 }
0x1baa   : > { %43836 = vmatpush3.bf16.msra.mxu0 %v47986_v29  ;;  %v23820_v32 = vsel %vm997_vm0, %v22792_v56, 0 }
0x1bab   : > { %v45599_v30 = vpop.eup %45598  ;;  %v23923_v54 = vsub.f32 %v23921_v24, %v23922_v35  ;;  %v23892_v62 = vand.u32 4294901760, %v23820_v32  ;;  %v43849_v20 = vpack.c.bf16 %v23922_v35, %v23915_v12 }
0x1bac   : > { %v22793_v9 = vmul.f32 %v45599_v30, %v47941_v16  ;;  %v37214_v16 = vld [vmem:[%s48677_s13 + $0x20] sm:$0xff] }
0x1bad   : > { %v23924_v6 = vand.u32 4294901760, %v23923_v54  ;;  %v23893_v28 = vsub.f32 %v23820_v32, %v23892_v62  ;;  %v47998_v47 = vand.u32 4294901760, %v37214_v16 }
0x1bae   : > { %v23823_v39 = vsel %vm997_vm0, %v22793_v9, 0 }
0x1baf   : > { %v43837_v51 = vpack.c.bf16 %v23924_v6, %v23917_v22  ;;  %v23894_v38 = vand.u32 4294901760, %v23893_v28  ;;  %v23902_v3 = vand.u32 4294901760, %v23823_v39  ;;  %41253 = vmatprep.subr.mxu1 %v47998_v47  ;;  %v48002_v58 = vsub.f32 %v37214_v16, %v47998_v47 }
0x1bb0   : > { %41254 = vmatpush3.msra.mxu1 %v47998_v47 }
0x1bb1   : > { %43838 = vmatprep.subr.bf16.mxu0 %v43837_v51  ;;  %v23895_v0 = vsub.f32 %v23893_v28, %v23894_v38  ;;  %v23903_v19 = vsub.f32 %v23823_v39, %v23902_v3  ;;  %v48006_v4 = vand.u32 4294901760, %v48002_v58 }
0x1bb3   : > { %v23896_v59 = vand.u32 4294901760, %v23895_v0  ;;  %v23904_v40 = vand.u32 4294901760, %v23903_v19  ;;  %v23404_v57 = vsub.f32 %v48002_v58, %v48006_v4 }
0x1bb5   : > { %41287 = vmatprep.mubr.f32.mxu0 %v23896_v59  ;;  %v23905_v27 = vsub.f32 %v23903_v19, %v23904_v40  ;;  %v48011_v45 = vand.u32 4294901760, %v23404_v57 }
0x1bb7   : > { %v23906_v53 = vand.u32 4294901760, %v23905_v27  ;;  %41258 = vmatprep.subr.mxu1 %v48011_v45 }
0x1bb9   : > { %41288 = vmatmul.mubr.f32.vlgmr.msra.gmra.mrb[40].mxu0 %v23906_v53 }
0x1bba   : > { %43840 = vmatpush3.bf16.msra.mxu0 %v43837_v51  ;;  %41294 = vmatprep.mubr.f32.mxu0 %v23892_v62 }
0x1bbb   : > { %43842 = vmatprep.subr.bf16.mxu0 %v43841_v23 }
0x1bc1   : > { %41295 = vmatmul.mubr.f32.vlgmr.msra.gmra.mrb[40].mxu0 %v23902_v3 }
0x1bc2   : > { %43844 = vmatpush3.bf16.msra.mxu0 %v43841_v23  ;;  %41301 = vmatprep.mubr.f32.mxu0 %v23893_v28 }
0x1bc3   : > { %43846 = vmatprep.subr.bf16.mxu0 %v47986_v29 }
0x1bc9   : > { %41302 = vmatmul.mubr.f32.vlgmr.msra.gmra.mrb[40].mxu0 %v23903_v19 }
0x1bca   : > { %43848 = vmatpush3.bf16.msra.mxu0 %v47986_v29  ;;  %41308 = vmatprep.mubr.f32.mxu0 %v23894_v38 }
0x1bcb   : > { %43850 = vmatprep.subr.bf16.mxu0 %v43849_v20 }
0x1bd1   : > { %41309 = vmatmul.mubr.f32.vlgmr.msra.gmra.mrb[40].mxu0 %v23904_v40  ;;  %v22775_v37 = vpop.xlane.xlu0 %22774 }
0x1bd2   : > { %43852 = vmatpush3.bf16.msra.mxu0 %v43849_v20  ;;  %45600 = vrcp.f32 %v22775_v37  ;;  %41315 = vmatprep.mubr.f32.mxu0 %v23892_v62 }
0x1bd3   : > { %43854 = vmatprep.subr.bf16.mxu0 %v47986_v29 }
0x1bd5   : > { %v22772_v34 = vpop.xlane.xlu1 %22771  ;;  %v24825_v46 = vpop.permute.xlu0 %24824 }
0x1bd6   : > { %45602 = vrcp.f32 %v22772_v34  ;;  %v24837_v15 = vand.u32 4294901760, %v24825_v46 }
0x1bd8   : > { %v24925_v8 = vsub.f32 %v24825_v46, %v24837_v15 }
0x1bd9   : > { %v24827_v50 = vpop.permute.xlu1 %24826  ;;  %41316 = vmatmul.mubr.f32.vlgmr.msra.gmra.mrb[40].mxu0 %v23902_v3 }
0x1bda   : > { %v24926_v61 = vand.u32 4294901760, %v24925_v8  ;;  %v24840_v11 = vand.u32 4294901760, %v24827_v50  ;;  %43856 = vmatpush3.bf16.msra.mxu0 %v47986_v29  ;;  %41322 = vmatprep.mubr.f32.mxu0 %v23892_v62 }
0x1bdc   : > { %v45601_v12 = vpop.eup %45600  ;;  %v43857_v31 = vpack.c.bf16 %v24840_v11, %v24837_v15  ;;  %v24932_v48 = vsub.f32 %v24827_v50, %v24840_v11  ;;  %v24927_v56 = vsub.f32 %v24925_v8, %v24926_v61 }
0x1bdd   : > { %v22795_v24 = vmul.f32 %v45601_v12, %v47952_v60 }
0x1bde   : > { %v24933_v5 = vand.u32 4294901760, %v24932_v48  ;;  %43858 = vmatprep.subr.bf16.mxu0 %v43857_v31  ;;  %v24928_v22 = vand.u32 4294901760, %v24927_v56 }
0x1bdf   : > { %v24834_v35 = vsel %vm997_vm0, %v22795_v24, 0 }
0x1be0   : > { %v45603_v32 = vpop.eup %45602  ;;  %v24934_v30 = vsub.f32 %v24932_v48, %v24933_v5  ;;  %v24913_v54 = vand.u32 4294901760, %v24834_v35 }
0x1be1   : > { %v22794_v9 = vmul.f32 %v45603_v32, %v47957_v43  ;;  %41323 = vmatmul.mubr.f32.vlgmr.msra.gmra.mrb[40].mxu0 %v23902_v3  ;;  %v43865_v43 = vpack.c.bf16 %v24932_v48, %v24925_v8  ;;  %v43873_v3 = vpack.c.bf16 %v24933_v5, %v24926_v61 }
0x1be2   : > { %43860 = vmatpush3.bf16.msra.mxu0 %v43857_v31  ;;  %v24935_v29 = vand.u32 4294901760, %v24934_v30  ;;  %v24914_v62 = vsub.f32 %v24834_v35, %v24913_v54 }
0x1be3   : > { %v24831_v6 = vsel %vm997_vm0, %v22794_v9, 0 }
0x1be4   : > { %v43861_v28 = vpack.c.bf16 %v24935_v29, %v24928_v22  ;;  %v24903_v39 = vand.u32 4294901760, %v24831_v6  ;;  %v24915_v60 = vand.u32 4294901760, %v24914_v62 }
0x1be6   : > { %43862 = vmatprep.subr.bf16.mxu0 %v43861_v28  ;;  %v24904_v51 = vsub.f32 %v24831_v6, %v24903_v39  ;;  %v24916_v0 = vsub.f32 %v24914_v62, %v24915_v60 }
0x1be8   : > { %v24905_v38 = vand.u32 4294901760, %v24904_v51  ;;  %v24917_v40 = vand.u32 4294901760, %v24916_v0 }
0x1bea   : > { %v24906_v19 = vsub.f32 %v24904_v51, %v24905_v38 }
0x1bec   : > { %v24907_v59 = vand.u32 4294901760, %v24906_v19 }
0x1bee   : > { %41359 = vmatprep.mubr.f32.mxu0 %v24907_v59 }
0x1bef   : > { %41360 = vmatmul.mubr.f32.vlgmr.msra.gmra.mrb[42].mxu0 %v24917_v40 }
0x1bf0   : > { %43864 = vmatpush3.bf16.msra.mxu0 %v43861_v28  ;;  %41366 = vmatprep.mubr.f32.mxu0 %v24903_v39 }
0x1bf1   : > { %43866 = vmatprep.subr.bf16.mxu0 %v43865_v43 }
0x1bf7   : > { %41367 = vmatmul.mubr.f32.vlgmr.msra.gmra.mrb[42].mxu0 %v24913_v54 }
0x1bf8   : > { %43868 = vmatpush3.bf16.msra.mxu0 %v43865_v43  ;;  %41373 = vmatprep.mubr.f32.mxu0 %v24904_v51 }
0x1bf9   : > { %43870 = vmatprep.subr.bf16.mxu0 %v43857_v31 }
0x1bff   : > { %41374 = vmatmul.mubr.f32.vlgmr.msra.gmra.mrb[42].mxu0 %v24914_v62 }
0x1c00   : > { %43872 = vmatpush3.bf16.msra.mxu0 %v43857_v31  ;;  %41380 = vmatprep.mubr.f32.mxu0 %v24905_v38 }
0x1c01   : > { %43874 = vmatprep.subr.bf16.mxu0 %v43873_v3 }
0x1c06   : > { %v22781_v27 = vpop.xlane.xlu0 %22780 }
0x1c07   : > { %45604 = vrcp.f32 %v22781_v27  ;;  %41381 = vmatmul.mubr.f32.vlgmr.msra.gmra.mrb[42].mxu0 %v24915_v60 }
0x1c08   : > { %43876 = vmatpush3.bf16.msra.mxu0 %v43873_v3  ;;  %41387 = vmatprep.mubr.f32.mxu0 %v24903_v39 }
0x1c09   : > { %43878 = vmatprep.subr.bf16.mxu0 %v43857_v31 }
0x1c0a   : > { %v22778_v53 = vpop.xlane.xlu1 %22777  ;;  %v25836_v23 = vpop.permute.xlu0 %25835 }
0x1c0b   : > { %45606 = vrcp.f32 %v22778_v53  ;;  %v25848_v16 = vand.u32 4294901760, %v25836_v23 }
0x1c0d   : > { %v25936_v20 = vsub.f32 %v25836_v23, %v25848_v16 }
0x1c0e   : > { %v25838_v57 = vpop.permute.xlu1 %25837 }
0x1c0f   : > { %v25937_v37 = vand.u32 4294901760, %v25936_v20  ;;  %v25851_v34 = vand.u32 4294901760, %v25838_v57  ;;  %41388 = vmatmul.mubr.f32.vlgmr.msra.gmra.mrb[42].mxu0 %v24913_v54 }
0x1c10   : > { %43880 = vmatpush3.bf16.msra.mxu0 %v43857_v31  ;;  %41394 = vmatprep.mubr.f32.mxu0 %v24903_v39 }
0x1c11   : > { %v45605_v46 = vpop.eup %45604  ;;  %v43881_v15 = vpack.c.bf16 %v25851_v34, %v25848_v16  ;;  %v25943_v8 = vsub.f32 %v25838_v57, %v25851_v34  ;;  %v25938_v61 = vsub.f32 %v25936_v20, %v25937_v37 }
0x1c12   : > { %v22797_v50 = vmul.f32 %v45605_v46, %v47974_v33 }
0x1c13   : > { %v25944_v11 = vand.u32 4294901760, %v25943_v8  ;;  %43882 = vmatprep.subr.bf16.mxu0 %v43881_v15  ;;  %v25939_v35 = vand.u32 4294901760, %v25938_v61 }
0x1c14   : > { %v25845_v12 = vsel %vm997_vm0, %v22797_v50, 0 }
0x1c15   : > { %v45607_v48 = vpop.eup %45606  ;;  %v25945_v24 = vsub.f32 %v25943_v8, %v25944_v11  ;;  %v25924_v56 = vand.u32 4294901760, %v25845_v12 }
0x1c16   : > { %v22796_v5 = vmul.f32 %v45607_v48, %v47978_v21  ;;  %v43889_v21 = vpack.c.bf16 %v25943_v8, %v25936_v20 }
0x1c17   : > { %41395 = vmatmul.mubr.f32.vlgmr.msra.gmra.mrb[42].mxu0 %v24913_v54  ;;  %v25946_v32 = vand.u32 4294901760, %v25945_v24  ;;  %v25925_v31 = vsub.f32 %v25845_v12, %v25924_v56  ;;  %v43897_v54 = vpack.c.bf16 %v25944_v11, %v25937_v37  ;;  %v37215_v37 = vld [vmem:[%s48677_s13 + $0x28] sm:$0xff] }
0x1c18   : > { %43884 = vmatpush3.bf16.msra.mxu0 %v43881_v15  ;;  %v25842_v30 = vsel %vm997_vm0, %v22796_v5, 0 }
0x1c19   : > { %v43885_v9 = vpack.c.bf16 %v25946_v32, %v25939_v35  ;;  %v25914_v22 = vand.u32 4294901760, %v25842_v30  ;;  %v25926_v33 = vand.u32 4294901760, %v25925_v31 }
0x1c1b   : > { %43886 = vmatprep.subr.bf16.mxu0 %v43885_v9  ;;  %v25915_v29 = vsub.f32 %v25842_v30, %v25914_v22  ;;  %v25927_v6 = vsub.f32 %v25925_v31, %v25926_v33  ;;  %v37216_v30 = vld [vmem:[%s48677_s13 + $0x30] sm:$0xff] }
0x1c1d   : > { %v25916_v62 = vand.u32 4294901760, %v25915_v29  ;;  %v25928_v60 = vand.u32 4294901760, %v25927_v6 }
0x1c1f   : > { %v25917_v28 = vsub.f32 %v25915_v29, %v25916_v62 }
0x1c21   : > { %v25918_v39 = vand.u32 4294901760, %v25917_v28 }
0x1c23   : > { %41431 = vmatprep.mubr.f32.mxu0 %v25918_v39 }
0x1c24   : > { %41432 = vmatmul.mubr.f32.vlgmr.msra.gmra.mrb[44].mxu0 %v25928_v60 }
0x1c25   : > { %43888 = vmatpush3.bf16.msra.mxu0 %v43885_v9  ;;  %41438 = vmatprep.mubr.f32.mxu0 %v25914_v22  ;;  %v25345_v9 = vand.u32 4294901760, %v37216_v30 }
0x1c26   : > { %43890 = vmatprep.subr.bf16.mxu0 %v43889_v21 }
0x1c2c   : > { %41439 = vmatmul.mubr.f32.vlgmr.msra.gmra.mrb[44].mxu0 %v25924_v56 }
0x1c2d   : > { %43892 = vmatpush3.bf16.msra.mxu0 %v43889_v21  ;;  %41445 = vmatprep.mubr.f32.mxu0 %v25915_v29 }
0x1c2e   : > { %43894 = vmatprep.subr.bf16.mxu0 %v43881_v15 }
0x1c34   : > { %41446 = vmatmul.mubr.f32.vlgmr.msra.gmra.mrb[44].mxu0 %v25925_v31 }
0x1c35   : > { %43896 = vmatpush3.bf16.msra.mxu0 %v43881_v15  ;;  %41452 = vmatprep.mubr.f32.mxu0 %v25916_v62 }
0x1c36   : > { %43898 = vmatprep.subr.bf16.mxu0 %v43897_v54 }
0x1c39   : > { %v41252_v51 = vpop.f32.mrb[28].mxu1 }
0x1c3a   : > { %v23312_v38 = vsel %vm5214_vm8, %v41252_v51, 0  ;;  %v23298_v0 = vpop.f32.mrb[29].mxu1 }
0x1c3b   : > { %v23390_v19 = vand.u32 4294901760, %v23312_v38  ;;  %v23309_v59 = vsel %vm5214_vm8, %v23298_v0, 0 }
0x1c3c   : > { %v23380_v40 = vand.u32 4294901760, %v23309_v59  ;;  %41453 = vmatmul.mubr.f32.vlgmr.msra.gmra.mrb[44].mxu0 %v25926_v33 }
0x1c3d   : > { %v23391_v43 = vsub.f32 %v23312_v38, %v23390_v19  ;;  %43900 = vmatpush3.bf16.msra.mxu0 %v43897_v54  ;;  %41459 = vmatprep.mubr.f32.mxu0 %v25914_v22 }
0x1c3e   : > { %v23381_v3 = vsub.f32 %v23309_v59, %v23380_v40  ;;  %43902 = vmatprep.subr.bf16.mxu0 %v43881_v15 }
0x1c3f   : > { %v23392_v27 = vand.u32 4294901760, %v23391_v43 }
0x1c40   : > { %v23382_v53 = vand.u32 4294901760, %v23381_v3 }
0x1c41   : > { %v23393_v23 = vsub.f32 %v23391_v43, %v23392_v27 }
0x1c42   : > { %v23383_v16 = vsub.f32 %v23381_v3, %v23382_v53 }
0x1c43   : > { %v23394_v57 = vand.u32 4294901760, %v23393_v23 }
0x1c44   : > { %41460 = vmatmul.mubr.f32.vlgmr.msra.gmra.mrb[44].mxu0 %v25924_v56  ;;  %v23384_v20 = vand.u32 4294901760, %v23383_v16 }
0x1c45   : > { %43904 = vmatpush3.bf16.msra.mxu0 %v43881_v15  ;;  %41466 = vmatprep.mubr.f32.mxu0 %v25914_v22  ;;  %v25432_v22 = vsub.f32 %v37216_v30, %v25345_v9 }
0x1c46   : > { %41255 = vmatprep.mubr.f32.mxu1 %v23384_v20 }
0x1c47   : > { %41256 = vmatmul.mubr.f32.vlgmr.msra.gmra.mrb[30].mxu1 %v23394_v57  ;;  %v25433_v33 = vand.u32 4294901760, %v25432_v22 }
0x1c48   : > { %41260 = vmatprep.mubr.f32.mxu1 %v23380_v40  ;;  %41259 = vmatpush3.msra.mxu1 %v48011_v45  ;;  %v24334_v45 = vand.u32 4294901760, %v37215_v37 }
0x1c49   : > { %41263 = vmatprep.subr.mxu1 %v48002_v58  ;;  %v25434_v29 = vsub.f32 %v25432_v22, %v25433_v33 }
0x1c4b   : > { %v25435_v62 = vand.u32 4294901760, %v25434_v29 }
0x1c4c   : > { %41467 = vmatmul.mubr.f32.vlgmr.msra.gmra.mrb[44].mxu0 %v25924_v56 }
0x1c4f   : > { %41261 = vmatmul.mubr.f32.vlgmr.msra.gmra.mrb[30].mxu1 %v23390_v19 }
0x1c50   : > { %41265 = vmatprep.mubr.f32.mxu1 %v23381_v3  ;;  %41264 = vmatpush3.msra.mxu1 %v48002_v58  ;;  %v24421_v58 = vsub.f32 %v37215_v37, %v24334_v45 }
0x1c51   : > { %41268 = vmatprep.subr.mxu1 %v47998_v47 }
0x1c52   : > { %v24422_v34 = vand.u32 4294901760, %v24421_v58 }
0x1c54   : > { %v24423_v46 = vsub.f32 %v24421_v58, %v24422_v34 }
0x1c56   : > { %v24424_v15 = vand.u32 4294901760, %v24423_v46 }
0x1c57   : > { %41266 = vmatmul.mubr.f32.vlgmr.msra.gmra.mrb[30].mxu1 %v23391_v43 }
0x1c58   : > { %41270 = vmatprep.mubr.f32.mxu1 %v23382_v53  ;;  %41269 = vmatpush3.msra.mxu1 %v47998_v47 }
0x1c59   : > { %41273 = vmatprep.subr.mxu1 %v48006_v4 }
0x1c5f   : > { %41271 = vmatmul.mubr.f32.vlgmr.msra.gmra.mrb[30].mxu1 %v23392_v27  ;;  %v37217_v27 = vld [vmem:[%s48677_s13 + $0x38] sm:$0xff] }
0x1c60   : > { %41275 = vmatprep.mubr.f32.mxu1 %v23380_v40  ;;  %41274 = vmatpush3.msra.mxu1 %v48006_v4  ;;  %v26356_v53 = vand.u32 4294901760, %v37217_v27 }
0x1c61   : > { %41278 = vmatprep.subr.mxu1 %v47998_v47 }
0x1c62   : > { %v26443_v23 = vsub.f32 %v37217_v27, %v26356_v53 }
0x1c64   : > { %v26444_v16 = vand.u32 4294901760, %v26443_v23 }
0x1c66   : > { %v26445_v20 = vsub.f32 %v26443_v23, %v26444_v16 }
0x1c67   : > { %41276 = vmatmul.mubr.f32.vlgmr.msra.gmra.mrb[30].mxu1 %v23390_v19 }
0x1c68   : > { %41280 = vmatprep.mubr.f32.mxu1 %v23380_v40  ;;  %41279 = vmatpush3.msra.mxu1 %v47998_v47  ;;  %v26446_v57 = vand.u32 4294901760, %v26445_v20 }
0x1c69   : > { %41325 = vmatprep.subr.mxu1 %v24334_v45 }
0x1c6f   : > { %41281 = vmatmul.mubr.f32.vlgmr.msra.gmra.mrb[30].mxu1 %v23390_v19 }
0x1c70   : > { %41326 = vmatpush3.msra.mxu1 %v24334_v45 }
0x1c71   : > { %41330 = vmatprep.subr.mxu1 %v24424_v15 }
0x1cb4   : > { %v41324_v8 = vpop.f32.mrb[40].mxu0 }
0x1cb5   : > { %v24331_v50 = vsel %vm5214_vm8, %v41324_v8, 0  ;;  %v24317_v61 = vpop.f32.mrb[41].mxu0 }
0x1cb6   : > { %v24409_v11 = vand.u32 4294901760, %v24331_v50  ;;  %v24328_v4 = vsel %vm5214_vm8, %v24317_v61, 0 }
0x1cb7   : > { %v24399_v12 = vand.u32 4294901760, %v24328_v4 }
0x1cb8   : > { %v24410_v48 = vsub.f32 %v24331_v50, %v24409_v11 }
0x1cb9   : > { %v24400_v24 = vsub.f32 %v24328_v4, %v24399_v12 }
0x1cba   : > { %v24411_v56 = vand.u32 4294901760, %v24410_v48 }
0x1cbb   : > { %v24401_v5 = vand.u32 4294901760, %v24400_v24 }
0x1cbc   : > { %v24412_v35 = vsub.f32 %v24410_v48, %v24411_v56 }
0x1cbd   : > { %v24402_v47 = vsub.f32 %v24400_v24, %v24401_v5 }
0x1cbe   : > { %v24413_v31 = vand.u32 4294901760, %v24412_v35 }
0x1cbf   : > { %v24403_v32 = vand.u32 4294901760, %v24402_v47 }
0x1cc1   : > { %41327 = vmatprep.mubr.f32.mxu1 %v24403_v32 }
0x1cc2   : > { %41328 = vmatmul.mubr.f32.vlgmr.msra.gmra.mrb[30].mxu1 %v24413_v31 }
0x1cc3   : > { %41332 = vmatprep.mubr.f32.mxu1 %v24399_v12  ;;  %41331 = vmatpush3.msra.mxu1 %v24424_v15 }
0x1cc4   : > { %41335 = vmatprep.subr.mxu1 %v24421_v58 }
0x1cca   : > { %41333 = vmatmul.mubr.f32.vlgmr.msra.gmra.mrb[30].mxu1 %v24409_v11 }
0x1ccb   : > { %41337 = vmatprep.mubr.f32.mxu1 %v24400_v24  ;;  %41336 = vmatpush3.msra.mxu1 %v24421_v58 }
0x1ccc   : > { %41340 = vmatprep.subr.mxu1 %v24334_v45 }
0x1cd2   : > { %41338 = vmatmul.mubr.f32.vlgmr.msra.gmra.mrb[30].mxu1 %v24410_v48 }
0x1cd3   : > { %41342 = vmatprep.mubr.f32.mxu1 %v24401_v5  ;;  %41341 = vmatpush3.msra.mxu1 %v24334_v45 }
0x1cd4   : > { %41345 = vmatprep.subr.mxu1 %v24422_v34 }
0x1cda   : > { %41343 = vmatmul.mubr.f32.vlgmr.msra.gmra.mrb[30].mxu1 %v24411_v56  ;;  %v37218_v56 = vld [vmem:[#allocation7 + $0x1] ss:$0 sm:$0xff] }
0x1cdb   : > { %41347 = vmatprep.mubr.f32.mxu1 %v24399_v12  ;;  %41346 = vmatpush3.msra.mxu1 %v24422_v34 }
0x1cdc   : > { %41350 = vmatprep.subr.mxu1 %v24334_v45 }
0x1ce2   : > { %41348 = vmatmul.mubr.f32.vlgmr.msra.gmra.mrb[30].mxu1 %v24409_v11 }
0x1ce3   : > { %41352 = vmatprep.mubr.f32.mxu1 %v24399_v12  ;;  %41351 = vmatpush3.msra.mxu1 %v24334_v45 }
0x1ce4   : > { %41397 = vmatprep.subr.mxu1 %v25345_v9 }
0x1cea   : > { %41353 = vmatmul.mubr.f32.vlgmr.msra.gmra.mrb[30].mxu1 %v24409_v11  ;;  %v41396_v6 = vpop.f32.mrb[42].mxu0 }
0x1ceb   : > { %v25342_v28 = vsel %vm5214_vm8, %v41396_v6, 0  ;;  %v25328_v39 = vpop.f32.mrb[43].mxu0  ;;  %41398 = vmatpush3.msra.mxu1 %v25345_v9 }
0x1cec   : > { %v25420_v60 = vand.u32 4294901760, %v25342_v28  ;;  %v25339_v21 = vsel %vm5214_vm8, %v25328_v39, 0  ;;  %41402 = vmatprep.subr.mxu1 %v25435_v62 }
0x1ced   : > { %v25410_v54 = vand.u32 4294901760, %v25339_v21 }
0x1cee   : > { %v25421_v51 = vsub.f32 %v25342_v28, %v25420_v60 }
0x1cef   : > { %v25411_v38 = vsub.f32 %v25339_v21, %v25410_v54 }
0x1cf0   : > { %v25422_v0 = vand.u32 4294901760, %v25421_v51 }
0x1cf1   : > { %v25412_v19 = vand.u32 4294901760, %v25411_v38 }
0x1cf2   : > { %v25423_v59 = vsub.f32 %v25421_v51, %v25422_v0 }
0x1cf3   : > { %v25413_v40 = vsub.f32 %v25411_v38, %v25412_v19 }
0x1cf4   : > { %v25424_v3 = vand.u32 4294901760, %v25423_v59 }
0x1cf5   : > { %v25414_v43 = vand.u32 4294901760, %v25413_v40 }
0x1cf7   : > { %41399 = vmatprep.mubr.f32.mxu1 %v25414_v43 }
0x1cf8   : > { %41400 = vmatmul.mubr.f32.vlgmr.msra.gmra.mrb[30].mxu1 %v25424_v3 }
0x1cf9   : > { %41404 = vmatprep.mubr.f32.mxu1 %v25410_v54  ;;  %41403 = vmatpush3.msra.mxu1 %v25435_v62 }
0x1cfa   : > { %41407 = vmatprep.subr.mxu1 %v25432_v22 }
0x1d00   : > { %41405 = vmatmul.mubr.f32.vlgmr.msra.gmra.mrb[30].mxu1 %v25420_v60 }
0x1d01   : > { %41409 = vmatprep.mubr.f32.mxu1 %v25411_v38  ;;  %41408 = vmatpush3.msra.mxu1 %v25432_v22 }
0x1d02   : > { %41412 = vmatprep.subr.mxu1 %v25345_v9 }
0x1d08   : > { %41410 = vmatmul.mubr.f32.vlgmr.msra.gmra.mrb[30].mxu1 %v25421_v51 }
0x1d09   : > { %41414 = vmatprep.mubr.f32.mxu1 %v25412_v19  ;;  %41413 = vmatpush3.msra.mxu1 %v25345_v9 }
0x1d0a   : > { %41417 = vmatprep.subr.mxu1 %v25433_v33 }
0x1d10   : > { %41415 = vmatmul.mubr.f32.vlgmr.msra.gmra.mrb[30].mxu1 %v25422_v0 }
0x1d11   : > { %41419 = vmatprep.mubr.f32.mxu1 %v25410_v54  ;;  %41418 = vmatpush3.msra.mxu1 %v25433_v33 }
0x1d12   : > { %41422 = vmatprep.subr.mxu1 %v25345_v9 }
0x1d18   : > { %41420 = vmatmul.mubr.f32.vlgmr.msra.gmra.mrb[30].mxu1 %v25420_v60 }
0x1d19   : > { %41424 = vmatprep.mubr.f32.mxu1 %v25410_v54  ;;  %41423 = vmatpush3.msra.mxu1 %v25345_v9  ;;  %v37223_v54 = vld [vmem:[%s48681_s17 + $0x10] sm:$0xff] }
0x1d1a   : > { %41469 = vmatprep.subr.mxu1 %v26356_v53  ;;  %v26912_v51 = vsel %vm997_vm0, %v37223_v54, 0 }
0x1d1b   : > { %v48068_v38 = vand.u32 4294901760, %v26912_v51 }
0x1d1d   : > { %v48071_v0 = vsub.f32 %v26912_v51, %v48068_v38 }
0x1d1f   : > { %v41468_v37 = vpop.f32.mrb[44].mxu0  ;;  %v48074_v19 = vand.u32 4294901760, %v48071_v0 }
0x1d20   : > { %v26353_v45 = vsel %vm5214_vm8, %v41468_v37, 0  ;;  %41425 = vmatmul.mubr.f32.vlgmr.msra.gmra.mrb[30].mxu1 %v25420_v60  ;;  %v26339_v58 = vpop.f32.mrb[45].mxu0 }
0x1d21   : > { %v26431_v34 = vand.u32 4294901760, %v26353_v45  ;;  %v26350_v46 = vsel %vm5214_vm8, %v26339_v58, 0  ;;  %41470 = vmatpush3.msra.mxu1 %v26356_v53  ;;  %v26987_v59 = vsub.f32 %v48071_v0, %v48074_v19 }
0x1d22   : > { %v26421_v15 = vand.u32 4294901760, %v26350_v46  ;;  %41474 = vmatprep.subr.mxu1 %v26446_v57 }
0x1d23   : > { %v26432_v8 = vsub.f32 %v26353_v45, %v26431_v34  ;;  %v48078_v40 = vand.u32 4294901760, %v26987_v59 }
0x1d24   : > { %v26422_v50 = vsub.f32 %v26350_v46, %v26421_v15 }
0x1d25   : > { %v26433_v61 = vand.u32 4294901760, %v26432_v8  ;;  %41503 = vmatprep.mubr.f32.mxu0 %v48078_v40 }
0x1d26   : > { %v26423_v11 = vand.u32 4294901760, %v26422_v50 }
0x1d27   : > { %v26434_v4 = vsub.f32 %v26432_v8, %v26433_v61 }
0x1d28   : > { %v26424_v12 = vsub.f32 %v26422_v50, %v26423_v11 }
0x1d29   : > { %v26435_v24 = vand.u32 4294901760, %v26434_v4 }
0x1d2a   : > { %v26425_v48 = vand.u32 4294901760, %v26424_v12  ;;  %v37221_v12 = vld [vmem:[%s48679_s15 + $0x1] ss:$0 sm:$0xff] }
0x1d2c   : > { %41471 = vmatprep.mubr.f32.mxu1 %v26425_v48 }
0x1d2d   : > { %41472 = vmatmul.mubr.f32.vlgmr.msra.gmra.mrb[30].mxu1 %v26435_v24 }
0x1d2e   : > { %41476 = vmatprep.mubr.f32.mxu1 %v26421_v15  ;;  %41475 = vmatpush3.msra.mxu1 %v26446_v57 }
0x1d2f   : > { %41479 = vmatprep.subr.mxu1 %v26443_v23 }
0x1d35   : > { %41477 = vmatmul.mubr.f32.vlgmr.msra.gmra.mrb[30].mxu1 %v26431_v34 }
0x1d36   : > { %41481 = vmatprep.mubr.f32.mxu1 %v26422_v50  ;;  %41480 = vmatpush3.msra.mxu1 %v26443_v23  ;;  %v37224_v50 = vld [vmem:[%s48681_s17 + $0x18] sm:$0xff] }
0x1d37   : > { %41484 = vmatprep.subr.mxu1 %v26356_v53 }
0x1d3d   : > { %41482 = vmatmul.mubr.f32.vlgmr.msra.gmra.mrb[30].mxu1 %v26432_v8 }
0x1d3e   : > { %41486 = vmatprep.mubr.f32.mxu1 %v26423_v11  ;;  %41485 = vmatpush3.msra.mxu1 %v26356_v53  ;;  %v26915_v11 = vsel %vm997_vm0, %v37224_v50, 0  ;;  %vm36978_vm0 = vcmask 23552  }
0x1d3f   : > { %41489 = vmatprep.subr.mxu1 %v26444_v16  ;;  %v48085_v4 = vand.u32 4294901760, %v26915_v11 }
0x1d41   : > { %v48091_v48 = vsub.f32 %v26915_v11, %v48085_v4 }
0x1d45   : > { %41487 = vmatmul.mubr.f32.vlgmr.msra.gmra.mrb[30].mxu1 %v26433_v61 }
0x1d46   : > { %41491 = vmatprep.mubr.f32.mxu1 %v26421_v15  ;;  %41490 = vmatpush3.msra.mxu1 %v26444_v16 }
0x1d47   : > { %41494 = vmatprep.subr.mxu1 %v26356_v53 }
0x1d4d   : > { %41492 = vmatmul.mubr.f32.vlgmr.msra.gmra.mrb[30].mxu1 %v26431_v34 }
0x1d4e   : > { %41496 = vmatprep.mubr.f32.mxu1 %v26421_v15  ;;  %41495 = vmatpush3.msra.mxu1 %v26356_v53 }
0x1d55   : > { %41497 = vmatmul.mubr.f32.vlgmr.msra.gmra.mrb[30].mxu1 %v26431_v34 }
0x1e28   : > { %v41498_v5 = vpop.f32.mrb[30].mxu1 }
0x1e29   : > { %v44695_v35 = vadd.f32 %v41498_v5, %v37218_v56  ;;  %v26834_v47 = vpop.f32.mrb[31].mxu1 }
0x1e2a   : > { %v44696_v32 = vadd.f32 %v37218_v56, %v26834_v47 }
0x1e2b   : > { %v48051_v31 = vadd.f32 %v44695_v35, %v47503_v36  ;;  %v37222_v35 = vld [vmem:[%s48680_s16 + $0x1] ss:$0 sm:$0xff] }
0x1e2c   : > { %v48054_v30 = vadd.f32 %v44696_v32, %v47506_v1 }
0x1e2d   : > { %v26855_v9 = vsel %vm3529_vm3, %v48051_v31, 0.0 }
0x1e2e   : > { %26856 = vadd.xlane.f32.xlu0 %v26855_v9  ;;  %v26852_v22 = vsel %vm3529_vm3, %v48054_v30, 0.0 }
0x1e2f   : > { %26853 = vadd.xlane.f32.xlu1 %v26852_v22  ;;  %v48097_v22 = vand.u32 4294901760, %v48091_v48 }
0x1ebb   : > { %v26857_v33 = vpop.xlane.xlu0 %26856 }
0x1ebc   : > { %v26859_v29 = vmul.f32 0.03125, %v26857_v33  ;;  %v26854_v62 = vpop.xlane.xlu1 %26853 }
0x1ebd   : > { %v26858_v6 = vmul.f32 0.03125, %v26854_v62 }
0x1ebe   : > { %v26861_v28 = vsub.f32 %v48051_v31, %v26859_v29 }
0x1ebf   : > { %v26860_v36 = vsub.f32 %v48054_v30, %v26858_v6 }
0x1ec0   : > { %v26863_v39 = vmul.f32 %v26861_v28, %v26861_v28  ;;  %v26897_v24 = vmul.f32 %v37221_v12, %v26861_v28 }
0x1ec1   : > { %v26862_v60 = vmul.f32 %v26860_v36, %v26860_v36  ;;  %v26896_v5 = vmul.f32 %v37221_v12, %v26860_v36 }
0x1ec2   : > { %v26867_v1 = vsel %vm3529_vm3, %v26863_v39, 0.0  ;;  %v26997_v39 = vsub.f32 %v48091_v48, %v48097_v22 }
0x1ec3   : > { %26868 = vadd.xlane.f32.xlu1 %v26867_v1  ;;  %v26864_v21 = vsel %vm3529_vm3, %v26862_v60, 0.0 }
0x1ec4   : > { %26865 = vadd.xlane.f32.xlu0 %v26864_v21  ;;  %v48101_v21 = vand.u32 4294901760, %v26997_v39 }
0x1f50   : > { %v26869_v43 = vpop.xlane.xlu1 %26868 }
0x1f51   : > { %v26871_v3 = vmul.f32 0.032258064, %v26869_v43  ;;  %v26866_v27 = vpop.xlane.xlu0 %26865 }
0x1f52   : > { %v26870_v53 = vmul.f32 0.032258064, %v26866_v27 }
0x1f53   : > { %45608 = vrsqrt.f32 %v26871_v3  ;;  %vm26881_vm6 = vcmp.eq.f32.partialorder %v26871_v3, inf  ;;  %v26884_v57 = vand.u32 2147483648, %v26871_v3  ;;  %vm26883_vm7 = vcmp.eq.f32.partialorder %v26871_v3, 0.0 }
0x1f54   : > { %45610 = vrsqrt.f32 %v26870_v53  ;;  %vm26874_vm8 = vcmp.eq.f32.partialorder %v26870_v53, inf  ;;  %v26877_v58 = vand.u32 2147483648, %v26870_v53  ;;  %vm26876_vm9 = vcmp.eq.f32.partialorder %v26870_v53, 0.0 }
0x1f5d   : > { %v45609_v23 = vpop.eup %45608 }
0x1f5e   : > { %v45611_v16 = vpop.eup %45610  ;;  %v26880_v20 = vmul.f32 %v45609_v23, %v26871_v3 }
0x1f5f   : > { %v26873_v37 = vmul.f32 %v45611_v16, %v26870_v53  ;;  %v27420_v16 = vld [vmem:[#allocation9 + $0x20] sm:$0xff] }
0x1f60   : > { %v26882_v45 = vsel %vm26881_vm6, %v26871_v3, %v26880_v20  ;;  %v27421_v20 = vld [vmem:[#allocation9 + $0x28] sm:$0xff] }
0x1f61   : > { %v26885_v34 = vsel %vm26883_vm7, %v26884_v57, %v26882_v45  ;;  %v26875_v46 = vsel %vm26874_vm8, %v26870_v53, %v26873_v37  ;;  %v27439_v57 = vand.u32 4294901760, %v27420_v16  ;;  %v27442_v37 = vand.u32 4294901760, %v27421_v20 }
0x1f62   : > { %v26887_v15 = vadd.f32 1e-06, %v26885_v34  ;;  %v26878_v8 = vsel %vm26876_vm9, %v26877_v58, %v26875_v46  ;;  %v27422_v46 = vld [vmem:[#allocation9 + $0x30] sm:$0xff] }
0x1f63   : > { %v26886_v61 = vadd.f32 1e-06, %v26878_v8  ;;  %v48115_v45 = vpack.c.bf16 %v27442_v37, %v27439_v57  ;;  %v27529_v58 = vsub.f32 %v27420_v16, %v27439_v57  ;;  %v27536_v34 = vsub.f32 %v27421_v20, %v27442_v37 }
0x1f64   : > { %45612 = vrcp.f32 %v26887_v15  ;;  %v27423_v15 = vld [vmem:[#allocation9 + $0x38] sm:$0xff]  ;;  %v27445_v8 = vand.u32 4294901760, %v27422_v46 }
0x1f65   : > { %45614 = vrcp.f32 %v26886_v61  ;;  %43930 = vmatprep.subr.bf16.mxu1 %v48115_v45  ;;  %v27448_v50 = vand.u32 4294901760, %v27423_v15  ;;  %v27530_v61 = vand.u32 4294901760, %v27529_v58  ;;  %v27537_v11 = vand.u32 4294901760, %v27536_v34 }
0x1f66   : > { %43932 = vmatpush3.bf16.msra.mxu1 %v48115_v45 }
0x1f67   : > { %v48119_v12 = vpack.c.bf16 %v27448_v50, %v27445_v8 }
0x1f69   : > { %43934 = vmatprep.subr.bf16.mxu1 %v48119_v12 }
0x1f6a   : > { %43936 = vmatpush3.bf16.msra.mxu1 %v48119_v12 }
0x1f6e   : > { %v45613_v56 = vpop.eup %45612 }
0x1f6f   : > { %v45615_v47 = vpop.eup %45614  ;;  %v26899_v32 = vmul.f32 %v45613_v56, %v26897_v24  ;;  %v27538_v24 = vsub.f32 %v27536_v34, %v27537_v11  ;;  %v27543_v56 = vsub.f32 %v27422_v46, %v27445_v8 }
0x1f70   : > { %v26898_v9 = vmul.f32 %v45615_v47, %v26896_v5  ;;  %v27550_v5 = vsub.f32 %v27423_v15, %v27448_v50 }
0x1f71   : > { %v26907_v33 = vadd.f32 %v37222_v35, %v26899_v32  ;;  %v27539_v47 = vand.u32 4294901760, %v27538_v24  ;;  %v27544_v32 = vand.u32 4294901760, %v27543_v56 }
0x1f72   : > { %v26906_v29 = vadd.f32 %v37222_v35, %v26898_v9  ;;  %v27551_v9 = vand.u32 4294901760, %v27550_v5 }
0x1f73   : > { %v26921_v62 = vand.u32 4294901760, %v26907_v33 }
0x1f74   : > { %v26918_v6 = vand.u32 4294901760, %v26906_v29 }
0x1f75   : > { %v27013_v28 = vsub.f32 %v26907_v33, %v26921_v62 }
0x1f76   : > { %v43905_v60 = vpack.c.bf16 %v26921_v62, %v26918_v6  ;;  %v27006_v36 = vsub.f32 %v26906_v29, %v26918_v6  ;;  %v27545_v29 = vsub.f32 %v27543_v56, %v27544_v32  ;;  %v27552_v62 = vsub.f32 %v27550_v5, %v27551_v9 }
0x1f77   : > { %v27014_v1 = vand.u32 4294901760, %v27013_v28 }
0x1f78   : > { %43906 = vmatprep.subr.bf16.mxu0 %v43905_v60  ;;  %v27007_v54 = vand.u32 4294901760, %v27006_v36  ;;  %v43913_v51 = vpack.c.bf16 %v27013_v28, %v27006_v36  ;;  %v27546_v6 = vand.u32 4294901760, %v27545_v29  ;;  %v27553_v39 = vand.u32 4294901760, %v27552_v62 }
0x1f79   : > { %43908 = vmatpush3.bf16.msra.mxu0 %v43905_v60  ;;  %v27015_v59 = vsub.f32 %v27013_v28, %v27014_v1 }
0x1f7a   : > { %v27008_v43 = vsub.f32 %v27006_v36, %v27007_v54  ;;  %v43921_v3 = vpack.c.bf16 %v27014_v1, %v27007_v54  ;;  %v43941_v28 = vpack.c.bf16 %v27553_v39, %v27546_v6  ;;  %v43949_v36 = vpack.c.bf16 %v27550_v5, %v27543_v56 }
0x1f7b   : > { %v27016_v27 = vand.u32 4294901760, %v27015_v59  ;;  %v43961_v1 = vpack.c.bf16 %v27537_v11, %v27530_v61  ;;  %v43965_v54 = vpack.c.bf16 %v27551_v9, %v27544_v32 }
0x1f7c   : > { %41504 = vmatmul.mubr.f32.vlgmr.msra.gmra.mrb[46].mxu0 %v48101_v21  ;;  %v27009_v53 = vand.u32 4294901760, %v27008_v43 }
0x1f7d   : > { %41510 = vmatprep.mubr.f32.mxu0 %v48068_v38 }
0x1f7e   : > { %v43909_v23 = vpack.c.bf16 %v27016_v27, %v27009_v53 }
0x1f80   : > { %43910 = vmatprep.subr.bf16.mxu0 %v43909_v23 }
0x1f81   : > { %43912 = vmatpush3.bf16.msra.mxu0 %v43909_v23 }
0x1f82   : > { %43914 = vmatprep.subr.bf16.mxu0 %v43913_v51 }
0x1f84   : > { %41511 = vmatmul.mubr.f32.vlgmr.msra.gmra.mrb[46].mxu0 %v48085_v4 }
0x1f85   : > { %43916 = vmatpush3.bf16.msra.mxu0 %v43913_v51  ;;  %41517 = vmatprep.mubr.f32.mxu0 %v48071_v0 }
0x1f86   : > { %43918 = vmatprep.subr.bf16.mxu0 %v43905_v60 }
0x1f8c   : > { %41518 = vmatmul.mubr.f32.vlgmr.msra.gmra.mrb[46].mxu0 %v48091_v48 }
0x1f8d   : > { %43920 = vmatpush3.bf16.msra.mxu0 %v43905_v60  ;;  %41524 = vmatprep.mubr.f32.mxu0 %v48074_v19 }
0x1f8e   : > { %43922 = vmatprep.subr.bf16.mxu0 %v43921_v3 }
0x1f94   : > { %41525 = vmatmul.mubr.f32.vlgmr.msra.gmra.mrb[46].mxu0 %v48097_v22 }
0x1f95   : > { %43924 = vmatpush3.bf16.msra.mxu0 %v43921_v3  ;;  %41531 = vmatprep.mubr.f32.mxu0 %v48068_v38 }
0x1f96   : > { %43926 = vmatprep.subr.bf16.mxu0 %v43905_v60 }
0x1f9c   : > { %41532 = vmatmul.mubr.f32.vlgmr.msra.gmra.mrb[46].mxu0 %v48085_v4 }
0x1f9d   : > { %43928 = vmatpush3.bf16.msra.mxu0 %v43905_v60  ;;  %41538 = vmatprep.mubr.f32.mxu0 %v48068_v38  ;;  %v43945_v60 = vpack.c.bf16 %v27536_v34, %v27529_v58 }
0x1fa4   : > { %41539 = vmatmul.mubr.f32.vlgmr.msra.gmra.mrb[46].mxu0 %v48085_v4 }
0x1fa5   : > { %41611 = vmatprep.mubr.f32.mxu0 %v48078_v40  ;;  %v27531_v40 = vsub.f32 %v27529_v58, %v27530_v61  ;;  %v37225_v58 = vld [vmem:[#allocation10 + $0x1] ss:$0 sm:$0xff] }
0x1fa7   : > { %v27532_v35 = vand.u32 4294901760, %v27531_v40 }
0x1fa9   : > { %v43937_v33 = vpack.c.bf16 %v27539_v47, %v27532_v35 }
0x1fab   : > { %43938 = vmatprep.subr.bf16.mxu1 %v43937_v33 }
0x2077   : > { %v41540_v51 = vpop.f32.mrb[46].mxu0 }
0x2078   : > { %v27436_v59 = vsel %vm3529_vm3, %v41540_v51, 0  ;;  %v27409_v43 = vpop.f32.mrb[47].mxu0 }
0x2079   : > { %v27517_v3 = vand.u32 4294901760, %v27436_v59  ;;  %v27433_v27 = vsel %vm3529_vm3, %v27409_v43, 0 }
0x207a   : > { %v27507_v53 = vand.u32 4294901760, %v27433_v27 }
0x207b   : > { %v27518_v23 = vsub.f32 %v27436_v59, %v27517_v3 }
0x207c   : > { %v27508_v16 = vsub.f32 %v27433_v27, %v27507_v53 }
0x207d   : > { %v27519_v20 = vand.u32 4294901760, %v27518_v23 }
0x207e   : > { %v27509_v57 = vand.u32 4294901760, %v27508_v16 }
0x207f   : > { %v27520_v37 = vsub.f32 %v27518_v23, %v27519_v20 }
0x2080   : > { %v27510_v46 = vsub.f32 %v27508_v16, %v27509_v57 }
0x2081   : > { %v27521_v8 = vand.u32 4294901760, %v27520_v37 }
0x2082   : > { %v27511_v15 = vand.u32 4294901760, %v27510_v46 }
0x2084   : > { %41549 = vmatprep.mubr.f32.mxu1 %v27511_v15 }
0x2085   : > { %41550 = vmatmul.mubr.f32.vlgmr.msra.gmra.mrb[32].mxu1 %v27521_v8 }
0x2086   : > { %43940 = vmatpush3.bf16.msra.mxu1 %v43937_v33  ;;  %41560 = vmatprep.mubr.f32.mxu1 %v27507_v53 }
0x2087   : > { %43942 = vmatprep.subr.bf16.mxu1 %v43941_v28 }
0x208a   : > { %43944 = vmatpush3.bf16.msra.mxu1 %v43941_v28 }
0x208b   : > { %43946 = vmatprep.subr.bf16.mxu1 %v43945_v60 }
0x208d   : > { %41561 = vmatmul.mubr.f32.vlgmr.msra.gmra.mrb[32].mxu1 %v27517_v3 }
0x208e   : > { %43948 = vmatpush3.bf16.msra.mxu1 %v43945_v60  ;;  %41571 = vmatprep.mubr.f32.mxu1 %v27508_v16  ;;  %v37227_v60 = vld [vmem:[%s48684_s20 + $0x48] sm:$0xff]  ;;  %v37233_v16 = vld [vmem:[%s48684_s20 + $0x78] sm:$0xff] }
0x208f   : > { %43950 = vmatprep.subr.bf16.mxu1 %v43949_v36 }
0x2092   : > { %43952 = vmatpush3.bf16.msra.mxu1 %v43949_v36 }
0x2093   : > { %43954 = vmatprep.subr.bf16.mxu1 %v48115_v45 }
0x2095   : > { %41572 = vmatmul.mubr.f32.vlgmr.msra.gmra.mrb[32].mxu1 %v27518_v23  ;;  %v37232_v23 = vld [vmem:[%s48684_s20 + $0x70] sm:$0xff] }
0x2096   : > { %43956 = vmatpush3.bf16.msra.mxu1 %v48115_v45  ;;  %41582 = vmatprep.mubr.f32.mxu1 %v27509_v57  ;;  %v28515_v57 = vand.u32 4294901760, %v37233_v16 }
0x2097   : > { %43958 = vmatprep.subr.bf16.mxu1 %v48119_v12 }
0x209a   : > { %43960 = vmatpush3.bf16.msra.mxu1 %v48119_v12 }
0x209b   : > { %43962 = vmatprep.subr.bf16.mxu1 %v43961_v1 }
0x209d   : > { %41583 = vmatmul.mubr.f32.vlgmr.msra.gmra.mrb[32].mxu1 %v27519_v20  ;;  %v28512_v20 = vand.u32 4294901760, %v37232_v23 }
0x209e   : > { %43964 = vmatpush3.bf16.msra.mxu1 %v43961_v1  ;;  %41593 = vmatprep.mubr.f32.mxu1 %v27507_v53 }
0x209f   : > { %43966 = vmatprep.subr.bf16.mxu1 %v43965_v54  ;;  %v48181_v15 = vpack.c.bf16 %v28515_v57, %v28512_v20 }
0x20a2   : > { %43968 = vmatpush3.bf16.msra.mxu1 %v43965_v54 }
0x20a3   : > { %43970 = vmatprep.subr.bf16.mxu1 %v48115_v45 }
0x20a5   : > { %41594 = vmatmul.mubr.f32.vlgmr.msra.gmra.mrb[32].mxu1 %v27517_v3 }
0x20a6   : > { %43972 = vmatpush3.bf16.msra.mxu1 %v48115_v45  ;;  %41604 = vmatprep.mubr.f32.mxu1 %v27507_v53 }
0x20a7   : > { %43974 = vmatprep.subr.bf16.mxu1 %v48119_v12 }
0x20aa   : > { %43976 = vmatpush3.bf16.msra.mxu1 %v48119_v12 }
0x20ad   : > { %41605 = vmatmul.mubr.f32.vlgmr.msra.gmra.mrb[32].mxu1 %v27517_v3 }
0x20ae   : > { %41767 = vmatprep.mubr.f32.mxu1 %v46374_v25 }
0x2180   : > { %v41606_v34 = vpop.f32.mrb[32].mxu1 }
0x2181   : > { %v44697_v50 = vadd.f32 %v41606_v34, %v37225_v58  ;;  %v27956_v61 = vpop.f32.mrb[33].mxu1 }
0x2182   : > { %v44698_v11 = vadd.f32 %v37225_v58, %v27956_v61 }
0x2183   : > { %v27967_v40 = vmax.f32 %v44697_v50, 0.0 }
0x2184   : > { %v27966_v24 = vmax.f32 %v44698_v11, 0.0 }
0x2185   : > { %v27972_v56 = vand.u32 4294901760, %v27967_v40 }
0x2186   : > { %v27969_v5 = vand.u32 4294901760, %v27966_v24 }
0x2187   : > { %v28064_v35 = vsub.f32 %v27967_v40, %v27972_v56 }
0x2188   : > { %v43977_v47 = vpack.c.bf16 %v27972_v56, %v27969_v5  ;;  %v28057_v45 = vsub.f32 %v27966_v24, %v27969_v5 }
0x2189   : > { %v28065_v32 = vand.u32 4294901760, %v28064_v35 }
0x218a   : > { %v28058_v9 = vand.u32 4294901760, %v28057_v45  ;;  %43978 = vmatprep.subr.bf16.mxu0 %v43977_v47  ;;  %v43985_v33 = vpack.c.bf16 %v28064_v35, %v28057_v45 }
0x218b   : > { %43980 = vmatpush3.bf16.msra.mxu0 %v43977_v47  ;;  %v28066_v12 = vsub.f32 %v28064_v35, %v28065_v32 }
0x218c   : > { %v28059_v29 = vsub.f32 %v28057_v45, %v28058_v9  ;;  %v43993_v62 = vpack.c.bf16 %v28065_v32, %v28058_v9 }
0x218d   : > { %v28067_v6 = vand.u32 4294901760, %v28066_v12 }
0x218e   : > { %41612 = vmatmul.mubr.f32.vlgmr.msra.gmra.mrb[48].mxu0 %v48101_v21  ;;  %v28060_v39 = vand.u32 4294901760, %v28059_v29  ;;  %v37226_v21 = vld [vmem:[%s48684_s20 + $0x40] sm:$0xff] }
0x218f   : > { %41618 = vmatprep.mubr.f32.mxu0 %v48068_v38 }
0x2190   : > { %v43981_v28 = vpack.c.bf16 %v28067_v6, %v28060_v39  ;;  %v28630_v6 = vsub.f32 %v37232_v23, %v28512_v20  ;;  %v28637_v39 = vsub.f32 %v37233_v16, %v28515_v57 }
0x2192   : > { %43982 = vmatprep.subr.bf16.mxu0 %v43981_v28 }
0x2193   : > { %43984 = vmatpush3.bf16.msra.mxu0 %v43981_v28 }
0x2194   : > { %43986 = vmatprep.subr.bf16.mxu0 %v43985_v33 }
0x2196   : > { %41619 = vmatmul.mubr.f32.vlgmr.msra.gmra.mrb[48].mxu0 %v48085_v4 }
0x2197   : > { %43988 = vmatpush3.bf16.msra.mxu0 %v43985_v33  ;;  %41625 = vmatprep.mubr.f32.mxu0 %v48071_v0  ;;  %v28494_v0 = vand.u32 4294901760, %v37226_v21 }
0x2198   : > { %43990 = vmatprep.subr.bf16.mxu0 %v43977_v47 }
0x2199   : > { %v28588_v27 = vsub.f32 %v37226_v21, %v28494_v0 }
0x219b   : > { %v28589_v37 = vand.u32 4294901760, %v28588_v27 }
0x219d   : > { %v28590_v8 = vsub.f32 %v28588_v27, %v28589_v37 }
0x219e   : > { %41626 = vmatmul.mubr.f32.vlgmr.msra.gmra.mrb[48].mxu0 %v48091_v48  ;;  %v28497_v48 = vand.u32 4294901760, %v37227_v60 }
0x219f   : > { %43992 = vmatpush3.bf16.msra.mxu0 %v43977_v47  ;;  %41632 = vmatprep.mubr.f32.mxu0 %v48074_v19  ;;  %v37228_v19 = vld [vmem:[%s48684_s20 + $0x50] sm:$0xff]  ;;  %v28591_v61 = vand.u32 4294901760, %v28590_v8 }
0x21a0   : > { %43994 = vmatprep.subr.bf16.mxu0 %v43993_v62  ;;  %v48148_v36 = vpack.c.bf16 %v28497_v48, %v28494_v0  ;;  %v28500_v1 = vand.u32 4294901760, %v37228_v19  ;;  %v28595_v53 = vsub.f32 %v37227_v60, %v28497_v48  ;;  %v28631_v0 = vand.u32 4294901760, %v28630_v6 }
0x21a1   : > { %v28638_v48 = vand.u32 4294901760, %v28637_v39 }
0x21a2   : > { %v28596_v46 = vand.u32 4294901760, %v28595_v53  ;;  %v28602_v34 = vsub.f32 %v37228_v19, %v28500_v1 }
0x21a3   : > { %v44077_v23 = vpack.c.bf16 %v28638_v48, %v28631_v0 }
0x21a4   : > { %v28597_v58 = vsub.f32 %v28595_v53, %v28596_v46  ;;  %v28603_v40 = vand.u32 4294901760, %v28602_v34 }
0x21a6   : > { %41633 = vmatmul.mubr.f32.vlgmr.msra.gmra.mrb[48].mxu0 %v48097_v22  ;;  %v37229_v22 = vld [vmem:[%s48684_s20 + $0x58] sm:$0xff]  ;;  %v28598_v11 = vand.u32 4294901760, %v28597_v58  ;;  %v28604_v5 = vsub.f32 %v28602_v34, %v28603_v40  ;;  %v44045_v58 = vpack.c.bf16 %v28637_v39, %v28630_v6 }
0x21a7   : > { %43996 = vmatpush3.bf16.msra.mxu0 %v43993_v62  ;;  %41639 = vmatprep.mubr.f32.mxu0 %v48068_v38  ;;  %v28503_v54 = vand.u32 4294901760, %v37229_v22 }
0x21a8   : > { %43998 = vmatprep.subr.bf16.mxu0 %v43977_v47  ;;  %v44017_v56 = vpack.c.bf16 %v28598_v11, %v28591_v61  ;;  %v28605_v32 = vand.u32 4294901760, %v28604_v5  ;;  %v44065_v61 = vpack.c.bf16 %v28596_v46, %v28589_v37 }
0x21a9   : > { %v48161_v51 = vpack.c.bf16 %v28503_v54, %v28500_v1  ;;  %v28609_v50 = vsub.f32 %v37229_v22, %v28503_v54  ;;  %v28632_v22 = vsub.f32 %v28630_v6, %v28631_v0  ;;  %v28639_v1 = vsub.f32 %v28637_v39, %v28638_v48 }
0x21ab   : > { %v28610_v24 = vand.u32 4294901760, %v28609_v50  ;;  %v28633_v54 = vand.u32 4294901760, %v28632_v22  ;;  %v37240_v22 = vld [vmem:[%s48772_s11 + $0x80] sm:$0xff] }
0x21ad   : > { %v28611_v45 = vsub.f32 %v28609_v50, %v28610_v24  ;;  %v44069_v11 = vpack.c.bf16 %v28610_v24, %v28603_v40 }
0x21ae   : > { %41640 = vmatmul.mubr.f32.vlgmr.msra.gmra.mrb[48].mxu0 %v48085_v4 }
0x21af   : > { %44000 = vmatpush3.bf16.msra.mxu0 %v43977_v47  ;;  %41646 = vmatprep.mubr.f32.mxu0 %v48068_v38  ;;  %v37230_v38 = vld [vmem:[%s48684_s20 + $0x60] sm:$0xff]  ;;  %v28612_v12 = vand.u32 4294901760, %v28611_v45 }
0x21b0   : > { %44002 = vmatprep.subr.bf16.mxu0 %v48148_v36  ;;  %v28506_v59 = vand.u32 4294901760, %v37230_v38 }
0x21b1   : > { %v44021_v28 = vpack.c.bf16 %v28612_v12, %v28605_v32 }
0x21b2   : > { %v28616_v35 = vsub.f32 %v37230_v38, %v28506_v59  ;;  %v28640_v38 = vand.u32 4294901760, %v28639_v1  ;;  %v37241_v1 = vld [vmem:[%s48772_s11 + $0x88] sm:$0xff] }
0x21b4   : > { %v28617_v9 = vand.u32 4294901760, %v28616_v35 }
0x21b6   : > { %41647 = vmatmul.mubr.f32.vlgmr.msra.gmra.mrb[48].mxu0 %v48085_v4  ;;  %v37231_v4 = vld [vmem:[%s48684_s20 + $0x68] sm:$0xff]  ;;  %v28618_v29 = vsub.f32 %v28616_v35, %v28617_v9 }
0x21b7   : > { %44004 = vmatpush3.bf16.msra.mxu0 %v48148_v36  ;;  %v28509_v43 = vand.u32 4294901760, %v37231_v4 }
0x21b8   : > { %44006 = vmatprep.subr.bf16.mxu0 %v48161_v51  ;;  %v28619_v21 = vand.u32 4294901760, %v28618_v29 }
0x21b9   : > { %v48171_v3 = vpack.c.bf16 %v28509_v43, %v28506_v59  ;;  %v28623_v47 = vsub.f32 %v37231_v4, %v28509_v43  ;;  %v44029_v4 = vpack.c.bf16 %v28640_v38, %v28633_v54  ;;  %v44033_v59 = vpack.c.bf16 %v28595_v53, %v28588_v27 }
0x21ba   : > { %v44037_v43 = vpack.c.bf16 %v28609_v50, %v28602_v34  ;;  %v29596_v54 = vand.u32 4294901760, %v37240_v22  ;;  %v29599_v38 = vand.u32 4294901760, %v37241_v1 }
0x21bb   : > { %44008 = vmatpush3.bf16.msra.mxu0 %v48161_v51  ;;  %v28624_v33 = vand.u32 4294901760, %v28623_v47  ;;  %v44041_v8 = vpack.c.bf16 %v28623_v47, %v28616_v35 }
0x21bc   : > { %44010 = vmatprep.subr.bf16.mxu0 %v48171_v3 }
0x21bd   : > { %v28625_v62 = vsub.f32 %v28623_v47, %v28624_v33  ;;  %v44073_v5 = vpack.c.bf16 %v28624_v33, %v28617_v9 }
0x21bf   : > { %44012 = vmatpush3.bf16.msra.mxu0 %v48171_v3  ;;  %v28626_v60 = vand.u32 4294901760, %v28625_v62 }
0x21c0   : > { %44014 = vmatprep.subr.bf16.mxu0 %v48181_v15 }
0x21c1   : > { %v44025_v19 = vpack.c.bf16 %v28626_v60, %v28619_v21 }
0x21c3   : > { %44016 = vmatpush3.bf16.msra.mxu0 %v48181_v15 }
0x21c4   : > { %44018 = vmatprep.subr.bf16.mxu0 %v44017_v56 }
0x2289   : > { %v41648_v16 = vpop.f32.mrb[48].mxu0 }
0x228a   : > { %v28491_v20 = vsel %vm13075_vm15, %v41648_v16, 0  ;;  %v28460_v57 = vpop.f32.mrb[49].mxu0 }
0x228b   : > { %v28576_v45 = vand.u32 4294901760, %v28491_v20  ;;  %v28488_v32 = vsel %vm13075_vm15, %v28460_v57, 0 }
0x228c   : > { %v28566_v12 = vand.u32 4294901760, %v28488_v32 }
0x228d   : > { %v28577_v29 = vsub.f32 %v28491_v20, %v28576_v45 }
0x228e   : > { %v28567_v62 = vsub.f32 %v28488_v32, %v28566_v12 }
0x228f   : > { %v28578_v21 = vand.u32 4294901760, %v28577_v29 }
0x2290   : > { %v28568_v60 = vand.u32 4294901760, %v28567_v62 }
0x2291   : > { %v28579_v27 = vsub.f32 %v28577_v29, %v28578_v21 }
0x2292   : > { %v28569_v53 = vsub.f32 %v28567_v62, %v28568_v60 }
0x2293   : > { %v28580_v50 = vand.u32 4294901760, %v28579_v27 }
0x2294   : > { %v28570_v34 = vand.u32 4294901760, %v28569_v53 }
0x2296   : > { %41665 = vmatprep.mubr.f32.mxu0 %v28570_v34 }
0x2297   : > { %41666 = vmatmul.mubr.f32.vlgmr.msra.gmra.mrb[50].mxu0 %v28580_v50 }
0x2298   : > { %44020 = vmatpush3.bf16.msra.mxu0 %v44017_v56  ;;  %41684 = vmatprep.mubr.f32.mxu0 %v28566_v12 }
0x2299   : > { %44022 = vmatprep.subr.bf16.mxu0 %v44021_v28 }
0x229c   : > { %44024 = vmatpush3.bf16.msra.mxu0 %v44021_v28 }
0x229d   : > { %44026 = vmatprep.subr.bf16.mxu0 %v44025_v19 }
0x22a0   : > { %44028 = vmatpush3.bf16.msra.mxu0 %v44025_v19 }
0x22a1   : > { %44030 = vmatprep.subr.bf16.mxu0 %v44029_v4 }
0x22a4   : > { %44032 = vmatpush3.bf16.msra.mxu0 %v44029_v4  ;;  %v48246_v4 = vpack.c.bf16 %v29599_v38, %v29596_v54 }
0x22a5   : > { %44034 = vmatprep.subr.bf16.mxu0 %v44033_v59 }
0x22a7   : > { %41685 = vmatmul.mubr.f32.vlgmr.msra.gmra.mrb[50].mxu0 %v28576_v45 }
0x22a8   : > { %44036 = vmatpush3.bf16.msra.mxu0 %v44033_v59  ;;  %41703 = vmatprep.mubr.f32.mxu0 %v28567_v62  ;;  %v29686_v59 = vsub.f32 %v37240_v22, %v29596_v54  ;;  %v37236_v54 = vld [vmem:[%s48772_s11 + $0x60] sm:$0xff] }
0x22a9   : > { %44038 = vmatprep.subr.bf16.mxu0 %v44037_v43 }
0x22ac   : > { %44040 = vmatpush3.bf16.msra.mxu0 %v44037_v43  ;;  %v29693_v43 = vsub.f32 %v37241_v1, %v29599_v38  ;;  %v37237_v38 = vld [vmem:[%s48772_s11 + $0x68] sm:$0xff] }
0x22ad   : > { %44042 = vmatprep.subr.bf16.mxu0 %v44041_v8 }
0x22b0   : > { %44044 = vmatpush3.bf16.msra.mxu0 %v44041_v8  ;;  %v37242_v8 = vld [vmem:[%s48772_s11 + $0x90] sm:$0xff] }
0x22b1   : > { %44046 = vmatprep.subr.bf16.mxu0 %v44045_v58 }
0x22b4   : > { %44048 = vmatpush3.bf16.msra.mxu0 %v44045_v58  ;;  %v37243_v58 = vld [vmem:[%s48772_s11 + $0x98] sm:$0xff] }
0x22b5   : > { %44050 = vmatprep.subr.bf16.mxu0 %v48148_v36 }
0x22b7   : > { %41704 = vmatmul.mubr.f32.vlgmr.msra.gmra.mrb[50].mxu0 %v28577_v29 }
0x22b8   : > { %44052 = vmatpush3.bf16.msra.mxu0 %v48148_v36  ;;  %41722 = vmatprep.mubr.f32.mxu0 %v28568_v60 }
0x22b9   : > { %44054 = vmatprep.subr.bf16.mxu0 %v48161_v51 }
0x22bc   : > { %44056 = vmatpush3.bf16.msra.mxu0 %v48161_v51 }
0x22bd   : > { %44058 = vmatprep.subr.bf16.mxu0 %v48171_v3 }
0x22c0   : > { %44060 = vmatpush3.bf16.msra.mxu0 %v48171_v3 }
0x22c1   : > { %44062 = vmatprep.subr.bf16.mxu0 %v48181_v15 }
0x22c4   : > { %44064 = vmatpush3.bf16.msra.mxu0 %v48181_v15 }
0x22c5   : > { %44066 = vmatprep.subr.bf16.mxu0 %v44065_v61 }
0x22c7   : > { %41723 = vmatmul.mubr.f32.vlgmr.msra.gmra.mrb[50].mxu0 %v28578_v21 }
0x22c8   : > { %44068 = vmatpush3.bf16.msra.mxu0 %v44065_v61  ;;  %41741 = vmatprep.mubr.f32.mxu0 %v28566_v12  ;;  %v29602_v61 = vand.u32 4294901760, %v37242_v8 }
0x22c9   : > { %44070 = vmatprep.subr.bf16.mxu0 %v44069_v11 }
0x22cc   : > { %44072 = vmatpush3.bf16.msra.mxu0 %v44069_v11  ;;  %v29605_v11 = vand.u32 4294901760, %v37243_v58 }
0x22cd   : > { %44074 = vmatprep.subr.bf16.mxu0 %v44073_v5 }
0x22ce   : > { %v48256_v16 = vpack.c.bf16 %v29605_v11, %v29602_v61  ;;  %v29707_v32 = vsub.f32 %v37243_v58, %v29605_v11  ;;  %v37239_v11 = vld [vmem:[%s48772_s11 + $0x78] sm:$0xff] }
0x22d0   : > { %44076 = vmatpush3.bf16.msra.mxu0 %v44073_v5  ;;  %v29687_v5 = vand.u32 4294901760, %v29686_v59  ;;  %v29708_v21 = vand.u32 4294901760, %v29707_v32 }
0x22d1   : > { %44078 = vmatprep.subr.bf16.mxu0 %v44077_v23 }
0x22d2   : > { %v29688_v20 = vsub.f32 %v29686_v59, %v29687_v5  ;;  %v29709_v53 = vsub.f32 %v29707_v32, %v29708_v21 }
0x22d4   : > { %44080 = vmatpush3.bf16.msra.mxu0 %v44077_v23  ;;  %v29694_v23 = vand.u32 4294901760, %v29693_v43  ;;  %v29710_v50 = vand.u32 4294901760, %v29709_v53 }
0x22d5   : > { %44082 = vmatprep.subr.bf16.mxu0 %v48148_v36 }
0x22d6   : > { %v29695_v57 = vsub.f32 %v29693_v43, %v29694_v23 }
0x22d7   : > { %41742 = vmatmul.mubr.f32.vlgmr.msra.gmra.mrb[50].mxu0 %v28576_v45 }
0x22d8   : > { %44084 = vmatpush3.bf16.msra.mxu0 %v48148_v36  ;;  %41760 = vmatprep.mubr.f32.mxu0 %v28566_v12  ;;  %v37235_v36 = vld [vmem:[%s48771_s1 + $0x1] ss:$0 sm:$0xff]  ;;  %v29689_v12 = vand.u32 4294901760, %v29688_v20  ;;  %v29696_v29 = vand.u32 4294901760, %v29695_v57  ;;  %v30139_v20 = vand.u32 4294901760, %v37239_v11 }
0x22d9   : > { %44086 = vmatprep.subr.bf16.mxu0 %v48161_v51 }
0x22da   : > { %v44129_v60 = vpack.c.bf16 %v29696_v29, %v29689_v12 }
0x22dc   : > { %44088 = vmatpush3.bf16.msra.mxu0 %v48161_v51 }
0x22dd   : > { %44090 = vmatprep.subr.bf16.mxu0 %v48171_v3 }
0x22e0   : > { %44092 = vmatpush3.bf16.msra.mxu0 %v48171_v3 }
0x22e1   : > { %44094 = vmatprep.subr.bf16.mxu0 %v48181_v15 }
0x22e4   : > { %44096 = vmatpush3.bf16.msra.mxu0 %v48181_v15 }
0x22e7   : > { %41761 = vmatmul.mubr.f32.vlgmr.msra.gmra.mrb[50].mxu0 %v28576_v45  ;;  %v29700_v45 = vsub.f32 %v37242_v8, %v29602_v61  ;;  %v30133_v8 = vand.u32 4294901760, %v37237_v38  ;;  %v37238_v61 = vld [vmem:[%s48772_s11 + $0x70] sm:$0xff] }
0x22e8   : > { %41941 = vmatprep.mubr.f32.mxu0 %v46447_v63 }
0x22e9   : > { %v29701_v62 = vand.u32 4294901760, %v29700_v45 }
0x22eb   : > { %v29702_v27 = vsub.f32 %v29700_v45, %v29701_v62 }
0x22ed   : > { %v29703_v34 = vand.u32 4294901760, %v29702_v27 }
0x23ba   : > { %v41762_v37 = vpop.f32.mrb[50].mxu0 }
0x23bb   : > { %v44699_v46 = vadd.f32 %v41762_v37, %v37235_v36  ;;  %v29063_v40 = vpop.f32.mrb[51].mxu0  ;;  %v44137_v37 = vpack.c.bf16 %v29693_v43, %v29686_v59  ;;  %v30130_v43 = vand.u32 4294901760, %v37236_v54 }
0x23bc   : > { %v44700_v24 = vadd.f32 %v37235_v36, %v29063_v40  ;;  %v44133_v36 = vpack.c.bf16 %v29710_v50, %v29703_v34  ;;  %v44153_v40 = vpack.c.bf16 %v29694_v23, %v29687_v5  ;;  %v30136_v23 = vand.u32 4294901760, %v37238_v61 }
0x23bd   : > { %v48208_v51 = vadd.f32 %v44699_v46, %v48051_v31  ;;  %v44141_v46 = vpack.c.bf16 %v29707_v32, %v29700_v45  ;;  %v30220_v57 = vsub.f32 %v37236_v54, %v30130_v43  ;;  %v30227_v45 = vsub.f32 %v37237_v38, %v30133_v8  ;;  %v37245_v54 = vld [vmem:[%s48772_s11 + $0xa8] sm:$0xff] }
0x23be   : > { %v48211_v3 = vadd.f32 %v44700_v24, %v48054_v30  ;;  %v44157_v24 = vpack.c.bf16 %v29708_v21, %v29701_v62  ;;  %v30234_v21 = vsub.f32 %v37238_v61, %v30136_v23  ;;  %v48299_v34 = vpack.c.bf16 %v30133_v8, %v30130_v43 }
0x23bf   : > { %v29086_v56 = vand.u32 4294901760, %v48208_v51  ;;  %v30127_v5 = vsel %vm3529_vm3, %v48208_v51, 0  ;;  %v30221_v29 = vand.u32 4294901760, %v30220_v57  ;;  %v30228_v62 = vand.u32 4294901760, %v30227_v45 }
0x23c0   : > { %v29083_v15 = vand.u32 4294901760, %v48211_v3  ;;  %v30124_v59 = vsel %vm3529_vm3, %v48211_v3, 0  ;;  %v48293_v12 = vand.u32 4294901760, %v30127_v5  ;;  %v31174_v8 = vand.u32 4294901760, %v37245_v54 }
0x23c1   : > { %v29178_v35 = vsub.f32 %v48208_v51, %v29086_v56  ;;  %v48282_v58 = vand.u32 4294901760, %v30124_v59  ;;  %v30222_v50 = vsub.f32 %v30220_v57, %v30221_v29 }
0x23c2   : > { %v44097_v47 = vpack.c.bf16 %v29086_v56, %v29083_v15  ;;  %v29171_v9 = vsub.f32 %v48211_v3, %v29083_v15  ;;  %v30209_v53 = vsub.f32 %v30127_v5, %v48293_v12  ;;  %v37247_v5 = vld [vmem:[%s48772_s11 + $0xb8] sm:$0xff] }
0x23c3   : > { %v29179_v33 = vand.u32 4294901760, %v29178_v35  ;;  %v30199_v32 = vsub.f32 %v30124_v59, %v48282_v58 }
0x23c4   : > { %44098 = vmatprep.subr.bf16.mxu1 %v44097_v47  ;;  %44218 = vmatprep.subr.bf16.mxu0 %v44097_v47  ;;  %v29172_v6 = vand.u32 4294901760, %v29171_v9  ;;  %v44105_v48 = vpack.c.bf16 %v29178_v35, %v29171_v9 }
0x23c5   : > { %44100 = vmatpush3.bf16.msra.mxu1 %v44097_v47  ;;  %44220 = vmatpush3.bf16.msra.mxu0 %v44097_v47  ;;  %v29180_v31 = vsub.f32 %v29178_v35, %v29179_v33  ;;  %v30200_v27 = vand.u32 4294901760, %v30199_v32 }
0x23c6   : > { %v29173_v39 = vsub.f32 %v29171_v9, %v29172_v6  ;;  %v44113_v19 = vpack.c.bf16 %v29179_v33, %v29172_v6 }
0x23c7   : > { %v29181_v28 = vand.u32 4294901760, %v29180_v31 }
0x23c8   : > { %41768 = vmatmul.mubr.f32.vlgmr.msra.gmra.mrb[34].mxu1 %v46376_v26  ;;  %41942 = vmatmul.mubr.f32.vlgmr.msra.gmra.mrb[52].mxu0 %v46449_v2  ;;  %v29174_v30 = vand.u32 4294901760, %v29173_v39 }
0x23c9   : > { %41774 = vmatprep.mubr.f32.mxu1 %v46347_v7  ;;  %41948 = vmatprep.mubr.f32.mxu0 %v46424_v41 }
0x23ca   : > { %v44101_v0 = vpack.c.bf16 %v29181_v28, %v29174_v30 }
0x23cc   : > { %44102 = vmatprep.subr.bf16.mxu1 %v44101_v0  ;;  %44222 = vmatprep.subr.bf16.mxu0 %v44101_v0 }
0x23cd   : > { %44104 = vmatpush3.bf16.msra.mxu1 %v44101_v0  ;;  %44224 = vmatpush3.bf16.msra.mxu0 %v44101_v0 }
0x23ce   : > { %44106 = vmatprep.subr.bf16.mxu1 %v44105_v48  ;;  %44226 = vmatprep.subr.bf16.mxu0 %v44105_v48 }
0x23d0   : > { %41775 = vmatmul.mubr.f32.vlgmr.msra.gmra.mrb[34].mxu1 %v46352_v10  ;;  %41949 = vmatmul.mubr.f32.vlgmr.msra.gmra.mrb[52].mxu0 %v46426_v42 }
0x23d1   : > { %44108 = vmatpush3.bf16.msra.mxu1 %v44105_v48  ;;  %44228 = vmatpush3.bf16.msra.mxu0 %v44105_v48 }
0x23d2   : > { %44110 = vmatprep.subr.bf16.mxu1 %v44097_v47  ;;  %44230 = vmatprep.subr.bf16.mxu0 %v44097_v47 }
0x23d3   : > { %41781 = vmatprep.mubr.f32.mxu1 %v46357_v13  ;;  %41955 = vmatprep.mubr.f32.mxu0 %v46429_v44 }
0x23d8   : > { %41782 = vmatmul.mubr.f32.vlgmr.msra.gmra.mrb[34].mxu1 %v46361_v14  ;;  %41956 = vmatmul.mubr.f32.vlgmr.msra.gmra.mrb[52].mxu0 %v46434_v49 }
0x23d9   : > { %44112 = vmatpush3.bf16.msra.mxu1 %v44097_v47  ;;  %44232 = vmatpush3.bf16.msra.mxu0 %v44097_v47 }
0x23da   : > { %44114 = vmatprep.subr.bf16.mxu1 %v44113_v19  ;;  %44234 = vmatprep.subr.bf16.mxu0 %v44113_v19 }
0x23db   : > { %41788 = vmatprep.mubr.f32.mxu1 %v46365_v17  ;;  %41962 = vmatprep.mubr.f32.mxu0 %v46437_v52 }
0x23e0   : > { %41789 = vmatmul.mubr.f32.vlgmr.msra.gmra.mrb[34].mxu1 %v46368_v18  ;;  %41963 = vmatmul.mubr.f32.vlgmr.msra.gmra.mrb[52].mxu0 %v46440_v55 }
0x23e1   : > { %44116 = vmatpush3.bf16.msra.mxu1 %v44113_v19  ;;  %44236 = vmatpush3.bf16.msra.mxu0 %v44113_v19 }
0x23e2   : > { %44118 = vmatprep.subr.bf16.mxu1 %v44097_v47  ;;  %44238 = vmatprep.subr.bf16.mxu0 %v44097_v47 }
0x23e3   : > { %41795 = vmatprep.mubr.f32.mxu1 %v46347_v7  ;;  %41969 = vmatprep.mubr.f32.mxu0 %v46424_v41 }
0x23e8   : > { %41796 = vmatmul.mubr.f32.vlgmr.msra.gmra.mrb[34].mxu1 %v46352_v10  ;;  %41970 = vmatmul.mubr.f32.vlgmr.msra.gmra.mrb[52].mxu0 %v46426_v42 }
0x23e9   : > { %44120 = vmatpush3.bf16.msra.mxu1 %v44097_v47  ;;  %44240 = vmatpush3.bf16.msra.mxu0 %v44097_v47 }
0x23ea   : > { %41802 = vmatprep.mubr.f32.mxu1 %v46347_v7  ;;  %41976 = vmatprep.mubr.f32.mxu0 %v46424_v41 }
0x23eb   : > { %44122 = vmatprep.subr.bf16.mxu1 %v48246_v4 }
0x23f0   : > { %41803 = vmatmul.mubr.f32.vlgmr.msra.gmra.mrb[34].mxu1 %v46352_v10  ;;  %41977 = vmatmul.mubr.f32.vlgmr.msra.gmra.mrb[52].mxu0 %v46426_v42 }
0x23f1   : > { %42049 = vmatprep.mubr.f32.mxu0 %v46374_v25  ;;  %44124 = vmatpush3.bf16.msra.mxu1 %v48246_v4 }
0x23f2   : > { %44126 = vmatprep.subr.bf16.mxu1 %v48256_v16 }
0x23f5   : > { %44128 = vmatpush3.bf16.msra.mxu1 %v48256_v16 }
0x23f6   : > { %44130 = vmatprep.subr.bf16.mxu1 %v44129_v60 }
0x24c3   : > { %v41804_v56 = vpop.f32.mrb[34].mxu1  ;;  %v48260_v15 = vpop.f32.mrb[52].mxu0 }
0x24c4   : > { %v29593_v35 = vsel %vm3529_vm3, %v41804_v56, 0  ;;  %v29574_v47 = vpop.f32.mrb[35].mxu1  ;;  %v48263_v9 = vpop.f32.mrb[53].mxu0  ;;  %v30210_v56 = vand.u32 4294901760, %v30209_v53 }
0x24c5   : > { %v48265_v33 = vand.u32 4294901760, %v29593_v35  ;;  %v29590_v6 = vsel %vm3529_vm3, %v29574_v47, 0  ;;  %v31165_v38 = vsel %vm3529_vm3, %v48263_v9, 0 }
0x24c6   : > { %v29664_v31 = vand.u32 4294901760, %v29590_v6  ;;  %v48324_v61 = vand.u32 4294901760, %v31165_v38 }
0x24c7   : > { %v29675_v39 = vsub.f32 %v29593_v35, %v48265_v33  ;;  %v30223_v35 = vand.u32 4294901760, %v30222_v50 }
0x24c8   : > { %v29665_v28 = vsub.f32 %v29590_v6, %v29664_v31 }
0x24c9   : > { %v29676_v30 = vand.u32 4294901760, %v29675_v39 }
0x24ca   : > { %v29666_v0 = vand.u32 4294901760, %v29665_v28 }
0x24cb   : > { %v29677_v48 = vsub.f32 %v29675_v39, %v29676_v30 }
0x24cc   : > { %v29667_v19 = vsub.f32 %v29665_v28, %v29666_v0 }
0x24cd   : > { %v29678_v1 = vand.u32 4294901760, %v29677_v48 }
0x24ce   : > { %v29668_v22 = vand.u32 4294901760, %v29667_v19 }
0x24d0   : > { %41813 = vmatprep.mubr.f32.mxu1 %v29668_v22  ;;  %v44201_v22 = vpack.c.bf16 %v30228_v62, %v30221_v29 }
0x24d1   : > { %41814 = vmatmul.mubr.f32.vlgmr.msra.gmra.mrb[36].mxu1 %v29678_v1  ;;  %v37244_v1 = vld [vmem:[%s48772_s11 + $0xa0] sm:$0xff] }
0x24d2   : > { %44132 = vmatpush3.bf16.msra.mxu1 %v44129_v60  ;;  %41824 = vmatprep.mubr.f32.mxu1 %v29664_v31  ;;  %v30241_v60 = vsub.f32 %v37239_v11, %v30139_v20  ;;  %v31171_v59 = vand.u32 4294901760, %v37244_v1  ;;  %v37246_v11 = vld [vmem:[%s48772_s11 + $0xb0] sm:$0xff] }
0x24d3   : > { %44134 = vmatprep.subr.bf16.mxu1 %v44133_v36 }
0x24d4   : > { %v44189_v19 = vpack.c.bf16 %v30241_v60, %v30234_v21  ;;  %v48333_v9 = vsub.f32 %v37244_v1, %v31171_v59 }
0x24d6   : > { %44136 = vmatpush3.bf16.msra.mxu1 %v44133_v36  ;;  %v30229_v36 = vsub.f32 %v30227_v45, %v30228_v62  ;;  %v31262_v29 = vand.u32 4294901760, %v48333_v9 }
0x24d7   : > { %44138 = vmatprep.subr.bf16.mxu1 %v44137_v37 }
0x24d8   : > { %v30230_v47 = vand.u32 4294901760, %v30229_v36  ;;  %v31263_v50 = vsub.f32 %v48333_v9, %v31262_v29 }
0x24d9   : > { %41825 = vmatmul.mubr.f32.vlgmr.msra.gmra.mrb[36].mxu1 %v48265_v33 }
0x24da   : > { %44140 = vmatpush3.bf16.msra.mxu1 %v44137_v37  ;;  %41835 = vmatprep.mubr.f32.mxu1 %v29665_v28  ;;  %v30235_v37 = vand.u32 4294901760, %v30234_v21  ;;  %v44177_v28 = vpack.c.bf16 %v30230_v47, %v30223_v35  ;;  %v31264_v47 = vand.u32 4294901760, %v31263_v50 }
0x24db   : > { %44142 = vmatprep.subr.bf16.mxu1 %v44141_v46 }
0x24de   : > { %44144 = vmatpush3.bf16.msra.mxu1 %v44141_v46  ;;  %v30242_v46 = vand.u32 4294901760, %v30241_v60 }
0x24df   : > { %44146 = vmatprep.subr.bf16.mxu1 %v48246_v4 }
0x24e0   : > { %v30243_v6 = vsub.f32 %v30241_v60, %v30242_v46  ;;  %v44205_v43 = vpack.c.bf16 %v30242_v46, %v30235_v37 }
0x24e1   : > { %41836 = vmatmul.mubr.f32.vlgmr.msra.gmra.mrb[36].mxu1 %v29675_v39  ;;  %v30211_v39 = vsub.f32 %v30209_v53, %v30210_v56 }
0x24e2   : > { %44148 = vmatpush3.bf16.msra.mxu1 %v48246_v4  ;;  %41846 = vmatprep.mubr.f32.mxu1 %v29666_v0 }
0x24e3   : > { %44150 = vmatprep.subr.bf16.mxu1 %v48256_v16  ;;  %v30212_v0 = vand.u32 4294901760, %v30211_v39 }
0x24e6   : > { %44152 = vmatpush3.bf16.msra.mxu1 %v48256_v16 }
0x24e7   : > { %44154 = vmatprep.subr.bf16.mxu1 %v44153_v40 }
0x24e9   : > { %41847 = vmatmul.mubr.f32.vlgmr.msra.gmra.mrb[36].mxu1 %v29676_v30  ;;  %v30244_v30 = vand.u32 4294901760, %v30243_v6 }
0x24ea   : > { %44156 = vmatpush3.bf16.msra.mxu1 %v44153_v40  ;;  %41857 = vmatprep.mubr.f32.mxu1 %v29664_v31  ;;  %v30201_v40 = vsub.f32 %v30199_v32, %v30200_v27 }
0x24eb   : > { %44158 = vmatprep.subr.bf16.mxu1 %v44157_v24 }
0x24ee   : > { %44160 = vmatpush3.bf16.msra.mxu1 %v44157_v24  ;;  %v48303_v24 = vpack.c.bf16 %v30139_v20, %v30136_v23  ;;  %v31177_v23 = vand.u32 4294901760, %v37246_v11  ;;  %v31180_v20 = vand.u32 4294901760, %v37247_v5 }
0x24ef   : > { %44162 = vmatprep.subr.bf16.mxu1 %v48246_v4 }
0x24f0   : > { %v31275_v60 = vsub.f32 %v37246_v11, %v31177_v23  ;;  %v44245_v35 = vpack.c.bf16 %v31180_v20, %v31177_v23 }
0x24f1   : > { %41858 = vmatmul.mubr.f32.vlgmr.msra.gmra.mrb[36].mxu1 %v48265_v33 }
0x24f2   : > { %44164 = vmatpush3.bf16.msra.mxu1 %v48246_v4  ;;  %41868 = vmatprep.mubr.f32.mxu1 %v29664_v31  ;;  %v30236_v4 = vsub.f32 %v30234_v21, %v30235_v37  ;;  %v30202_v31 = vand.u32 4294901760, %v30201_v40  ;;  %v31276_v46 = vand.u32 4294901760, %v31275_v60 }
0x24f3   : > { %44166 = vmatprep.subr.bf16.mxu1 %v48256_v16 }
0x24f4   : > { %v31277_v6 = vsub.f32 %v31275_v60, %v31276_v46 }
0x24f6   : > { %44168 = vmatpush3.bf16.msra.mxu1 %v48256_v16  ;;  %v30237_v16 = vand.u32 4294901760, %v30236_v4 }
0x24f7   : > { %44170 = vmatprep.subr.bf16.mxu1 %v48299_v34 }
0x24f8   : > { %v44181_v48 = vpack.c.bf16 %v30244_v30, %v30237_v16  ;;  %v31278_v16 = vand.u32 4294901760, %v31277_v6 }
0x24f9   : > { %41869 = vmatmul.mubr.f32.vlgmr.msra.gmra.mrb[36].mxu1 %v48265_v33  ;;  %v44185_v33 = vpack.c.bf16 %v30227_v45, %v30220_v57  ;;  %v31268_v57 = vsub.f32 %v37245_v54, %v31174_v8  ;;  %v31168_v45 = vsel %vm3529_vm3, %v48260_v15, 0  ;;  %v44241_v15 = vpack.c.bf16 %v31174_v8, %v31171_v59 }
0x24fa   : > { %44172 = vmatpush3.bf16.msra.mxu1 %v48299_v34  ;;  %41879 = vmatprep.mubr.f32.mxu1 %v30202_v31  ;;  %v48339_v62 = vand.u32 4294901760, %v31168_v45 }
0x24fb   : > { %44174 = vmatprep.subr.bf16.mxu1 %v48303_v24  ;;  %v31269_v21 = vand.u32 4294901760, %v31268_v57 }
0x24fc   : > { %v31250_v36 = vsub.f32 %v31168_v45, %v48339_v62 }
0x24fd   : > { %v31270_v37 = vsub.f32 %v31268_v57, %v31269_v21 }
0x24fe   : > { %44176 = vmatpush3.bf16.msra.mxu1 %v48303_v24  ;;  %v31251_v4 = vand.u32 4294901760, %v31250_v36 }
0x24ff   : > { %44178 = vmatprep.subr.bf16.mxu1 %v44177_v28 }
0x2500   : > { %v31252_v39 = vsub.f32 %v31250_v36, %v31251_v4 }
0x2501   : > { %41880 = vmatmul.mubr.f32.vlgmr.msra.gmra.mrb[36].mxu1 %v30212_v0 }
0x2502   : > { %44180 = vmatpush3.bf16.msra.mxu1 %v44177_v28  ;;  %41890 = vmatprep.mubr.f32.mxu1 %v48282_v58  ;;  %v31253_v0 = vand.u32 4294901760, %v31252_v39 }
0x2503   : > { %44182 = vmatprep.subr.bf16.mxu1 %v44181_v48 }
0x2506   : > { %44184 = vmatpush3.bf16.msra.mxu1 %v44181_v48  ;;  %v44257_v48 = vpack.c.bf16 %v31268_v57, %v48333_v9 }
0x2507   : > { %44186 = vmatprep.subr.bf16.mxu1 %v44185_v33 }
0x2509   : > { %41891 = vmatmul.mubr.f32.vlgmr.msra.gmra.mrb[36].mxu1 %v48293_v12 }
0x250a   : > { %44188 = vmatpush3.bf16.msra.mxu1 %v44185_v33  ;;  %41901 = vmatprep.mubr.f32.mxu1 %v30199_v32  ;;  %v31240_v32 = vsub.f32 %v31165_v38, %v48324_v61  ;;  %v44273_v33 = vpack.c.bf16 %v31269_v21, %v31262_v29 }
0x250b   : > { %44190 = vmatprep.subr.bf16.mxu1 %v44189_v19 }
0x250e   : > { %44192 = vmatpush3.bf16.msra.mxu1 %v44189_v19 }
0x250f   : > { %44194 = vmatprep.subr.bf16.mxu1 %v48299_v34 }
0x2511   : > { %41902 = vmatmul.mubr.f32.vlgmr.msra.gmra.mrb[36].mxu1 %v30209_v53  ;;  %v31241_v53 = vand.u32 4294901760, %v31240_v32 }
0x2512   : > { %44196 = vmatpush3.bf16.msra.mxu1 %v48299_v34  ;;  %41912 = vmatprep.mubr.f32.mxu1 %v30200_v27  ;;  %v31282_v27 = vsub.f32 %v37247_v5, %v31180_v20 }
0x2513   : > { %44198 = vmatprep.subr.bf16.mxu1 %v48303_v24 }
0x2514   : > { %v31283_v40 = vand.u32 4294901760, %v31282_v27 }
0x2516   : > { %44200 = vmatpush3.bf16.msra.mxu1 %v48303_v24  ;;  %v44277_v19 = vpack.c.bf16 %v31283_v40, %v31276_v46 }
0x2517   : > { %44202 = vmatprep.subr.bf16.mxu1 %v44201_v22 }
0x2519   : > { %41913 = vmatmul.mubr.f32.vlgmr.msra.gmra.mrb[36].mxu1 %v30210_v56  ;;  %v31242_v56 = vsub.f32 %v31240_v32, %v31241_v53 }
0x251a   : > { %44204 = vmatpush3.bf16.msra.mxu1 %v44201_v22  ;;  %41923 = vmatprep.mubr.f32.mxu1 %v48282_v58  ;;  %v37248_v22 = vld [vmem:[#allocation12 + $0x1] ss:$0 sm:$0xff] }
0x251b   : > { %44206 = vmatprep.subr.bf16.mxu1 %v44205_v43  ;;  %v31243_v31 = vand.u32 4294901760, %v31242_v56  ;;  %v37255_v56 = vld [vmem:[%s48773_s0 + $0x90] sm:$0xff] }
0x251e   : > { %44208 = vmatpush3.bf16.msra.mxu1 %v44205_v43 }
0x251f   : > { %44210 = vmatprep.subr.bf16.mxu1 %v48299_v34 }
0x2521   : > { %41924 = vmatmul.mubr.f32.vlgmr.msra.gmra.mrb[36].mxu1 %v48293_v12 }
0x2522   : > { %44212 = vmatpush3.bf16.msra.mxu1 %v48299_v34  ;;  %41934 = vmatprep.mubr.f32.mxu1 %v48282_v58  ;;  %v31271_v34 = vand.u32 4294901760, %v31270_v37  ;;  %v31284_v58 = vsub.f32 %v31282_v27, %v31283_v40 }
0x2523   : > { %44214 = vmatprep.subr.bf16.mxu1 %v48303_v24 }
0x2524   : > { %v44249_v28 = vpack.c.bf16 %v31271_v34, %v31264_v47  ;;  %v31285_v30 = vand.u32 4294901760, %v31284_v58 }
0x2526   : > { %44216 = vmatpush3.bf16.msra.mxu1 %v48303_v24  ;;  %v44253_v24 = vpack.c.bf16 %v31285_v30, %v31278_v16 }
0x2527   : > { %44242 = vmatprep.subr.bf16.mxu1 %v44241_v15 }
0x2529   : > { %41935 = vmatmul.mubr.f32.vlgmr.msra.gmra.mrb[36].mxu1 %v48293_v12  ;;  %v44261_v12 = vpack.c.bf16 %v31282_v27, %v31275_v60 }
0x252a   : > { %44244 = vmatpush3.bf16.msra.mxu1 %v44241_v15  ;;  %41987 = vmatprep.mubr.f32.mxu1 %v31243_v31 }
0x252b   : > { %44246 = vmatprep.subr.bf16.mxu1 %v44245_v35 }
0x252e   : > { %44248 = vmatpush3.bf16.msra.mxu1 %v44245_v35 }
0x252f   : > { %44250 = vmatprep.subr.bf16.mxu1 %v44249_v28 }
0x2531   : > { %41988 = vmatmul.mubr.f32.vlgmr.msra.gmra.mrb[36].mxu1 %v31253_v0 }
0x2532   : > { %44252 = vmatpush3.bf16.msra.mxu1 %v44249_v28  ;;  %41998 = vmatprep.mubr.f32.mxu1 %v48324_v61 }
0x2533   : > { %44254 = vmatprep.subr.bf16.mxu1 %v44253_v24 }
0x2536   : > { %44256 = vmatpush3.bf16.msra.mxu1 %v44253_v24 }
0x2537   : > { %44258 = vmatprep.subr.bf16.mxu1 %v44257_v48 }
0x2539   : > { %41999 = vmatmul.mubr.f32.vlgmr.msra.gmra.mrb[36].mxu1 %v48339_v62 }
0x253a   : > { %44260 = vmatpush3.bf16.msra.mxu1 %v44257_v48  ;;  %42009 = vmatprep.mubr.f32.mxu1 %v31240_v32 }
0x253b   : > { %44262 = vmatprep.subr.bf16.mxu1 %v44261_v12 }
0x253e   : > { %44264 = vmatpush3.bf16.msra.mxu1 %v44261_v12 }
0x253f   : > { %44266 = vmatprep.subr.bf16.mxu1 %v44241_v15 }
0x2541   : > { %42010 = vmatmul.mubr.f32.vlgmr.msra.gmra.mrb[36].mxu1 %v31250_v36 }
0x2542   : > { %44268 = vmatpush3.bf16.msra.mxu1 %v44241_v15  ;;  %42020 = vmatprep.mubr.f32.mxu1 %v31241_v53  ;;  %v37253_v53 = vld [vmem:[%s48773_s0 + $0x80] sm:$0xff] }
0x2543   : > { %44270 = vmatprep.subr.bf16.mxu1 %v44245_v35  ;;  %v32231_v50 = vand.u32 4294901760, %v37253_v53 }
0x2545   : > { %v32321_v46 = vsub.f32 %v37253_v53, %v32231_v50 }
0x2546   : > { %44272 = vmatpush3.bf16.msra.mxu1 %v44245_v35 }
0x2547   : > { %44274 = vmatprep.subr.bf16.mxu1 %v44273_v33 }
0x2549   : > { %42021 = vmatmul.mubr.f32.vlgmr.msra.gmra.mrb[36].mxu1 %v31251_v4  ;;  %v32322_v4 = vand.u32 4294901760, %v32321_v46 }
0x254a   : > { %44276 = vmatpush3.bf16.msra.mxu1 %v44273_v33  ;;  %42031 = vmatprep.mubr.f32.mxu1 %v48324_v61 }
0x254b   : > { %44278 = vmatprep.subr.bf16.mxu1 %v44277_v19  ;;  %v32323_v58 = vsub.f32 %v32321_v46, %v32322_v4 }
0x254d   : > { %v32324_v16 = vand.u32 4294901760, %v32323_v58 }
0x254e   : > { %44280 = vmatpush3.bf16.msra.mxu1 %v44277_v19 }
0x254f   : > { %44282 = vmatprep.subr.bf16.mxu1 %v44241_v15 }
0x2551   : > { %42032 = vmatmul.mubr.f32.vlgmr.msra.gmra.mrb[36].mxu1 %v48339_v62 }
0x2552   : > { %44284 = vmatpush3.bf16.msra.mxu1 %v44241_v15  ;;  %42042 = vmatprep.mubr.f32.mxu1 %v48324_v61  ;;  %v37254_v15 = vld [vmem:[%s48773_s0 + $0x88] sm:$0xff] }
0x2553   : > { %44286 = vmatprep.subr.bf16.mxu1 %v44245_v35  ;;  %v32234_v36 = vand.u32 4294901760, %v37254_v15 }
0x2555   : > { %v48395_v37 = vpack.c.bf16 %v32234_v36, %v32231_v50  ;;  %v32328_v40 = vsub.f32 %v37254_v15, %v32234_v36  ;;  %v37249_v36 = vld [vmem:[%s48773_s0 + $0x60] sm:$0xff] }
0x2556   : > { %44288 = vmatpush3.bf16.msra.mxu1 %v44245_v35  ;;  %v32237_v35 = vand.u32 4294901760, %v37255_v56 }
0x2557   : > { %v32329_v34 = vand.u32 4294901760, %v32328_v40 }
0x2558   : > { %v32335_v39 = vsub.f32 %v37255_v56, %v32237_v35  ;;  %v32765_v56 = vand.u32 4294901760, %v37249_v36 }
0x2559   : > { %42043 = vmatmul.mubr.f32.vlgmr.msra.gmra.mrb[36].mxu1 %v48339_v62  ;;  %v32330_v31 = vsub.f32 %v32328_v40, %v32329_v34 }
0x255a   : > { %42223 = vmatprep.mubr.f32.mxu1 %v46447_v63  ;;  %v32336_v0 = vand.u32 4294901760, %v32335_v39 }
0x255b   : > { %v32331_v30 = vand.u32 4294901760, %v32330_v31  ;;  %v32855_v31 = vsub.f32 %v37249_v36, %v32765_v56 }
0x255c   : > { %v32337_v12 = vsub.f32 %v32335_v39, %v32336_v0 }
0x255d   : > { %v44321_v48 = vpack.c.bf16 %v32331_v30, %v32324_v16  ;;  %v32856_v30 = vand.u32 4294901760, %v32855_v31 }
0x255e   : > { %v32338_v19 = vand.u32 4294901760, %v32337_v12 }
0x262c   : > { %v42044_v1 = vpop.f32.mrb[36].mxu1 }
0x262d   : > { %v31707_v54 = vadd.f32 %v42044_v1, %v37248_v22  ;;  %v31688_v38 = vpop.f32.mrb[37].mxu1 }
0x262e   : > { %v31706_v59 = vadd.f32 %v37248_v22, %v31688_v38 }
0x262f   : > { %v48358_v43 = vmax.f32 %v31707_v54, 0.0  ;;  %v44329_v54 = vpack.c.bf16 %v32328_v40, %v32321_v46  ;;  %v37250_v46 = vld [vmem:[%s48773_s0 + $0x68] sm:$0xff] }
0x2630   : > { %v48360_v8 = vmax.f32 %v31706_v59, 0.0  ;;  %v44345_v59 = vpack.c.bf16 %v32329_v34, %v32322_v4  ;;  %v37252_v4 = vld [vmem:[%s48773_s0 + $0x78] sm:$0xff] }
0x2631   : > { %v31721_v11 = vand.u32 4294901760, %v48358_v43  ;;  %v32762_v34 = vsel %vm3529_vm3, %v48358_v43, 0  ;;  %v32774_v58 = vand.u32 4294901760, %v37252_v4 }
0x2632   : > { %v31718_v5 = vand.u32 4294901760, %v48360_v8  ;;  %v32759_v40 = vsel %vm3529_vm3, %v48360_v8, 0  ;;  %v48442_v16 = vand.u32 4294901760, %v32762_v34 }
0x2633   : > { %v31813_v61 = vsub.f32 %v48358_v43, %v31721_v11 }
0x2634   : > { %v44289_v9 = vpack.c.bf16 %v31721_v11, %v31718_v5  ;;  %v31806_v23 = vsub.f32 %v48360_v8, %v31718_v5  ;;  %v32844_v43 = vsub.f32 %v32762_v34, %v48442_v16 }
0x2635   : > { %v31814_v20 = vand.u32 4294901760, %v31813_v61 }
0x2636   : > { %v31807_v57 = vand.u32 4294901760, %v31806_v23  ;;  %44290 = vmatprep.subr.bf16.mxu0 %v44289_v9  ;;  %44410 = vmatprep.subr.bf16.mxu1 %v44289_v9  ;;  %v44297_v45 = vpack.c.bf16 %v31813_v61, %v31806_v23 }
0x2637   : > { %44292 = vmatpush3.bf16.msra.mxu0 %v44289_v9  ;;  %44412 = vmatpush3.bf16.msra.mxu1 %v44289_v9  ;;  %v31815_v32 = vsub.f32 %v31813_v61, %v31814_v20 }
0x2638   : > { %v31808_v29 = vsub.f32 %v31806_v23, %v31807_v57  ;;  %v44305_v62 = vpack.c.bf16 %v31814_v20, %v31807_v57 }
0x2639   : > { %v31816_v21 = vand.u32 4294901760, %v31815_v32 }
0x263a   : > { %42050 = vmatmul.mubr.f32.vlgmr.msra.gmra.mrb[54].mxu0 %v46376_v26  ;;  %42224 = vmatmul.mubr.f32.vlgmr.msra.gmra.mrb[38].mxu1 %v46449_v2  ;;  %v31809_v60 = vand.u32 4294901760, %v31808_v29 }
0x263b   : > { %42056 = vmatprep.mubr.f32.mxu0 %v46347_v7  ;;  %42230 = vmatprep.mubr.f32.mxu1 %v46424_v41 }
0x263c   : > { %v44293_v27 = vpack.c.bf16 %v31816_v21, %v31809_v60 }
0x263e   : > { %44294 = vmatprep.subr.bf16.mxu0 %v44293_v27  ;;  %44414 = vmatprep.subr.bf16.mxu1 %v44293_v27 }
0x263f   : > { %44296 = vmatpush3.bf16.msra.mxu0 %v44293_v27  ;;  %44416 = vmatpush3.bf16.msra.mxu1 %v44293_v27 }
0x2640   : > { %44298 = vmatprep.subr.bf16.mxu0 %v44297_v45  ;;  %44418 = vmatprep.subr.bf16.mxu1 %v44297_v45 }
0x2642   : > { %42057 = vmatmul.mubr.f32.vlgmr.msra.gmra.mrb[54].mxu0 %v46352_v10  ;;  %42231 = vmatmul.mubr.f32.vlgmr.msra.gmra.mrb[38].mxu1 %v46426_v42 }
0x2643   : > { %44300 = vmatpush3.bf16.msra.mxu0 %v44297_v45  ;;  %44420 = vmatpush3.bf16.msra.mxu1 %v44297_v45 }
0x2644   : > { %44302 = vmatprep.subr.bf16.mxu0 %v44289_v9  ;;  %44422 = vmatprep.subr.bf16.mxu1 %v44289_v9 }
0x2645   : > { %42063 = vmatprep.mubr.f32.mxu0 %v46357_v13  ;;  %42237 = vmatprep.mubr.f32.mxu1 %v46429_v44 }
0x264a   : > { %42064 = vmatmul.mubr.f32.vlgmr.msra.gmra.mrb[54].mxu0 %v46361_v14  ;;  %42238 = vmatmul.mubr.f32.vlgmr.msra.gmra.mrb[38].mxu1 %v46434_v49 }
0x264b   : > { %44304 = vmatpush3.bf16.msra.mxu0 %v44289_v9  ;;  %44424 = vmatpush3.bf16.msra.mxu1 %v44289_v9 }
0x264c   : > { %44306 = vmatprep.subr.bf16.mxu0 %v44305_v62  ;;  %44426 = vmatprep.subr.bf16.mxu1 %v44305_v62 }
0x264d   : > { %42070 = vmatprep.mubr.f32.mxu0 %v46365_v17  ;;  %42244 = vmatprep.mubr.f32.mxu1 %v46437_v52 }
0x2652   : > { %42071 = vmatmul.mubr.f32.vlgmr.msra.gmra.mrb[54].mxu0 %v46368_v18  ;;  %42245 = vmatmul.mubr.f32.vlgmr.msra.gmra.mrb[38].mxu1 %v46440_v55 }
0x2653   : > { %44308 = vmatpush3.bf16.msra.mxu0 %v44305_v62  ;;  %44428 = vmatpush3.bf16.msra.mxu1 %v44305_v62 }
0x2654   : > { %44310 = vmatprep.subr.bf16.mxu0 %v44289_v9  ;;  %44430 = vmatprep.subr.bf16.mxu1 %v44289_v9 }
0x2655   : > { %42077 = vmatprep.mubr.f32.mxu0 %v46347_v7  ;;  %42251 = vmatprep.mubr.f32.mxu1 %v46424_v41 }
0x265a   : > { %42078 = vmatmul.mubr.f32.vlgmr.msra.gmra.mrb[54].mxu0 %v46352_v10  ;;  %42252 = vmatmul.mubr.f32.vlgmr.msra.gmra.mrb[38].mxu1 %v46426_v42 }
0x265b   : > { %44312 = vmatpush3.bf16.msra.mxu0 %v44289_v9  ;;  %44432 = vmatpush3.bf16.msra.mxu1 %v44289_v9 }
0x265c   : > { %42084 = vmatprep.mubr.f32.mxu0 %v46347_v7  ;;  %42258 = vmatprep.mubr.f32.mxu1 %v46424_v41 }
0x265d   : > { %44314 = vmatprep.subr.bf16.mxu0 %v48395_v37 }
0x2662   : > { %42085 = vmatmul.mubr.f32.vlgmr.msra.gmra.mrb[54].mxu0 %v46352_v10  ;;  %42259 = vmatmul.mubr.f32.vlgmr.msra.gmra.mrb[38].mxu1 %v46426_v42 }
0x2663   : > { %42331 = vmatprep.mubr.f32.mxu1 %v46374_v25  ;;  %v37256_v25 = vld [vmem:[%s48773_s0 + $0x98] sm:$0xff]  ;;  %44316 = vmatpush3.bf16.msra.mxu0 %v48395_v37 }
0x2664   : > { %v32240_v47 = vand.u32 4294901760, %v37256_v25 }
0x2666   : > { %v48405_v6 = vpack.c.bf16 %v32240_v47, %v32237_v35  ;;  %v32342_v28 = vsub.f32 %v37256_v25, %v32240_v47  ;;  %v32768_v25 = vand.u32 4294901760, %v37250_v46  ;;  %v48431_v35 = vand.u32 4294901760, %v32759_v40  ;;  %v37251_v47 = vld [vmem:[%s48773_s0 + $0x70] sm:$0xff] }
0x2667   : > { %v32771_v8 = vand.u32 4294901760, %v37251_v47 }
0x2668   : > { %44318 = vmatprep.subr.bf16.mxu0 %v48405_v6  ;;  %v32343_v24 = vand.u32 4294901760, %v32342_v28  ;;  %v44333_v38 = vpack.c.bf16 %v32342_v28, %v32335_v39  ;;  %v32862_v39 = vsub.f32 %v37250_v46, %v32768_v25 }
0x2669   : > { %44320 = vmatpush3.bf16.msra.mxu0 %v48405_v6 }
0x266a   : > { %v32344_v33 = vsub.f32 %v32342_v28, %v32343_v24  ;;  %44322 = vmatprep.subr.bf16.mxu0 %v44321_v48  ;;  %v44349_v11 = vpack.c.bf16 %v32343_v24, %v32336_v0  ;;  %v32834_v28 = vsub.f32 %v32759_v40, %v48431_v35  ;;  %v32863_v0 = vand.u32 4294901760, %v32862_v39 }
0x266b   : > { %v32869_v24 = vsub.f32 %v37251_v47, %v32771_v8  ;;  %v37259_v47 = vld [vmem:[%s48773_s0 + $0xb0] sm:$0xff] }
0x266c   : > { %v32345_v22 = vand.u32 4294901760, %v32344_v33  ;;  %v32835_v12 = vand.u32 4294901760, %v32834_v28  ;;  %v48448_v33 = vpack.c.bf16 %v32768_v25, %v32765_v56  ;;  %v33812_v34 = vand.u32 4294901760, %v37259_v47 }
0x266e   : > { %v44325_v1 = vpack.c.bf16 %v32345_v22, %v32338_v19  ;;  %v32857_v19 = vsub.f32 %v32855_v31, %v32856_v30  ;;  %v32864_v22 = vsub.f32 %v32862_v39, %v32863_v0 }
0x2735   : > { %v42086_v5 = vpop.f32.mrb[54].mxu0  ;;  %v48409_v61 = vpop.f32.mrb[38].mxu1 }
0x2736   : > { %v32228_v9 = vsel %vm3529_vm3, %v42086_v5, 0  ;;  %v32209_v23 = vpop.f32.mrb[55].mxu0  ;;  %v48412_v20 = vpop.f32.mrb[39].mxu1  ;;  %v32858_v5 = vand.u32 4294901760, %v32857_v19 }
0x2737   : > { %v48414_v57 = vand.u32 4294901760, %v32228_v9  ;;  %v32225_v45 = vsel %vm3529_vm3, %v32209_v23, 0  ;;  %v33800_v36 = vsel %vm3529_vm3, %v48412_v20, 0 }
0x2738   : > { %v32299_v32 = vand.u32 4294901760, %v32225_v45  ;;  %v48473_v25 = vand.u32 4294901760, %v33800_v36 }
0x2739   : > { %v32310_v29 = vsub.f32 %v32228_v9, %v48414_v57  ;;  %v32865_v9 = vand.u32 4294901760, %v32864_v22 }
0x273a   : > { %v32300_v62 = vsub.f32 %v32225_v45, %v32299_v32 }
0x273b   : > { %v32311_v21 = vand.u32 4294901760, %v32310_v29 }
0x273c   : > { %v32301_v60 = vand.u32 4294901760, %v32300_v62 }
0x273d   : > { %v32312_v27 = vsub.f32 %v32310_v29, %v32311_v21 }
0x273e   : > { %v32302_v53 = vsub.f32 %v32300_v62, %v32301_v60 }
0x273f   : > { %v32313_v50 = vand.u32 4294901760, %v32312_v27 }
0x2740   : > { %v32303_v15 = vand.u32 4294901760, %v32302_v53  ;;  %v44393_v53 = vpack.c.bf16 %v32863_v0, %v32856_v30 }
0x2742   : > { %42095 = vmatprep.mubr.f32.mxu0 %v32303_v15  ;;  %v37257_v15 = vld [vmem:[%s48773_s0 + $0xa0] sm:$0xff] }
0x2743   : > { %42096 = vmatmul.mubr.f32.vlgmr.msra.gmra.mrb[56].mxu0 %v32313_v50  ;;  %v37258_v50 = vld [vmem:[%s48773_s0 + $0xa8] sm:$0xff]  ;;  %v33806_v46 = vand.u32 4294901760, %v37257_v15 }
0x2744   : > { %44324 = vmatpush3.bf16.msra.mxu0 %v44321_v48  ;;  %42106 = vmatprep.mubr.f32.mxu0 %v32299_v32  ;;  %v32876_v48 = vsub.f32 %v37252_v4, %v32774_v58  ;;  %v33809_v56 = vand.u32 4294901760, %v37258_v50  ;;  %v37260_v4 = vld [vmem:[%s48773_s0 + $0xb8] sm:$0xff] }
0x2745   : > { %44326 = vmatprep.subr.bf16.mxu0 %v44325_v1  ;;  %v48482_v20 = vsub.f32 %v37257_v15, %v33806_v46 }
0x2746   : > { %v44381_v27 = vpack.c.bf16 %v32876_v48, %v32869_v24 }
0x2748   : > { %44328 = vmatpush3.bf16.msra.mxu0 %v44325_v1  ;;  %v32870_v1 = vand.u32 4294901760, %v32869_v24 }
0x2749   : > { %44330 = vmatprep.subr.bf16.mxu0 %v44329_v54 }
0x274b   : > { %42107 = vmatmul.mubr.f32.vlgmr.msra.gmra.mrb[56].mxu0 %v48414_v57 }
0x274c   : > { %44332 = vmatpush3.bf16.msra.mxu0 %v44329_v54  ;;  %42117 = vmatprep.mubr.f32.mxu0 %v32300_v62  ;;  %v32877_v54 = vand.u32 4294901760, %v32876_v48 }
0x274d   : > { %44334 = vmatprep.subr.bf16.mxu0 %v44333_v38 }
0x274e   : > { %v32878_v23 = vsub.f32 %v32876_v48, %v32877_v54  ;;  %v44397_v40 = vpack.c.bf16 %v32877_v54, %v32870_v1 }
0x2750   : > { %44336 = vmatpush3.bf16.msra.mxu0 %v44333_v38  ;;  %v32836_v38 = vsub.f32 %v32834_v28, %v32835_v12  ;;  %v32879_v62 = vand.u32 4294901760, %v32878_v23 }
0x2751   : > { %44338 = vmatprep.subr.bf16.mxu0 %v48395_v37 }
0x2752   : > { %v32837_v45 = vand.u32 4294901760, %v32836_v38 }
0x2753   : > { %42118 = vmatmul.mubr.f32.vlgmr.msra.gmra.mrb[56].mxu0 %v32310_v29  ;;  %v44369_v29 = vpack.c.bf16 %v32865_v9, %v32858_v5 }
0x2754   : > { %44340 = vmatpush3.bf16.msra.mxu0 %v48395_v37  ;;  %42128 = vmatprep.mubr.f32.mxu0 %v32301_v60 }
0x2755   : > { %44342 = vmatprep.subr.bf16.mxu0 %v48405_v6 }
0x2758   : > { %44344 = vmatpush3.bf16.msra.mxu0 %v48405_v6 }
0x2759   : > { %44346 = vmatprep.subr.bf16.mxu0 %v44345_v59 }
0x275b   : > { %42129 = vmatmul.mubr.f32.vlgmr.msra.gmra.mrb[56].mxu0 %v32311_v21 }
0x275c   : > { %44348 = vmatpush3.bf16.msra.mxu0 %v44345_v59  ;;  %42139 = vmatprep.mubr.f32.mxu0 %v32299_v32  ;;  %v48452_v59 = vpack.c.bf16 %v32774_v58, %v32771_v8  ;;  %v33815_v8 = vand.u32 4294901760, %v37260_v4  ;;  %v33903_v58 = vsub.f32 %v37258_v50, %v33809_v56 }
0x275d   : > { %44350 = vmatprep.subr.bf16.mxu0 %v44349_v11 }
0x275e   : > { %v33904_v0 = vand.u32 4294901760, %v33903_v58  ;;  %v33917_v48 = vsub.f32 %v37260_v4, %v33815_v8 }
0x2760   : > { %44352 = vmatpush3.bf16.msra.mxu0 %v44349_v11  ;;  %v32845_v11 = vand.u32 4294901760, %v32844_v43  ;;  %v33905_v22 = vsub.f32 %v33903_v58, %v33904_v0  ;;  %v33918_v54 = vand.u32 4294901760, %v33917_v48 }
0x2761   : > { %44354 = vmatprep.subr.bf16.mxu0 %v48395_v37 }
0x2763   : > { %42140 = vmatmul.mubr.f32.vlgmr.msra.gmra.mrb[56].mxu0 %v48414_v57 }
0x2764   : > { %44356 = vmatpush3.bf16.msra.mxu0 %v48395_v37  ;;  %42150 = vmatprep.mubr.f32.mxu0 %v32299_v32  ;;  %v32871_v37 = vsub.f32 %v32869_v24, %v32870_v1  ;;  %v32846_v32 = vsub.f32 %v32844_v43, %v32845_v11  ;;  %v33910_v24 = vsub.f32 %v37259_v47, %v33812_v34 }
0x2765   : > { %44358 = vmatprep.subr.bf16.mxu0 %v48405_v6 }
0x2766   : > { %v32847_v21 = vand.u32 4294901760, %v32846_v32  ;;  %v33911_v1 = vand.u32 4294901760, %v33910_v24 }
0x2768   : > { %44360 = vmatpush3.bf16.msra.mxu0 %v48405_v6  ;;  %v32872_v6 = vand.u32 4294901760, %v32871_v37  ;;  %v33912_v37 = vsub.f32 %v33910_v24, %v33911_v1 }
0x2769   : > { %44362 = vmatprep.subr.bf16.mxu0 %v48448_v33 }
0x276a   : > { %v44373_v60 = vpack.c.bf16 %v32879_v62, %v32872_v6 }
0x276b   : > { %42151 = vmatmul.mubr.f32.vlgmr.msra.gmra.mrb[56].mxu0 %v48414_v57  ;;  %v44377_v57 = vpack.c.bf16 %v32862_v39, %v32855_v31  ;;  %v33803_v31 = vsel %vm3529_vm3, %v48409_v61, 0  ;;  %v33875_v39 = vsub.f32 %v33800_v36, %v48473_v25  ;;  %v44433_v61 = vpack.c.bf16 %v33809_v56, %v33806_v46 }
0x276c   : > { %44364 = vmatpush3.bf16.msra.mxu0 %v48448_v33  ;;  %42161 = vmatprep.mubr.f32.mxu0 %v32837_v45  ;;  %v48488_v30 = vand.u32 4294901760, %v33803_v31 }
0x276d   : > { %44366 = vmatprep.subr.bf16.mxu0 %v48452_v59 }
0x276e   : > { %v33885_v19 = vsub.f32 %v33803_v31, %v48488_v30 }
0x2770   : > { %44368 = vmatpush3.bf16.msra.mxu0 %v48452_v59  ;;  %v33886_v9 = vand.u32 4294901760, %v33885_v19 }
0x2771   : > { %44370 = vmatprep.subr.bf16.mxu0 %v44369_v29 }
0x2772   : > { %v33887_v45 = vsub.f32 %v33885_v19, %v33886_v9 }
0x2773   : > { %42162 = vmatmul.mubr.f32.vlgmr.msra.gmra.mrb[56].mxu0 %v32847_v21  ;;  %v44449_v21 = vpack.c.bf16 %v33903_v58, %v48482_v20 }
0x2774   : > { %44372 = vmatpush3.bf16.msra.mxu0 %v44369_v29  ;;  %42172 = vmatprep.mubr.f32.mxu0 %v48431_v35  ;;  %v33913_v29 = vand.u32 4294901760, %v33912_v37  ;;  %v33888_v62 = vand.u32 4294901760, %v33887_v45 }
0x2775   : > { %44374 = vmatprep.subr.bf16.mxu0 %v44373_v60 }
0x2778   : > { %44376 = vmatpush3.bf16.msra.mxu0 %v44373_v60 }
0x2779   : > { %44378 = vmatprep.subr.bf16.mxu0 %v44377_v57 }
0x277b   : > { %42173 = vmatmul.mubr.f32.vlgmr.msra.gmra.mrb[56].mxu0 %v48442_v16 }
0x277c   : > { %44380 = vmatpush3.bf16.msra.mxu0 %v44377_v57  ;;  %42183 = vmatprep.mubr.f32.mxu0 %v32834_v28  ;;  %v33897_v28 = vand.u32 4294901760, %v48482_v20  ;;  %v44469_v57 = vpack.c.bf16 %v33918_v54, %v33911_v1 }
0x277d   : > { %44382 = vmatprep.subr.bf16.mxu0 %v44381_v27 }
0x277e   : > { %v44465_v60 = vpack.c.bf16 %v33904_v0, %v33897_v28 }
0x2780   : > { %44384 = vmatpush3.bf16.msra.mxu0 %v44381_v27  ;;  %v37261_v27 = vld [vmem:[#allocation13 + $0x1] ss:$0 sm:$0xff] }
0x2781   : > { %44386 = vmatprep.subr.bf16.mxu0 %v48448_v33 }
0x2783   : > { %42184 = vmatmul.mubr.f32.vlgmr.msra.gmra.mrb[56].mxu0 %v32844_v43  ;;  %v33898_v43 = vsub.f32 %v48482_v20, %v33897_v28 }
0x2784   : > { %44388 = vmatpush3.bf16.msra.mxu0 %v48448_v33  ;;  %42194 = vmatprep.mubr.f32.mxu0 %v32835_v12  ;;  %v33876_v12 = vand.u32 4294901760, %v33875_v39 }
0x2785   : > { %44390 = vmatprep.subr.bf16.mxu0 %v48452_v59  ;;  %v33899_v5 = vand.u32 4294901760, %v33898_v43 }
0x2786   : > { %v33877_v38 = vsub.f32 %v33875_v39, %v33876_v12 }
0x2788   : > { %44392 = vmatpush3.bf16.msra.mxu0 %v48452_v59  ;;  %v33878_v23 = vand.u32 4294901760, %v33877_v38 }
0x2789   : > { %44394 = vmatprep.subr.bf16.mxu0 %v44393_v53 }
0x278b   : > { %42195 = vmatmul.mubr.f32.vlgmr.msra.gmra.mrb[56].mxu0 %v32845_v11  ;;  %v44437_v11 = vpack.c.bf16 %v33815_v8, %v33812_v34 }
0x278c   : > { %44396 = vmatpush3.bf16.msra.mxu0 %v44393_v53  ;;  %42205 = vmatprep.mubr.f32.mxu0 %v48431_v35 }
0x278d   : > { %44398 = vmatprep.subr.bf16.mxu0 %v44397_v40 }
0x2790   : > { %44400 = vmatpush3.bf16.msra.mxu0 %v44397_v40 }
0x2791   : > { %44402 = vmatprep.subr.bf16.mxu0 %v48448_v33 }
0x2793   : > { %42206 = vmatmul.mubr.f32.vlgmr.msra.gmra.mrb[56].mxu0 %v48442_v16 }
0x2794   : > { %44404 = vmatpush3.bf16.msra.mxu0 %v48448_v33  ;;  %42216 = vmatprep.mubr.f32.mxu0 %v48431_v35  ;;  %v33906_v33 = vand.u32 4294901760, %v33905_v22  ;;  %v33919_v35 = vsub.f32 %v33917_v48, %v33918_v54 }
0x2795   : > { %44406 = vmatprep.subr.bf16.mxu0 %v48452_v59 }
0x2796   : > { %v44441_v32 = vpack.c.bf16 %v33906_v33, %v33899_v5  ;;  %v33920_v6 = vand.u32 4294901760, %v33919_v35 }
0x2798   : > { %44408 = vmatpush3.bf16.msra.mxu0 %v48452_v59  ;;  %v44445_v59 = vpack.c.bf16 %v33920_v6, %v33913_v29 }
0x2799   : > { %44434 = vmatprep.subr.bf16.mxu0 %v44433_v61 }
0x279b   : > { %42217 = vmatmul.mubr.f32.vlgmr.msra.gmra.mrb[56].mxu0 %v48442_v16  ;;  %v44453_v16 = vpack.c.bf16 %v33917_v48, %v33910_v24 }
0x279c   : > { %44436 = vmatpush3.bf16.msra.mxu0 %v44433_v61  ;;  %42269 = vmatprep.mubr.f32.mxu0 %v33878_v23 }
0x279d   : > { %44438 = vmatprep.subr.bf16.mxu0 %v44437_v11 }
0x27a0   : > { %44440 = vmatpush3.bf16.msra.mxu0 %v44437_v11 }
0x27a1   : > { %44442 = vmatprep.subr.bf16.mxu0 %v44441_v32 }
0x27a3   : > { %42270 = vmatmul.mubr.f32.vlgmr.msra.gmra.mrb[56].mxu0 %v33888_v62 }
0x27a4   : > { %44444 = vmatpush3.bf16.msra.mxu0 %v44441_v32  ;;  %42280 = vmatprep.mubr.f32.mxu0 %v48473_v25 }
0x27a5   : > { %44446 = vmatprep.subr.bf16.mxu0 %v44445_v59 }
0x27a8   : > { %44448 = vmatpush3.bf16.msra.mxu0 %v44445_v59 }
0x27a9   : > { %44450 = vmatprep.subr.bf16.mxu0 %v44449_v21 }
0x27ab   : > { %42281 = vmatmul.mubr.f32.vlgmr.msra.gmra.mrb[56].mxu0 %v48488_v30 }
0x27ac   : > { %44452 = vmatpush3.bf16.msra.mxu0 %v44449_v21  ;;  %42291 = vmatprep.mubr.f32.mxu0 %v33875_v39 }
0x27ad   : > { %44454 = vmatprep.subr.bf16.mxu0 %v44453_v16 }
0x27b0   : > { %44456 = vmatpush3.bf16.msra.mxu0 %v44453_v16 }
0x27b1   : > { %44458 = vmatprep.subr.bf16.mxu0 %v44433_v61 }
0x27b3   : > { %42292 = vmatmul.mubr.f32.vlgmr.msra.gmra.mrb[56].mxu0 %v33885_v19 }
0x27b4   : > { %44460 = vmatpush3.bf16.msra.mxu0 %v44433_v61  ;;  %42302 = vmatprep.mubr.f32.mxu0 %v33876_v12 }
0x27b5   : > { %44462 = vmatprep.subr.bf16.mxu0 %v44437_v11 }
0x27b8   : > { %44464 = vmatpush3.bf16.msra.mxu0 %v44437_v11 }
0x27b9   : > { %44466 = vmatprep.subr.bf16.mxu0 %v44465_v60 }
0x27bb   : > { %42303 = vmatmul.mubr.f32.vlgmr.msra.gmra.mrb[56].mxu0 %v33886_v9 }
0x27bc   : > { %44468 = vmatpush3.bf16.msra.mxu0 %v44465_v60  ;;  %42313 = vmatprep.mubr.f32.mxu0 %v48473_v25 }
0x27bd   : > { %44470 = vmatprep.subr.bf16.mxu0 %v44469_v57 }
0x27c0   : > { %44472 = vmatpush3.bf16.msra.mxu0 %v44469_v57 }
0x27c1   : > { %44474 = vmatprep.subr.bf16.mxu0 %v44433_v61 }
0x27c3   : > { %42314 = vmatmul.mubr.f32.vlgmr.msra.gmra.mrb[56].mxu0 %v48488_v30 }
0x27c4   : > { %44476 = vmatpush3.bf16.msra.mxu0 %v44433_v61  ;;  %42324 = vmatprep.mubr.f32.mxu0 %v48473_v25 }
0x27c5   : > { %44478 = vmatprep.subr.bf16.mxu0 %v44437_v11 }
0x27c8   : > { %44480 = vmatpush3.bf16.msra.mxu0 %v44437_v11 }
0x27cb   : > { %42325 = vmatmul.mubr.f32.vlgmr.msra.gmra.mrb[56].mxu0 %v48488_v30 }
0x27cc   : > { %42505 = vmatprep.mubr.f32.mxu0 %v46447_v63 }
0x289e   : > { %v42326_v53 = vpop.f32.mrb[56].mxu0 }
0x289f   : > { %v34342_v15 = vadd.f32 %v42326_v53, %v37261_v27  ;;  %v34323_v50 = vpop.f32.mrb[57].mxu0 }
0x28a0   : > { %v34341_v36 = vadd.f32 %v37261_v27, %v34323_v50 }
0x28a1   : > { %v34344_v46 = vmax.f32 %v34342_v15, 0.0 }
0x28a2   : > { %v34343_v40 = vmax.f32 %v34341_v36, 0.0 }
0x28a3   : > { %v48508_v56 = vadd.f32 %v34344_v46, %v48208_v51 }
0x28a4   : > { %v48511_v47 = vadd.f32 %v34343_v40, %v48211_v3 }
0x28a5   : > { %v34356_v25 = vand.u32 4294901760, %v48508_v56 }
0x28a6   : > { %v34353_v4 = vand.u32 4294901760, %v48511_v47 }
0x28a7   : > { %v34448_v20 = vsub.f32 %v48508_v56, %v34356_v25 }
0x28a8   : > { %v44481_v63 = vpack.c.bf16 %v34356_v25, %v34353_v4  ;;  %v34441_v34 = vsub.f32 %v48511_v47, %v34353_v4  ;;  %v34348_v25 = vld [vmem:[%s48777_s12] sm:$0xff]  ;;  %v34349_v4 = vld [vmem:[%s48777_s12 + $0x8] sm:$0xff] }
0x28a9   : > { %v34449_v8 = vand.u32 4294901760, %v34448_v20 }
0x28aa   : > { %44482 = vmatprep.subr.bf16.mxu1 %v44481_v63  ;;  %44602 = vmatprep.subr.bf16.mxu0 %v44481_v63  ;;  %v34442_v58 = vand.u32 4294901760, %v34441_v34  ;;  %v44489_v31 = vpack.c.bf16 %v34448_v20, %v34441_v34 }
0x28ab   : > { %44484 = vmatpush3.bf16.msra.mxu1 %v44481_v63  ;;  %44604 = vmatpush3.bf16.msra.mxu0 %v44481_v63  ;;  %v34450_v51 = vsub.f32 %v34448_v20, %v34449_v8  ;;  %v35394_v20 = vsel %vm3529_vm3, %v48511_v47, 0 }
0x28ac   : > { %v34443_v39 = vsub.f32 %v34441_v34, %v34442_v58  ;;  %v44497_v3 = vpack.c.bf16 %v34449_v8, %v34442_v58  ;;  %v35403_v34 = vand.u32 4294901760, %v34349_v4  ;;  %v48581_v8 = vand.u32 4294901760, %v35394_v20  ;;  %v34350_v58 = vld [vmem:[%s48777_s12 + $0x10] sm:$0xff] }
0x28ad   : > { %v34451_v28 = vand.u32 4294901760, %v34450_v51  ;;  %v35397_v51 = vsel %vm3529_vm3, %v48508_v56, 0  ;;  %v35406_v47 = vand.u32 4294901760, %v34350_v58 }
0x28ae   : > { %42332 = vmatmul.mubr.f32.vlgmr.msra.gmra.mrb[40].mxu1 %v46376_v26  ;;  %42506 = vmatmul.mubr.f32.vlgmr.msra.gmra.mrb[58].mxu0 %v46449_v2  ;;  %v34444_v30 = vand.u32 4294901760, %v34443_v39 }
0x28af   : > { %42338 = vmatprep.mubr.f32.mxu1 %v46347_v7  ;;  %42512 = vmatprep.mubr.f32.mxu0 %v46424_v41 }
0x28b0   : > { %v44485_v0 = vpack.c.bf16 %v34451_v28, %v34444_v30  ;;  %v35497_v28 = vsub.f32 %v34349_v4, %v35403_v34  ;;  %v35469_v30 = vsub.f32 %v35394_v20, %v48581_v8 }
0x28b2   : > { %44486 = vmatprep.subr.bf16.mxu1 %v44485_v0  ;;  %44606 = vmatprep.subr.bf16.mxu0 %v44485_v0 }
0x28b3   : > { %44488 = vmatpush3.bf16.msra.mxu1 %v44485_v0  ;;  %44608 = vmatpush3.bf16.msra.mxu0 %v44485_v0  ;;  %v48592_v0 = vand.u32 4294901760, %v35397_v51 }
0x28b4   : > { %44490 = vmatprep.subr.bf16.mxu1 %v44489_v31  ;;  %44610 = vmatprep.subr.bf16.mxu0 %v44489_v31 }
0x28b5   : > { %v35479_v56 = vsub.f32 %v35397_v51, %v48592_v0 }
0x28b6   : > { %42339 = vmatmul.mubr.f32.vlgmr.msra.gmra.mrb[40].mxu1 %v46352_v10  ;;  %42513 = vmatmul.mubr.f32.vlgmr.msra.gmra.mrb[58].mxu0 %v46426_v42 }
0x28b7   : > { %44492 = vmatpush3.bf16.msra.mxu1 %v44489_v31  ;;  %44612 = vmatpush3.bf16.msra.mxu0 %v44489_v31  ;;  %v34351_v31 = vld [vmem:[%s48777_s12 + $0x18] sm:$0xff] }
0x28b8   : > { %44494 = vmatprep.subr.bf16.mxu1 %v44481_v63  ;;  %44614 = vmatprep.subr.bf16.mxu0 %v44481_v63  ;;  %v35409_v39 = vand.u32 4294901760, %v34351_v31 }
0x28b9   : > { %42345 = vmatprep.mubr.f32.mxu1 %v46357_v13  ;;  %42519 = vmatprep.mubr.f32.mxu0 %v46429_v44  ;;  %v37262_v13 = vld [vmem:[%s48777_s12 + $0x20] sm:$0xff] }
0x28be   : > { %42346 = vmatmul.mubr.f32.vlgmr.msra.gmra.mrb[40].mxu1 %v46361_v14  ;;  %42520 = vmatmul.mubr.f32.vlgmr.msra.gmra.mrb[58].mxu0 %v46434_v49  ;;  %v37263_v14 = vld [vmem:[%s48777_s12 + $0x28] sm:$0xff] }
0x28bf   : > { %44496 = vmatpush3.bf16.msra.mxu1 %v44481_v63  ;;  %44616 = vmatpush3.bf16.msra.mxu0 %v44481_v63 }
0x28c0   : > { %44498 = vmatprep.subr.bf16.mxu1 %v44497_v3  ;;  %44618 = vmatprep.subr.bf16.mxu0 %v44497_v3 }
0x28c1   : > { %42352 = vmatprep.mubr.f32.mxu1 %v46365_v17  ;;  %42526 = vmatprep.mubr.f32.mxu0 %v46437_v52  ;;  %v34866_v17 = vand.u32 4294901760, %v37262_v13 }
0x28c3   : > { %v34956_v44 = vsub.f32 %v37262_v13, %v34866_v17 }
0x28c5   : > { %v34957_v52 = vand.u32 4294901760, %v34956_v44 }
0x28c6   : > { %42353 = vmatmul.mubr.f32.vlgmr.msra.gmra.mrb[40].mxu1 %v46368_v18  ;;  %42527 = vmatmul.mubr.f32.vlgmr.msra.gmra.mrb[58].mxu0 %v46440_v55  ;;  %v34869_v18 = vand.u32 4294901760, %v37263_v14 }
0x28c7   : > { %44500 = vmatpush3.bf16.msra.mxu1 %v44497_v3  ;;  %44620 = vmatpush3.bf16.msra.mxu0 %v44497_v3  ;;  %v34958_v24 = vsub.f32 %v34956_v44, %v34957_v52 }
0x28c8   : > { %44502 = vmatprep.subr.bf16.mxu1 %v44481_v63  ;;  %44622 = vmatprep.subr.bf16.mxu0 %v44481_v63  ;;  %v48545_v26 = vpack.c.bf16 %v34869_v18, %v34866_v17  ;;  %v35504_v17 = vsub.f32 %v34350_v58, %v35406_v47 }
0x28c9   : > { %42359 = vmatprep.mubr.f32.mxu1 %v46347_v7  ;;  %42533 = vmatprep.mubr.f32.mxu0 %v46424_v41  ;;  %v34959_v43 = vand.u32 4294901760, %v34958_v24  ;;  %v35480_v24 = vand.u32 4294901760, %v35479_v56 }
0x28ce   : > { %42360 = vmatmul.mubr.f32.vlgmr.msra.gmra.mrb[40].mxu1 %v46352_v10  ;;  %42534 = vmatmul.mubr.f32.vlgmr.msra.gmra.mrb[58].mxu0 %v46426_v42 }
0x28cf   : > { %44504 = vmatpush3.bf16.msra.mxu1 %v44481_v63  ;;  %44624 = vmatpush3.bf16.msra.mxu0 %v44481_v63  ;;  %v35400_v63 = vand.u32 4294901760, %v34348_v25 }
0x28d0   : > { %42366 = vmatprep.mubr.f32.mxu1 %v46347_v7  ;;  %42540 = vmatprep.mubr.f32.mxu0 %v46424_v41  ;;  %v34963_v7 = vsub.f32 %v37263_v14, %v34869_v18  ;;  %v37265_v41 = vld [vmem:[%s48777_s12 + $0x38] sm:$0xff]  ;;  %v35498_v14 = vand.u32 4294901760, %v35497_v28  ;;  %v35511_v18 = vsub.f32 %v34351_v31, %v35409_v39 }
0x28d1   : > { %44506 = vmatprep.subr.bf16.mxu1 %v48545_v26  ;;  %v34875_v49 = vand.u32 4294901760, %v37265_v41  ;;  %v35490_v3 = vsub.f32 %v34348_v25, %v35400_v63 }
0x28d2   : > { %v34964_v55 = vand.u32 4294901760, %v34963_v7  ;;  %v44521_v37 = vpack.c.bf16 %v34963_v7, %v34956_v44  ;;  %v35470_v44 = vand.u32 4294901760, %v35469_v30 }
0x28d3   : > { %v34977_v61 = vsub.f32 %v37265_v41, %v34875_v49  ;;  %v35491_v13 = vand.u32 4294901760, %v35490_v3  ;;  %v35499_v41 = vsub.f32 %v35497_v28, %v35498_v14 }
0x28d4   : > { %v34965_v48 = vsub.f32 %v34963_v7, %v34964_v55  ;;  %v44537_v23 = vpack.c.bf16 %v34964_v55, %v34957_v52  ;;  %v48598_v7 = vpack.c.bf16 %v35403_v34, %v35400_v63  ;;  %v35471_v52 = vsub.f32 %v35469_v30, %v35470_v44 }
0x28d5   : > { %v34978_v1 = vand.u32 4294901760, %v34977_v61  ;;  %v48602_v55 = vpack.c.bf16 %v35409_v39, %v35406_v47 }
0x28d6   : > { %42367 = vmatmul.mubr.f32.vlgmr.msra.gmra.mrb[40].mxu1 %v46352_v10  ;;  %42541 = vmatmul.mubr.f32.vlgmr.msra.gmra.mrb[58].mxu0 %v46426_v42  ;;  %v37264_v10 = vld [vmem:[%s48777_s12 + $0x30] sm:$0xff]  ;;  %v34966_v19 = vand.u32 4294901760, %v34965_v48 }
0x28d7   : > { %v34872_v42 = vand.u32 4294901760, %v37264_v10  ;;  %44508 = vmatpush3.bf16.msra.mxu1 %v48545_v26  ;;  %v34979_v11 = vsub.f32 %v34977_v61, %v34978_v1 }
0x28d8   : > { %v44513_v54 = vpack.c.bf16 %v34966_v19, %v34959_v43  ;;  %v35472_v43 = vand.u32 4294901760, %v35471_v52  ;;  %v35481_v19 = vsub.f32 %v35479_v56, %v35480_v24 }
0x28d9   : > { %v48555_v2 = vpack.c.bf16 %v34875_v49, %v34872_v42  ;;  %v34970_v12 = vsub.f32 %v37264_v10, %v34872_v42  ;;  %v34980_v9 = vand.u32 4294901760, %v34979_v11  ;;  %v35492_v10 = vsub.f32 %v35490_v3, %v35491_v13 }
0x28da   : > { %v35505_v42 = vand.u32 4294901760, %v35504_v17  ;;  %v35512_v49 = vand.u32 4294901760, %v35511_v18  ;;  %v44569_v11 = vpack.c.bf16 %v35497_v28, %v35490_v3 }
0x28db   : > { %44510 = vmatprep.subr.bf16.mxu1 %v48555_v2  ;;  %v34971_v22 = vand.u32 4294901760, %v34970_v12  ;;  %v44525_v35 = vpack.c.bf16 %v34977_v61, %v34970_v12  ;;  %v35493_v48 = vand.u32 4294901760, %v35492_v10 }
0x28dc   : > { %44512 = vmatpush3.bf16.msra.mxu1 %v48555_v2  ;;  %v35513_v61 = vsub.f32 %v35511_v18, %v35512_v49 }
0x28dd   : > { %v34972_v38 = vsub.f32 %v34970_v12, %v34971_v22  ;;  %44514 = vmatprep.subr.bf16.mxu1 %v44513_v54  ;;  %v44541_v45 = vpack.c.bf16 %v34978_v1, %v34971_v22  ;;  %v35500_v12 = vand.u32 4294901760, %v35499_v41 }
0x28de   : > { %v35514_v1 = vand.u32 4294901760, %v35513_v61 }
0x28df   : > { %v34973_v5 = vand.u32 4294901760, %v34972_v38  ;;  %v44561_v22 = vpack.c.bf16 %v35500_v12, %v35493_v48 }
0x28e1   : > { %v44517_v33 = vpack.c.bf16 %v34980_v9, %v34973_v5  ;;  %v44573_v5 = vpack.c.bf16 %v35511_v18, %v35504_v17  ;;  %v44585_v9 = vpack.c.bf16 %v35498_v14, %v35491_v13 }
0x29a9   : > { %v42368_v32 = vpop.f32.mrb[40].mxu1  ;;  %v48559_v29 = vpop.f32.mrb[58].mxu0 }
0x29aa   : > { %v34863_v6 = vsel %vm3529_vm3, %v42368_v32, 0  ;;  %v34844_v62 = vpop.f32.mrb[41].mxu1  ;;  %v48562_v59 = vpop.f32.mrb[59].mxu0 }
0x29ab   : > { %v48564_v21 = vand.u32 4294901760, %v34863_v6  ;;  %v34860_v16 = vsel %vm3529_vm3, %v34844_v62, 0  ;;  %v37268_v62 = vld [vmem:[%s48777_s12 + $0x50] sm:$0xff] }
0x29ac   : > { %v34934_v60 = vand.u32 4294901760, %v34860_v16 }
0x29ad   : > { %v34945_v57 = vsub.f32 %v34863_v6, %v48564_v21 }
0x29ae   : > { %v34935_v27 = vsub.f32 %v34860_v16, %v34934_v60  ;;  %v36447_v16 = vand.u32 4294901760, %v37268_v62 }
0x29af   : > { %v34946_v53 = vand.u32 4294901760, %v34945_v57 }
0x29b0   : > { %v34936_v15 = vand.u32 4294901760, %v34935_v27 }
0x29b1   : > { %v34947_v50 = vsub.f32 %v34945_v57, %v34946_v53 }
0x29b2   : > { %v34937_v36 = vsub.f32 %v34935_v27, %v34936_v15 }
0x29b3   : > { %v34948_v40 = vand.u32 4294901760, %v34947_v50 }
0x29b4   : > { %v34938_v46 = vand.u32 4294901760, %v34937_v36 }
0x29b6   : > { %42377 = vmatprep.mubr.f32.mxu1 %v34938_v46  ;;  %v36545_v46 = vsub.f32 %v37268_v62, %v36447_v16 }
0x29b7   : > { %42378 = vmatmul.mubr.f32.vlgmr.msra.gmra.mrb[42].mxu1 %v34948_v40 }
0x29b8   : > { %44516 = vmatpush3.bf16.msra.mxu1 %v44513_v54  ;;  %42388 = vmatprep.mubr.f32.mxu1 %v34934_v60  ;;  %v35482_v54 = vand.u32 4294901760, %v35481_v19  ;;  %v36546_v34 = vand.u32 4294901760, %v36545_v46 }
0x29b9   : > { %44518 = vmatprep.subr.bf16.mxu1 %v44517_v33 }
0x29ba   : > { %v36547_v28 = vsub.f32 %v36545_v46, %v36546_v34 }
0x29bc   : > { %44520 = vmatpush3.bf16.msra.mxu1 %v44517_v33  ;;  %v37266_v33 = vld [vmem:[%s48777_s12 + $0x40] sm:$0xff] }
0x29bd   : > { %44522 = vmatprep.subr.bf16.mxu1 %v44521_v37 }
0x29bf   : > { %42389 = vmatmul.mubr.f32.vlgmr.msra.gmra.mrb[42].mxu1 %v48564_v21 }
0x29c0   : > { %44524 = vmatpush3.bf16.msra.mxu1 %v44521_v37  ;;  %42399 = vmatprep.mubr.f32.mxu1 %v34935_v27  ;;  %v37267_v37 = vld [vmem:[%s48777_s12 + $0x48] sm:$0xff]  ;;  %v36438_v27 = vsel %vm3529_vm3, %v48559_v29, 0 }
0x29c1   : > { %44526 = vmatprep.subr.bf16.mxu1 %v44525_v35  ;;  %v36444_v32 = vand.u32 4294901760, %v37267_v37  ;;  %v48638_v50 = vand.u32 4294901760, %v36438_v27 }
0x29c3   : > { %v36520_v20 = vsub.f32 %v36438_v27, %v48638_v50 }
0x29c4   : > { %44528 = vmatpush3.bf16.msra.mxu1 %v44525_v35  ;;  %v36435_v35 = vsel %vm3529_vm3, %v48562_v59, 0 }
0x29c5   : > { %44530 = vmatprep.subr.bf16.mxu1 %v48545_v26  ;;  %v48623_v6 = vand.u32 4294901760, %v36435_v35  ;;  %v36521_v39 = vand.u32 4294901760, %v36520_v20 }
0x29c7   : > { %42400 = vmatmul.mubr.f32.vlgmr.msra.gmra.mrb[42].mxu1 %v34945_v57  ;;  %v36538_v57 = vsub.f32 %v37267_v37, %v36444_v32  ;;  %v36522_v13 = vsub.f32 %v36520_v20, %v36521_v39 }
0x29c8   : > { %44532 = vmatpush3.bf16.msra.mxu1 %v48545_v26  ;;  %42410 = vmatprep.mubr.f32.mxu1 %v34936_v15 }
0x29c9   : > { %44534 = vmatprep.subr.bf16.mxu1 %v48555_v2  ;;  %v36539_v36 = vand.u32 4294901760, %v36538_v57 }
0x29cb   : > { %v36540_v63 = vsub.f32 %v36538_v57, %v36539_v36 }
0x29cc   : > { %44536 = vmatpush3.bf16.msra.mxu1 %v48555_v2 }
0x29cd   : > { %44538 = vmatprep.subr.bf16.mxu1 %v44537_v23  ;;  %v36541_v3 = vand.u32 4294901760, %v36540_v63 }
0x29cf   : > { %42411 = vmatmul.mubr.f32.vlgmr.msra.gmra.mrb[42].mxu1 %v34946_v53  ;;  %v36510_v53 = vsub.f32 %v36435_v35, %v48623_v6 }
0x29d0   : > { %44540 = vmatpush3.bf16.msra.mxu1 %v44537_v23  ;;  %42421 = vmatprep.mubr.f32.mxu1 %v34934_v60  ;;  %v36441_v23 = vand.u32 4294901760, %v37266_v33 }
0x29d1   : > { %44542 = vmatprep.subr.bf16.mxu1 %v44541_v45  ;;  %v36511_v25 = vand.u32 4294901760, %v36510_v53 }
0x29d2   : > { %v48632_v59 = vsub.f32 %v37266_v33, %v36441_v23  ;;  %v44625_v29 = vpack.c.bf16 %v36444_v32, %v36441_v23 }
0x29d3   : > { %v36512_v31 = vsub.f32 %v36510_v53, %v36511_v25 }
0x29d4   : > { %44544 = vmatpush3.bf16.msra.mxu1 %v44541_v45  ;;  %v44589_v45 = vpack.c.bf16 %v35512_v49, %v35505_v42  ;;  %v36532_v15 = vand.u32 4294901760, %v48632_v59 }
0x29d5   : > { %44546 = vmatprep.subr.bf16.mxu1 %v48545_v26 }
0x29d6   : > { %v36533_v4 = vsub.f32 %v48632_v59, %v36532_v15  ;;  %v44657_v10 = vpack.c.bf16 %v36539_v36, %v36532_v15 }
0x29d7   : > { %42422 = vmatmul.mubr.f32.vlgmr.msra.gmra.mrb[42].mxu1 %v48564_v21 }
0x29d8   : > { %44548 = vmatpush3.bf16.msra.mxu1 %v48545_v26  ;;  %42432 = vmatprep.mubr.f32.mxu1 %v34934_v60  ;;  %v35506_v26 = vsub.f32 %v35504_v17, %v35505_v42  ;;  %v36534_v47 = vand.u32 4294901760, %v36533_v4  ;;  %v36548_v17 = vand.u32 4294901760, %v36547_v28  ;;  %v37270_v42 = vld [vmem:[#allocation15] ss:$0 sm:$0xff] }
0x29d9   : > { %44550 = vmatprep.subr.bf16.mxu1 %v48555_v2 }
0x29da   : > { %v44633_v14 = vpack.c.bf16 %v36541_v3, %v36534_v47 }
0x29dc   : > { %44552 = vmatpush3.bf16.msra.mxu1 %v48555_v2  ;;  %v35507_v2 = vand.u32 4294901760, %v35506_v26 }
0x29dd   : > { %44554 = vmatprep.subr.bf16.mxu1 %v48598_v7 }
0x29de   : > { %v44565_v38 = vpack.c.bf16 %v35514_v1, %v35507_v2 }
0x29df   : > { %42433 = vmatmul.mubr.f32.vlgmr.msra.gmra.mrb[42].mxu1 %v48564_v21  ;;  %v37269_v21 = vld [vmem:[%s48777_s12 + $0x58] sm:$0xff] }
0x29e0   : > { %44556 = vmatpush3.bf16.msra.mxu1 %v48598_v7  ;;  %42443 = vmatprep.mubr.f32.mxu1 %v35472_v43  ;;  %v36450_v60 = vand.u32 4294901760, %v37269_v21 }
0x29e1   : > { %44558 = vmatprep.subr.bf16.mxu1 %v48602_v55 }
0x29e2   : > { %v36552_v40 = vsub.f32 %v37269_v21, %v36450_v60  ;;  %v44629_v51 = vpack.c.bf16 %v36450_v60, %v36447_v16 }
0x29e4   : > { %44560 = vmatpush3.bf16.msra.mxu1 %v48602_v55  ;;  %v36553_v58 = vand.u32 4294901760, %v36552_v40 }
0x29e5   : > { %44562 = vmatprep.subr.bf16.mxu1 %v44561_v22 }
0x29e6   : > { %v44661_v41 = vpack.c.bf16 %v36553_v58, %v36546_v34 }
0x29e7   : > { %42444 = vmatmul.mubr.f32.vlgmr.msra.gmra.mrb[42].mxu1 %v35482_v54 }
0x29e8   : > { %44564 = vmatpush3.bf16.msra.mxu1 %v44561_v22  ;;  %42454 = vmatprep.mubr.f32.mxu1 %v48581_v8 }
0x29e9   : > { %44566 = vmatprep.subr.bf16.mxu1 %v44565_v38 }
0x29ec   : > { %44568 = vmatpush3.bf16.msra.mxu1 %v44565_v38 }
0x29ed   : > { %44570 = vmatprep.subr.bf16.mxu1 %v44569_v11 }
0x29ef   : > { %42455 = vmatmul.mubr.f32.vlgmr.msra.gmra.mrb[42].mxu1 %v48592_v0 }
0x29f0   : > { %44572 = vmatpush3.bf16.msra.mxu1 %v44569_v11  ;;  %42465 = vmatprep.mubr.f32.mxu1 %v35469_v30  ;;  %v36513_v30 = vand.u32 4294901760, %v36512_v31 }
0x29f1   : > { %44574 = vmatprep.subr.bf16.mxu1 %v44573_v5 }
0x29f4   : > { %44576 = vmatpush3.bf16.msra.mxu1 %v44573_v5 }
0x29f5   : > { %44578 = vmatprep.subr.bf16.mxu1 %v48598_v7 }
0x29f7   : > { %42466 = vmatmul.mubr.f32.vlgmr.msra.gmra.mrb[42].mxu1 %v35479_v56 }
0x29f8   : > { %44580 = vmatpush3.bf16.msra.mxu1 %v48598_v7  ;;  %42476 = vmatprep.mubr.f32.mxu1 %v35470_v44  ;;  %v36523_v44 = vand.u32 4294901760, %v36522_v13 }
0x29f9   : > { %44582 = vmatprep.subr.bf16.mxu1 %v48602_v55 }
0x29fc   : > { %44584 = vmatpush3.bf16.msra.mxu1 %v48602_v55 }
0x29fd   : > { %44586 = vmatprep.subr.bf16.mxu1 %v44585_v9 }
0x29ff   : > { %42477 = vmatmul.mubr.f32.vlgmr.msra.gmra.mrb[42].mxu1 %v35480_v24 }
0x2a00   : > { %44588 = vmatpush3.bf16.msra.mxu1 %v44585_v9  ;;  %42487 = vmatprep.mubr.f32.mxu1 %v48581_v8 }
0x2a01   : > { %44590 = vmatprep.subr.bf16.mxu1 %v44589_v45 }
0x2a04   : > { %44592 = vmatpush3.bf16.msra.mxu1 %v44589_v45 }
0x2a05   : > { %44594 = vmatprep.subr.bf16.mxu1 %v48598_v7 }
0x2a07   : > { %42488 = vmatmul.mubr.f32.vlgmr.msra.gmra.mrb[42].mxu1 %v48592_v0 }
0x2a08   : > { %44596 = vmatpush3.bf16.msra.mxu1 %v48598_v7  ;;  %42498 = vmatprep.mubr.f32.mxu1 %v48581_v8  ;;  %v36554_v8 = vsub.f32 %v36552_v40, %v36553_v58  ;;  %v44641_v7 = vpack.c.bf16 %v36538_v57, %v48632_v59 }
0x2a09   : > { %44598 = vmatprep.subr.bf16.mxu1 %v48602_v55 }
0x2a0a   : > { %v36555_v18 = vand.u32 4294901760, %v36554_v8 }
0x2a0c   : > { %44600 = vmatpush3.bf16.msra.mxu1 %v48602_v55  ;;  %v44637_v56 = vpack.c.bf16 %v36555_v18, %v36548_v17 }
0x2a0d   : > { %44626 = vmatprep.subr.bf16.mxu1 %v44625_v29 }
0x2a0f   : > { %42499 = vmatmul.mubr.f32.vlgmr.msra.gmra.mrb[42].mxu1 %v48592_v0  ;;  %v44645_v0 = vpack.c.bf16 %v36552_v40, %v36545_v46 }
0x2a10   : > { %44628 = vmatpush3.bf16.msra.mxu1 %v44625_v29  ;;  %42551 = vmatprep.mubr.f32.mxu1 %v36513_v30 }
0x2a11   : > { %44630 = vmatprep.subr.bf16.mxu1 %v44629_v51 }
0x2a14   : > { %44632 = vmatpush3.bf16.msra.mxu1 %v44629_v51 }
0x2a15   : > { %44634 = vmatprep.subr.bf16.mxu1 %v44633_v14 }
0x2a17   : > { %42552 = vmatmul.mubr.f32.vlgmr.msra.gmra.mrb[42].mxu1 %v36523_v44 }
0x2a18   : > { %44636 = vmatpush3.bf16.msra.mxu1 %v44633_v14  ;;  %42562 = vmatprep.mubr.f32.mxu1 %v48623_v6 }
0x2a19   : > { %44638 = vmatprep.subr.bf16.mxu1 %v44637_v56 }
0x2a1c   : > { %44640 = vmatpush3.bf16.msra.mxu1 %v44637_v56 }
0x2a1d   : > { %44642 = vmatprep.subr.bf16.mxu1 %v44641_v7 }
0x2a1f   : > { %42563 = vmatmul.mubr.f32.vlgmr.msra.gmra.mrb[42].mxu1 %v48638_v50 }
0x2a20   : > { %44644 = vmatpush3.bf16.msra.mxu1 %v44641_v7  ;;  %42573 = vmatprep.mubr.f32.mxu1 %v36510_v53 }
0x2a21   : > { %44646 = vmatprep.subr.bf16.mxu1 %v44645_v0 }
0x2a24   : > { %44648 = vmatpush3.bf16.msra.mxu1 %v44645_v0 }
0x2a25   : > { %44650 = vmatprep.subr.bf16.mxu1 %v44625_v29 }
0x2a27   : > { %42574 = vmatmul.mubr.f32.vlgmr.msra.gmra.mrb[42].mxu1 %v36520_v20 }
0x2a28   : > { %44652 = vmatpush3.bf16.msra.mxu1 %v44625_v29  ;;  %42584 = vmatprep.mubr.f32.mxu1 %v36511_v25 }
0x2a29   : > { %44654 = vmatprep.subr.bf16.mxu1 %v44629_v51 }
0x2a2c   : > { %44656 = vmatpush3.bf16.msra.mxu1 %v44629_v51 }
0x2a2d   : > { %44658 = vmatprep.subr.bf16.mxu1 %v44657_v10 }
0x2a2f   : > { %42585 = vmatmul.mubr.f32.vlgmr.msra.gmra.mrb[42].mxu1 %v36521_v39 }
0x2a30   : > { %44660 = vmatpush3.bf16.msra.mxu1 %v44657_v10  ;;  %42595 = vmatprep.mubr.f32.mxu1 %v48623_v6 }
0x2a31   : > { %44662 = vmatprep.subr.bf16.mxu1 %v44661_v41 }
0x2a34   : > { %44664 = vmatpush3.bf16.msra.mxu1 %v44661_v41 }
0x2a35   : > { %44666 = vmatprep.subr.bf16.mxu1 %v44625_v29 }
0x2a37   : > { %42596 = vmatmul.mubr.f32.vlgmr.msra.gmra.mrb[42].mxu1 %v48638_v50 }
0x2a38   : > { %44668 = vmatpush3.bf16.msra.mxu1 %v44625_v29  ;;  %42606 = vmatprep.mubr.f32.mxu1 %v48623_v6 }
0x2a39   : > { %44670 = vmatprep.subr.bf16.mxu1 %v44629_v51 }
0x2a3c   : > { %44672 = vmatpush3.bf16.msra.mxu1 %v44629_v51 }
0x2a3f   : > { %42607 = vmatmul.mubr.f32.vlgmr.msra.gmra.mrb[42].mxu1 %v48638_v50 }
0x2b12   : > { %v42608_v49 = vpop.f32.mrb[42].mxu1 }
0x2b13   : > { %v36977_v52 = vadd.f32 %v42608_v49, %v37270_v42  ;;  %v36958_v55 = vpop.f32.mrb[43].mxu1 }
0x2b14   : > { %v36976_v24 = vadd.f32 %v37270_v42, %v36958_v55 }
0x2b15   : > { %36980 = vst.msk [vmem:[%s988_s21 + $0x8] sm:$0xff] %vm36978_vm0, %v36977_v52 }
0x2b16   : > { %36979 = vst.msk [vmem:[%s988_s21] sm:$0xff] %vm36978_vm0, %v36976_v24 }
0x2b17 PF: > { %s48780_s6 = sld [smem:[#allocation21_spill]] }
0x2b1d   : > { %s43_s8 = sadd.s32 1, %s48780_s6  }
0x2b1e   : > { %p40_p11 = scmp.ge.s32.totalorder %s43_s8, 4  }
0x2b20   :  { %42 = sbr.rel (!%p40_p11) target bundleno = 24 (0x18), region = 237 }
0x2b27   :  { %37002 = vsyncpa [#allocation3], 1 }
0x2b28   :  { %37004 = vsyncpa [#allocation3 + $0x1], 1 }
0x2b29   :  { %37005 = vsyncpa [#allocation5], 1 }
0x2b2a   :  { %37006 = vsyncpa [#allocation8], 1 }
0x2b2b   :  { %37007 = vsyncpa [#allocation11], 1 }
0x2b2c   :  { %37008 = vsyncpa [#allocation14], 1 }

</bundles_post_ra>
